<compile_context>
chip_gen: v7x
topology: tpu7x:2x2x1
jax: 0.10.0
libtpu: 0.0.40
codegen_flags: <defaults>
</compile_context>

<pallas_src>
import functools

import jax
import jax.numpy as jnp
from jax.experimental import pallas as pl
from jax.experimental.pallas import tpu as pltpu


def _round_up(x, m):
    return (x + m - 1) // m * m


# ----------------------------- Pallas kernels ------------------------------

def _mm_bn_kernel(a_ref, b_ref, s_ref, c_ref, o_ref, acc_ref, *, relu):
    """Tiled MXU matmul with fused folded-BN affine (+ReLU) epilogue."""
    k = pl.program_id(2)

    @pl.when(k == 0)
    def _():
        acc_ref[...] = jnp.zeros_like(acc_ref)

    acc_ref[...] += jnp.dot(a_ref[...], b_ref[...],
                            preferred_element_type=jnp.float32)

    @pl.when(k == pl.num_programs(2) - 1)
    def _():
        y = acc_ref[...] * s_ref[...] + c_ref[...]
        if relu:
            y = jnp.maximum(y, 0.0)
        o_ref[...] = y.astype(o_ref.dtype)


def _mm_bn_res_kernel(a_ref, b_ref, s_ref, c_ref, r_ref, o_ref, acc_ref, *,
                      relu):
    """Same as _mm_bn_kernel plus fused residual add before the ReLU."""
    k = pl.program_id(2)

    @pl.when(k == 0)
    def _():
        acc_ref[...] = jnp.zeros_like(acc_ref)

    acc_ref[...] += jnp.dot(a_ref[...], b_ref[...],
                            preferred_element_type=jnp.float32)

    @pl.when(k == pl.num_programs(2) - 1)
    def _():
        y = acc_ref[...] * s_ref[...] + c_ref[...] + r_ref[...]
        if relu:
            y = jnp.maximum(y, 0.0)
        o_ref[...] = y.astype(o_ref.dtype)


def matmul_bn(a, w_p, scale_p, bias_p, *, out_n, relu, residual=None):
    """(M,K) x pre-padded bf16 (Kp,Np) with fused scale/bias(+res)(+ReLU)."""
    M, K = a.shape
    Kp, Np = w_p.shape

    tm = min(256, _round_up(M, 8))
    Mp = _round_up(M, tm)
    tn = min(256, Np)
    tk = 256 if Kp % 256 == 0 else 128

    a_p = jnp.pad(a.astype(jnp.bfloat16), ((0, Mp - M), (0, Kp - K)))

    grid = (Mp // tm, Np // tn, Kp // tk)
    in_specs = [
        pl.BlockSpec((tm, tk), lambda i, j, k: (i, k)),
        pl.BlockSpec((tk, tn), lambda i, j, k: (k, j)),
        pl.BlockSpec((1, tn), lambda i, j, k: (0, j)),
        pl.BlockSpec((1, tn), lambda i, j, k: (0, j)),
    ]
    args = [a_p, w_p, scale_p, bias_p]

    if residual is not None:
        r_p = jnp.pad(residual, ((0, Mp - M), (0, Np - out_n)))
        in_specs.append(pl.BlockSpec((tm, tn), lambda i, j, k: (i, j)))
        args.append(r_p)
        kern = functools.partial(_mm_bn_res_kernel, relu=relu)
    else:
        kern = functools.partial(_mm_bn_kernel, relu=relu)

    out = pl.pallas_call(
        kern,
        out_shape=jax.ShapeDtypeStruct((Mp, Np), jnp.float32),
        grid=grid,
        in_specs=in_specs,
        out_specs=pl.BlockSpec((tm, tn), lambda i, j, k: (i, j)),
        scratch_shapes=[pltpu.VMEM((tm, tn), jnp.float32)],
        compiler_params=pltpu.CompilerParams(
            dimension_semantics=("parallel", "parallel", "arbitrary")),
    )(*args)
    return out[:M, :out_n]


def _maxpool9_kernel(x_ref, o_ref):
    x = x_ref[...]            # (9, rows_tile, C)
    y = x[0]
    for i in range(1, 9):
        y = jnp.maximum(y, x[i])
    o_ref[...] = y


def _tail_kernel(x_ref, w_ref, b_ref, o_ref, *, inv_hw):
    """Fused global avgpool + fc matmul + bias."""
    feat = (jnp.sum(x_ref[...], axis=1) * inv_hw).astype(w_ref.dtype)
    o_ref[...] = (jnp.dot(feat, w_ref[...],
                          preferred_element_type=jnp.float32) + b_ref[...])


# ------------------------------ layer wrappers -------------------------------

def conv2d_bn(x, prep, *, kh, kw, stride, padding, cout, relu, residual=None):
    """NHWC conv (no bias) + folded BN (+ReLU, +residual), one Pallas call."""
    B, H, W, cin = x.shape
    Ho = (H + 2 * padding - kh) // stride + 1
    Wo = (W + 2 * padding - kw) // stride + 1
    if padding:
        xp = jnp.pad(x, ((0, 0), (padding, padding), (padding, padding),
                         (0, 0)))
    else:
        xp = x
    cols = []
    for dh in range(kh):
        for dw in range(kw):
            cols.append(xp[:, dh:dh + stride * (Ho - 1) + 1:stride,
                            dw:dw + stride * (Wo - 1) + 1:stride, :])
    patches = jnp.concatenate(cols, axis=-1) if len(cols) > 1 else cols[0]
    a = patches.reshape(B * Ho * Wo, kh * kw * cin)
    res2d = None
    if residual is not None:
        res2d = residual.reshape(B * Ho * Wo, cout)
    y = matmul_bn(a, prep["w"], prep["scale"], prep["bias"],
                  out_n=cout, relu=relu, residual=res2d)
    return y.reshape(B, Ho, Wo, cout)


def maxpool_3x3_s2_p1(x):
    """MaxPool2d(kernel_size=3, stride=2, padding=1), NHWC."""
    B, H, W, C = x.shape
    Ho = (H + 2 - 3) // 2 + 1
    Wo = (W + 2 - 3) // 2 + 1
    xp = jnp.pad(x, ((0, 0), (1, 1), (1, 1), (0, 0)),
                 constant_values=-jnp.inf)
    wins = [xp[:, dh:dh + 2 * (Ho - 1) + 1:2,
               dw:dw + 2 * (Wo - 1) + 1:2, :]
            for dh in range(3) for dw in range(3)]
    R = B * Ho * Wo
    rt = min(256, _round_up(R, 8))
    Rp = _round_up(R, rt)
    stacked = jnp.stack(wins, axis=0).reshape(9, R, C)
    if Rp != R:
        stacked = jnp.pad(stacked, ((0, 0), (0, Rp - R), (0, 0)))
    out = pl.pallas_call(
        _maxpool9_kernel,
        out_shape=jax.ShapeDtypeStruct((Rp, C), jnp.float32),
        grid=(Rp // rt,),
        in_specs=[pl.BlockSpec((9, rt, C), lambda i: (0, i, 0))],
        out_specs=pl.BlockSpec((rt, C), lambda i: (i, 0)),
        compiler_params=pltpu.CompilerParams(
            dimension_semantics=("parallel",)),
    )(stacked)
    return out[:R].reshape(B, Ho, Wo, C)


def avgpool_fc(x, fc_w_p, fc_b_p, *, num_classes):
    """adaptive avgpool (1,1) + Linear, fused into a single Pallas kernel."""
    B, H, W, C = x.shape
    HW = H * W
    Bp = _round_up(B, 8)
    xr = x.reshape(B, HW, C)
    if Bp != B:
        xr = jnp.pad(xr, ((0, Bp - B), (0, 0), (0, 0)))
    Np = fc_w_p.shape[1]
    out = pl.pallas_call(
        functools.partial(_tail_kernel, inv_hw=1.0 / HW),
        out_shape=jax.ShapeDtypeStruct((Bp, Np), jnp.float32),
    )(xr, fc_w_p, fc_b_p)
    return out[:B, :num_classes]


# ----------------------------- parameter init -------------------------------

def init_resnet18_params(key, num_classes):
    keys = iter(jax.random.split(key, 256))

    def conv_w(kh, kw, cin, cout):
        return 0.05 * jax.random.normal(next(keys), (kh, kw, cin, cout),
                                        jnp.float32)

    def bn_fold(c):
        g = 1.0 + 0.1 * jax.random.normal(next(keys), (c,), jnp.float32)
        b = 0.1 * jax.random.normal(next(keys), (c,), jnp.float32)
        m = 0.1 * jax.random.normal(next(keys), (c,), jnp.float32)
        v = 1.0 + 0.1 * jnp.abs(jax.random.normal(next(keys), (c,),
                                                  jnp.float32))
        scale = g / jnp.sqrt(v + 1e-5)
        bias = b - m * scale
        return scale, bias

    def prep(kh, kw, cin, cout):
        # pre-reshape (HWIO -> (K, Cout)), pre-pad to lane/sublane multiples,
        # and pre-cast the matmul weight to bf16 ONCE at init.
        w = conv_w(kh, kw, cin, cout)
        scale, bias = bn_fold(cout)
        K = kh * kw * cin
        Kp = _round_up(K, 128)
        Np = _round_up(cout, 128)
        wm = jnp.pad(w.reshape(K, cout), ((0, Kp - K), (0, Np - cout)))
        return {
            "w": wm.astype(jnp.bfloat16),                          # (Kp, Np)
            "scale": jnp.pad(scale, (0, Np - cout)).reshape(1, Np),
            "bias": jnp.pad(bias, (0, Np - cout)).reshape(1, Np),
        }

    params = {"conv1": prep(7, 7, 3, 64), "layers": []}
    cin = 64
    for cout, stride in ((64, 1), (128, 2), (256, 2), (512, 2)):
        blocks = []
        for bi in range(2):
            s = stride if bi == 0 else 1
            c_in_blk = cin if bi == 0 else cout
            blk = {"c1": prep(3, 3, c_in_blk, cout),
                   "c2": prep(3, 3, cout, cout)}
            if bi == 0 and (s != 1 or cin != cout):
                blk["ds"] = prep(1, 1, cin, cout)
            blocks.append(blk)
        params["layers"].append(blocks)
        cin = cout

    ncp = _round_up(num_classes, 128)
    fc_w = 0.05 * jax.random.normal(next(keys), (512, num_classes),
                                    jnp.float32)
    fc_b = 0.01 * jax.random.normal(next(keys), (num_classes,), jnp.float32)
    params["fc_w"] = jnp.pad(
        fc_w, ((0, 0), (0, ncp - num_classes))).astype(jnp.bfloat16)
    params["fc_b"] = jnp.pad(fc_b, (0, ncp - num_classes)).reshape(1, ncp)
    return params


# ------------------------------- forward pass --------------------------------

_STAGE_COUT = (64, 128, 256, 512)


def pretrained_model_forward(params, x_nchw, *, num_classes):
    """Equivalent of PretrainedModel.forward (resnet18 + replaced fc).

    All strides / kernel sizes / block topology are static Python values
    (NOT pytree leaves), so jit never sees traced slice parameters.
    """
    x = jnp.transpose(x_nchw, (0, 2, 3, 1)).astype(jnp.float32)   # NCHW->NHWC

    # stem: conv 7x7/2 + BN + ReLU fused into one matmul epilogue
    x = conv2d_bn(x, params["conv1"], kh=7, kw=7, stride=2, padding=3,
                  cout=64, relu=True)
    x = maxpool_3x3_s2_p1(x)

    # residual stages (BasicBlock x 2 per stage)
    for si, blocks in enumerate(params["layers"]):
        cout = _STAGE_COUT[si]
        for bi, blk in enumerate(blocks):
            stride = 2 if (si > 0 and bi == 0) else 1
            identity = x
            out = conv2d_bn(x, blk["c1"], kh=3, kw=3, stride=stride,
                            padding=1, cout=cout, relu=True)
            if "ds" in blk:
                identity = conv2d_bn(x, blk["ds"], kh=1, kw=1, stride=stride,
                                     padding=0, cout=cout, relu=False)
            # conv2 + BN + residual add + ReLU, all in one fused epilogue
            x = conv2d_bn(out, blk["c2"], kh=3, kw=3, stride=1, padding=1,
                          cout=cout, relu=True, residual=identity)

    # adaptive avgpool (1,1) + fc, fused
    return avgpool_fc(x, params["fc_w"], params["fc_b"],
                      num_classes=num_classes)


if __name__ == "__main__":
    key = jax.random.PRNGKey(0)
    pkey, xkey = jax.random.split(key)
    num_classes = 10
    params = init_resnet18_params(pkey, num_classes)
    # PyTorch-style NCHW input; 32x32 survives resnet18's 5 downsamplings
    # (32 -> 16 -> 8 -> 4 -> 2 -> 1).
    x = jax.random.normal(xkey, (2, 3, 32, 32), jnp.float32)
    fwd = jax.jit(functools.partial(pretrained_model_forward,
                                    num_classes=num_classes))
    out = fwd(params, x)
    out = jax.block_until_ready(out)
    assert out.shape == (2, num_classes)
    assert bool(jnp.all(jnp.isfinite(out)))
    print("KERNEL_OK")
</pallas_src>

<mosaic_0001>
module attributes {stable_mosaic.version = 11 : i64} {
  func.func @_mm_bn_kernel(%arg0: i32, %arg1: i32, %arg2: i32, %arg3: memref<256x256xbf16, #tpu.memory_space<vmem>>, %arg4: memref<256x128xbf16, #tpu.memory_space<vmem>>, %arg5: memref<1x128xf32, #tpu.memory_space<vmem>>, %arg6: memref<1x128xf32, #tpu.memory_space<vmem>>, %arg7: memref<256x128xf32, #tpu.memory_space<vmem>>, %arg8: memref<256x128xf32, #tpu.memory_space<vmem>>) attributes {dimension_semantics = [#tpu.dimension_semantics<parallel>, #tpu.dimension_semantics<parallel>, #tpu.dimension_semantics<arbitrary>], iteration_bounds = array<i64: 2, 1, 1>, scalar_prefetch = 0 : i64, scratch_operands = 1 : i64, tpu.core_type = #tpu.core_type<tc>, window_params = [{transform_indices = @transform_0, window_bounds = array<i64: 256, 256>}, {transform_indices = @transform_1, window_bounds = array<i64: 256, 128>}, {transform_indices = @transform_2, window_bounds = array<i64: 1, 128>}, {transform_indices = @transform_3, window_bounds = array<i64: 1, 128>}, {transform_indices = @transform_4, window_bounds = array<i64: 256, 128>}]} {
    %c0_i32 = arith.constant 0 : i32
    %0 = arith.cmpi eq, %arg2, %c0_i32 : i32
    %1 = arith.extui %0 : i1 to i32
    %c0_i32_0 = arith.constant 0 : i32
    %2 = arith.cmpi ne, %1, %c0_i32_0 : i32
    scf.if %2 {
      %cst_10 = arith.constant 0.000000e+00 : f32
      %12 = vector.broadcast %cst_10 : f32 to vector<256x128xf32>
      %c0_11 = arith.constant 0 : index
      %c0_12 = arith.constant 0 : index
      %13 = vector.load %arg8[%c0_11, %c0_12] : memref<256x128xf32, #tpu.memory_space<vmem>>, vector<256x128xf32>
      tpu.vector_store %arg8[%c0_11, %c0_12], %12 {strides = array<i32>} : memref<256x128xf32, #tpu.memory_space<vmem>>, vector<256x128xf32>,
    } else {
    }
    %c0 = arith.constant 0 : index
    %c0_1 = arith.constant 0 : index
    %3 = vector.load %arg8[%c0, %c0_1] : memref<256x128xf32, #tpu.memory_space<vmem>>, vector<256x128xf32>
    %c0_2 = arith.constant 0 : index
    %c0_3 = arith.constant 0 : index
    %4 = vector.load %arg3[%c0_2, %c0_3] : memref<256x256xbf16, #tpu.memory_space<vmem>>, vector<256x256xbf16>
    %c0_4 = arith.constant 0 : index
    %c0_5 = arith.constant 0 : index
    %5 = vector.load %arg4[%c0_4, %c0_5] : memref<256x128xbf16, #tpu.memory_space<vmem>>, vector<256x128xbf16>
    %cst = arith.constant dense<0.000000e+00> : vector<256x128xf32>
    %6 = tpu.matmul %4, %5, %cst {dimension_numbers = #tpu.dot_dimension_numbers<[1], [0], [0], [1], [0, 0, 1, 1], [], []>} : vector<256x256xbf16>, vector<256x128xbf16>, vector<256x128xf32> -> vector<256x128xf32>
    %7 = arith.addf %3, %6 : vector<256x128xf32>
    %c0_6 = arith.constant 0 : index
    %c0_7 = arith.constant 0 : index
    %8 = vector.load %arg8[%c0_6, %c0_7] : memref<256x128xf32, #tpu.memory_space<vmem>>, vector<256x128xf32>
    tpu.vector_store %arg8[%c0_6, %c0_7], %7 {strides = array<i32>} : memref<256x128xf32, #tpu.memory_space<vmem>>, vector<256x128xf32>,
    %c0_i32_8 = arith.constant 0 : i32
    %9 = arith.cmpi eq, %arg2, %c0_i32_8 : i32
    %10 = arith.extui %9 : i1 to i32
    %c0_i32_9 = arith.constant 0 : i32
    %11 = arith.cmpi ne, %10, %c0_i32_9 : i32
    scf.if %11 {
      %c0_10 = arith.constant 0 : index
      %c0_11 = arith.constant 0 : index
      %12 = vector.load %arg8[%c0_10, %c0_11] : memref<256x128xf32, #tpu.memory_space<vmem>>, vector<256x128xf32>
      %c0_12 = arith.constant 0 : index
      %c0_13 = arith.constant 0 : index
      %13 = vector.load %arg5[%c0_12, %c0_13] : memref<1x128xf32, #tpu.memory_space<vmem>>, vector<1x128xf32>
      %14 = vector.broadcast %13 : vector<1x128xf32> to vector<256x128xf32>
      %15 = arith.mulf %12, %14 : vector<256x128xf32>
      %c0_14 = arith.constant 0 : index
      %c0_15 = arith.constant 0 : index
      %16 = vector.load %arg6[%c0_14, %c0_15] : memref<1x128xf32, #tpu.memory_space<vmem>>, vector<1x128xf32>
      %17 = vector.broadcast %16 : vector<1x128xf32> to vector<256x128xf32>
      %18 = arith.addf %15, %17 : vector<256x128xf32>
      %cst_16 = arith.constant 0.000000e+00 : f32
      %19 = vector.broadcast %cst_16 : f32 to vector<256x128xf32>
      %20 = arith.maximumf %18, %19 : vector<256x128xf32>
      %c0_17 = arith.constant 0 : index
      %c0_18 = arith.constant 0 : index
      %21 = vector.load %arg7[%c0_17, %c0_18] : memref<256x128xf32, #tpu.memory_space<vmem>>, vector<256x128xf32>
      tpu.vector_store %arg7[%c0_17, %c0_18], %20 {strides = array<i32>} : memref<256x128xf32, #tpu.memory_space<vmem>>, vector<256x128xf32>,
    } else {
    }
    return
  }
  func.func @transform_0(%arg0: i32, %arg1: i32, %arg2: i32) -> (i32, i32) {
    %c0_i32 = arith.constant 0 : i32
    return %arg0, %arg2 : i32, i32
  }
  func.func @transform_1(%arg0: i32, %arg1: i32, %arg2: i32) -> (i32, i32) {
    %c0_i32 = arith.constant 0 : i32
    return %arg2, %arg1 : i32, i32
  }
  func.func @transform_2(%arg0: i32, %arg1: i32, %arg2: i32) -> (i32, i32) {
    %c0_i32 = arith.constant 0 : i32
    %c0_i32_0 = arith.constant 0 : i32
    return %c0_i32, %arg1 : i32, i32
  }
  func.func @transform_3(%arg0: i32, %arg1: i32, %arg2: i32) -> (i32, i32) {
    %c0_i32 = arith.constant 0 : i32
    %c0_i32_0 = arith.constant 0 : i32
    return %c0_i32, %arg1 : i32, i32
  }
  func.func @transform_4(%arg0: i32, %arg1: i32, %arg2: i32) -> (i32, i32) {
    %c0_i32 = arith.constant 0 : i32
    return %arg0, %arg1 : i32, i32
  }
}

module attributes {stable_mosaic.version = 11 : i64} {
  func.func @_maxpool9_kernel(%arg0: i32, %arg1: memref<9x128x64xf32, #tpu.memory_space<vmem>>, %arg2: memref<128x64xf32, #tpu.memory_space<vmem>>) attributes {dimension_semantics = [#tpu.dimension_semantics<parallel>], iteration_bounds = array<i64: 1>, scalar_prefetch = 0 : i64, scratch_operands = 0 : i64, tpu.core_type = #tpu.core_type<tc>, window_params = [{transform_indices = @transform_0, window_bounds = array<i64: 9, 128, 64>}, {transform_indices = @transform_1, window_bounds = array<i64: 128, 64>}]} {
    %c0 = arith.constant 0 : index
    %c0_0 = arith.constant 0 : index
    %c0_1 = arith.constant 0 : index
    %0 = vector.load %arg1[%c0, %c0_0, %c0_1] : memref<9x128x64xf32, #tpu.memory_space<vmem>>, vector<9x128x64xf32>
    %1 = vector.extract_strided_slice %0 {offsets = [0, 0, 0], sizes = [1, 128, 64], strides = [1, 1, 1]} : vector<9x128x64xf32> to vector<1x128x64xf32>
    %2 = vector.shape_cast %1 : vector<1x128x64xf32> to vector<128x64xf32>
    %3 = vector.extract_strided_slice %0 {offsets = [1, 0, 0], sizes = [1, 128, 64], strides = [1, 1, 1]} : vector<9x128x64xf32> to vector<1x128x64xf32>
    %4 = vector.shape_cast %3 : vector<1x128x64xf32> to vector<128x64xf32>
    %5 = arith.maximumf %2, %4 : vector<128x64xf32>
    %6 = vector.extract_strided_slice %0 {offsets = [2, 0, 0], sizes = [1, 128, 64], strides = [1, 1, 1]} : vector<9x128x64xf32> to vector<1x128x64xf32>
    %7 = vector.shape_cast %6 : vector<1x128x64xf32> to vector<128x64xf32>
    %8 = arith.maximumf %5, %7 : vector<128x64xf32>
    %9 = vector.extract_strided_slice %0 {offsets = [3, 0, 0], sizes = [1, 128, 64], strides = [1, 1, 1]} : vector<9x128x64xf32> to vector<1x128x64xf32>
    %10 = vector.shape_cast %9 : vector<1x128x64xf32> to vector<128x64xf32>
    %11 = arith.maximumf %8, %10 : vector<128x64xf32>
    %12 = vector.extract_strided_slice %0 {offsets = [4, 0, 0], sizes = [1, 128, 64], strides = [1, 1, 1]} : vector<9x128x64xf32> to vector<1x128x64xf32>
    %13 = vector.shape_cast %12 : vector<1x128x64xf32> to vector<128x64xf32>
    %14 = arith.maximumf %11, %13 : vector<128x64xf32>
    %15 = vector.extract_strided_slice %0 {offsets = [5, 0, 0], sizes = [1, 128, 64], strides = [1, 1, 1]} : vector<9x128x64xf32> to vector<1x128x64xf32>
    %16 = vector.shape_cast %15 : vector<1x128x64xf32> to vector<128x64xf32>
    %17 = arith.maximumf %14, %16 : vector<128x64xf32>
    %18 = vector.extract_strided_slice %0 {offsets = [6, 0, 0], sizes = [1, 128, 64], strides = [1, 1, 1]} : vector<9x128x64xf32> to vector<1x128x64xf32>
    %19 = vector.shape_cast %18 : vector<1x128x64xf32> to vector<128x64xf32>
    %20 = arith.maximumf %17, %19 : vector<128x64xf32>
    %21 = vector.extract_strided_slice %0 {offsets = [7, 0, 0], sizes = [1, 128, 64], strides = [1, 1, 1]} : vector<9x128x64xf32> to vector<1x128x64xf32>
    %22 = vector.shape_cast %21 : vector<1x128x64xf32> to vector<128x64xf32>
    %23 = arith.maximumf %20, %22 : vector<128x64xf32>
    %24 = vector.extract_strided_slice %0 {offsets = [8, 0, 0], sizes = [1, 128, 64], strides = [1, 1, 1]} : vector<9x128x64xf32> to vector<1x128x64xf32>
    %25 = vector.shape_cast %24 : vector<1x128x64xf32> to vector<128x64xf32>
    %26 = arith.maximumf %23, %25 : vector<128x64xf32>
    %c0_2 = arith.constant 0 : index
    %c0_3 = arith.constant 0 : index
    %27 = vector.load %arg2[%c0_2, %c0_3] : memref<128x64xf32, #tpu.memory_space<vmem>>, vector<128x64xf32>
    tpu.vector_store %arg2[%c0_2, %c0_3], %26 {strides = array<i32>} : memref<128x64xf32, #tpu.memory_space<vmem>>, vector<128x64xf32>,
    return
  }
  func.func @transform_0(%arg0: i32) -> (i32, i32, i32) {
    %c0_i32 = arith.constant 0 : i32
    %c0_i32_0 = arith.constant 0 : i32
    %c0_i32_1 = arith.constant 0 : i32
    return %c0_i32, %arg0, %c0_i32_0 : i32, i32, i32
  }
  func.func @transform_1(%arg0: i32) -> (i32, i32) {
    %c0_i32 = arith.constant 0 : i32
    %c0_i32_0 = arith.constant 0 : i32
    return %arg0, %c0_i32 : i32, i32
  }
}

module attributes {stable_mosaic.version = 11 : i64} {
  func.func @_mm_bn_kernel(%arg0: i32, %arg1: i32, %arg2: i32, %arg3: memref<128x128xbf16, #tpu.memory_space<vmem>>, %arg4: memref<128x128xbf16, #tpu.memory_space<vmem>>, %arg5: memref<1x128xf32, #tpu.memory_space<vmem>>, %arg6: memref<1x128xf32, #tpu.memory_space<vmem>>, %arg7: memref<128x128xf32, #tpu.memory_space<vmem>>, %arg8: memref<128x128xf32, #tpu.memory_space<vmem>>) attributes {dimension_semantics = [#tpu.dimension_semantics<parallel>, #tpu.dimension_semantics<parallel>, #tpu.dimension_semantics<arbitrary>], iteration_bounds = array<i64: 1, 1, 5>, scalar_prefetch = 0 : i64, scratch_operands = 1 : i64, tpu.core_type = #tpu.core_type<tc>, window_params = [{transform_indices = @transform_0, window_bounds = array<i64: 128, 128>}, {transform_indices = @transform_1, window_bounds = array<i64: 128, 128>}, {transform_indices = @transform_2, window_bounds = array<i64: 1, 128>}, {transform_indices = @transform_3, window_bounds = array<i64: 1, 128>}, {transform_indices = @transform_4, window_bounds = array<i64: 128, 128>}]} {
    %c0_i32 = arith.constant 0 : i32
    %0 = arith.cmpi eq, %arg2, %c0_i32 : i32
    %1 = arith.extui %0 : i1 to i32
    %c0_i32_0 = arith.constant 0 : i32
    %2 = arith.cmpi ne, %1, %c0_i32_0 : i32
    scf.if %2 {
      %cst_9 = arith.constant 0.000000e+00 : f32
      %12 = vector.broadcast %cst_9 : f32 to vector<128x128xf32>
      %c0_10 = arith.constant 0 : index
      %c0_11 = arith.constant 0 : index
      %13 = vector.load %arg8[%c0_10, %c0_11] : memref<128x128xf32, #tpu.memory_space<vmem>>, vector<128x128xf32>
      tpu.vector_store %arg8[%c0_10, %c0_11], %12 {strides = array<i32>} : memref<128x128xf32, #tpu.memory_space<vmem>>, vector<128x128xf32>,
    } else {
    }
    %c0 = arith.constant 0 : index
    %c0_1 = arith.constant 0 : index
    %3 = vector.load %arg8[%c0, %c0_1] : memref<128x128xf32, #tpu.memory_space<vmem>>, vector<128x128xf32>
    %c0_2 = arith.constant 0 : index
    %c0_3 = arith.constant 0 : index
    %4 = vector.load %arg3[%c0_2, %c0_3] : memref<128x128xbf16, #tpu.memory_space<vmem>>, vector<128x128xbf16>
    %c0_4 = arith.constant 0 : index
    %c0_5 = arith.constant 0 : index
    %5 = vector.load %arg4[%c0_4, %c0_5] : memref<128x128xbf16, #tpu.memory_space<vmem>>, vector<128x128xbf16>
    %cst = arith.constant dense<0.000000e+00> : vector<128x128xf32>
    %6 = tpu.matmul %4, %5, %cst {dimension_numbers = #tpu.dot_dimension_numbers<[1], [0], [0], [1], [0, 0, 1, 1], [], []>} : vector<128x128xbf16>, vector<128x128xbf16>, vector<128x128xf32> -> vector<128x128xf32>
    %7 = arith.addf %3, %6 : vector<128x128xf32>
    %c0_6 = arith.constant 0 : index
    %c0_7 = arith.constant 0 : index
    %8 = vector.load %arg8[%c0_6, %c0_7] : memref<128x128xf32, #tpu.memory_space<vmem>>, vector<128x128xf32>
    tpu.vector_store %arg8[%c0_6, %c0_7], %7 {strides = array<i32>} : memref<128x128xf32, #tpu.memory_space<vmem>>, vector<128x128xf32>,
    %c4_i32 = arith.constant 4 : i32
    %9 = arith.cmpi eq, %arg2, %c4_i32 : i32
    %10 = arith.extui %9 : i1 to i32
    %c0_i32_8 = arith.constant 0 : i32
    %11 = arith.cmpi ne, %10, %c0_i32_8 : i32
    scf.if %11 {
      %c0_9 = arith.constant 0 : index
      %c0_10 = arith.constant 0 : index
      %12 = vector.load %arg8[%c0_9, %c0_10] : memref<128x128xf32, #tpu.memory_space<vmem>>, vector<128x128xf32>
      %c0_11 = arith.constant 0 : index
      %c0_12 = arith.constant 0 : index
      %13 = vector.load %arg5[%c0_11, %c0_12] : memref<1x128xf32, #tpu.memory_space<vmem>>, vector<1x128xf32>
      %14 = vector.broadcast %13 : vector<1x128xf32> to vector<128x128xf32>
      %15 = arith.mulf %12, %14 : vector<128x128xf32>
      %c0_13 = arith.constant 0 : index
      %c0_14 = arith.constant 0 : index
      %16 = vector.load %arg6[%c0_13, %c0_14] : memref<1x128xf32, #tpu.memory_space<vmem>>, vector<1x128xf32>
      %17 = vector.broadcast %16 : vector<1x128xf32> to vector<128x128xf32>
      %18 = arith.addf %15, %17 : vector<128x128xf32>
      %cst_15 = arith.constant 0.000000e+00 : f32
      %19 = vector.broadcast %cst_15 : f32 to vector<128x128xf32>
      %20 = arith.maximumf %18, %19 : vector<128x128xf32>
      %c0_16 = arith.constant 0 : index
      %c0_17 = arith.constant 0 : index
      %21 = vector.load %arg7[%c0_16, %c0_17] : memref<128x128xf32, #tpu.memory_space<vmem>>, vector<128x128xf32>
      tpu.vector_store %arg7[%c0_16, %c0_17], %20 {strides = array<i32>} : memref<128x128xf32, #tpu.memory_space<vmem>>, vector<128x128xf32>,
    } else {
    }
    return
  }
  func.func @transform_0(%arg0: i32, %arg1: i32, %arg2: i32) -> (i32, i32) {
    %c0_i32 = arith.constant 0 : i32
    return %arg0, %arg2 : i32, i32
  }
  func.func @transform_1(%arg0: i32, %arg1: i32, %arg2: i32) -> (i32, i32) {
    %c0_i32 = arith.constant 0 : i32
    return %arg2, %arg1 : i32, i32
  }
  func.func @transform_2(%arg0: i32, %arg1: i32, %arg2: i32) -> (i32, i32) {
    %c0_i32 = arith.constant 0 : i32
    %c0_i32_0 = arith.constant 0 : i32
    return %c0_i32, %arg1 : i32, i32
  }
  func.func @transform_3(%arg0: i32, %arg1: i32, %arg2: i32) -> (i32, i32) {
    %c0_i32 = arith.constant 0 : i32
    %c0_i32_0 = arith.constant 0 : i32
    return %c0_i32, %arg1 : i32, i32
  }
  func.func @transform_4(%arg0: i32, %arg1: i32, %arg2: i32) -> (i32, i32) {
    %c0_i32 = arith.constant 0 : i32
    return %arg0, %arg1 : i32, i32
  }
}

module attributes {stable_mosaic.version = 11 : i64} {
  func.func @_mm_bn_res_kernel(%arg0: i32, %arg1: i32, %arg2: i32, %arg3: memref<128x128xbf16, #tpu.memory_space<vmem>>, %arg4: memref<128x128xbf16, #tpu.memory_space<vmem>>, %arg5: memref<1x128xf32, #tpu.memory_space<vmem>>, %arg6: memref<1x128xf32, #tpu.memory_space<vmem>>, %arg7: memref<128x128xf32, #tpu.memory_space<vmem>>, %arg8: memref<128x128xf32, #tpu.memory_space<vmem>>, %arg9: memref<128x128xf32, #tpu.memory_space<vmem>>) attributes {dimension_semantics = [#tpu.dimension_semantics<parallel>, #tpu.dimension_semantics<parallel>, #tpu.dimension_semantics<arbitrary>], iteration_bounds = array<i64: 1, 1, 5>, scalar_prefetch = 0 : i64, scratch_operands = 1 : i64, tpu.core_type = #tpu.core_type<tc>, window_params = [{transform_indices = @transform_0, window_bounds = array<i64: 128, 128>}, {transform_indices = @transform_1, window_bounds = array<i64: 128, 128>}, {transform_indices = @transform_2, window_bounds = array<i64: 1, 128>}, {transform_indices = @transform_3, window_bounds = array<i64: 1, 128>}, {transform_indices = @transform_4, window_bounds = array<i64: 128, 128>}, {transform_indices = @transform_5, window_bounds = array<i64: 128, 128>}]} {
    %c0_i32 = arith.constant 0 : i32
    %0 = arith.cmpi eq, %arg2, %c0_i32 : i32
    %1 = arith.extui %0 : i1 to i32
    %c0_i32_0 = arith.constant 0 : i32
    %2 = arith.cmpi ne, %1, %c0_i32_0 : i32
    scf.if %2 {
      %cst_9 = arith.constant 0.000000e+00 : f32
      %12 = vector.broadcast %cst_9 : f32 to vector<128x128xf32>
      %c0_10 = arith.constant 0 : index
      %c0_11 = arith.constant 0 : index
      %13 = vector.load %arg9[%c0_10, %c0_11] : memref<128x128xf32, #tpu.memory_space<vmem>>, vector<128x128xf32>
      tpu.vector_store %arg9[%c0_10, %c0_11], %12 {strides = array<i32>} : memref<128x128xf32, #tpu.memory_space<vmem>>, vector<128x128xf32>,
    } else {
    }
    %c0 = arith.constant 0 : index
    %c0_1 = arith.constant 0 : index
    %3 = vector.load %arg9[%c0, %c0_1] : memref<128x128xf32, #tpu.memory_space<vmem>>, vector<128x128xf32>
    %c0_2 = arith.constant 0 : index
    %c0_3 = arith.constant 0 : index
    %4 = vector.load %arg3[%c0_2, %c0_3] : memref<128x128xbf16, #tpu.memory_space<vmem>>, vector<128x128xbf16>
    %c0_4 = arith.constant 0 : index
    %c0_5 = arith.constant 0 : index
    %5 = vector.load %arg4[%c0_4, %c0_5] : memref<128x128xbf16, #tpu.memory_space<vmem>>, vector<128x128xbf16>
    %cst = arith.constant dense<0.000000e+00> : vector<128x128xf32>
    %6 = tpu.matmul %4, %5, %cst {dimension_numbers = #tpu.dot_dimension_numbers<[1], [0], [0], [1], [0, 0, 1, 1], [], []>} : vector<128x128xbf16>, vector<128x128xbf16>, vector<128x128xf32> -> vector<128x128xf32>
    %7 = arith.addf %3, %6 : vector<128x128xf32>
    %c0_6 = arith.constant 0 : index
    %c0_7 = arith.constant 0 : index
    %8 = vector.load %arg9[%c0_6, %c0_7] : memref<128x128xf32, #tpu.memory_space<vmem>>, vector<128x128xf32>
    tpu.vector_store %arg9[%c0_6, %c0_7], %7 {strides = array<i32>} : memref<128x128xf32, #tpu.memory_space<vmem>>, vector<128x128xf32>,
    %c4_i32 = arith.constant 4 : i32
    %9 = arith.cmpi eq, %arg2, %c4_i32 : i32
    %10 = arith.extui %9 : i1 to i32
    %c0_i32_8 = arith.constant 0 : i32
    %11 = arith.cmpi ne, %10, %c0_i32_8 : i32
    scf.if %11 {
      %c0_9 = arith.constant 0 : index
      %c0_10 = arith.constant 0 : index
      %12 = vector.load %arg9[%c0_9, %c0_10] : memref<128x128xf32, #tpu.memory_space<vmem>>, vector<128x128xf32>
      %c0_11 = arith.constant 0 : index
      %c0_12 = arith.constant 0 : index
      %13 = vector.load %arg5[%c0_11, %c0_12] : memref<1x128xf32, #tpu.memory_space<vmem>>, vector<1x128xf32>
      %14 = vector.broadcast %13 : vector<1x128xf32> to vector<128x128xf32>
      %15 = arith.mulf %12, %14 : vector<128x128xf32>
      %c0_13 = arith.constant 0 : index
      %c0_14 = arith.constant 0 : index
      %16 = vector.load %arg6[%c0_13, %c0_14] : memref<1x128xf32, #tpu.memory_space<vmem>>, vector<1x128xf32>
      %17 = vector.broadcast %16 : vector<1x128xf32> to vector<128x128xf32>
      %18 = arith.addf %15, %17 : vector<128x128xf32>
      %c0_15 = arith.constant 0 : index
      %c0_16 = arith.constant 0 : index
      %19 = vector.load %arg7[%c0_15, %c0_16] : memref<128x128xf32, #tpu.memory_space<vmem>>, vector<128x128xf32>
      %20 = arith.addf %18, %19 : vector<128x128xf32>
      %cst_17 = arith.constant 0.000000e+00 : f32
      %21 = vector.broadcast %cst_17 : f32 to vector<128x128xf32>
      %22 = arith.maximumf %20, %21 : vector<128x128xf32>
      %c0_18 = arith.constant 0 : index
      %c0_19 = arith.constant 0 : index
      %23 = vector.load %arg8[%c0_18, %c0_19] : memref<128x128xf32, #tpu.memory_space<vmem>>, vector<128x128xf32>
      tpu.vector_store %arg8[%c0_18, %c0_19], %22 {strides = array<i32>} : memref<128x128xf32, #tpu.memory_space<vmem>>, vector<128x128xf32>,
    } else {
    }
    return
  }
  func.func @transform_0(%arg0: i32, %arg1: i32, %arg2: i32) -> (i32, i32) {
    %c0_i32 = arith.constant 0 : i32
    return %arg0, %arg2 : i32, i32
  }
  func.func @transform_1(%arg0: i32, %arg1: i32, %arg2: i32) -> (i32, i32) {
    %c0_i32 = arith.constant 0 : i32
    return %arg2, %arg1 : i32, i32
  }
  func.func @transform_2(%arg0: i32, %arg1: i32, %arg2: i32) -> (i32, i32) {
    %c0_i32 = arith.constant 0 : i32
    %c0_i32_0 = arith.constant 0 : i32
    return %c0_i32, %arg1 : i32, i32
  }
  func.func @transform_3(%arg0: i32, %arg1: i32, %arg2: i32) -> (i32, i32) {
    %c0_i32 = arith.constant 0 : i32
    %c0_i32_0 = arith.constant 0 : i32
    return %c0_i32, %arg1 : i32, i32
  }
  func.func @transform_4(%arg0: i32, %arg1: i32, %arg2: i32) -> (i32, i32) {
    %c0_i32 = arith.constant 0 : i32
    return %arg0, %arg1 : i32, i32
  }
  func.func @transform_5(%arg0: i32, %arg1: i32, %arg2: i32) -> (i32, i32) {
    %c0_i32 = arith.constant 0 : i32
    return %arg0, %arg1 : i32, i32
  }
}

module attributes {stable_mosaic.version = 11 : i64} {
  func.func @_mm_bn_kernel(%arg0: i32, %arg1: i32, %arg2: i32, %arg3: memref<32x128xbf16, #tpu.memory_space<vmem>>, %arg4: memref<128x128xbf16, #tpu.memory_space<vmem>>, %arg5: memref<1x128xf32, #tpu.memory_space<vmem>>, %arg6: memref<1x128xf32, #tpu.memory_space<vmem>>, %arg7: memref<32x128xf32, #tpu.memory_space<vmem>>, %arg8: memref<32x128xf32, #tpu.memory_space<vmem>>) attributes {dimension_semantics = [#tpu.dimension_semantics<parallel>, #tpu.dimension_semantics<parallel>, #tpu.dimension_semantics<arbitrary>], iteration_bounds = array<i64: 1, 1, 5>, scalar_prefetch = 0 : i64, scratch_operands = 1 : i64, tpu.core_type = #tpu.core_type<tc>, window_params = [{transform_indices = @transform_0, window_bounds = array<i64: 32, 128>}, {transform_indices = @transform_1, window_bounds = array<i64: 128, 128>}, {transform_indices = @transform_2, window_bounds = array<i64: 1, 128>}, {transform_indices = @transform_3, window_bounds = array<i64: 1, 128>}, {transform_indices = @transform_4, window_bounds = array<i64: 32, 128>}]} {
    %c0_i32 = arith.constant 0 : i32
    %0 = arith.cmpi eq, %arg2, %c0_i32 : i32
    %1 = arith.extui %0 : i1 to i32
    %c0_i32_0 = arith.constant 0 : i32
    %2 = arith.cmpi ne, %1, %c0_i32_0 : i32
    scf.if %2 {
      %cst_9 = arith.constant 0.000000e+00 : f32
      %12 = vector.broadcast %cst_9 : f32 to vector<32x128xf32>
      %c0_10 = arith.constant 0 : index
      %c0_11 = arith.constant 0 : index
      %13 = vector.load %arg8[%c0_10, %c0_11] : memref<32x128xf32, #tpu.memory_space<vmem>>, vector<32x128xf32>
      tpu.vector_store %arg8[%c0_10, %c0_11], %12 {strides = array<i32>} : memref<32x128xf32, #tpu.memory_space<vmem>>, vector<32x128xf32>,
    } else {
    }
    %c0 = arith.constant 0 : index
    %c0_1 = arith.constant 0 : index
    %3 = vector.load %arg8[%c0, %c0_1] : memref<32x128xf32, #tpu.memory_space<vmem>>, vector<32x128xf32>
    %c0_2 = arith.constant 0 : index
    %c0_3 = arith.constant 0 : index
    %4 = vector.load %arg3[%c0_2, %c0_3] : memref<32x128xbf16, #tpu.memory_space<vmem>>, vector<32x128xbf16>
    %c0_4 = arith.constant 0 : index
    %c0_5 = arith.constant 0 : index
    %5 = vector.load %arg4[%c0_4, %c0_5] : memref<128x128xbf16, #tpu.memory_space<vmem>>, vector<128x128xbf16>
    %cst = arith.constant dense<0.000000e+00> : vector<32x128xf32>
    %6 = tpu.matmul %4, %5, %cst {dimension_numbers = #tpu.dot_dimension_numbers<[1], [0], [0], [1], [0, 0, 1, 1], [], []>} : vector<32x128xbf16>, vector<128x128xbf16>, vector<32x128xf32> -> vector<32x128xf32>
    %7 = arith.addf %3, %6 : vector<32x128xf32>
    %c0_6 = arith.constant 0 : index
    %c0_7 = arith.constant 0 : index
    %8 = vector.load %arg8[%c0_6, %c0_7] : memref<32x128xf32, #tpu.memory_space<vmem>>, vector<32x128xf32>
    tpu.vector_store %arg8[%c0_6, %c0_7], %7 {strides = array<i32>} : memref<32x128xf32, #tpu.memory_space<vmem>>, vector<32x128xf32>,
    %c4_i32 = arith.constant 4 : i32
    %9 = arith.cmpi eq, %arg2, %c4_i32 : i32
    %10 = arith.extui %9 : i1 to i32
    %c0_i32_8 = arith.constant 0 : i32
    %11 = arith.cmpi ne, %10, %c0_i32_8 : i32
    scf.if %11 {
      %c0_9 = arith.constant 0 : index
      %c0_10 = arith.constant 0 : index
      %12 = vector.load %arg8[%c0_9, %c0_10] : memref<32x128xf32, #tpu.memory_space<vmem>>, vector<32x128xf32>
      %c0_11 = arith.constant 0 : index
      %c0_12 = arith.constant 0 : index
      %13 = vector.load %arg5[%c0_11, %c0_12] : memref<1x128xf32, #tpu.memory_space<vmem>>, vector<1x128xf32>
      %14 = vector.broadcast %13 : vector<1x128xf32> to vector<32x128xf32>
      %15 = arith.mulf %12, %14 : vector<32x128xf32>
      %c0_13 = arith.constant 0 : index
      %c0_14 = arith.constant 0 : index
      %16 = vector.load %arg6[%c0_13, %c0_14] : memref<1x128xf32, #tpu.memory_space<vmem>>, vector<1x128xf32>
      %17 = vector.broadcast %16 : vector<1x128xf32> to vector<32x128xf32>
      %18 = arith.addf %15, %17 : vector<32x128xf32>
      %cst_15 = arith.constant 0.000000e+00 : f32
      %19 = vector.broadcast %cst_15 : f32 to vector<32x128xf32>
      %20 = arith.maximumf %18, %19 : vector<32x128xf32>
      %c0_16 = arith.constant 0 : index
      %c0_17 = arith.constant 0 : index
      %21 = vector.load %arg7[%c0_16, %c0_17] : memref<32x128xf32, #tpu.memory_space<vmem>>, vector<32x128xf32>
      tpu.vector_store %arg7[%c0_16, %c0_17], %20 {strides = array<i32>} : memref<32x128xf32, #tpu.memory_space<vmem>>, vector<32x128xf32>,
    } else {
    }
    return
  }
  func.func @transform_0(%arg0: i32, %arg1: i32, %arg2: i32) -> (i32, i32) {
    %c0_i32 = arith.constant 0 : i32
    return %arg0, %arg2 : i32, i32
  }
  func.func @transform_1(%arg0: i32, %arg1: i32, %arg2: i32) -> (i32, i32) {
    %c0_i32 = arith.constant 0 : i32
    return %arg2, %arg1 : i32, i32
  }
  func.func @transform_2(%arg0: i32, %arg1: i32, %arg2: i32) -> (i32, i32) {
    %c0_i32 = arith.constant 0 : i32
    %c0_i32_0 = arith.constant 0 : i32
    return %c0_i32, %arg1 : i32, i32
  }
  func.func @transform_3(%arg0: i32, %arg1: i32, %arg2: i32) -> (i32, i32) {
    %c0_i32 = arith.constant 0 : i32
    %c0_i32_0 = arith.constant 0 : i32
    return %c0_i32, %arg1 : i32, i32
  }
  func.func @transform_4(%arg0: i32, %arg1: i32, %arg2: i32) -> (i32, i32) {
    %c0_i32 = arith.constant 0 : i32
    return %arg0, %arg1 : i32, i32
  }
}

module attributes {stable_mosaic.version = 11 : i64} {
  func.func @_mm_bn_kernel(%arg0: i32, %arg1: i32, %arg2: i32, %arg3: memref<32x128xbf16, #tpu.memory_space<vmem>>, %arg4: memref<128x128xbf16, #tpu.memory_space<vmem>>, %arg5: memref<1x128xf32, #tpu.memory_space<vmem>>, %arg6: memref<1x128xf32, #tpu.memory_space<vmem>>, %arg7: memref<32x128xf32, #tpu.memory_space<vmem>>, %arg8: memref<32x128xf32, #tpu.memory_space<vmem>>) attributes {dimension_semantics = [#tpu.dimension_semantics<parallel>, #tpu.dimension_semantics<parallel>, #tpu.dimension_semantics<arbitrary>], iteration_bounds = array<i64: 1, 1, 1>, scalar_prefetch = 0 : i64, scratch_operands = 1 : i64, tpu.core_type = #tpu.core_type<tc>, window_params = [{transform_indices = @transform_0, window_bounds = array<i64: 32, 128>}, {transform_indices = @transform_1, window_bounds = array<i64: 128, 128>}, {transform_indices = @transform_2, window_bounds = array<i64: 1, 128>}, {transform_indices = @transform_3, window_bounds = array<i64: 1, 128>}, {transform_indices = @transform_4, window_bounds = array<i64: 32, 128>}]} {
    %c0_i32 = arith.constant 0 : i32
    %0 = arith.cmpi eq, %arg2, %c0_i32 : i32
    %1 = arith.extui %0 : i1 to i32
    %c0_i32_0 = arith.constant 0 : i32
    %2 = arith.cmpi ne, %1, %c0_i32_0 : i32
    scf.if %2 {
      %cst_10 = arith.constant 0.000000e+00 : f32
      %12 = vector.broadcast %cst_10 : f32 to vector<32x128xf32>
      %c0_11 = arith.constant 0 : index
      %c0_12 = arith.constant 0 : index
      %13 = vector.load %arg8[%c0_11, %c0_12] : memref<32x128xf32, #tpu.memory_space<vmem>>, vector<32x128xf32>
      tpu.vector_store %arg8[%c0_11, %c0_12], %12 {strides = array<i32>} : memref<32x128xf32, #tpu.memory_space<vmem>>, vector<32x128xf32>,
    } else {
    }
    %c0 = arith.constant 0 : index
    %c0_1 = arith.constant 0 : index
    %3 = vector.load %arg8[%c0, %c0_1] : memref<32x128xf32, #tpu.memory_space<vmem>>, vector<32x128xf32>
    %c0_2 = arith.constant 0 : index
    %c0_3 = arith.constant 0 : index
    %4 = vector.load %arg3[%c0_2, %c0_3] : memref<32x128xbf16, #tpu.memory_space<vmem>>, vector<32x128xbf16>
    %c0_4 = arith.constant 0 : index
    %c0_5 = arith.constant 0 : index
    %5 = vector.load %arg4[%c0_4, %c0_5] : memref<128x128xbf16, #tpu.memory_space<vmem>>, vector<128x128xbf16>
    %cst = arith.constant dense<0.000000e+00> : vector<32x128xf32>
    %6 = tpu.matmul %4, %5, %cst {dimension_numbers = #tpu.dot_dimension_numbers<[1], [0], [0], [1], [0, 0, 1, 1], [], []>} : vector<32x128xbf16>, vector<128x128xbf16>, vector<32x128xf32> -> vector<32x128xf32>
    %7 = arith.addf %3, %6 : vector<32x128xf32>
    %c0_6 = arith.constant 0 : index
    %c0_7 = arith.constant 0 : index
    %8 = vector.load %arg8[%c0_6, %c0_7] : memref<32x128xf32, #tpu.memory_space<vmem>>, vector<32x128xf32>
    tpu.vector_store %arg8[%c0_6, %c0_7], %7 {strides = array<i32>} : memref<32x128xf32, #tpu.memory_space<vmem>>, vector<32x128xf32>,
    %c0_i32_8 = arith.constant 0 : i32
    %9 = arith.cmpi eq, %arg2, %c0_i32_8 : i32
    %10 = arith.extui %9 : i1 to i32
    %c0_i32_9 = arith.constant 0 : i32
    %11 = arith.cmpi ne, %10, %c0_i32_9 : i32
    scf.if %11 {
      %c0_10 = arith.constant 0 : index
      %c0_11 = arith.constant 0 : index
      %12 = vector.load %arg8[%c0_10, %c0_11] : memref<32x128xf32, #tpu.memory_space<vmem>>, vector<32x128xf32>
      %c0_12 = arith.constant 0 : index
      %c0_13 = arith.constant 0 : index
      %13 = vector.load %arg5[%c0_12, %c0_13] : memref<1x128xf32, #tpu.memory_space<vmem>>, vector<1x128xf32>
      %14 = vector.broadcast %13 : vector<1x128xf32> to vector<32x128xf32>
      %15 = arith.mulf %12, %14 : vector<32x128xf32>
      %c0_14 = arith.constant 0 : index
      %c0_15 = arith.constant 0 : index
      %16 = vector.load %arg6[%c0_14, %c0_15] : memref<1x128xf32, #tpu.memory_space<vmem>>, vector<1x128xf32>
      %17 = vector.broadcast %16 : vector<1x128xf32> to vector<32x128xf32>
      %18 = arith.addf %15, %17 : vector<32x128xf32>
      %c0_16 = arith.constant 0 : index
      %c0_17 = arith.constant 0 : index
      %19 = vector.load %arg7[%c0_16, %c0_17] : memref<32x128xf32, #tpu.memory_space<vmem>>, vector<32x128xf32>
      tpu.vector_store %arg7[%c0_16, %c0_17], %18 {strides = array<i32>} : memref<32x128xf32, #tpu.memory_space<vmem>>, vector<32x128xf32>,
    } else {
    }
    return
  }
  func.func @transform_0(%arg0: i32, %arg1: i32, %arg2: i32) -> (i32, i32) {
    %c0_i32 = arith.constant 0 : i32
    return %arg0, %arg2 : i32, i32
  }
  func.func @transform_1(%arg0: i32, %arg1: i32, %arg2: i32) -> (i32, i32) {
    %c0_i32 = arith.constant 0 : i32
    return %arg2, %arg1 : i32, i32
  }
  func.func @transform_2(%arg0: i32, %arg1: i32, %arg2: i32) -> (i32, i32) {
    %c0_i32 = arith.constant 0 : i32
    %c0_i32_0 = arith.constant 0 : i32
    return %c0_i32, %arg1 : i32, i32
  }
  func.func @transform_3(%arg0: i32, %arg1: i32, %arg2: i32) -> (i32, i32) {
    %c0_i32 = arith.constant 0 : i32
    %c0_i32_0 = arith.constant 0 : i32
    return %c0_i32, %arg1 : i32, i32
  }
  func.func @transform_4(%arg0: i32, %arg1: i32, %arg2: i32) -> (i32, i32) {
    %c0_i32 = arith.constant 0 : i32
    return %arg0, %arg1 : i32, i32
  }
}

module attributes {stable_mosaic.version = 11 : i64} {
  func.func @_mm_bn_kernel(%arg0: i32, %arg1: i32, %arg2: i32, %arg3: memref<32x128xbf16, #tpu.memory_space<vmem>>, %arg4: memref<128x128xbf16, #tpu.memory_space<vmem>>, %arg5: memref<1x128xf32, #tpu.memory_space<vmem>>, %arg6: memref<1x128xf32, #tpu.memory_space<vmem>>, %arg7: memref<32x128xf32, #tpu.memory_space<vmem>>, %arg8: memref<32x128xf32, #tpu.memory_space<vmem>>) attributes {dimension_semantics = [#tpu.dimension_semantics<parallel>, #tpu.dimension_semantics<parallel>, #tpu.dimension_semantics<arbitrary>], iteration_bounds = array<i64: 1, 1, 9>, scalar_prefetch = 0 : i64, scratch_operands = 1 : i64, tpu.core_type = #tpu.core_type<tc>, window_params = [{transform_indices = @transform_0, window_bounds = array<i64: 32, 128>}, {transform_indices = @transform_1, window_bounds = array<i64: 128, 128>}, {transform_indices = @transform_2, window_bounds = array<i64: 1, 128>}, {transform_indices = @transform_3, window_bounds = array<i64: 1, 128>}, {transform_indices = @transform_4, window_bounds = array<i64: 32, 128>}]} {
    %c0_i32 = arith.constant 0 : i32
    %0 = arith.cmpi eq, %arg2, %c0_i32 : i32
    %1 = arith.extui %0 : i1 to i32
    %c0_i32_0 = arith.constant 0 : i32
    %2 = arith.cmpi ne, %1, %c0_i32_0 : i32
    scf.if %2 {
      %cst_9 = arith.constant 0.000000e+00 : f32
      %12 = vector.broadcast %cst_9 : f32 to vector<32x128xf32>
      %c0_10 = arith.constant 0 : index
      %c0_11 = arith.constant 0 : index
      %13 = vector.load %arg8[%c0_10, %c0_11] : memref<32x128xf32, #tpu.memory_space<vmem>>, vector<32x128xf32>
      tpu.vector_store %arg8[%c0_10, %c0_11], %12 {strides = array<i32>} : memref<32x128xf32, #tpu.memory_space<vmem>>, vector<32x128xf32>,
    } else {
    }
    %c0 = arith.constant 0 : index
    %c0_1 = arith.constant 0 : index
    %3 = vector.load %arg8[%c0, %c0_1] : memref<32x128xf32, #tpu.memory_space<vmem>>, vector<32x128xf32>
    %c0_2 = arith.constant 0 : index
    %c0_3 = arith.constant 0 : index
    %4 = vector.load %arg3[%c0_2, %c0_3] : memref<32x128xbf16, #tpu.memory_space<vmem>>, vector<32x128xbf16>
    %c0_4 = arith.constant 0 : index
    %c0_5 = arith.constant 0 : index
    %5 = vector.load %arg4[%c0_4, %c0_5] : memref<128x128xbf16, #tpu.memory_space<vmem>>, vector<128x128xbf16>
    %cst = arith.constant dense<0.000000e+00> : vector<32x128xf32>
    %6 = tpu.matmul %4, %5, %cst {dimension_numbers = #tpu.dot_dimension_numbers<[1], [0], [0], [1], [0, 0, 1, 1], [], []>} : vector<32x128xbf16>, vector<128x128xbf16>, vector<32x128xf32> -> vector<32x128xf32>
    %7 = arith.addf %3, %6 : vector<32x128xf32>
    %c0_6 = arith.constant 0 : index
    %c0_7 = arith.constant 0 : index
    %8 = vector.load %arg8[%c0_6, %c0_7] : memref<32x128xf32, #tpu.memory_space<vmem>>, vector<32x128xf32>
    tpu.vector_store %arg8[%c0_6, %c0_7], %7 {strides = array<i32>} : memref<32x128xf32, #tpu.memory_space<vmem>>, vector<32x128xf32>,
    %c8_i32 = arith.constant 8 : i32
    %9 = arith.cmpi eq, %arg2, %c8_i32 : i32
    %10 = arith.extui %9 : i1 to i32
    %c0_i32_8 = arith.constant 0 : i32
    %11 = arith.cmpi ne, %10, %c0_i32_8 : i32
    scf.if %11 {
      %c0_9 = arith.constant 0 : index
      %c0_10 = arith.constant 0 : index
      %12 = vector.load %arg8[%c0_9, %c0_10] : memref<32x128xf32, #tpu.memory_space<vmem>>, vector<32x128xf32>
      %c0_11 = arith.constant 0 : index
      %c0_12 = arith.constant 0 : index
      %13 = vector.load %arg5[%c0_11, %c0_12] : memref<1x128xf32, #tpu.memory_space<vmem>>, vector<1x128xf32>
      %14 = vector.broadcast %13 : vector<1x128xf32> to vector<32x128xf32>
      %15 = arith.mulf %12, %14 : vector<32x128xf32>
      %c0_13 = arith.constant 0 : index
      %c0_14 = arith.constant 0 : index
      %16 = vector.load %arg6[%c0_13, %c0_14] : memref<1x128xf32, #tpu.memory_space<vmem>>, vector<1x128xf32>
      %17 = vector.broadcast %16 : vector<1x128xf32> to vector<32x128xf32>
      %18 = arith.addf %15, %17 : vector<32x128xf32>
      %cst_15 = arith.constant 0.000000e+00 : f32
      %19 = vector.broadcast %cst_15 : f32 to vector<32x128xf32>
      %20 = arith.maximumf %18, %19 : vector<32x128xf32>
      %c0_16 = arith.constant 0 : index
      %c0_17 = arith.constant 0 : index
      %21 = vector.load %arg7[%c0_16, %c0_17] : memref<32x128xf32, #tpu.memory_space<vmem>>, vector<32x128xf32>
      tpu.vector_store %arg7[%c0_16, %c0_17], %20 {strides = array<i32>} : memref<32x128xf32, #tpu.memory_space<vmem>>, vector<32x128xf32>,
    } else {
    }
    return
  }
  func.func @transform_0(%arg0: i32, %arg1: i32, %arg2: i32) -> (i32, i32) {
    %c0_i32 = arith.constant 0 : i32
    return %arg0, %arg2 : i32, i32
  }
  func.func @transform_1(%arg0: i32, %arg1: i32, %arg2: i32) -> (i32, i32) {
    %c0_i32 = arith.constant 0 : i32
    return %arg2, %arg1 : i32, i32
  }
  func.func @transform_2(%arg0: i32, %arg1: i32, %arg2: i32) -> (i32, i32) {
    %c0_i32 = arith.constant 0 : i32
    %c0_i32_0 = arith.constant 0 : i32
    return %c0_i32, %arg1 : i32, i32
  }
  func.func @transform_3(%arg0: i32, %arg1: i32, %arg2: i32) -> (i32, i32) {
    %c0_i32 = arith.constant 0 : i32
    %c0_i32_0 = arith.constant 0 : i32
    return %c0_i32, %arg1 : i32, i32
  }
  func.func @transform_4(%arg0: i32, %arg1: i32, %arg2: i32) -> (i32, i32) {
    %c0_i32 = arith.constant 0 : i32
    return %arg0, %arg1 : i32, i32
  }
}

module attributes {stable_mosaic.version = 11 : i64} {
  func.func @_mm_bn_res_kernel(%arg0: i32, %arg1: i32, %arg2: i32, %arg3: memref<32x128xbf16, #tpu.memory_space<vmem>>, %arg4: memref<128x128xbf16, #tpu.memory_space<vmem>>, %arg5: memref<1x128xf32, #tpu.memory_space<vmem>>, %arg6: memref<1x128xf32, #tpu.memory_space<vmem>>, %arg7: memref<32x128xf32, #tpu.memory_space<vmem>>, %arg8: memref<32x128xf32, #tpu.memory_space<vmem>>, %arg9: memref<32x128xf32, #tpu.memory_space<vmem>>) attributes {dimension_semantics = [#tpu.dimension_semantics<parallel>, #tpu.dimension_semantics<parallel>, #tpu.dimension_semantics<arbitrary>], iteration_bounds = array<i64: 1, 1, 9>, scalar_prefetch = 0 : i64, scratch_operands = 1 : i64, tpu.core_type = #tpu.core_type<tc>, window_params = [{transform_indices = @transform_0, window_bounds = array<i64: 32, 128>}, {transform_indices = @transform_1, window_bounds = array<i64: 128, 128>}, {transform_indices = @transform_2, window_bounds = array<i64: 1, 128>}, {transform_indices = @transform_3, window_bounds = array<i64: 1, 128>}, {transform_indices = @transform_4, window_bounds = array<i64: 32, 128>}, {transform_indices = @transform_5, window_bounds = array<i64: 32, 128>}]} {
    %c0_i32 = arith.constant 0 : i32
    %0 = arith.cmpi eq, %arg2, %c0_i32 : i32
    %1 = arith.extui %0 : i1 to i32
    %c0_i32_0 = arith.constant 0 : i32
    %2 = arith.cmpi ne, %1, %c0_i32_0 : i32
    scf.if %2 {
      %cst_9 = arith.constant 0.000000e+00 : f32
      %12 = vector.broadcast %cst_9 : f32 to vector<32x128xf32>
      %c0_10 = arith.constant 0 : index
      %c0_11 = arith.constant 0 : index
      %13 = vector.load %arg9[%c0_10, %c0_11] : memref<32x128xf32, #tpu.memory_space<vmem>>, vector<32x128xf32>
      tpu.vector_store %arg9[%c0_10, %c0_11], %12 {strides = array<i32>} : memref<32x128xf32, #tpu.memory_space<vmem>>, vector<32x128xf32>,
    } else {
    }
    %c0 = arith.constant 0 : index
    %c0_1 = arith.constant 0 : index
    %3 = vector.load %arg9[%c0, %c0_1] : memref<32x128xf32, #tpu.memory_space<vmem>>, vector<32x128xf32>
    %c0_2 = arith.constant 0 : index
    %c0_3 = arith.constant 0 : index
    %4 = vector.load %arg3[%c0_2, %c0_3] : memref<32x128xbf16, #tpu.memory_space<vmem>>, vector<32x128xbf16>
    %c0_4 = arith.constant 0 : index
    %c0_5 = arith.constant 0 : index
    %5 = vector.load %arg4[%c0_4, %c0_5] : memref<128x128xbf16, #tpu.memory_space<vmem>>, vector<128x128xbf16>
    %cst = arith.constant dense<0.000000e+00> : vector<32x128xf32>
    %6 = tpu.matmul %4, %5, %cst {dimension_numbers = #tpu.dot_dimension_numbers<[1], [0], [0], [1], [0, 0, 1, 1], [], []>} : vector<32x128xbf16>, vector<128x128xbf16>, vector<32x128xf32> -> vector<32x128xf32>
    %7 = arith.addf %3, %6 : vector<32x128xf32>
    %c0_6 = arith.constant 0 : index
    %c0_7 = arith.constant 0 : index
    %8 = vector.load %arg9[%c0_6, %c0_7] : memref<32x128xf32, #tpu.memory_space<vmem>>, vector<32x128xf32>
    tpu.vector_store %arg9[%c0_6, %c0_7], %7 {strides = array<i32>} : memref<32x128xf32, #tpu.memory_space<vmem>>, vector<32x128xf32>,
    %c8_i32 = arith.constant 8 : i32
    %9 = arith.cmpi eq, %arg2, %c8_i32 : i32
    %10 = arith.extui %9 : i1 to i32
    %c0_i32_8 = arith.constant 0 : i32
    %11 = arith.cmpi ne, %10, %c0_i32_8 : i32
    scf.if %11 {
      %c0_9 = arith.constant 0 : index
      %c0_10 = arith.constant 0 : index
      %12 = vector.load %arg9[%c0_9, %c0_10] : memref<32x128xf32, #tpu.memory_space<vmem>>, vector<32x128xf32>
      %c0_11 = arith.constant 0 : index
      %c0_12 = arith.constant 0 : index
      %13 = vector.load %arg5[%c0_11, %c0_12] : memref<1x128xf32, #tpu.memory_space<vmem>>, vector<1x128xf32>
      %14 = vector.broadcast %13 : vector<1x128xf32> to vector<32x128xf32>
      %15 = arith.mulf %12, %14 : vector<32x128xf32>
      %c0_13 = arith.constant 0 : index
      %c0_14 = arith.constant 0 : index
      %16 = vector.load %arg6[%c0_13, %c0_14] : memref<1x128xf32, #tpu.memory_space<vmem>>, vector<1x128xf32>
      %17 = vector.broadcast %16 : vector<1x128xf32> to vector<32x128xf32>
      %18 = arith.addf %15, %17 : vector<32x128xf32>
      %c0_15 = arith.constant 0 : index
      %c0_16 = arith.constant 0 : index
      %19 = vector.load %arg7[%c0_15, %c0_16] : memref<32x128xf32, #tpu.memory_space<vmem>>, vector<32x128xf32>
      %20 = arith.addf %18, %19 : vector<32x128xf32>
      %cst_17 = arith.constant 0.000000e+00 : f32
      %21 = vector.broadcast %cst_17 : f32 to vector<32x128xf32>
      %22 = arith.maximumf %20, %21 : vector<32x128xf32>
      %c0_18 = arith.constant 0 : index
      %c0_19 = arith.constant 0 : index
      %23 = vector.load %arg8[%c0_18, %c0_19] : memref<32x128xf32, #tpu.memory_space<vmem>>, vector<32x128xf32>
      tpu.vector_store %arg8[%c0_18, %c0_19], %22 {strides = array<i32>} : memref<32x128xf32, #tpu.memory_space<vmem>>, vector<32x128xf32>,
    } else {
    }
    return
  }
  func.func @transform_0(%arg0: i32, %arg1: i32, %arg2: i32) -> (i32, i32) {
    %c0_i32 = arith.constant 0 : i32
    return %arg0, %arg2 : i32, i32
  }
  func.func @transform_1(%arg0: i32, %arg1: i32, %arg2: i32) -> (i32, i32) {
    %c0_i32 = arith.constant 0 : i32
    return %arg2, %arg1 : i32, i32
  }
  func.func @transform_2(%arg0: i32, %arg1: i32, %arg2: i32) -> (i32, i32) {
    %c0_i32 = arith.constant 0 : i32
    %c0_i32_0 = arith.constant 0 : i32
    return %c0_i32, %arg1 : i32, i32
  }
  func.func @transform_3(%arg0: i32, %arg1: i32, %arg2: i32) -> (i32, i32) {
    %c0_i32 = arith.constant 0 : i32
    %c0_i32_0 = arith.constant 0 : i32
    return %c0_i32, %arg1 : i32, i32
  }
  func.func @transform_4(%arg0: i32, %arg1: i32, %arg2: i32) -> (i32, i32) {
    %c0_i32 = arith.constant 0 : i32
    return %arg0, %arg1 : i32, i32
  }
  func.func @transform_5(%arg0: i32, %arg1: i32, %arg2: i32) -> (i32, i32) {
    %c0_i32 = arith.constant 0 : i32
    return %arg0, %arg1 : i32, i32
  }
}

module attributes {stable_mosaic.version = 11 : i64} {
  func.func @_mm_bn_kernel(%arg0: i32, %arg1: i32, %arg2: i32, %arg3: memref<8x128xbf16, #tpu.memory_space<vmem>>, %arg4: memref<128x256xbf16, #tpu.memory_space<vmem>>, %arg5: memref<1x256xf32, #tpu.memory_space<vmem>>, %arg6: memref<1x256xf32, #tpu.memory_space<vmem>>, %arg7: memref<8x256xf32, #tpu.memory_space<vmem>>, %arg8: memref<8x256xf32, #tpu.memory_space<vmem>>) attributes {dimension_semantics = [#tpu.dimension_semantics<parallel>, #tpu.dimension_semantics<parallel>, #tpu.dimension_semantics<arbitrary>], iteration_bounds = array<i64: 1, 1, 9>, scalar_prefetch = 0 : i64, scratch_operands = 1 : i64, tpu.core_type = #tpu.core_type<tc>, window_params = [{transform_indices = @transform_0, window_bounds = array<i64: 8, 128>}, {transform_indices = @transform_1, window_bounds = array<i64: 128, 256>}, {transform_indices = @transform_2, window_bounds = array<i64: 1, 256>}, {transform_indices = @transform_3, window_bounds = array<i64: 1, 256>}, {transform_indices = @transform_4, window_bounds = array<i64: 8, 256>}]} {
    %c0_i32 = arith.constant 0 : i32
    %0 = arith.cmpi eq, %arg2, %c0_i32 : i32
    %1 = arith.extui %0 : i1 to i32
    %c0_i32_0 = arith.constant 0 : i32
    %2 = arith.cmpi ne, %1, %c0_i32_0 : i32
    scf.if %2 {
      %cst_9 = arith.constant 0.000000e+00 : f32
      %12 = vector.broadcast %cst_9 : f32 to vector<8x256xf32>
      %c0_10 = arith.constant 0 : index
      %c0_11 = arith.constant 0 : index
      %13 = vector.load %arg8[%c0_10, %c0_11] : memref<8x256xf32, #tpu.memory_space<vmem>>, vector<8x256xf32>
      tpu.vector_store %arg8[%c0_10, %c0_11], %12 {strides = array<i32>} : memref<8x256xf32, #tpu.memory_space<vmem>>, vector<8x256xf32>,
    } else {
    }
    %c0 = arith.constant 0 : index
    %c0_1 = arith.constant 0 : index
    %3 = vector.load %arg8[%c0, %c0_1] : memref<8x256xf32, #tpu.memory_space<vmem>>, vector<8x256xf32>
    %c0_2 = arith.constant 0 : index
    %c0_3 = arith.constant 0 : index
    %4 = vector.load %arg3[%c0_2, %c0_3] : memref<8x128xbf16, #tpu.memory_space<vmem>>, vector<8x128xbf16>
    %c0_4 = arith.constant 0 : index
    %c0_5 = arith.constant 0 : index
    %5 = vector.load %arg4[%c0_4, %c0_5] : memref<128x256xbf16, #tpu.memory_space<vmem>>, vector<128x256xbf16>
    %cst = arith.constant dense<0.000000e+00> : vector<8x256xf32>
    %6 = tpu.matmul %4, %5, %cst {dimension_numbers = #tpu.dot_dimension_numbers<[1], [0], [0], [1], [0, 0, 1, 1], [], []>} : vector<8x128xbf16>, vector<128x256xbf16>, vector<8x256xf32> -> vector<8x256xf32>
    %7 = arith.addf %3, %6 : vector<8x256xf32>
    %c0_6 = arith.constant 0 : index
    %c0_7 = arith.constant 0 : index
    %8 = vector.load %arg8[%c0_6, %c0_7] : memref<8x256xf32, #tpu.memory_space<vmem>>, vector<8x256xf32>
    tpu.vector_store %arg8[%c0_6, %c0_7], %7 {strides = array<i32>} : memref<8x256xf32, #tpu.memory_space<vmem>>, vector<8x256xf32>,
    %c8_i32 = arith.constant 8 : i32
    %9 = arith.cmpi eq, %arg2, %c8_i32 : i32
    %10 = arith.extui %9 : i1 to i32
    %c0_i32_8 = arith.constant 0 : i32
    %11 = arith.cmpi ne, %10, %c0_i32_8 : i32
    scf.if %11 {
      %c0_9 = arith.constant 0 : index
      %c0_10 = arith.constant 0 : index
      %12 = vector.load %arg8[%c0_9, %c0_10] : memref<8x256xf32, #tpu.memory_space<vmem>>, vector<8x256xf32>
      %c0_11 = arith.constant 0 : index
      %c0_12 = arith.constant 0 : index
      %13 = vector.load %arg5[%c0_11, %c0_12] : memref<1x256xf32, #tpu.memory_space<vmem>>, vector<1x256xf32>
      %14 = vector.broadcast %13 : vector<1x256xf32> to vector<8x256xf32>
      %15 = arith.mulf %12, %14 : vector<8x256xf32>
      %c0_13 = arith.constant 0 : index
      %c0_14 = arith.constant 0 : index
      %16 = vector.load %arg6[%c0_13, %c0_14] : memref<1x256xf32, #tpu.memory_space<vmem>>, vector<1x256xf32>
      %17 = vector.broadcast %16 : vector<1x256xf32> to vector<8x256xf32>
      %18 = arith.addf %15, %17 : vector<8x256xf32>
      %cst_15 = arith.constant 0.000000e+00 : f32
      %19 = vector.broadcast %cst_15 : f32 to vector<8x256xf32>
      %20 = arith.maximumf %18, %19 : vector<8x256xf32>
      %c0_16 = arith.constant 0 : index
      %c0_17 = arith.constant 0 : index
      %21 = vector.load %arg7[%c0_16, %c0_17] : memref<8x256xf32, #tpu.memory_space<vmem>>, vector<8x256xf32>
      tpu.vector_store %arg7[%c0_16, %c0_17], %20 {strides = array<i32>} : memref<8x256xf32, #tpu.memory_space<vmem>>, vector<8x256xf32>,
    } else {
    }
    return
  }
  func.func @transform_0(%arg0: i32, %arg1: i32, %arg2: i32) -> (i32, i32) {
    %c0_i32 = arith.constant 0 : i32
    return %arg0, %arg2 : i32, i32
  }
  func.func @transform_1(%arg0: i32, %arg1: i32, %arg2: i32) -> (i32, i32) {
    %c0_i32 = arith.constant 0 : i32
    return %arg2, %arg1 : i32, i32
  }
  func.func @transform_2(%arg0: i32, %arg1: i32, %arg2: i32) -> (i32, i32) {
    %c0_i32 = arith.constant 0 : i32
    %c0_i32_0 = arith.constant 0 : i32
    return %c0_i32, %arg1 : i32, i32
  }
  func.func @transform_3(%arg0: i32, %arg1: i32, %arg2: i32) -> (i32, i32) {
    %c0_i32 = arith.constant 0 : i32
    %c0_i32_0 = arith.constant 0 : i32
    return %c0_i32, %arg1 : i32, i32
  }
  func.func @transform_4(%arg0: i32, %arg1: i32, %arg2: i32) -> (i32, i32) {
    %c0_i32 = arith.constant 0 : i32
    return %arg0, %arg1 : i32, i32
  }
}

module attributes {stable_mosaic.version = 11 : i64} {
  func.func @_mm_bn_kernel(%arg0: i32, %arg1: i32, %arg2: i32, %arg3: memref<8x128xbf16, #tpu.memory_space<vmem>>, %arg4: memref<128x256xbf16, #tpu.memory_space<vmem>>, %arg5: memref<1x256xf32, #tpu.memory_space<vmem>>, %arg6: memref<1x256xf32, #tpu.memory_space<vmem>>, %arg7: memref<8x256xf32, #tpu.memory_space<vmem>>, %arg8: memref<8x256xf32, #tpu.memory_space<vmem>>) attributes {dimension_semantics = [#tpu.dimension_semantics<parallel>, #tpu.dimension_semantics<parallel>, #tpu.dimension_semantics<arbitrary>], iteration_bounds = array<i64: 1, 1, 1>, scalar_prefetch = 0 : i64, scratch_operands = 1 : i64, tpu.core_type = #tpu.core_type<tc>, window_params = [{transform_indices = @transform_0, window_bounds = array<i64: 8, 128>}, {transform_indices = @transform_1, window_bounds = array<i64: 128, 256>}, {transform_indices = @transform_2, window_bounds = array<i64: 1, 256>}, {transform_indices = @transform_3, window_bounds = array<i64: 1, 256>}, {transform_indices = @transform_4, window_bounds = array<i64: 8, 256>}]} {
    %c0_i32 = arith.constant 0 : i32
    %0 = arith.cmpi eq, %arg2, %c0_i32 : i32
    %1 = arith.extui %0 : i1 to i32
    %c0_i32_0 = arith.constant 0 : i32
    %2 = arith.cmpi ne, %1, %c0_i32_0 : i32
    scf.if %2 {
      %cst_10 = arith.constant 0.000000e+00 : f32
      %12 = vector.broadcast %cst_10 : f32 to vector<8x256xf32>
      %c0_11 = arith.constant 0 : index
      %c0_12 = arith.constant 0 : index
      %13 = vector.load %arg8[%c0_11, %c0_12] : memref<8x256xf32, #tpu.memory_space<vmem>>, vector<8x256xf32>
      tpu.vector_store %arg8[%c0_11, %c0_12], %12 {strides = array<i32>} : memref<8x256xf32, #tpu.memory_space<vmem>>, vector<8x256xf32>,
    } else {
    }
    %c0 = arith.constant 0 : index
    %c0_1 = arith.constant 0 : index
    %3 = vector.load %arg8[%c0, %c0_1] : memref<8x256xf32, #tpu.memory_space<vmem>>, vector<8x256xf32>
    %c0_2 = arith.constant 0 : index
    %c0_3 = arith.constant 0 : index
    %4 = vector.load %arg3[%c0_2, %c0_3] : memref<8x128xbf16, #tpu.memory_space<vmem>>, vector<8x128xbf16>
    %c0_4 = arith.constant 0 : index
    %c0_5 = arith.constant 0 : index
    %5 = vector.load %arg4[%c0_4, %c0_5] : memref<128x256xbf16, #tpu.memory_space<vmem>>, vector<128x256xbf16>
    %cst = arith.constant dense<0.000000e+00> : vector<8x256xf32>
    %6 = tpu.matmul %4, %5, %cst {dimension_numbers = #tpu.dot_dimension_numbers<[1], [0], [0], [1], [0, 0, 1, 1], [], []>} : vector<8x128xbf16>, vector<128x256xbf16>, vector<8x256xf32> -> vector<8x256xf32>
    %7 = arith.addf %3, %6 : vector<8x256xf32>
    %c0_6 = arith.constant 0 : index
    %c0_7 = arith.constant 0 : index
    %8 = vector.load %arg8[%c0_6, %c0_7] : memref<8x256xf32, #tpu.memory_space<vmem>>, vector<8x256xf32>
    tpu.vector_store %arg8[%c0_6, %c0_7], %7 {strides = array<i32>} : memref<8x256xf32, #tpu.memory_space<vmem>>, vector<8x256xf32>,
    %c0_i32_8 = arith.constant 0 : i32
    %9 = arith.cmpi eq, %arg2, %c0_i32_8 : i32
    %10 = arith.extui %9 : i1 to i32
    %c0_i32_9 = arith.constant 0 : i32
    %11 = arith.cmpi ne, %10, %c0_i32_9 : i32
    scf.if %11 {
      %c0_10 = arith.constant 0 : index
      %c0_11 = arith.constant 0 : index
      %12 = vector.load %arg8[%c0_10, %c0_11] : memref<8x256xf32, #tpu.memory_space<vmem>>, vector<8x256xf32>
      %c0_12 = arith.constant 0 : index
      %c0_13 = arith.constant 0 : index
      %13 = vector.load %arg5[%c0_12, %c0_13] : memref<1x256xf32, #tpu.memory_space<vmem>>, vector<1x256xf32>
      %14 = vector.broadcast %13 : vector<1x256xf32> to vector<8x256xf32>
      %15 = arith.mulf %12, %14 : vector<8x256xf32>
      %c0_14 = arith.constant 0 : index
      %c0_15 = arith.constant 0 : index
      %16 = vector.load %arg6[%c0_14, %c0_15] : memref<1x256xf32, #tpu.memory_space<vmem>>, vector<1x256xf32>
      %17 = vector.broadcast %16 : vector<1x256xf32> to vector<8x256xf32>
      %18 = arith.addf %15, %17 : vector<8x256xf32>
      %c0_16 = arith.constant 0 : index
      %c0_17 = arith.constant 0 : index
      %19 = vector.load %arg7[%c0_16, %c0_17] : memref<8x256xf32, #tpu.memory_space<vmem>>, vector<8x256xf32>
      tpu.vector_store %arg7[%c0_16, %c0_17], %18 {strides = array<i32>} : memref<8x256xf32, #tpu.memory_space<vmem>>, vector<8x256xf32>,
    } else {
    }
    return
  }
  func.func @transform_0(%arg0: i32, %arg1: i32, %arg2: i32) -> (i32, i32) {
    %c0_i32 = arith.constant 0 : i32
    return %arg0, %arg2 : i32, i32
  }
  func.func @transform_1(%arg0: i32, %arg1: i32, %arg2: i32) -> (i32, i32) {
    %c0_i32 = arith.constant 0 : i32
    return %arg2, %arg1 : i32, i32
  }
  func.func @transform_2(%arg0: i32, %arg1: i32, %arg2: i32) -> (i32, i32) {
    %c0_i32 = arith.constant 0 : i32
    %c0_i32_0 = arith.constant 0 : i32
    return %c0_i32, %arg1 : i32, i32
  }
  func.func @transform_3(%arg0: i32, %arg1: i32, %arg2: i32) -> (i32, i32) {
    %c0_i32 = arith.constant 0 : i32
    %c0_i32_0 = arith.constant 0 : i32
    return %c0_i32, %arg1 : i32, i32
  }
  func.func @transform_4(%arg0: i32, %arg1: i32, %arg2: i32) -> (i32, i32) {
    %c0_i32 = arith.constant 0 : i32
    return %arg0, %arg1 : i32, i32
  }
}

module attributes {stable_mosaic.version = 11 : i64} {
  func.func @_mm_bn_kernel(%arg0: i32, %arg1: i32, %arg2: i32, %arg3: memref<8x256xbf16, #tpu.memory_space<vmem>>, %arg4: memref<256x256xbf16, #tpu.memory_space<vmem>>, %arg5: memref<1x256xf32, #tpu.memory_space<vmem>>, %arg6: memref<1x256xf32, #tpu.memory_space<vmem>>, %arg7: memref<8x256xf32, #tpu.memory_space<vmem>>, %arg8: memref<8x256xf32, #tpu.memory_space<vmem>>) attributes {dimension_semantics = [#tpu.dimension_semantics<parallel>, #tpu.dimension_semantics<parallel>, #tpu.dimension_semantics<arbitrary>], iteration_bounds = array<i64: 1, 1, 9>, scalar_prefetch = 0 : i64, scratch_operands = 1 : i64, tpu.core_type = #tpu.core_type<tc>, window_params = [{transform_indices = @transform_0, window_bounds = array<i64: 8, 256>}, {transform_indices = @transform_1, window_bounds = array<i64: 256, 256>}, {transform_indices = @transform_2, window_bounds = array<i64: 1, 256>}, {transform_indices = @transform_3, window_bounds = array<i64: 1, 256>}, {transform_indices = @transform_4, window_bounds = array<i64: 8, 256>}]} {
    %c0_i32 = arith.constant 0 : i32
    %0 = arith.cmpi eq, %arg2, %c0_i32 : i32
    %1 = arith.extui %0 : i1 to i32
    %c0_i32_0 = arith.constant 0 : i32
    %2 = arith.cmpi ne, %1, %c0_i32_0 : i32
    scf.if %2 {
      %cst_9 = arith.constant 0.000000e+00 : f32
      %12 = vector.broadcast %cst_9 : f32 to vector<8x256xf32>
      %c0_10 = arith.constant 0 : index
      %c0_11 = arith.constant 0 : index
      %13 = vector.load %arg8[%c0_10, %c0_11] : memref<8x256xf32, #tpu.memory_space<vmem>>, vector<8x256xf32>
      tpu.vector_store %arg8[%c0_10, %c0_11], %12 {strides = array<i32>} : memref<8x256xf32, #tpu.memory_space<vmem>>, vector<8x256xf32>,
    } else {
    }
    %c0 = arith.constant 0 : index
    %c0_1 = arith.constant 0 : index
    %3 = vector.load %arg8[%c0, %c0_1] : memref<8x256xf32, #tpu.memory_space<vmem>>, vector<8x256xf32>
    %c0_2 = arith.constant 0 : index
    %c0_3 = arith.constant 0 : index
    %4 = vector.load %arg3[%c0_2, %c0_3] : memref<8x256xbf16, #tpu.memory_space<vmem>>, vector<8x256xbf16>
    %c0_4 = arith.constant 0 : index
    %c0_5 = arith.constant 0 : index
    %5 = vector.load %arg4[%c0_4, %c0_5] : memref<256x256xbf16, #tpu.memory_space<vmem>>, vector<256x256xbf16>
    %cst = arith.constant dense<0.000000e+00> : vector<8x256xf32>
    %6 = tpu.matmul %4, %5, %cst {dimension_numbers = #tpu.dot_dimension_numbers<[1], [0], [0], [1], [0, 0, 1, 1], [], []>} : vector<8x256xbf16>, vector<256x256xbf16>, vector<8x256xf32> -> vector<8x256xf32>
    %7 = arith.addf %3, %6 : vector<8x256xf32>
    %c0_6 = arith.constant 0 : index
    %c0_7 = arith.constant 0 : index
    %8 = vector.load %arg8[%c0_6, %c0_7] : memref<8x256xf32, #tpu.memory_space<vmem>>, vector<8x256xf32>
    tpu.vector_store %arg8[%c0_6, %c0_7], %7 {strides = array<i32>} : memref<8x256xf32, #tpu.memory_space<vmem>>, vector<8x256xf32>,
    %c8_i32 = arith.constant 8 : i32
    %9 = arith.cmpi eq, %arg2, %c8_i32 : i32
    %10 = arith.extui %9 : i1 to i32
    %c0_i32_8 = arith.constant 0 : i32
    %11 = arith.cmpi ne, %10, %c0_i32_8 : i32
    scf.if %11 {
      %c0_9 = arith.constant 0 : index
      %c0_10 = arith.constant 0 : index
      %12 = vector.load %arg8[%c0_9, %c0_10] : memref<8x256xf32, #tpu.memory_space<vmem>>, vector<8x256xf32>
      %c0_11 = arith.constant 0 : index
      %c0_12 = arith.constant 0 : index
      %13 = vector.load %arg5[%c0_11, %c0_12] : memref<1x256xf32, #tpu.memory_space<vmem>>, vector<1x256xf32>
      %14 = vector.broadcast %13 : vector<1x256xf32> to vector<8x256xf32>
      %15 = arith.mulf %12, %14 : vector<8x256xf32>
      %c0_13 = arith.constant 0 : index
      %c0_14 = arith.constant 0 : index
      %16 = vector.load %arg6[%c0_13, %c0_14] : memref<1x256xf32, #tpu.memory_space<vmem>>, vector<1x256xf32>
      %17 = vector.broadcast %16 : vector<1x256xf32> to vector<8x256xf32>
      %18 = arith.addf %15, %17 : vector<8x256xf32>
      %cst_15 = arith.constant 0.000000e+00 : f32
      %19 = vector.broadcast %cst_15 : f32 to vector<8x256xf32>
      %20 = arith.maximumf %18, %19 : vector<8x256xf32>
      %c0_16 = arith.constant 0 : index
      %c0_17 = arith.constant 0 : index
      %21 = vector.load %arg7[%c0_16, %c0_17] : memref<8x256xf32, #tpu.memory_space<vmem>>, vector<8x256xf32>
      tpu.vector_store %arg7[%c0_16, %c0_17], %20 {strides = array<i32>} : memref<8x256xf32, #tpu.memory_space<vmem>>, vector<8x256xf32>,
    } else {
    }
    return
  }
  func.func @transform_0(%arg0: i32, %arg1: i32, %arg2: i32) -> (i32, i32) {
    %c0_i32 = arith.constant 0 : i32
    return %arg0, %arg2 : i32, i32
  }
  func.func @transform_1(%arg0: i32, %arg1: i32, %arg2: i32) -> (i32, i32) {
    %c0_i32 = arith.constant 0 : i32
    return %arg2, %arg1 : i32, i32
  }
  func.func @transform_2(%arg0: i32, %arg1: i32, %arg2: i32) -> (i32, i32) {
    %c0_i32 = arith.constant 0 : i32
    %c0_i32_0 = arith.constant 0 : i32
    return %c0_i32, %arg1 : i32, i32
  }
  func.func @transform_3(%arg0: i32, %arg1: i32, %arg2: i32) -> (i32, i32) {
    %c0_i32 = arith.constant 0 : i32
    %c0_i32_0 = arith.constant 0 : i32
    return %c0_i32, %arg1 : i32, i32
  }
  func.func @transform_4(%arg0: i32, %arg1: i32, %arg2: i32) -> (i32, i32) {
    %c0_i32 = arith.constant 0 : i32
    return %arg0, %arg1 : i32, i32
  }
}

module attributes {stable_mosaic.version = 11 : i64} {
  func.func @_mm_bn_res_kernel(%arg0: i32, %arg1: i32, %arg2: i32, %arg3: memref<8x256xbf16, #tpu.memory_space<vmem>>, %arg4: memref<256x256xbf16, #tpu.memory_space<vmem>>, %arg5: memref<1x256xf32, #tpu.memory_space<vmem>>, %arg6: memref<1x256xf32, #tpu.memory_space<vmem>>, %arg7: memref<8x256xf32, #tpu.memory_space<vmem>>, %arg8: memref<8x256xf32, #tpu.memory_space<vmem>>, %arg9: memref<8x256xf32, #tpu.memory_space<vmem>>) attributes {dimension_semantics = [#tpu.dimension_semantics<parallel>, #tpu.dimension_semantics<parallel>, #tpu.dimension_semantics<arbitrary>], iteration_bounds = array<i64: 1, 1, 9>, scalar_prefetch = 0 : i64, scratch_operands = 1 : i64, tpu.core_type = #tpu.core_type<tc>, window_params = [{transform_indices = @transform_0, window_bounds = array<i64: 8, 256>}, {transform_indices = @transform_1, window_bounds = array<i64: 256, 256>}, {transform_indices = @transform_2, window_bounds = array<i64: 1, 256>}, {transform_indices = @transform_3, window_bounds = array<i64: 1, 256>}, {transform_indices = @transform_4, window_bounds = array<i64: 8, 256>}, {transform_indices = @transform_5, window_bounds = array<i64: 8, 256>}]} {
    %c0_i32 = arith.constant 0 : i32
    %0 = arith.cmpi eq, %arg2, %c0_i32 : i32
    %1 = arith.extui %0 : i1 to i32
    %c0_i32_0 = arith.constant 0 : i32
    %2 = arith.cmpi ne, %1, %c0_i32_0 : i32
    scf.if %2 {
      %cst_9 = arith.constant 0.000000e+00 : f32
      %12 = vector.broadcast %cst_9 : f32 to vector<8x256xf32>
      %c0_10 = arith.constant 0 : index
      %c0_11 = arith.constant 0 : index
      %13 = vector.load %arg9[%c0_10, %c0_11] : memref<8x256xf32, #tpu.memory_space<vmem>>, vector<8x256xf32>
      tpu.vector_store %arg9[%c0_10, %c0_11], %12 {strides = array<i32>} : memref<8x256xf32, #tpu.memory_space<vmem>>, vector<8x256xf32>,
    } else {
    }
    %c0 = arith.constant 0 : index
    %c0_1 = arith.constant 0 : index
    %3 = vector.load %arg9[%c0, %c0_1] : memref<8x256xf32, #tpu.memory_space<vmem>>, vector<8x256xf32>
    %c0_2 = arith.constant 0 : index
    %c0_3 = arith.constant 0 : index
    %4 = vector.load %arg3[%c0_2, %c0_3] : memref<8x256xbf16, #tpu.memory_space<vmem>>, vector<8x256xbf16>
    %c0_4 = arith.constant 0 : index
    %c0_5 = arith.constant 0 : index
    %5 = vector.load %arg4[%c0_4, %c0_5] : memref<256x256xbf16, #tpu.memory_space<vmem>>, vector<256x256xbf16>
    %cst = arith.constant dense<0.000000e+00> : vector<8x256xf32>
    %6 = tpu.matmul %4, %5, %cst {dimension_numbers = #tpu.dot_dimension_numbers<[1], [0], [0], [1], [0, 0, 1, 1], [], []>} : vector<8x256xbf16>, vector<256x256xbf16>, vector<8x256xf32> -> vector<8x256xf32>
    %7 = arith.addf %3, %6 : vector<8x256xf32>
    %c0_6 = arith.constant 0 : index
    %c0_7 = arith.constant 0 : index
    %8 = vector.load %arg9[%c0_6, %c0_7] : memref<8x256xf32, #tpu.memory_space<vmem>>, vector<8x256xf32>
    tpu.vector_store %arg9[%c0_6, %c0_7], %7 {strides = array<i32>} : memref<8x256xf32, #tpu.memory_space<vmem>>, vector<8x256xf32>,
    %c8_i32 = arith.constant 8 : i32
    %9 = arith.cmpi eq, %arg2, %c8_i32 : i32
    %10 = arith.extui %9 : i1 to i32
    %c0_i32_8 = arith.constant 0 : i32
    %11 = arith.cmpi ne, %10, %c0_i32_8 : i32
    scf.if %11 {
      %c0_9 = arith.constant 0 : index
      %c0_10 = arith.constant 0 : index
      %12 = vector.load %arg9[%c0_9, %c0_10] : memref<8x256xf32, #tpu.memory_space<vmem>>, vector<8x256xf32>
      %c0_11 = arith.constant 0 : index
      %c0_12 = arith.constant 0 : index
      %13 = vector.load %arg5[%c0_11, %c0_12] : memref<1x256xf32, #tpu.memory_space<vmem>>, vector<1x256xf32>
      %14 = vector.broadcast %13 : vector<1x256xf32> to vector<8x256xf32>
      %15 = arith.mulf %12, %14 : vector<8x256xf32>
      %c0_13 = arith.constant 0 : index
      %c0_14 = arith.constant 0 : index
      %16 = vector.load %arg6[%c0_13, %c0_14] : memref<1x256xf32, #tpu.memory_space<vmem>>, vector<1x256xf32>
      %17 = vector.broadcast %16 : vector<1x256xf32> to vector<8x256xf32>
      %18 = arith.addf %15, %17 : vector<8x256xf32>
      %c0_15 = arith.constant 0 : index
      %c0_16 = arith.constant 0 : index
      %19 = vector.load %arg7[%c0_15, %c0_16] : memref<8x256xf32, #tpu.memory_space<vmem>>, vector<8x256xf32>
      %20 = arith.addf %18, %19 : vector<8x256xf32>
      %cst_17 = arith.constant 0.000000e+00 : f32
      %21 = vector.broadcast %cst_17 : f32 to vector<8x256xf32>
      %22 = arith.maximumf %20, %21 : vector<8x256xf32>
      %c0_18 = arith.constant 0 : index
      %c0_19 = arith.constant 0 : index
      %23 = vector.load %arg8[%c0_18, %c0_19] : memref<8x256xf32, #tpu.memory_space<vmem>>, vector<8x256xf32>
      tpu.vector_store %arg8[%c0_18, %c0_19], %22 {strides = array<i32>} : memref<8x256xf32, #tpu.memory_space<vmem>>, vector<8x256xf32>,
    } else {
    }
    return
  }
  func.func @transform_0(%arg0: i32, %arg1: i32, %arg2: i32) -> (i32, i32) {
    %c0_i32 = arith.constant 0 : i32
    return %arg0, %arg2 : i32, i32
  }
  func.func @transform_1(%arg0: i32, %arg1: i32, %arg2: i32) -> (i32, i32) {
    %c0_i32 = arith.constant 0 : i32
    return %arg2, %arg1 : i32, i32
  }
  func.func @transform_2(%arg0: i32, %arg1: i32, %arg2: i32) -> (i32, i32) {
    %c0_i32 = arith.constant 0 : i32
    %c0_i32_0 = arith.constant 0 : i32
    return %c0_i32, %arg1 : i32, i32
  }
  func.func @transform_3(%arg0: i32, %arg1: i32, %arg2: i32) -> (i32, i32) {
    %c0_i32 = arith.constant 0 : i32
    %c0_i32_0 = arith.constant 0 : i32
    return %c0_i32, %arg1 : i32, i32
  }
  func.func @transform_4(%arg0: i32, %arg1: i32, %arg2: i32) -> (i32, i32) {
    %c0_i32 = arith.constant 0 : i32
    return %arg0, %arg1 : i32, i32
  }
  func.func @transform_5(%arg0: i32, %arg1: i32, %arg2: i32) -> (i32, i32) {
    %c0_i32 = arith.constant 0 : i32
    return %arg0, %arg1 : i32, i32
  }
}

module attributes {stable_mosaic.version = 11 : i64} {
  func.func @_mm_bn_kernel(%arg0: i32, %arg1: i32, %arg2: i32, %arg3: memref<8x256xbf16, #tpu.memory_space<vmem>>, %arg4: memref<256x256xbf16, #tpu.memory_space<vmem>>, %arg5: memref<1x256xf32, #tpu.memory_space<vmem>>, %arg6: memref<1x256xf32, #tpu.memory_space<vmem>>, %arg7: memref<8x256xf32, #tpu.memory_space<vmem>>, %arg8: memref<8x256xf32, #tpu.memory_space<vmem>>) attributes {dimension_semantics = [#tpu.dimension_semantics<parallel>, #tpu.dimension_semantics<parallel>, #tpu.dimension_semantics<arbitrary>], iteration_bounds = array<i64: 1, 2, 9>, scalar_prefetch = 0 : i64, scratch_operands = 1 : i64, tpu.core_type = #tpu.core_type<tc>, window_params = [{transform_indices = @transform_0, window_bounds = array<i64: 8, 256>}, {transform_indices = @transform_1, window_bounds = array<i64: 256, 256>}, {transform_indices = @transform_2, window_bounds = array<i64: 1, 256>}, {transform_indices = @transform_3, window_bounds = array<i64: 1, 256>}, {transform_indices = @transform_4, window_bounds = array<i64: 8, 256>}]} {
    %c0_i32 = arith.constant 0 : i32
    %0 = arith.cmpi eq, %arg2, %c0_i32 : i32
    %1 = arith.extui %0 : i1 to i32
    %c0_i32_0 = arith.constant 0 : i32
    %2 = arith.cmpi ne, %1, %c0_i32_0 : i32
    scf.if %2 {
      %cst_9 = arith.constant 0.000000e+00 : f32
      %12 = vector.broadcast %cst_9 : f32 to vector<8x256xf32>
      %c0_10 = arith.constant 0 : index
      %c0_11 = arith.constant 0 : index
      %13 = vector.load %arg8[%c0_10, %c0_11] : memref<8x256xf32, #tpu.memory_space<vmem>>, vector<8x256xf32>
      tpu.vector_store %arg8[%c0_10, %c0_11], %12 {strides = array<i32>} : memref<8x256xf32, #tpu.memory_space<vmem>>, vector<8x256xf32>,
    } else {
    }
    %c0 = arith.constant 0 : index
    %c0_1 = arith.constant 0 : index
    %3 = vector.load %arg8[%c0, %c0_1] : memref<8x256xf32, #tpu.memory_space<vmem>>, vector<8x256xf32>
    %c0_2 = arith.constant 0 : index
    %c0_3 = arith.constant 0 : index
    %4 = vector.load %arg3[%c0_2, %c0_3] : memref<8x256xbf16, #tpu.memory_space<vmem>>, vector<8x256xbf16>
    %c0_4 = arith.constant 0 : index
    %c0_5 = arith.constant 0 : index
    %5 = vector.load %arg4[%c0_4, %c0_5] : memref<256x256xbf16, #tpu.memory_space<vmem>>, vector<256x256xbf16>
    %cst = arith.constant dense<0.000000e+00> : vector<8x256xf32>
    %6 = tpu.matmul %4, %5, %cst {dimension_numbers = #tpu.dot_dimension_numbers<[1], [0], [0], [1], [0, 0, 1, 1], [], []>} : vector<8x256xbf16>, vector<256x256xbf16>, vector<8x256xf32> -> vector<8x256xf32>
    %7 = arith.addf %3, %6 : vector<8x256xf32>
    %c0_6 = arith.constant 0 : index
    %c0_7 = arith.constant 0 : index
    %8 = vector.load %arg8[%c0_6, %c0_7] : memref<8x256xf32, #tpu.memory_space<vmem>>, vector<8x256xf32>
    tpu.vector_store %arg8[%c0_6, %c0_7], %7 {strides = array<i32>} : memref<8x256xf32, #tpu.memory_space<vmem>>, vector<8x256xf32>,
    %c8_i32 = arith.constant 8 : i32
    %9 = arith.cmpi eq, %arg2, %c8_i32 : i32
    %10 = arith.extui %9 : i1 to i32
    %c0_i32_8 = arith.constant 0 : i32
    %11 = arith.cmpi ne, %10, %c0_i32_8 : i32
    scf.if %11 {
      %c0_9 = arith.constant 0 : index
      %c0_10 = arith.constant 0 : index
      %12 = vector.load %arg8[%c0_9, %c0_10] : memref<8x256xf32, #tpu.memory_space<vmem>>, vector<8x256xf32>
      %c0_11 = arith.constant 0 : index
      %c0_12 = arith.constant 0 : index
      %13 = vector.load %arg5[%c0_11, %c0_12] : memref<1x256xf32, #tpu.memory_space<vmem>>, vector<1x256xf32>
      %14 = vector.broadcast %13 : vector<1x256xf32> to vector<8x256xf32>
      %15 = arith.mulf %12, %14 : vector<8x256xf32>
      %c0_13 = arith.constant 0 : index
      %c0_14 = arith.constant 0 : index
      %16 = vector.load %arg6[%c0_13, %c0_14] : memref<1x256xf32, #tpu.memory_space<vmem>>, vector<1x256xf32>
      %17 = vector.broadcast %16 : vector<1x256xf32> to vector<8x256xf32>
      %18 = arith.addf %15, %17 : vector<8x256xf32>
      %cst_15 = arith.constant 0.000000e+00 : f32
      %19 = vector.broadcast %cst_15 : f32 to vector<8x256xf32>
      %20 = arith.maximumf %18, %19 : vector<8x256xf32>
      %c0_16 = arith.constant 0 : index
      %c0_17 = arith.constant 0 : index
      %21 = vector.load %arg7[%c0_16, %c0_17] : memref<8x256xf32, #tpu.memory_space<vmem>>, vector<8x256xf32>
      tpu.vector_store %arg7[%c0_16, %c0_17], %20 {strides = array<i32>} : memref<8x256xf32, #tpu.memory_space<vmem>>, vector<8x256xf32>,
    } else {
    }
    return
  }
  func.func @transform_0(%arg0: i32, %arg1: i32, %arg2: i32) -> (i32, i32) {
    %c0_i32 = arith.constant 0 : i32
    return %arg0, %arg2 : i32, i32
  }
  func.func @transform_1(%arg0: i32, %arg1: i32, %arg2: i32) -> (i32, i32) {
    %c0_i32 = arith.constant 0 : i32
    return %arg2, %arg1 : i32, i32
  }
  func.func @transform_2(%arg0: i32, %arg1: i32, %arg2: i32) -> (i32, i32) {
    %c0_i32 = arith.constant 0 : i32
    %c0_i32_0 = arith.constant 0 : i32
    return %c0_i32, %arg1 : i32, i32
  }
  func.func @transform_3(%arg0: i32, %arg1: i32, %arg2: i32) -> (i32, i32) {
    %c0_i32 = arith.constant 0 : i32
    %c0_i32_0 = arith.constant 0 : i32
    return %c0_i32, %arg1 : i32, i32
  }
  func.func @transform_4(%arg0: i32, %arg1: i32, %arg2: i32) -> (i32, i32) {
    %c0_i32 = arith.constant 0 : i32
    return %arg0, %arg1 : i32, i32
  }
}

module attributes {stable_mosaic.version = 11 : i64} {
  func.func @_mm_bn_kernel(%arg0: i32, %arg1: i32, %arg2: i32, %arg3: memref<8x256xbf16, #tpu.memory_space<vmem>>, %arg4: memref<256x256xbf16, #tpu.memory_space<vmem>>, %arg5: memref<1x256xf32, #tpu.memory_space<vmem>>, %arg6: memref<1x256xf32, #tpu.memory_space<vmem>>, %arg7: memref<8x256xf32, #tpu.memory_space<vmem>>, %arg8: memref<8x256xf32, #tpu.memory_space<vmem>>) attributes {dimension_semantics = [#tpu.dimension_semantics<parallel>, #tpu.dimension_semantics<parallel>, #tpu.dimension_semantics<arbitrary>], iteration_bounds = array<i64: 1, 2, 1>, scalar_prefetch = 0 : i64, scratch_operands = 1 : i64, tpu.core_type = #tpu.core_type<tc>, window_params = [{transform_indices = @transform_0, window_bounds = array<i64: 8, 256>}, {transform_indices = @transform_1, window_bounds = array<i64: 256, 256>}, {transform_indices = @transform_2, window_bounds = array<i64: 1, 256>}, {transform_indices = @transform_3, window_bounds = array<i64: 1, 256>}, {transform_indices = @transform_4, window_bounds = array<i64: 8, 256>}]} {
    %c0_i32 = arith.constant 0 : i32
    %0 = arith.cmpi eq, %arg2, %c0_i32 : i32
    %1 = arith.extui %0 : i1 to i32
    %c0_i32_0 = arith.constant 0 : i32
    %2 = arith.cmpi ne, %1, %c0_i32_0 : i32
    scf.if %2 {
      %cst_10 = arith.constant 0.000000e+00 : f32
      %12 = vector.broadcast %cst_10 : f32 to vector<8x256xf32>
      %c0_11 = arith.constant 0 : index
      %c0_12 = arith.constant 0 : index
      %13 = vector.load %arg8[%c0_11, %c0_12] : memref<8x256xf32, #tpu.memory_space<vmem>>, vector<8x256xf32>
      tpu.vector_store %arg8[%c0_11, %c0_12], %12 {strides = array<i32>} : memref<8x256xf32, #tpu.memory_space<vmem>>, vector<8x256xf32>,
    } else {
    }
    %c0 = arith.constant 0 : index
    %c0_1 = arith.constant 0 : index
    %3 = vector.load %arg8[%c0, %c0_1] : memref<8x256xf32, #tpu.memory_space<vmem>>, vector<8x256xf32>
    %c0_2 = arith.constant 0 : index
    %c0_3 = arith.constant 0 : index
    %4 = vector.load %arg3[%c0_2, %c0_3] : memref<8x256xbf16, #tpu.memory_space<vmem>>, vector<8x256xbf16>
    %c0_4 = arith.constant 0 : index
    %c0_5 = arith.constant 0 : index
    %5 = vector.load %arg4[%c0_4, %c0_5] : memref<256x256xbf16, #tpu.memory_space<vmem>>, vector<256x256xbf16>
    %cst = arith.constant dense<0.000000e+00> : vector<8x256xf32>
    %6 = tpu.matmul %4, %5, %cst {dimension_numbers = #tpu.dot_dimension_numbers<[1], [0], [0], [1], [0, 0, 1, 1], [], []>} : vector<8x256xbf16>, vector<256x256xbf16>, vector<8x256xf32> -> vector<8x256xf32>
    %7 = arith.addf %3, %6 : vector<8x256xf32>
    %c0_6 = arith.constant 0 : index
    %c0_7 = arith.constant 0 : index
    %8 = vector.load %arg8[%c0_6, %c0_7] : memref<8x256xf32, #tpu.memory_space<vmem>>, vector<8x256xf32>
    tpu.vector_store %arg8[%c0_6, %c0_7], %7 {strides = array<i32>} : memref<8x256xf32, #tpu.memory_space<vmem>>, vector<8x256xf32>,
    %c0_i32_8 = arith.constant 0 : i32
    %9 = arith.cmpi eq, %arg2, %c0_i32_8 : i32
    %10 = arith.extui %9 : i1 to i32
    %c0_i32_9 = arith.constant 0 : i32
    %11 = arith.cmpi ne, %10, %c0_i32_9 : i32
    scf.if %11 {
      %c0_10 = arith.constant 0 : index
      %c0_11 = arith.constant 0 : index
      %12 = vector.load %arg8[%c0_10, %c0_11] : memref<8x256xf32, #tpu.memory_space<vmem>>, vector<8x256xf32>
      %c0_12 = arith.constant 0 : index
      %c0_13 = arith.constant 0 : index
      %13 = vector.load %arg5[%c0_12, %c0_13] : memref<1x256xf32, #tpu.memory_space<vmem>>, vector<1x256xf32>
      %14 = vector.broadcast %13 : vector<1x256xf32> to vector<8x256xf32>
      %15 = arith.mulf %12, %14 : vector<8x256xf32>
      %c0_14 = arith.constant 0 : index
      %c0_15 = arith.constant 0 : index
      %16 = vector.load %arg6[%c0_14, %c0_15] : memref<1x256xf32, #tpu.memory_space<vmem>>, vector<1x256xf32>
      %17 = vector.broadcast %16 : vector<1x256xf32> to vector<8x256xf32>
      %18 = arith.addf %15, %17 : vector<8x256xf32>
      %c0_16 = arith.constant 0 : index
      %c0_17 = arith.constant 0 : index
      %19 = vector.load %arg7[%c0_16, %c0_17] : memref<8x256xf32, #tpu.memory_space<vmem>>, vector<8x256xf32>
      tpu.vector_store %arg7[%c0_16, %c0_17], %18 {strides = array<i32>} : memref<8x256xf32, #tpu.memory_space<vmem>>, vector<8x256xf32>,
    } else {
    }
    return
  }
  func.func @transform_0(%arg0: i32, %arg1: i32, %arg2: i32) -> (i32, i32) {
    %c0_i32 = arith.constant 0 : i32
    return %arg0, %arg2 : i32, i32
  }
  func.func @transform_1(%arg0: i32, %arg1: i32, %arg2: i32) -> (i32, i32) {
    %c0_i32 = arith.constant 0 : i32
    return %arg2, %arg1 : i32, i32
  }
  func.func @transform_2(%arg0: i32, %arg1: i32, %arg2: i32) -> (i32, i32) {
    %c0_i32 = arith.constant 0 : i32
    %c0_i32_0 = arith.constant 0 : i32
    return %c0_i32, %arg1 : i32, i32
  }
  func.func @transform_3(%arg0: i32, %arg1: i32, %arg2: i32) -> (i32, i32) {
    %c0_i32 = arith.constant 0 : i32
    %c0_i32_0 = arith.constant 0 : i32
    return %c0_i32, %arg1 : i32, i32
  }
  func.func @transform_4(%arg0: i32, %arg1: i32, %arg2: i32) -> (i32, i32) {
    %c0_i32 = arith.constant 0 : i32
    return %arg0, %arg1 : i32, i32
  }
}

module attributes {stable_mosaic.version = 11 : i64} {
  func.func @_mm_bn_res_kernel(%arg0: i32, %arg1: i32, %arg2: i32, %arg3: memref<8x256xbf16, #tpu.memory_space<vmem>>, %arg4: memref<256x256xbf16, #tpu.memory_space<vmem>>, %arg5: memref<1x256xf32, #tpu.memory_space<vmem>>, %arg6: memref<1x256xf32, #tpu.memory_space<vmem>>, %arg7: memref<8x256xf32, #tpu.memory_space<vmem>>, %arg8: memref<8x256xf32, #tpu.memory_space<vmem>>, %arg9: memref<8x256xf32, #tpu.memory_space<vmem>>) attributes {dimension_semantics = [#tpu.dimension_semantics<parallel>, #tpu.dimension_semantics<parallel>, #tpu.dimension_semantics<arbitrary>], iteration_bounds = array<i64: 1, 2, 18>, scalar_prefetch = 0 : i64, scratch_operands = 1 : i64, tpu.core_type = #tpu.core_type<tc>, window_params = [{transform_indices = @transform_0, window_bounds = array<i64: 8, 256>}, {transform_indices = @transform_1, window_bounds = array<i64: 256, 256>}, {transform_indices = @transform_2, window_bounds = array<i64: 1, 256>}, {transform_indices = @transform_3, window_bounds = array<i64: 1, 256>}, {transform_indices = @transform_4, window_bounds = array<i64: 8, 256>}, {transform_indices = @transform_5, window_bounds = array<i64: 8, 256>}]} {
    %c0_i32 = arith.constant 0 : i32
    %0 = arith.cmpi eq, %arg2, %c0_i32 : i32
    %1 = arith.extui %0 : i1 to i32
    %c0_i32_0 = arith.constant 0 : i32
    %2 = arith.cmpi ne, %1, %c0_i32_0 : i32
    scf.if %2 {
      %cst_9 = arith.constant 0.000000e+00 : f32
      %12 = vector.broadcast %cst_9 : f32 to vector<8x256xf32>
      %c0_10 = arith.constant 0 : index
      %c0_11 = arith.constant 0 : index
      %13 = vector.load %arg9[%c0_10, %c0_11] : memref<8x256xf32, #tpu.memory_space<vmem>>, vector<8x256xf32>
      tpu.vector_store %arg9[%c0_10, %c0_11], %12 {strides = array<i32>} : memref<8x256xf32, #tpu.memory_space<vmem>>, vector<8x256xf32>,
    } else {
    }
    %c0 = arith.constant 0 : index
    %c0_1 = arith.constant 0 : index
    %3 = vector.load %arg9[%c0, %c0_1] : memref<8x256xf32, #tpu.memory_space<vmem>>, vector<8x256xf32>
    %c0_2 = arith.constant 0 : index
    %c0_3 = arith.constant 0 : index
    %4 = vector.load %arg3[%c0_2, %c0_3] : memref<8x256xbf16, #tpu.memory_space<vmem>>, vector<8x256xbf16>
    %c0_4 = arith.constant 0 : index
    %c0_5 = arith.constant 0 : index
    %5 = vector.load %arg4[%c0_4, %c0_5] : memref<256x256xbf16, #tpu.memory_space<vmem>>, vector<256x256xbf16>
    %cst = arith.constant dense<0.000000e+00> : vector<8x256xf32>
    %6 = tpu.matmul %4, %5, %cst {dimension_numbers = #tpu.dot_dimension_numbers<[1], [0], [0], [1], [0, 0, 1, 1], [], []>} : vector<8x256xbf16>, vector<256x256xbf16>, vector<8x256xf32> -> vector<8x256xf32>
    %7 = arith.addf %3, %6 : vector<8x256xf32>
    %c0_6 = arith.constant 0 : index
    %c0_7 = arith.constant 0 : index
    %8 = vector.load %arg9[%c0_6, %c0_7] : memref<8x256xf32, #tpu.memory_space<vmem>>, vector<8x256xf32>
    tpu.vector_store %arg9[%c0_6, %c0_7], %7 {strides = array<i32>} : memref<8x256xf32, #tpu.memory_space<vmem>>, vector<8x256xf32>,
    %c17_i32 = arith.constant 17 : i32
    %9 = arith.cmpi eq, %arg2, %c17_i32 : i32
    %10 = arith.extui %9 : i1 to i32
    %c0_i32_8 = arith.constant 0 : i32
    %11 = arith.cmpi ne, %10, %c0_i32_8 : i32
    scf.if %11 {
      %c0_9 = arith.constant 0 : index
      %c0_10 = arith.constant 0 : index
      %12 = vector.load %arg9[%c0_9, %c0_10] : memref<8x256xf32, #tpu.memory_space<vmem>>, vector<8x256xf32>
      %c0_11 = arith.constant 0 : index
      %c0_12 = arith.constant 0 : index
      %13 = vector.load %arg5[%c0_11, %c0_12] : memref<1x256xf32, #tpu.memory_space<vmem>>, vector<1x256xf32>
      %14 = vector.broadcast %13 : vector<1x256xf32> to vector<8x256xf32>
      %15 = arith.mulf %12, %14 : vector<8x256xf32>
      %c0_13 = arith.constant 0 : index
      %c0_14 = arith.constant 0 : index
      %16 = vector.load %arg6[%c0_13, %c0_14] : memref<1x256xf32, #tpu.memory_space<vmem>>, vector<1x256xf32>
      %17 = vector.broadcast %16 : vector<1x256xf32> to vector<8x256xf32>
      %18 = arith.addf %15, %17 : vector<8x256xf32>
      %c0_15 = arith.constant 0 : index
      %c0_16 = arith.constant 0 : index
      %19 = vector.load %arg7[%c0_15, %c0_16] : memref<8x256xf32, #tpu.memory_space<vmem>>, vector<8x256xf32>
      %20 = arith.addf %18, %19 : vector<8x256xf32>
      %cst_17 = arith.constant 0.000000e+00 : f32
      %21 = vector.broadcast %cst_17 : f32 to vector<8x256xf32>
      %22 = arith.maximumf %20, %21 : vector<8x256xf32>
      %c0_18 = arith.constant 0 : index
      %c0_19 = arith.constant 0 : index
      %23 = vector.load %arg8[%c0_18, %c0_19] : memref<8x256xf32, #tpu.memory_space<vmem>>, vector<8x256xf32>
      tpu.vector_store %arg8[%c0_18, %c0_19], %22 {strides = array<i32>} : memref<8x256xf32, #tpu.memory_space<vmem>>, vector<8x256xf32>,
    } else {
    }
    return
  }
  func.func @transform_0(%arg0: i32, %arg1: i32, %arg2: i32) -> (i32, i32) {
    %c0_i32 = arith.constant 0 : i32
    return %arg0, %arg2 : i32, i32
  }
  func.func @transform_1(%arg0: i32, %arg1: i32, %arg2: i32) -> (i32, i32) {
    %c0_i32 = arith.constant 0 : i32
    return %arg2, %arg1 : i32, i32
  }
  func.func @transform_2(%arg0: i32, %arg1: i32, %arg2: i32) -> (i32, i32) {
    %c0_i32 = arith.constant 0 : i32
    %c0_i32_0 = arith.constant 0 : i32
    return %c0_i32, %arg1 : i32, i32
  }
  func.func @transform_3(%arg0: i32, %arg1: i32, %arg2: i32) -> (i32, i32) {
    %c0_i32 = arith.constant 0 : i32
    %c0_i32_0 = arith.constant 0 : i32
    return %c0_i32, %arg1 : i32, i32
  }
  func.func @transform_4(%arg0: i32, %arg1: i32, %arg2: i32) -> (i32, i32) {
    %c0_i32 = arith.constant 0 : i32
    return %arg0, %arg1 : i32, i32
  }
  func.func @transform_5(%arg0: i32, %arg1: i32, %arg2: i32) -> (i32, i32) {
    %c0_i32 = arith.constant 0 : i32
    return %arg0, %arg1 : i32, i32
  }
}

module attributes {stable_mosaic.version = 11 : i64} {
  func.func @_mm_bn_kernel(%arg0: i32, %arg1: i32, %arg2: i32, %arg3: memref<8x256xbf16, #tpu.memory_space<vmem>>, %arg4: memref<256x256xbf16, #tpu.memory_space<vmem>>, %arg5: memref<1x256xf32, #tpu.memory_space<vmem>>, %arg6: memref<1x256xf32, #tpu.memory_space<vmem>>, %arg7: memref<8x256xf32, #tpu.memory_space<vmem>>, %arg8: memref<8x256xf32, #tpu.memory_space<vmem>>) attributes {dimension_semantics = [#tpu.dimension_semantics<parallel>, #tpu.dimension_semantics<parallel>, #tpu.dimension_semantics<arbitrary>], iteration_bounds = array<i64: 1, 2, 18>, scalar_prefetch = 0 : i64, scratch_operands = 1 : i64, tpu.core_type = #tpu.core_type<tc>, window_params = [{transform_indices = @transform_0, window_bounds = array<i64: 8, 256>}, {transform_indices = @transform_1, window_bounds = array<i64: 256, 256>}, {transform_indices = @transform_2, window_bounds = array<i64: 1, 256>}, {transform_indices = @transform_3, window_bounds = array<i64: 1, 256>}, {transform_indices = @transform_4, window_bounds = array<i64: 8, 256>}]} {
    %c0_i32 = arith.constant 0 : i32
    %0 = arith.cmpi eq, %arg2, %c0_i32 : i32
    %1 = arith.extui %0 : i1 to i32
    %c0_i32_0 = arith.constant 0 : i32
    %2 = arith.cmpi ne, %1, %c0_i32_0 : i32
    scf.if %2 {
      %cst_9 = arith.constant 0.000000e+00 : f32
      %12 = vector.broadcast %cst_9 : f32 to vector<8x256xf32>
      %c0_10 = arith.constant 0 : index
      %c0_11 = arith.constant 0 : index
      %13 = vector.load %arg8[%c0_10, %c0_11] : memref<8x256xf32, #tpu.memory_space<vmem>>, vector<8x256xf32>
      tpu.vector_store %arg8[%c0_10, %c0_11], %12 {strides = array<i32>} : memref<8x256xf32, #tpu.memory_space<vmem>>, vector<8x256xf32>,
    } else {
    }
    %c0 = arith.constant 0 : index
    %c0_1 = arith.constant 0 : index
    %3 = vector.load %arg8[%c0, %c0_1] : memref<8x256xf32, #tpu.memory_space<vmem>>, vector<8x256xf32>
    %c0_2 = arith.constant 0 : index
    %c0_3 = arith.constant 0 : index
    %4 = vector.load %arg3[%c0_2, %c0_3] : memref<8x256xbf16, #tpu.memory_space<vmem>>, vector<8x256xbf16>
    %c0_4 = arith.constant 0 : index
    %c0_5 = arith.constant 0 : index
    %5 = vector.load %arg4[%c0_4, %c0_5] : memref<256x256xbf16, #tpu.memory_space<vmem>>, vector<256x256xbf16>
    %cst = arith.constant dense<0.000000e+00> : vector<8x256xf32>
    %6 = tpu.matmul %4, %5, %cst {dimension_numbers = #tpu.dot_dimension_numbers<[1], [0], [0], [1], [0, 0, 1, 1], [], []>} : vector<8x256xbf16>, vector<256x256xbf16>, vector<8x256xf32> -> vector<8x256xf32>
    %7 = arith.addf %3, %6 : vector<8x256xf32>
    %c0_6 = arith.constant 0 : index
    %c0_7 = arith.constant 0 : index
    %8 = vector.load %arg8[%c0_6, %c0_7] : memref<8x256xf32, #tpu.memory_space<vmem>>, vector<8x256xf32>
    tpu.vector_store %arg8[%c0_6, %c0_7], %7 {strides = array<i32>} : memref<8x256xf32, #tpu.memory_space<vmem>>, vector<8x256xf32>,
    %c17_i32 = arith.constant 17 : i32
    %9 = arith.cmpi eq, %arg2, %c17_i32 : i32
    %10 = arith.extui %9 : i1 to i32
    %c0_i32_8 = arith.constant 0 : i32
    %11 = arith.cmpi ne, %10, %c0_i32_8 : i32
    scf.if %11 {
      %c0_9 = arith.constant 0 : index
      %c0_10 = arith.constant 0 : index
      %12 = vector.load %arg8[%c0_9, %c0_10] : memref<8x256xf32, #tpu.memory_space<vmem>>, vector<8x256xf32>
      %c0_11 = arith.constant 0 : index
      %c0_12 = arith.constant 0 : index
      %13 = vector.load %arg5[%c0_11, %c0_12] : memref<1x256xf32, #tpu.memory_space<vmem>>, vector<1x256xf32>
      %14 = vector.broadcast %13 : vector<1x256xf32> to vector<8x256xf32>
      %15 = arith.mulf %12, %14 : vector<8x256xf32>
      %c0_13 = arith.constant 0 : index
      %c0_14 = arith.constant 0 : index
      %16 = vector.load %arg6[%c0_13, %c0_14] : memref<1x256xf32, #tpu.memory_space<vmem>>, vector<1x256xf32>
      %17 = vector.broadcast %16 : vector<1x256xf32> to vector<8x256xf32>
      %18 = arith.addf %15, %17 : vector<8x256xf32>
      %cst_15 = arith.constant 0.000000e+00 : f32
      %19 = vector.broadcast %cst_15 : f32 to vector<8x256xf32>
      %20 = arith.maximumf %18, %19 : vector<8x256xf32>
      %c0_16 = arith.constant 0 : index
      %c0_17 = arith.constant 0 : index
      %21 = vector.load %arg7[%c0_16, %c0_17] : memref<8x256xf32, #tpu.memory_space<vmem>>, vector<8x256xf32>
      tpu.vector_store %arg7[%c0_16, %c0_17], %20 {strides = array<i32>} : memref<8x256xf32, #tpu.memory_space<vmem>>, vector<8x256xf32>,
    } else {
    }
    return
  }
  func.func @transform_0(%arg0: i32, %arg1: i32, %arg2: i32) -> (i32, i32) {
    %c0_i32 = arith.constant 0 : i32
    return %arg0, %arg2 : i32, i32
  }
  func.func @transform_1(%arg0: i32, %arg1: i32, %arg2: i32) -> (i32, i32) {
    %c0_i32 = arith.constant 0 : i32
    return %arg2, %arg1 : i32, i32
  }
  func.func @transform_2(%arg0: i32, %arg1: i32, %arg2: i32) -> (i32, i32) {
    %c0_i32 = arith.constant 0 : i32
    %c0_i32_0 = arith.constant 0 : i32
    return %c0_i32, %arg1 : i32, i32
  }
  func.func @transform_3(%arg0: i32, %arg1: i32, %arg2: i32) -> (i32, i32) {
    %c0_i32 = arith.constant 0 : i32
    %c0_i32_0 = arith.constant 0 : i32
    return %c0_i32, %arg1 : i32, i32
  }
  func.func @transform_4(%arg0: i32, %arg1: i32, %arg2: i32) -> (i32, i32) {
    %c0_i32 = arith.constant 0 : i32
    return %arg0, %arg1 : i32, i32
  }
}

module attributes {stable_mosaic.version = 11 : i64} {
  func.func @_tail_kernel(%arg0: memref<8x1x512xf32, #tpu.memory_space<vmem>>, %arg1: memref<512x128xbf16, #tpu.memory_space<vmem>>, %arg2: memref<1x128xf32, #tpu.memory_space<vmem>>, %arg3: memref<8x128xf32, #tpu.memory_space<vmem>>) attributes {dimension_semantics = [], scalar_prefetch = 0 : i64, scratch_operands = 0 : i64, tpu.core_type = #tpu.core_type<tc>} {
    %c0 = arith.constant 0 : index
    %c0_0 = arith.constant 0 : index
    %c0_1 = arith.constant 0 : index
    %0 = vector.load %arg0[%c0, %c0_0, %c0_1] : memref<8x1x512xf32, #tpu.memory_space<vmem>>, vector<8x1x512xf32>
    %cst = arith.constant dense<0.000000e+00> : vector<8x512xf32>
    %1 = vector.multi_reduction <add>, %0, %cst [1] : vector<8x1x512xf32> to vector<8x512xf32>
    %cst_2 = arith.constant 1.000000e+00 : f32
    %2 = vector.broadcast %cst_2 : f32 to vector<8x512xf32>
    %3 = arith.mulf %1, %2 : vector<8x512xf32>
    %4 = arith.truncf %3 : vector<8x512xf32> to vector<8x512xbf16>
    %c0_3 = arith.constant 0 : index
    %c0_4 = arith.constant 0 : index
    %5 = vector.load %arg1[%c0_3, %c0_4] : memref<512x128xbf16, #tpu.memory_space<vmem>>, vector<512x128xbf16>
    %cst_5 = arith.constant dense<0.000000e+00> : vector<8x128xf32>
    %6 = tpu.matmul %4, %5, %cst_5 {dimension_numbers = #tpu.dot_dimension_numbers<[1], [0], [0], [1], [0, 0, 1, 1], [], []>} : vector<8x512xbf16>, vector<512x128xbf16>, vector<8x128xf32> -> vector<8x128xf32>
    %c0_6 = arith.constant 0 : index
    %c0_7 = arith.constant 0 : index
    %7 = vector.load %arg2[%c0_6, %c0_7] : memref<1x128xf32, #tpu.memory_space<vmem>>, vector<1x128xf32>
    %8 = vector.broadcast %7 : vector<1x128xf32> to vector<8x128xf32>
    %9 = arith.addf %6, %8 : vector<8x128xf32>
    %c0_8 = arith.constant 0 : index
    %c0_9 = arith.constant 0 : index
    %10 = vector.load %arg3[%c0_8, %c0_9] : memref<8x128xf32, #tpu.memory_space<vmem>>, vector<8x128xf32>
    tpu.vector_store %arg3[%c0_8, %c0_9], %9 {strides = array<i32>} : memref<8x128xf32, #tpu.memory_space<vmem>>, vector<8x128xf32>,
    return
  }
}

</mosaic_0001>

<bundles_post_ra>
// kernel: pretrained_model_forward.22
= control target key start
LH: loop header
LB: loop body
LE: loop exit
PB: predicated region body
PF: predicated region fallthrough
CT: control target
= control target key end

     0   :  { %s1556_s15 = smov 0   ;;  %s1558_s16 = smov 0   ;;  %s1786_s0 = inlined_call_operand.vmem [shape: bf16[512,256], index: 0, kind: input, shape index: {}]   ;;  %s1787_s1 = inlined_call_operand.vmem [shape: bf16[256,128], index: 1, kind: input, shape index: {}]   ;;  %s1788_s2 = inlined_call_operand.vmem [shape: f32[1,128], index: 2, kind: input, shape index: {}]   ;;  %s1789_s3 = inlined_call_operand.vmem [shape: f32[1,128], index: 3, kind: input, shape index: {}]   ;;  %s1790_s4 = inlined_call_operand.vmem [shape: f32[512,128], index: 4, kind: output, shape index: {}]  }
   0x1   :  { %s1560_s17 = smov 0  }
   0x2 LB: > { %s33_s18 = sadd.s32 1, %s1525_s16  ;;  %p1232_p0 = scmp.ge.s32.totalorder %s1529_s17, 1  ;;  %s1529_s17 = sphi %s1560_s17, %s14_s17   ;;  %s1525_s16 = sphi %s1558_s16, %s1792_s16   ;;  %s1521_s15 = sphi %s1556_s15, %s1791_s15  }
   0x3   : > { %p35_p1 = scmp.ge.s32.totalorder %s33_s18, 2  ;;  %p224_p2 = scmp.lt.s32.totalorder %s1529_s17, 3 }
   0x5   : > { %s1794_s18 = smov (%p35_p1, %s33_s18), 0  ;;  %p225_p3 = pnand %p1232_p0, %p224_p2 }
   0x6   : > { %v1443_v0 = vld [vmem:[%s1787_s1 + $0x40] sm:$0xff] (!%p225_p3)   ;;  %s1233_s21 = sshll.u32 (!%p225_p3), %s1521_s15, 5  ;;  %v1445_v2 = vld [vmem:[%s1787_s1 + $0x48] sm:$0xff] (!%p225_p3)   ;;  %v1447_v4 = vld [vmem:[%s1787_s1 + $0x50] sm:$0xff] (!%p225_p3)  }
   0x7   : > { %228 = sbr.rel (%p225_p3) target bundleno = 320 (0x140), region = 36  ;;  %v1444_v1 = vld [vmem:[%s1787_s1] sm:$0xff] (!%p225_p3)   ;;  %1291 = vmatprep.subr.bf16.mxu0 (!%p225_p3), %v1443_v0  ;;  %1403 = vmatprep.subr.bf16.mxu1 (!%p225_p3), %v1443_v0  ;;  %v1446_v3 = vld [vmem:[%s1787_s1 + $0x8] sm:$0xff] (!%p225_p3)   ;;  %p274_p4 = scmp.lt.s32.totalorder (!%p225_p3), %s1233_s21, 63  ;;  %v1448_v5 = vld [vmem:[%s1787_s1 + $0x10] sm:$0xff] (!%p225_p3)  }
   0x8   : > { %1292 = vmatpush3.bf16.msra.mxu0 (!%p225_p3), %v1444_v1  ;;  %1411 = vmatpush3.bf16.msra.mxu1 (!%p225_p3), %v1444_v1  ;;  %v1449_v6 = vld [vmem:[%s1787_s1 + $0x58] sm:$0xff] (!%p225_p3)   ;;  %v1451_v8 = vld [vmem:[%s1787_s1 + $0x60] sm:$0xff] (!%p225_p3)   ;;  %v1453_v10 = vld [vmem:[%s1787_s1 + $0x68] sm:$0xff] (!%p225_p3)  }
   0x9   : > { %1293 = vmatprep.subr.bf16.mxu0 (!%p225_p3), %v1445_v2  ;;  %1404 = vmatprep.subr.bf16.mxu1 (!%p225_p3), %v1445_v2  ;;  %v1450_v7 = vld [vmem:[%s1787_s1 + $0x18] sm:$0xff] (!%p225_p3)   ;;  %v1452_v9 = vld [vmem:[%s1787_s1 + $0x20] sm:$0xff] (!%p225_p3)   ;;  %v1454_v13 = vld [vmem:[%s1787_s1 + $0x28] sm:$0xff] (!%p225_p3)  }
   0xa   : > { %v1455_v14 = vld [vmem:[%s1787_s1 + $0x70] sm:$0xff] (!%p225_p3)   ;;  %v1457_v16 = vld [vmem:[%s1787_s1 + $0x78] sm:$0xff] (!%p225_p3)   ;;  %v1667_v51 = vld [vmem:[%s1788_s2] ss:$0 sm:$0xff] (!%p225_p3) }
   0xb   : > { %v1456_v15 = vld [vmem:[%s1787_s1 + $0x30] sm:$0xff] (!%p225_p3)   ;;  %v1458_v17 = vld [vmem:[%s1787_s1 + $0x38] sm:$0xff] (!%p225_p3)   ;;  %v1672_v57 = vld [vmem:[%s1789_s3] ss:$0 sm:$0xff] (!%p225_p3) }
   0xc   : > { %1294 = vmatpush3.bf16.msra.mxu0 (!%p225_p3), %v1446_v3  ;;  %1412 = vmatpush3.bf16.msra.mxu1 (!%p225_p3), %v1446_v3 }
   0xd   : > { %1295 = vmatprep.subr.bf16.mxu0 (!%p225_p3), %v1447_v4  ;;  %1405 = vmatprep.subr.bf16.mxu1 (!%p225_p3), %v1447_v4 }
   0xe   : > { %s1796_s21 = smov (!%p274_p4, %s1233_s21), 63 }
   0xf   : > { %s1290_s10 = sshll.u32 %s1796_s21, 3 }
  0x10   : > { %1296 = vmatpush3.bf16.msra.mxu0 %v1448_v5  ;;  %1413 = vmatpush3.bf16.msra.mxu1 %v1448_v5  ;;  %s1609_s15 = scalar_lea.vmem %s1786_s0, %s1290_s10 }
  0x11   : > { %1297 = vmatprep.subr.bf16.mxu0 %v1449_v6  ;;  %1406 = vmatprep.subr.bf16.mxu1 %v1449_v6  ;;  %v1461_v11 = vld [vmem:[%s1609_s15 + $0x4] ss:$8 sps:$4 sm:$0xff]   ;;  %v1459_v18 = vld [vmem:[%s1609_s15] ss:$8 sps:$4 sm:$0xff]   ;;  %v1465_v20 = vld [vmem:[%s1609_s15 + $0x14] ss:$8 sps:$4 sm:$0xff]  }
  0x12   : > { %v1464_v12 = vld [vmem:[%s1609_s15 + $0x84] ss:$8 sps:$4 sm:$0xff]   ;;  %729 = vmatprep.mubr.bf16.mxu0 %v1461_v11  ;;  %v1462_v19 = vld [vmem:[%s1609_s15 + $0x80] ss:$8 sps:$4 sm:$0xff]   ;;  %v1467_v21 = vld [vmem:[%s1609_s15 + $0x94] ss:$8 sps:$4 sm:$0xff]  }
  0x13   : > { %793 = vmatprep.mubr.bf16.mxu1 %v1464_v12  ;;  %v1469_v22 = vld [vmem:[%s1609_s15 + $0x10] ss:$8 sps:$4 sm:$0xff]   ;;  %v1471_v24 = vld [vmem:[%s1609_s15 + $0x24] ss:$8 sps:$4 sm:$0xff]   ;;  %v1475_v26 = vld [vmem:[%s1609_s15 + $0x20] ss:$8 sps:$4 sm:$0xff]  }
  0x14   : > { %1298 = vmatpush3.bf16.msra.mxu0 %v1450_v7  ;;  %1414 = vmatpush3.bf16.msra.mxu1 %v1450_v7  ;;  %v1470_v23 = vld [vmem:[%s1609_s15 + $0x90] ss:$8 sps:$4 sm:$0xff]   ;;  %v1473_v25 = vld [vmem:[%s1609_s15 + $0xa4] ss:$8 sps:$4 sm:$0xff]   ;;  %v1476_v27 = vld [vmem:[%s1609_s15 + $0xa0] ss:$8 sps:$4 sm:$0xff]  }
  0x15   : > { %1299 = vmatprep.subr.bf16.mxu0 %v1451_v8  ;;  %1407 = vmatprep.subr.bf16.mxu1 %v1451_v8  ;;  %v1477_v28 = vld [vmem:[%s1609_s15 + $0x34] ss:$8 sps:$4 sm:$0xff]   ;;  %v1481_v30 = vld [vmem:[%s1609_s15 + $0x30] ss:$8 sps:$4 sm:$0xff]   ;;  %v1483_v32 = vld [vmem:[%s1609_s15 + $0x44] ss:$8 sps:$4 sm:$0xff]  }
  0x16   : > { %v1479_v29 = vld [vmem:[%s1609_s15 + $0xb4] ss:$8 sps:$4 sm:$0xff]   ;;  %v1482_v31 = vld [vmem:[%s1609_s15 + $0xb0] ss:$8 sps:$4 sm:$0xff]   ;;  %v1485_v33 = vld [vmem:[%s1609_s15 + $0xc4] ss:$8 sps:$4 sm:$0xff]  }
  0x17   : > { %v1487_v34 = vld [vmem:[%s1609_s15 + $0x40] ss:$8 sps:$4 sm:$0xff]   ;;  %v1489_v36 = vld [vmem:[%s1609_s15 + $0x54] ss:$8 sps:$4 sm:$0xff]   ;;  %v1493_v38 = vld [vmem:[%s1609_s15 + $0x50] ss:$8 sps:$4 sm:$0xff]  }
  0x18   : > { %1300 = vmatpush3.bf16.msra.mxu0 %v1452_v9  ;;  %1415 = vmatpush3.bf16.msra.mxu1 %v1452_v9  ;;  %v1488_v35 = vld [vmem:[%s1609_s15 + $0xc0] ss:$8 sps:$4 sm:$0xff]   ;;  %v1491_v37 = vld [vmem:[%s1609_s15 + $0xd4] ss:$8 sps:$4 sm:$0xff]   ;;  %v1494_v39 = vld [vmem:[%s1609_s15 + $0xd0] ss:$8 sps:$4 sm:$0xff]  }
  0x19   : > { %1301 = vmatprep.subr.bf16.mxu0 %v1453_v10  ;;  %1408 = vmatprep.subr.bf16.mxu1 %v1453_v10  ;;  %v1495_v40 = vld [vmem:[%s1609_s15 + $0x64] ss:$8 sps:$4 sm:$0xff]   ;;  %v1499_v42 = vld [vmem:[%s1609_s15 + $0x60] ss:$8 sps:$4 sm:$0xff]   ;;  %v1501_v44 = vld [vmem:[%s1609_s15 + $0x74] ss:$8 sps:$4 sm:$0xff]  }
  0x1a   : > { %v1497_v41 = vld [vmem:[%s1609_s15 + $0xe4] ss:$8 sps:$4 sm:$0xff]   ;;  %v1500_v43 = vld [vmem:[%s1609_s15 + $0xe0] ss:$8 sps:$4 sm:$0xff]   ;;  %v1503_v45 = vld [vmem:[%s1609_s15 + $0xf4] ss:$8 sps:$4 sm:$0xff]  }
  0x1b   : > { %v1505_v46 = vld [vmem:[%s1609_s15 + $0x70] ss:$8 sps:$4 sm:$0xff]  }
  0x1c   : > { %1302 = vmatpush3.bf16.msra.mxu0 %v1454_v13  ;;  %1416 = vmatpush3.bf16.msra.mxu1 %v1454_v13  ;;  %v1506_v47 = vld [vmem:[%s1609_s15 + $0xf0] ss:$8 sps:$4 sm:$0xff]   ;;  %s1685_s15 = scalar_lea.vmem %s1790_s4, %s1290_s10 }
  0x1d   : > { %1303 = vmatprep.subr.bf16.mxu0 %v1455_v14  ;;  %1409 = vmatprep.subr.bf16.mxu1 %v1455_v14 }
  0x20   : > { %1304 = vmatpush3.bf16.msra.mxu0 %v1456_v15  ;;  %1417 = vmatpush3.bf16.msra.mxu1 %v1456_v15 }
  0x21   : > { %1305 = vmatprep.subr.bf16.mxu0 %v1457_v16  ;;  %1410 = vmatprep.subr.bf16.mxu1 %v1457_v16 }
  0x24   : > { %1306 = vmatpush3.bf16.msra.mxu0 %v1458_v17  ;;  %1418 = vmatpush3.bf16.msra.mxu1 %v1458_v17 }
  0x27   : > { %730 = vmatmul.mubr.bf16.vlgmr.msra.gmra.mrb[0].mxu0 %v1459_v18  ;;  %794 = vmatmul.mubr.bf16.vlgmr.msra.gmra.mrb[0].mxu1 %v1462_v19 }
  0x28   : > { %737 = vmatprep.mubr.bf16.mxu0 %v1465_v20  ;;  %801 = vmatprep.mubr.bf16.mxu1 %v1467_v21 }
  0x2f   : > { %738 = vmatmul.mubr.bf16.gmra.mrb[4].mxu0 %v1469_v22  ;;  %802 = vmatmul.mubr.bf16.gmra.mrb[4].mxu1 %v1470_v23 }
  0x30   : > { %745 = vmatprep.mubr.bf16.mxu0 %v1471_v24  ;;  %809 = vmatprep.mubr.bf16.mxu1 %v1473_v25 }
  0x37   : > { %746 = vmatmul.mubr.bf16.gmra.mrb[8].mxu0 %v1475_v26  ;;  %810 = vmatmul.mubr.bf16.gmra.mrb[8].mxu1 %v1476_v27 }
  0x38   : > { %753 = vmatprep.mubr.bf16.mxu0 %v1477_v28  ;;  %817 = vmatprep.mubr.bf16.mxu1 %v1479_v29 }
  0x3f   : > { %754 = vmatmul.mubr.bf16.gmra.mrb[12].mxu0 %v1481_v30  ;;  %818 = vmatmul.mubr.bf16.gmra.mrb[12].mxu1 %v1482_v31 }
  0x40   : > { %761 = vmatprep.mubr.bf16.mxu0 %v1483_v32  ;;  %825 = vmatprep.mubr.bf16.mxu1 %v1485_v33 }
  0x47   : > { %762 = vmatmul.mubr.bf16.gmra.mrb[16].mxu0 %v1487_v34  ;;  %826 = vmatmul.mubr.bf16.gmra.mrb[16].mxu1 %v1488_v35 }
  0x48   : > { %769 = vmatprep.mubr.bf16.mxu0 %v1489_v36  ;;  %833 = vmatprep.mubr.bf16.mxu1 %v1491_v37 }
  0x4f   : > { %770 = vmatmul.mubr.bf16.gmra.mrb[20].mxu0 %v1493_v38  ;;  %834 = vmatmul.mubr.bf16.gmra.mrb[20].mxu1 %v1494_v39 }
  0x50   : > { %777 = vmatprep.mubr.bf16.mxu0 %v1495_v40  ;;  %841 = vmatprep.mubr.bf16.mxu1 %v1497_v41 }
  0x57   : > { %778 = vmatmul.mubr.bf16.gmra.mrb[24].mxu0 %v1499_v42  ;;  %842 = vmatmul.mubr.bf16.gmra.mrb[24].mxu1 %v1500_v43 }
  0x58   : > { %785 = vmatprep.mubr.bf16.mxu0 %v1501_v44  ;;  %849 = vmatprep.mubr.bf16.mxu1 %v1503_v45 }
  0x5f   : > { %786 = vmatmul.mubr.bf16.gmra.mrb[28].mxu0 %v1505_v46  ;;  %850 = vmatmul.mubr.bf16.gmra.mrb[28].mxu1 %v1506_v47 }
  0xfa   : > { %v1307_v48 = vpop.f32.mrb[0].mxu0  ;;  %v1355_v49 = vpop.f32.mrb[0].mxu1 }
  0xfb   : > { %v1308_v50 = vpop.f32.mrb[1].mxu0  ;;  %v1356_v52 = vpop.f32.mrb[1].mxu1 }
  0xfc   : > { %v1309_v53 = vadd.f32 %v1308_v50, %v1307_v48  ;;  %v1357_v54 = vadd.f32 %v1356_v52, %v1355_v49  ;;  %v1310_v55 = vpop.f32.mrb[2].mxu0  ;;  %v1358_v56 = vpop.f32.mrb[2].mxu1 }
  0xfd   : > { %v1311_v58 = vpop.f32.mrb[3].mxu0  ;;  %v1359_v59 = vpop.f32.mrb[3].mxu1 }
  0xfe   : > { %v964_v60 = vmul.f32 %v1309_v53, %v1667_v51  ;;  %v980_v61 = vmul.f32 %v1357_v54, %v1667_v51  ;;  %v1312_v62 = vadd.f32 %v1311_v58, %v1310_v55  ;;  %v1360_v63 = vadd.f32 %v1359_v59, %v1358_v56 }
 0x100   : > { %v1003_v0 = vadd.f32 %v1672_v57, %v964_v60  ;;  %v1019_v1 = vadd.f32 %v1672_v57, %v980_v61  ;;  %v965_v2 = vmul.f32 %v1312_v62, %v1667_v51  ;;  %v981_v3 = vmul.f32 %v1360_v63, %v1667_v51 }
 0x102   : > { %v1035_v4 = vmax.f32 %v1003_v0, 0.0  ;;  %v1051_v5 = vmax.f32 %v1019_v1, 0.0  ;;  %v1004_v6 = vadd.f32 %v1672_v57, %v965_v2  ;;  %v1020_v7 = vadd.f32 %v1672_v57, %v981_v3  ;;  %v1313_v8 = vpop.f32.mrb[4].mxu0  ;;  %v1361_v9 = vpop.f32.mrb[4].mxu1 }
 0x103   : > { %v1314_v10 = vpop.f32.mrb[5].mxu0  ;;  %v1362_v11 = vpop.f32.mrb[5].mxu1 }
 0x104   : > { %1067 = vst [vmem:[%s1685_s15] sm:$0xff] %v1035_v4  ;;  %1083 = vst [vmem:[%s1685_s15 + $0x80] sm:$0xff] %v1051_v5  ;;  %v1036_v12 = vmax.f32 %v1004_v6, 0.0  ;;  %v1052_v13 = vmax.f32 %v1020_v7, 0.0  ;;  %v1315_v14 = vadd.f32 %v1314_v10, %v1313_v8  ;;  %v1363_v15 = vadd.f32 %v1362_v11, %v1361_v9  ;;  %v1316_v16 = vpop.f32.mrb[6].mxu0  ;;  %v1364_v17 = vpop.f32.mrb[6].mxu1 }
 0x105   : > { %v1317_v18 = vpop.f32.mrb[7].mxu0  ;;  %v1365_v19 = vpop.f32.mrb[7].mxu1 }
 0x106   : > { %1068 = vst [vmem:[%s1685_s15 + $0x8] sm:$0xff] %v1036_v12  ;;  %1084 = vst [vmem:[%s1685_s15 + $0x88] sm:$0xff] %v1052_v13  ;;  %v966_v20 = vmul.f32 %v1315_v14, %v1667_v51  ;;  %v982_v21 = vmul.f32 %v1363_v15, %v1667_v51  ;;  %v1318_v22 = vadd.f32 %v1317_v18, %v1316_v16 }
 0x107   : > { %v1366_v23 = vadd.f32 %v1365_v19, %v1364_v17 }
 0x108   : > { %v1005_v24 = vadd.f32 %v1672_v57, %v966_v20  ;;  %v1021_v25 = vadd.f32 %v1672_v57, %v982_v21  ;;  %v967_v26 = vmul.f32 %v1318_v22, %v1667_v51 }
 0x109   : > { %v983_v27 = vmul.f32 %v1366_v23, %v1667_v51 }
 0x10a   : > { %v1037_v28 = vmax.f32 %v1005_v24, 0.0  ;;  %v1053_v29 = vmax.f32 %v1021_v25, 0.0  ;;  %v1006_v30 = vadd.f32 %v1672_v57, %v967_v26  ;;  %v1319_v32 = vpop.f32.mrb[8].mxu0  ;;  %v1367_v33 = vpop.f32.mrb[8].mxu1 }
 0x10b   : > { %v1022_v31 = vadd.f32 %v1672_v57, %v983_v27  ;;  %v1320_v34 = vpop.f32.mrb[9].mxu0  ;;  %v1368_v35 = vpop.f32.mrb[9].mxu1 }
 0x10c   : > { %1069 = vst [vmem:[%s1685_s15 + $0x10] sm:$0xff] %v1037_v28  ;;  %1085 = vst [vmem:[%s1685_s15 + $0x90] sm:$0xff] %v1053_v29  ;;  %v1038_v36 = vmax.f32 %v1006_v30, 0.0  ;;  %v1321_v38 = vadd.f32 %v1320_v34, %v1319_v32  ;;  %v1369_v39 = vadd.f32 %v1368_v35, %v1367_v33  ;;  %v1322_v40 = vpop.f32.mrb[10].mxu0  ;;  %v1370_v41 = vpop.f32.mrb[10].mxu1 }
 0x10d   : > { %v1054_v37 = vmax.f32 %v1022_v31, 0.0  ;;  %v1323_v42 = vpop.f32.mrb[11].mxu0  ;;  %v1371_v43 = vpop.f32.mrb[11].mxu1 }
 0x10e   : > { %1070 = vst [vmem:[%s1685_s15 + $0x18] sm:$0xff] %v1038_v36  ;;  %v968_v44 = vmul.f32 %v1321_v38, %v1667_v51  ;;  %v984_v45 = vmul.f32 %v1369_v39, %v1667_v51  ;;  %v1324_v46 = vadd.f32 %v1323_v42, %v1322_v40  ;;  %v1372_v47 = vadd.f32 %v1371_v43, %v1370_v41 }
 0x10f   : > { %1086 = vst [vmem:[%s1685_s15 + $0x98] sm:$0xff] %v1054_v37 }
 0x110   : > { %v1007_v48 = vadd.f32 %v1672_v57, %v968_v44  ;;  %v1023_v49 = vadd.f32 %v1672_v57, %v984_v45  ;;  %v969_v50 = vmul.f32 %v1324_v46, %v1667_v51  ;;  %v985_v52 = vmul.f32 %v1372_v47, %v1667_v51 }
 0x112   : > { %v1039_v53 = vmax.f32 %v1007_v48, 0.0  ;;  %v1055_v54 = vmax.f32 %v1023_v49, 0.0  ;;  %v1008_v55 = vadd.f32 %v1672_v57, %v969_v50  ;;  %v1024_v56 = vadd.f32 %v1672_v57, %v985_v52  ;;  %v1325_v58 = vpop.f32.mrb[12].mxu0  ;;  %v1373_v59 = vpop.f32.mrb[12].mxu1 }
 0x113   : > { %v1326_v60 = vpop.f32.mrb[13].mxu0  ;;  %v1374_v61 = vpop.f32.mrb[13].mxu1 }
 0x114   : > { %1071 = vst [vmem:[%s1685_s15 + $0x20] sm:$0xff] %v1039_v53  ;;  %1087 = vst [vmem:[%s1685_s15 + $0xa0] sm:$0xff] %v1055_v54  ;;  %v1040_v62 = vmax.f32 %v1008_v55, 0.0  ;;  %v1056_v63 = vmax.f32 %v1024_v56, 0.0  ;;  %v1327_v0 = vadd.f32 %v1326_v60, %v1325_v58  ;;  %v1375_v1 = vadd.f32 %v1374_v61, %v1373_v59  ;;  %v1328_v2 = vpop.f32.mrb[14].mxu0  ;;  %v1376_v3 = vpop.f32.mrb[14].mxu1 }
 0x115   : > { %v1329_v4 = vpop.f32.mrb[15].mxu0  ;;  %v1377_v5 = vpop.f32.mrb[15].mxu1 }
 0x116   : > { %1072 = vst [vmem:[%s1685_s15 + $0x28] sm:$0xff] %v1040_v62  ;;  %1088 = vst [vmem:[%s1685_s15 + $0xa8] sm:$0xff] %v1056_v63  ;;  %v970_v6 = vmul.f32 %v1327_v0, %v1667_v51  ;;  %v986_v7 = vmul.f32 %v1375_v1, %v1667_v51  ;;  %v1330_v8 = vadd.f32 %v1329_v4, %v1328_v2 }
 0x117   : > { %v1378_v9 = vadd.f32 %v1377_v5, %v1376_v3 }
 0x118   : > { %v1009_v10 = vadd.f32 %v1672_v57, %v970_v6  ;;  %v1025_v11 = vadd.f32 %v1672_v57, %v986_v7  ;;  %v971_v12 = vmul.f32 %v1330_v8, %v1667_v51 }
 0x119   : > { %v987_v13 = vmul.f32 %v1378_v9, %v1667_v51 }
 0x11a   : > { %v1041_v14 = vmax.f32 %v1009_v10, 0.0  ;;  %v1057_v15 = vmax.f32 %v1025_v11, 0.0  ;;  %v1010_v16 = vadd.f32 %v1672_v57, %v971_v12  ;;  %v1331_v18 = vpop.f32.mrb[16].mxu0  ;;  %v1379_v19 = vpop.f32.mrb[16].mxu1 }
 0x11b   : > { %v1026_v17 = vadd.f32 %v1672_v57, %v987_v13  ;;  %v1332_v20 = vpop.f32.mrb[17].mxu0  ;;  %v1380_v21 = vpop.f32.mrb[17].mxu1 }
 0x11c   : > { %1073 = vst [vmem:[%s1685_s15 + $0x30] sm:$0xff] %v1041_v14  ;;  %1089 = vst [vmem:[%s1685_s15 + $0xb0] sm:$0xff] %v1057_v15  ;;  %v1042_v22 = vmax.f32 %v1010_v16, 0.0  ;;  %v1333_v24 = vadd.f32 %v1332_v20, %v1331_v18  ;;  %v1381_v25 = vadd.f32 %v1380_v21, %v1379_v19  ;;  %v1334_v26 = vpop.f32.mrb[18].mxu0  ;;  %v1382_v27 = vpop.f32.mrb[18].mxu1 }
 0x11d   : > { %v1058_v23 = vmax.f32 %v1026_v17, 0.0  ;;  %v1335_v28 = vpop.f32.mrb[19].mxu0  ;;  %v1383_v29 = vpop.f32.mrb[19].mxu1 }
 0x11e   : > { %1074 = vst [vmem:[%s1685_s15 + $0x38] sm:$0xff] %v1042_v22  ;;  %v972_v30 = vmul.f32 %v1333_v24, %v1667_v51  ;;  %v988_v31 = vmul.f32 %v1381_v25, %v1667_v51  ;;  %v1336_v32 = vadd.f32 %v1335_v28, %v1334_v26  ;;  %v1384_v33 = vadd.f32 %v1383_v29, %v1382_v27 }
 0x11f   : > { %1090 = vst [vmem:[%s1685_s15 + $0xb8] sm:$0xff] %v1058_v23 }
 0x120   : > { %v1011_v34 = vadd.f32 %v1672_v57, %v972_v30  ;;  %v1027_v35 = vadd.f32 %v1672_v57, %v988_v31  ;;  %v973_v36 = vmul.f32 %v1336_v32, %v1667_v51  ;;  %v989_v37 = vmul.f32 %v1384_v33, %v1667_v51 }
 0x122   : > { %v1043_v38 = vmax.f32 %v1011_v34, 0.0  ;;  %v1059_v39 = vmax.f32 %v1027_v35, 0.0  ;;  %v1012_v40 = vadd.f32 %v1672_v57, %v973_v36  ;;  %v1028_v41 = vadd.f32 %v1672_v57, %v989_v37  ;;  %v1337_v42 = vpop.f32.mrb[20].mxu0  ;;  %v1385_v43 = vpop.f32.mrb[20].mxu1 }
 0x123   : > { %v1338_v44 = vpop.f32.mrb[21].mxu0  ;;  %v1386_v45 = vpop.f32.mrb[21].mxu1 }
 0x124   : > { %1075 = vst [vmem:[%s1685_s15 + $0x40] sm:$0xff] %v1043_v38  ;;  %1091 = vst [vmem:[%s1685_s15 + $0xc0] sm:$0xff] %v1059_v39  ;;  %v1044_v46 = vmax.f32 %v1012_v40, 0.0  ;;  %v1060_v47 = vmax.f32 %v1028_v41, 0.0  ;;  %v1339_v48 = vadd.f32 %v1338_v44, %v1337_v42  ;;  %v1387_v49 = vadd.f32 %v1386_v45, %v1385_v43  ;;  %v1340_v50 = vpop.f32.mrb[22].mxu0  ;;  %v1388_v52 = vpop.f32.mrb[22].mxu1 }
 0x125   : > { %v1341_v53 = vpop.f32.mrb[23].mxu0  ;;  %v1389_v54 = vpop.f32.mrb[23].mxu1 }
 0x126   : > { %1076 = vst [vmem:[%s1685_s15 + $0x48] sm:$0xff] %v1044_v46  ;;  %1092 = vst [vmem:[%s1685_s15 + $0xc8] sm:$0xff] %v1060_v47  ;;  %v974_v55 = vmul.f32 %v1339_v48, %v1667_v51  ;;  %v990_v56 = vmul.f32 %v1387_v49, %v1667_v51  ;;  %v1342_v58 = vadd.f32 %v1341_v53, %v1340_v50 }
 0x127   : > { %v1390_v59 = vadd.f32 %v1389_v54, %v1388_v52 }
 0x128   : > { %v1013_v60 = vadd.f32 %v1672_v57, %v974_v55  ;;  %v1029_v61 = vadd.f32 %v1672_v57, %v990_v56  ;;  %v975_v62 = vmul.f32 %v1342_v58, %v1667_v51 }
 0x129   : > { %v991_v63 = vmul.f32 %v1390_v59, %v1667_v51 }
 0x12a   : > { %v1045_v0 = vmax.f32 %v1013_v60, 0.0  ;;  %v1061_v1 = vmax.f32 %v1029_v61, 0.0  ;;  %v1014_v2 = vadd.f32 %v1672_v57, %v975_v62  ;;  %v1343_v4 = vpop.f32.mrb[24].mxu0  ;;  %v1391_v5 = vpop.f32.mrb[24].mxu1 }
 0x12b   : > { %v1030_v3 = vadd.f32 %v1672_v57, %v991_v63  ;;  %v1344_v6 = vpop.f32.mrb[25].mxu0  ;;  %v1392_v7 = vpop.f32.mrb[25].mxu1 }
 0x12c   : > { %1077 = vst [vmem:[%s1685_s15 + $0x50] sm:$0xff] %v1045_v0  ;;  %1093 = vst [vmem:[%s1685_s15 + $0xd0] sm:$0xff] %v1061_v1  ;;  %v1046_v8 = vmax.f32 %v1014_v2, 0.0  ;;  %v1345_v10 = vadd.f32 %v1344_v6, %v1343_v4  ;;  %v1393_v11 = vadd.f32 %v1392_v7, %v1391_v5  ;;  %v1346_v12 = vpop.f32.mrb[26].mxu0  ;;  %v1394_v13 = vpop.f32.mrb[26].mxu1 }
 0x12d   : > { %v1062_v9 = vmax.f32 %v1030_v3, 0.0  ;;  %v1347_v14 = vpop.f32.mrb[27].mxu0  ;;  %v1395_v15 = vpop.f32.mrb[27].mxu1 }
 0x12e   : > { %1078 = vst [vmem:[%s1685_s15 + $0x58] sm:$0xff] %v1046_v8  ;;  %v976_v16 = vmul.f32 %v1345_v10, %v1667_v51  ;;  %v992_v17 = vmul.f32 %v1393_v11, %v1667_v51  ;;  %v1348_v18 = vadd.f32 %v1347_v14, %v1346_v12  ;;  %v1396_v19 = vadd.f32 %v1395_v15, %v1394_v13 }
 0x12f   : > { %1094 = vst [vmem:[%s1685_s15 + $0xd8] sm:$0xff] %v1062_v9 }
 0x130   : > { %v1015_v20 = vadd.f32 %v1672_v57, %v976_v16  ;;  %v1031_v21 = vadd.f32 %v1672_v57, %v992_v17  ;;  %v977_v22 = vmul.f32 %v1348_v18, %v1667_v51  ;;  %v993_v23 = vmul.f32 %v1396_v19, %v1667_v51 }
 0x132   : > { %v1047_v24 = vmax.f32 %v1015_v20, 0.0  ;;  %v1063_v25 = vmax.f32 %v1031_v21, 0.0  ;;  %v1016_v26 = vadd.f32 %v1672_v57, %v977_v22  ;;  %v1032_v27 = vadd.f32 %v1672_v57, %v993_v23  ;;  %v1349_v28 = vpop.f32.mrb[28].mxu0  ;;  %v1397_v29 = vpop.f32.mrb[28].mxu1 }
 0x133   : > { %v1350_v30 = vpop.f32.mrb[29].mxu0  ;;  %v1398_v31 = vpop.f32.mrb[29].mxu1 }
 0x134   : > { %1079 = vst [vmem:[%s1685_s15 + $0x60] sm:$0xff] %v1047_v24  ;;  %1095 = vst [vmem:[%s1685_s15 + $0xe0] sm:$0xff] %v1063_v25  ;;  %v1048_v32 = vmax.f32 %v1016_v26, 0.0  ;;  %v1064_v33 = vmax.f32 %v1032_v27, 0.0  ;;  %v1351_v34 = vadd.f32 %v1350_v30, %v1349_v28  ;;  %v1399_v35 = vadd.f32 %v1398_v31, %v1397_v29  ;;  %v1352_v36 = vpop.f32.mrb[30].mxu0  ;;  %v1400_v37 = vpop.f32.mrb[30].mxu1 }
 0x135   : > { %v1353_v38 = vpop.f32.mrb[31].mxu0  ;;  %v1401_v39 = vpop.f32.mrb[31].mxu1 }
 0x136   : > { %1080 = vst [vmem:[%s1685_s15 + $0x68] sm:$0xff] %v1048_v32  ;;  %1096 = vst [vmem:[%s1685_s15 + $0xe8] sm:$0xff] %v1064_v33  ;;  %v978_v40 = vmul.f32 %v1351_v34, %v1667_v51  ;;  %v994_v41 = vmul.f32 %v1399_v35, %v1667_v51  ;;  %v1354_v42 = vadd.f32 %v1353_v38, %v1352_v36 }
 0x137   : > { %v1402_v43 = vadd.f32 %v1401_v39, %v1400_v37 }
 0x138   : > { %v1017_v44 = vadd.f32 %v1672_v57, %v978_v40  ;;  %v1033_v45 = vadd.f32 %v1672_v57, %v994_v41  ;;  %v979_v46 = vmul.f32 %v1354_v42, %v1667_v51 }
 0x139   : > { %v995_v47 = vmul.f32 %v1402_v43, %v1667_v51 }
 0x13a   : > { %v1049_v48 = vmax.f32 %v1017_v44, 0.0  ;;  %v1065_v49 = vmax.f32 %v1033_v45, 0.0  ;;  %v1018_v50 = vadd.f32 %v1672_v57, %v979_v46 }
 0x13b   : > { %v1034_v52 = vadd.f32 %v1672_v57, %v995_v47 }
 0x13c   : > { %1081 = vst [vmem:[%s1685_s15 + $0x70] sm:$0xff] %v1049_v48  ;;  %1097 = vst [vmem:[%s1685_s15 + $0xf0] sm:$0xff] %v1065_v49  ;;  %v1050_v53 = vmax.f32 %v1018_v50, 0.0 }
 0x13d   : > { %v1066_v54 = vmax.f32 %v1034_v52, 0.0 }
 0x13e   : > { %1082 = vst [vmem:[%s1685_s15 + $0x78] sm:$0xff] %v1050_v53 }
 0x13f   : > { %1098 = vst [vmem:[%s1685_s15 + $0xf8] sm:$0xff] %v1066_v54 }
 0x140 PF: > { %s14_s17 = sadd.s32 1, %s1529_s17   ;;  %s1791_s15 = smov %s1525_s16 }
 0x141   : > { %p11_p5 = scmp.ge.s32.totalorder %s14_s17, 4   ;;  %s1792_s16 = smov %s1794_s18 }
 0x143   :  { %13 = sbr.rel (!%p11_p5) target bundleno = 2 (0x2), region = 83 }

// kernel: pretrained_model_forward.23
= control target key start
LH: loop header
LB: loop body
LE: loop exit
PB: predicated region body
PF: predicated region fallthrough
CT: control target
= control target key end

     0   :  { %vm280_vm0 = vcmask 523264   ;;  %s807_s0 = inlined_call_operand.vmem [shape: f32[9,128,64], index: 0, kind: input, shape index: {}]   ;;  %s808_s1 = inlined_call_operand.vmem [shape: f32[128,64], index: 1, kind: output, shape index: {}]  }
   0x1   :  { %v8_v0 = vld [vmem:[%s807_s0] sm:$0xff]  ;;  %v9_v6 = vld [vmem:[%s807_s0 + $0x8] sm:$0xff]  ;;  %v10_v15 = vld [vmem:[%s807_s0 + $0x10] sm:$0xff] }
   0x2   :  { %v24_v1 = vld [vmem:[%s807_s0 + $0x80] sm:$0xff]  ;;  %v25_v7 = vld [vmem:[%s807_s0 + $0x88] sm:$0xff]  ;;  %v26_v16 = vld [vmem:[%s807_s0 + $0x90] sm:$0xff] }
   0x3   :  { %v40_v2 = vld [vmem:[%s807_s0 + $0x100] sm:$0xff]  ;;  %v152_v3 = vmax.f32 %v8_v0, %v24_v1  ;;  %v41_v8 = vld [vmem:[%s807_s0 + $0x108] sm:$0xff]  ;;  %v153_v10 = vmax.f32 %v9_v6, %v25_v7  ;;  %v42_v17 = vld [vmem:[%s807_s0 + $0x110] sm:$0xff]  ;;  %v154_v20 = vmax.f32 %v10_v15, %v26_v16 }
   0x4   :  { %v56_v4 = vld [vmem:[%s807_s0 + $0x180] sm:$0xff]  ;;  %v57_v13 = vld [vmem:[%s807_s0 + $0x188] sm:$0xff]  ;;  %v58_v24 = vld [vmem:[%s807_s0 + $0x190] sm:$0xff] }
   0x5   :  { %v168_v5 = vmax.f32 %v152_v3, %v40_v2  ;;  %v72_v9 = vld [vmem:[%s807_s0 + $0x200] sm:$0xff]  ;;  %v169_v14 = vmax.f32 %v153_v10, %v41_v8  ;;  %v73_v19 = vld [vmem:[%s807_s0 + $0x208] sm:$0xff]  ;;  %v170_v26 = vmax.f32 %v154_v20, %v42_v17  ;;  %v11_v27 = vld [vmem:[%s807_s0 + $0x18] sm:$0xff] }
   0x6   :  { %v88_v11 = vld [vmem:[%s807_s0 + $0x280] sm:$0xff]  ;;  %v89_v22 = vld [vmem:[%s807_s0 + $0x288] sm:$0xff]  ;;  %v27_v28 = vld [vmem:[%s807_s0 + $0x98] sm:$0xff] }
   0x7   :  { %v184_v12 = vmax.f32 %v168_v5, %v56_v4  ;;  %v104_v21 = vld [vmem:[%s807_s0 + $0x300] sm:$0xff]  ;;  %v185_v23 = vmax.f32 %v169_v14, %v57_v13  ;;  %v43_v29 = vld [vmem:[%s807_s0 + $0x118] sm:$0xff]  ;;  %v74_v33 = vld [vmem:[%s807_s0 + $0x210] sm:$0xff]  ;;  %v155_v34 = vmax.f32 %v11_v27, %v27_v28  ;;  %v186_v38 = vmax.f32 %v170_v26, %v58_v24 }
   0x8   :  { %v120_v30 = vld [vmem:[%s807_s0 + $0x380] sm:$0xff]  ;;  %v105_v36 = vld [vmem:[%s807_s0 + $0x308] sm:$0xff]  ;;  %v90_v37 = vld [vmem:[%s807_s0 + $0x290] sm:$0xff] }
   0x9   :  { %v200_v18 = vmax.f32 %v184_v12, %v72_v9  ;;  %v136_v31 = vld [vmem:[%s807_s0 + $0x400] sm:$0xff]  ;;  %v201_v32 = vmax.f32 %v185_v23, %v73_v19  ;;  %v59_v39 = vld [vmem:[%s807_s0 + $0x198] sm:$0xff]  ;;  %v171_v41 = vmax.f32 %v155_v34, %v43_v29  ;;  %v121_v46 = vld [vmem:[%s807_s0 + $0x388] sm:$0xff]  ;;  %v202_v48 = vmax.f32 %v186_v38, %v74_v33 }
   0xa   :  { %v12_v42 = vld [vmem:[%s807_s0 + $0x20] sm:$0xff]  ;;  %v137_v47 = vld [vmem:[%s807_s0 + $0x408] sm:$0xff]  ;;  %v75_v49 = vld [vmem:[%s807_s0 + $0x218] sm:$0xff] }
   0xb   :  { %v216_v25 = vmax.f32 %v200_v18, %v88_v11  ;;  %v217_v40 = vmax.f32 %v201_v32, %v89_v22  ;;  %v28_v43 = vld [vmem:[%s807_s0 + $0xa0] sm:$0xff]  ;;  %v106_v52 = vld [vmem:[%s807_s0 + $0x310] sm:$0xff]  ;;  %v91_v53 = vld [vmem:[%s807_s0 + $0x298] sm:$0xff]  ;;  %v187_v54 = vmax.f32 %v171_v41, %v59_v39  ;;  %v218_v57 = vmax.f32 %v202_v48, %v90_v37 }
   0xc   :  { %v44_v44 = vld [vmem:[%s807_s0 + $0x120] sm:$0xff]  ;;  %v156_v50 = vmax.f32 %v12_v42, %v28_v43  ;;  %v13_v59 = vld [vmem:[%s807_s0 + $0x28] sm:$0xff]  ;;  %v122_v63 = vld [vmem:[%s807_s0 + $0x390] sm:$0xff] }
   0xd   :  { %v232_v35 = vmax.f32 %v216_v25, %v104_v21  ;;  %v233_v51 = vmax.f32 %v217_v40, %v105_v36  ;;  %v60_v55 = vld [vmem:[%s807_s0 + $0x1a0] sm:$0xff]  ;;  %v29_v60 = vld [vmem:[%s807_s0 + $0xa8] sm:$0xff]  ;;  %v138_v0 = vld [vmem:[%s807_s0 + $0x410] sm:$0xff]  ;;  %v203_v1 = vmax.f32 %v187_v54, %v75_v49  ;;  %v234_v4 = vmax.f32 %v218_v57, %v106_v52 }
   0xe   :  { %v172_v58 = vmax.f32 %v156_v50, %v44_v44  ;;  %v45_v61 = vld [vmem:[%s807_s0 + $0x128] sm:$0xff]  ;;  %v76_v2 = vld [vmem:[%s807_s0 + $0x220] sm:$0xff]  ;;  %v157_v3 = vmax.f32 %v13_v59, %v29_v60  ;;  %v107_v5 = vld [vmem:[%s807_s0 + $0x318] sm:$0xff] }
   0xf   :  { %v248_v45 = vmax.f32 %v232_v35, %v120_v30  ;;  %v249_v62 = vmax.f32 %v233_v51, %v121_v46  ;;  %v92_v6 = vld [vmem:[%s807_s0 + $0x2a0] sm:$0xff]  ;;  %v61_v8 = vld [vmem:[%s807_s0 + $0x1a8] sm:$0xff]  ;;  %v219_v10 = vmax.f32 %v203_v1, %v91_v53  ;;  %v14_v12 = vld [vmem:[%s807_s0 + $0x30] sm:$0xff]  ;;  %v250_v15 = vmax.f32 %v234_v4, %v122_v63 }
  0x10   :  { %v188_v7 = vmax.f32 %v172_v58, %v60_v55  ;;  %v173_v11 = vmax.f32 %v157_v3, %v45_v61  ;;  %v30_v13 = vld [vmem:[%s807_s0 + $0xb0] sm:$0xff]  ;;  %v123_v16 = vld [vmem:[%s807_s0 + $0x398] sm:$0xff]  ;;  %v77_v19 = vld [vmem:[%s807_s0 + $0x228] sm:$0xff] }
  0x11   :  { %v264_v56 = vmax.f32 %v248_v45, %v136_v31  ;;  %v265_v9 = vmax.f32 %v249_v62, %v137_v47  ;;  %v46_v14 = vld [vmem:[%s807_s0 + $0x130] sm:$0xff]  ;;  %v139_v17 = vld [vmem:[%s807_s0 + $0x418] sm:$0xff]  ;;  %v158_v20 = vmax.f32 %v14_v12, %v30_v13  ;;  %v235_v21 = vmax.f32 %v219_v10, %v107_v5  ;;  %v108_v22 = vld [vmem:[%s807_s0 + $0x320] sm:$0xff] }
  0x12   :  { %v204_v18 = vmax.f32 %v188_v7, %v76_v2  ;;  %v93_v23 = vld [vmem:[%s807_s0 + $0x2a8] sm:$0xff]  ;;  %v189_v24 = vmax.f32 %v173_v11, %v61_v8  ;;  %v62_v25 = vld [vmem:[%s807_s0 + $0x1b0] sm:$0xff]  ;;  %v266_v26 = vmax.f32 %v250_v15, %v138_v0  ;;  %v15_v29 = vld [vmem:[%s807_s0 + $0x38] sm:$0xff] }
  0x13   :  { %281 = vst.msk [vmem:[%s808_s1] sm:$0xff] %vm280_vm0, %v264_v56  ;;  %282 = vst.msk [vmem:[%s808_s1 + $0x8] sm:$0xff] %vm280_vm0, %v265_v9  ;;  %v174_v28 = vmax.f32 %v158_v20, %v46_v14  ;;  %v31_v30 = vld [vmem:[%s807_s0 + $0xb8] sm:$0xff]  ;;  %v251_v32 = vmax.f32 %v235_v21, %v123_v16  ;;  %v124_v33 = vld [vmem:[%s807_s0 + $0x3a0] sm:$0xff] }
  0x14   :  { %v220_v27 = vmax.f32 %v204_v18, %v92_v6  ;;  %v47_v31 = vld [vmem:[%s807_s0 + $0x138] sm:$0xff]  ;;  %v140_v34 = vld [vmem:[%s807_s0 + $0x420] sm:$0xff]  ;;  %v205_v35 = vmax.f32 %v189_v24, %v77_v19  ;;  %v78_v36 = vld [vmem:[%s807_s0 + $0x230] sm:$0xff]  ;;  %v159_v37 = vmax.f32 %v15_v29, %v31_v30  ;;  %283 = vst.msk [vmem:[%s808_s1 + $0x10] sm:$0xff] %vm280_vm0, %v266_v26 }
  0x15   :  { %v109_v39 = vld [vmem:[%s807_s0 + $0x328] sm:$0xff]  ;;  %v94_v40 = vld [vmem:[%s807_s0 + $0x2b0] sm:$0xff]  ;;  %v190_v41 = vmax.f32 %v174_v28, %v62_v25  ;;  %v63_v42 = vld [vmem:[%s807_s0 + $0x1b8] sm:$0xff]  ;;  %v267_v43 = vmax.f32 %v251_v32, %v139_v17 }
  0x16   :  { %v236_v38 = vmax.f32 %v220_v27, %v108_v22  ;;  %v221_v44 = vmax.f32 %v205_v35, %v93_v23  ;;  %v175_v45 = vmax.f32 %v159_v37, %v47_v31  ;;  %v16_v46 = vld [vmem:[%s807_s0 + $0x40] sm:$0xff]  ;;  %v125_v50 = vld [vmem:[%s807_s0 + $0x3a8] sm:$0xff]  ;;  %v79_v53 = vld [vmem:[%s807_s0 + $0x238] sm:$0xff] }
  0x17   :  { %v32_v47 = vld [vmem:[%s807_s0 + $0xc0] sm:$0xff]  ;;  %v141_v51 = vld [vmem:[%s807_s0 + $0x428] sm:$0xff]  ;;  %v206_v52 = vmax.f32 %v190_v41, %v78_v36  ;;  %284 = vst.msk [vmem:[%s808_s1 + $0x18] sm:$0xff] %vm280_vm0, %v267_v43  ;;  %v110_v56 = vld [vmem:[%s807_s0 + $0x330] sm:$0xff] }
  0x18   :  { %v48_v48 = vld [vmem:[%s807_s0 + $0x140] sm:$0xff]  ;;  %v252_v49 = vmax.f32 %v236_v38, %v124_v33  ;;  %v160_v54 = vmax.f32 %v16_v46, %v32_v47  ;;  %v237_v55 = vmax.f32 %v221_v44, %v109_v39  ;;  %v95_v57 = vld [vmem:[%s807_s0 + $0x2b8] sm:$0xff]  ;;  %v191_v58 = vmax.f32 %v175_v45, %v63_v42  ;;  %v17_v63 = vld [vmem:[%s807_s0 + $0x48] sm:$0xff] }
  0x19   :  { %v64_v59 = vld [vmem:[%s807_s0 + $0x1c0] sm:$0xff]  ;;  %v222_v61 = vmax.f32 %v206_v52, %v94_v40  ;;  %v33_v0 = vld [vmem:[%s807_s0 + $0xc8] sm:$0xff]  ;;  %v126_v3 = vld [vmem:[%s807_s0 + $0x3b0] sm:$0xff] }
  0x1a   :  { %v268_v60 = vmax.f32 %v252_v49, %v140_v34  ;;  %v176_v62 = vmax.f32 %v160_v54, %v48_v48  ;;  %v49_v1 = vld [vmem:[%s807_s0 + $0x148] sm:$0xff]  ;;  %v253_v2 = vmax.f32 %v237_v55, %v125_v50  ;;  %v142_v4 = vld [vmem:[%s807_s0 + $0x430] sm:$0xff]  ;;  %v207_v5 = vmax.f32 %v191_v58, %v79_v53  ;;  %v80_v6 = vld [vmem:[%s807_s0 + $0x240] sm:$0xff] }
  0x1b   :  { %v161_v7 = vmax.f32 %v17_v63, %v33_v0  ;;  %v238_v8 = vmax.f32 %v222_v61, %v110_v56  ;;  %v111_v9 = vld [vmem:[%s807_s0 + $0x338] sm:$0xff]  ;;  %v96_v10 = vld [vmem:[%s807_s0 + $0x2c0] sm:$0xff]  ;;  %v65_v12 = vld [vmem:[%s807_s0 + $0x1c8] sm:$0xff] }
  0x1c   :  { %285 = vst.msk [vmem:[%s808_s1 + $0x20] sm:$0xff] %vm280_vm0, %v268_v60  ;;  %v192_v11 = vmax.f32 %v176_v62, %v64_v59  ;;  %v269_v13 = vmax.f32 %v253_v2, %v141_v51  ;;  %v223_v14 = vmax.f32 %v207_v5, %v95_v57  ;;  %v18_v16 = vld [vmem:[%s807_s0 + $0x50] sm:$0xff]  ;;  %v127_v20 = vld [vmem:[%s807_s0 + $0x3b8] sm:$0xff]  ;;  %v81_v23 = vld [vmem:[%s807_s0 + $0x248] sm:$0xff] }
  0x1d   :  { %v177_v15 = vmax.f32 %v161_v7, %v49_v1  ;;  %v34_v17 = vld [vmem:[%s807_s0 + $0xd0] sm:$0xff]  ;;  %v254_v19 = vmax.f32 %v238_v8, %v126_v3  ;;  %v143_v21 = vld [vmem:[%s807_s0 + $0x438] sm:$0xff]  ;;  %v112_v26 = vld [vmem:[%s807_s0 + $0x340] sm:$0xff] }
  0x1e   :  { %v50_v18 = vld [vmem:[%s807_s0 + $0x150] sm:$0xff]  ;;  %v208_v22 = vmax.f32 %v192_v11, %v80_v6  ;;  %v162_v24 = vmax.f32 %v18_v16, %v34_v17  ;;  %286 = vst.msk [vmem:[%s808_s1 + $0x28] sm:$0xff] %vm280_vm0, %v269_v13  ;;  %v239_v25 = vmax.f32 %v223_v14, %v111_v9  ;;  %v97_v27 = vld [vmem:[%s807_s0 + $0x2c8] sm:$0xff]  ;;  %v19_v33 = vld [vmem:[%s807_s0 + $0x58] sm:$0xff] }
  0x1f   :  { %v193_v28 = vmax.f32 %v177_v15, %v65_v12  ;;  %v66_v29 = vld [vmem:[%s807_s0 + $0x1d0] sm:$0xff]  ;;  %v270_v30 = vmax.f32 %v254_v19, %v142_v4  ;;  %v35_v34 = vld [vmem:[%s807_s0 + $0xd8] sm:$0xff]  ;;  %v128_v37 = vld [vmem:[%s807_s0 + $0x3c0] sm:$0xff] }
  0x20   :  { %v224_v31 = vmax.f32 %v208_v22, %v96_v10  ;;  %v178_v32 = vmax.f32 %v162_v24, %v50_v18  ;;  %v51_v35 = vld [vmem:[%s807_s0 + $0x158] sm:$0xff]  ;;  %v255_v36 = vmax.f32 %v239_v25, %v127_v20  ;;  %v144_v38 = vld [vmem:[%s807_s0 + $0x440] sm:$0xff]  ;;  %v82_v40 = vld [vmem:[%s807_s0 + $0x250] sm:$0xff]  ;;  %v163_v41 = vmax.f32 %v19_v33, %v35_v34 }
  0x21   :  { %v209_v39 = vmax.f32 %v193_v28, %v81_v23  ;;  %287 = vst.msk [vmem:[%s808_s1 + $0x30] sm:$0xff] %vm280_vm0, %v270_v30  ;;  %v113_v43 = vld [vmem:[%s807_s0 + $0x348] sm:$0xff]  ;;  %v98_v44 = vld [vmem:[%s807_s0 + $0x2d0] sm:$0xff]  ;;  %v67_v46 = vld [vmem:[%s807_s0 + $0x1d8] sm:$0xff] }
  0x22   :  { %v240_v42 = vmax.f32 %v224_v31, %v112_v26  ;;  %v194_v45 = vmax.f32 %v178_v32, %v66_v29  ;;  %v271_v47 = vmax.f32 %v255_v36, %v143_v21  ;;  %v179_v49 = vmax.f32 %v163_v41, %v51_v35  ;;  %v20_v50 = vld [vmem:[%s807_s0 + $0x60] sm:$0xff]  ;;  %v129_v54 = vld [vmem:[%s807_s0 + $0x3c8] sm:$0xff]  ;;  %v83_v57 = vld [vmem:[%s807_s0 + $0x258] sm:$0xff] }
  0x23   :  { %v225_v48 = vmax.f32 %v209_v39, %v97_v27  ;;  %v36_v51 = vld [vmem:[%s807_s0 + $0xe0] sm:$0xff]  ;;  %v145_v55 = vld [vmem:[%s807_s0 + $0x448] sm:$0xff]  ;;  %v114_v60 = vld [vmem:[%s807_s0 + $0x350] sm:$0xff] }
  0x24   :  { %v52_v52 = vld [vmem:[%s807_s0 + $0x160] sm:$0xff]  ;;  %v256_v53 = vmax.f32 %v240_v42, %v128_v37  ;;  %v210_v56 = vmax.f32 %v194_v45, %v82_v40  ;;  %v164_v58 = vmax.f32 %v20_v50, %v36_v51  ;;  %288 = vst.msk [vmem:[%s808_s1 + $0x38] sm:$0xff] %vm280_vm0, %v271_v47  ;;  %v99_v61 = vld [vmem:[%s807_s0 + $0x2d8] sm:$0xff]  ;;  %v195_v62 = vmax.f32 %v179_v49, %v67_v46  ;;  %v21_v3 = vld [vmem:[%s807_s0 + $0x68] sm:$0xff] }
  0x25   :  { %v241_v59 = vmax.f32 %v225_v48, %v113_v43  ;;  %v68_v63 = vld [vmem:[%s807_s0 + $0x1e0] sm:$0xff]  ;;  %v37_v4 = vld [vmem:[%s807_s0 + $0xe8] sm:$0xff]  ;;  %v130_v7 = vld [vmem:[%s807_s0 + $0x3d0] sm:$0xff] }
  0x26   :  { %v272_v0 = vmax.f32 %v256_v53, %v144_v38  ;;  %v226_v1 = vmax.f32 %v210_v56, %v98_v44  ;;  %v180_v2 = vmax.f32 %v164_v58, %v52_v52  ;;  %v53_v5 = vld [vmem:[%s807_s0 + $0x168] sm:$0xff]  ;;  %v146_v8 = vld [vmem:[%s807_s0 + $0x450] sm:$0xff]  ;;  %v211_v9 = vmax.f32 %v195_v62, %v83_v57  ;;  %v84_v10 = vld [vmem:[%s807_s0 + $0x260] sm:$0xff] }
  0x27   :  { %v257_v6 = vmax.f32 %v241_v59, %v129_v54  ;;  %v165_v11 = vmax.f32 %v21_v3, %v37_v4  ;;  %v115_v13 = vld [vmem:[%s807_s0 + $0x358] sm:$0xff]  ;;  %v100_v14 = vld [vmem:[%s807_s0 + $0x2e0] sm:$0xff]  ;;  %v69_v16 = vld [vmem:[%s807_s0 + $0x1e8] sm:$0xff] }
  0x28   :  { %289 = vst.msk [vmem:[%s808_s1 + $0x40] sm:$0xff] %vm280_vm0, %v272_v0  ;;  %v242_v12 = vmax.f32 %v226_v1, %v114_v60  ;;  %v196_v15 = vmax.f32 %v180_v2, %v68_v63  ;;  %v227_v18 = vmax.f32 %v211_v9, %v99_v61  ;;  %v22_v20 = vld [vmem:[%s807_s0 + $0x70] sm:$0xff]  ;;  %v131_v24 = vld [vmem:[%s807_s0 + $0x3d8] sm:$0xff]  ;;  %v85_v27 = vld [vmem:[%s807_s0 + $0x268] sm:$0xff] }
  0x29   :  { %v273_v17 = vmax.f32 %v257_v6, %v145_v55  ;;  %v181_v19 = vmax.f32 %v165_v11, %v53_v5  ;;  %v38_v21 = vld [vmem:[%s807_s0 + $0xf0] sm:$0xff]  ;;  %v147_v25 = vld [vmem:[%s807_s0 + $0x458] sm:$0xff]  ;;  %v116_v30 = vld [vmem:[%s807_s0 + $0x360] sm:$0xff] }
  0x2a   :  { %v54_v22 = vld [vmem:[%s807_s0 + $0x170] sm:$0xff]  ;;  %v258_v23 = vmax.f32 %v242_v12, %v130_v7  ;;  %v212_v26 = vmax.f32 %v196_v15, %v84_v10  ;;  %v166_v28 = vmax.f32 %v22_v20, %v38_v21  ;;  %v243_v29 = vmax.f32 %v227_v18, %v115_v13  ;;  %v101_v31 = vld [vmem:[%s807_s0 + $0x2e8] sm:$0xff]  ;;  %v23_v37 = vld [vmem:[%s807_s0 + $0x78] sm:$0xff] }
  0x2b   :  { %290 = vst.msk [vmem:[%s808_s1 + $0x48] sm:$0xff] %vm280_vm0, %v273_v17  ;;  %v197_v32 = vmax.f32 %v181_v19, %v69_v16  ;;  %v70_v33 = vld [vmem:[%s807_s0 + $0x1f0] sm:$0xff]  ;;  %v39_v38 = vld [vmem:[%s807_s0 + $0xf8] sm:$0xff]  ;;  %v132_v41 = vld [vmem:[%s807_s0 + $0x3e0] sm:$0xff] }
  0x2c   :  { %v274_v34 = vmax.f32 %v258_v23, %v146_v8  ;;  %v228_v35 = vmax.f32 %v212_v26, %v100_v14  ;;  %v182_v36 = vmax.f32 %v166_v28, %v54_v22  ;;  %v55_v39 = vld [vmem:[%s807_s0 + $0x178] sm:$0xff]  ;;  %v259_v40 = vmax.f32 %v243_v29, %v131_v24  ;;  %v86_v43 = vld [vmem:[%s807_s0 + $0x270] sm:$0xff]  ;;  %v117_v46 = vld [vmem:[%s807_s0 + $0x368] sm:$0xff] }
  0x2d   :  { %v213_v42 = vmax.f32 %v197_v32, %v85_v27  ;;  %v167_v44 = vmax.f32 %v23_v37, %v39_v38  ;;  %v71_v48 = vld [vmem:[%s807_s0 + $0x1f8] sm:$0xff]  ;;  %v148_v50 = vld [vmem:[%s807_s0 + $0x460] sm:$0xff]  ;;  %v102_v52 = vld [vmem:[%s807_s0 + $0x2f0] sm:$0xff] }
  0x2e   :  { %291 = vst.msk [vmem:[%s808_s1 + $0x50] sm:$0xff] %vm280_vm0, %v274_v34  ;;  %v244_v45 = vmax.f32 %v228_v35, %v116_v30  ;;  %v198_v47 = vmax.f32 %v182_v36, %v70_v33  ;;  %v275_v49 = vmax.f32 %v259_v40, %v147_v25  ;;  %v133_v55 = vld [vmem:[%s807_s0 + $0x3e8] sm:$0xff]  ;;  %v87_v57 = vld [vmem:[%s807_s0 + $0x278] sm:$0xff]  ;;  %v118_v59 = vld [vmem:[%s807_s0 + $0x370] sm:$0xff] }
  0x2f   :  { %v229_v51 = vmax.f32 %v213_v42, %v101_v31  ;;  %v183_v53 = vmax.f32 %v167_v44, %v55_v39  ;;  %v149_v62 = vld [vmem:[%s807_s0 + $0x468] sm:$0xff]  ;;  %v103_v0 = vld [vmem:[%s807_s0 + $0x2f8] sm:$0xff]  ;;  %v134_v2 = vld [vmem:[%s807_s0 + $0x3f0] sm:$0xff] }
  0x30   :  { %v260_v54 = vmax.f32 %v244_v45, %v132_v41  ;;  %v214_v56 = vmax.f32 %v198_v47, %v86_v43  ;;  %292 = vst.msk [vmem:[%s808_s1 + $0x58] sm:$0xff] %vm280_vm0, %v275_v49  ;;  %v119_v5 = vld [vmem:[%s807_s0 + $0x378] sm:$0xff]  ;;  %v150_v7 = vld [vmem:[%s807_s0 + $0x470] sm:$0xff] }
  0x31   :  { %v245_v58 = vmax.f32 %v229_v51, %v117_v46  ;;  %v199_v60 = vmax.f32 %v183_v53, %v71_v48  ;;  %v135_v10 = vld [vmem:[%s807_s0 + $0x3f8] sm:$0xff] }
  0x32   :  { %v276_v61 = vmax.f32 %v260_v54, %v148_v50  ;;  %v230_v63 = vmax.f32 %v214_v56, %v102_v52  ;;  %v151_v13 = vld [vmem:[%s807_s0 + $0x478] sm:$0xff] }
  0x33   :  { %v261_v1 = vmax.f32 %v245_v58, %v133_v55  ;;  %v215_v3 = vmax.f32 %v199_v60, %v87_v57 }
  0x34   :  { %293 = vst.msk [vmem:[%s808_s1 + $0x60] sm:$0xff] %vm280_vm0, %v276_v61  ;;  %v246_v4 = vmax.f32 %v230_v63, %v118_v59 }
  0x35   :  { %v277_v6 = vmax.f32 %v261_v1, %v149_v62  ;;  %v231_v8 = vmax.f32 %v215_v3, %v103_v0 }
  0x36   :  { %v262_v9 = vmax.f32 %v246_v4, %v134_v2 }
  0x37   :  { %294 = vst.msk [vmem:[%s808_s1 + $0x68] sm:$0xff] %vm280_vm0, %v277_v6  ;;  %v247_v11 = vmax.f32 %v231_v8, %v119_v5 }
  0x38   :  { %v278_v12 = vmax.f32 %v262_v9, %v150_v7 }
  0x39   :  { %v263_v14 = vmax.f32 %v247_v11, %v135_v10 }
  0x3a   :  { %295 = vst.msk [vmem:[%s808_s1 + $0x70] sm:$0xff] %vm280_vm0, %v278_v12 }
  0x3b   :  { %v279_v15 = vmax.f32 %v263_v14, %v151_v13 }
  0x3d   :  { %296 = vst.msk [vmem:[%s808_s1 + $0x78] sm:$0xff] %vm280_vm0, %v279_v15 }

// kernel: pretrained_model_forward.24
= control target key start
LH: loop header
LB: loop body
LE: loop exit
PB: predicated region body
PF: predicated region fallthrough
CT: control target
= control target key end

     0   :  { %s1130_s15 = smov 0   ;;  %s1132_s16 = smov 0   ;;  %s1307_s0 = inlined_call_operand.vmem [shape: bf16[128,640], index: 0, kind: input, shape index: {}]   ;;  %s1308_s1 = inlined_call_operand.vmem [shape: bf16[640,128], index: 1, kind: input, shape index: {}]   ;;  %s1309_s2 = inlined_call_operand.vmem [shape: f32[1,128], index: 2, kind: input, shape index: {}]   ;;  %s1310_s3 = inlined_call_operand.vmem [shape: f32[1,128], index: 3, kind: input, shape index: {}]   ;;  %s1311_s4 = inlined_call_operand.vmem [shape: f32[128,128], index: 4, kind: output, shape index: {}]  }
   0x1   :  { %s1134_s17 = smov 0   ;;  %s1136_s18 = smov 0  }
   0x2   :  { %s1138_s19 = smov 0  }
   0x3 LB: > { %s26_s20 = sadd.s32 1, %s1098_s18  ;;  %p49_p1 = scmp.ne.s32.totalorder %s1090_s16, %s1086_s15  ;;  %s1102_s19 = sphi %s1138_s19, %s14_s19   ;;  %s1098_s18 = sphi %s1136_s18, %s1315_s18   ;;  %s1094_s17 = sphi %s1134_s17, %s1314_s17   ;;  %s1090_s16 = sphi %s1132_s16, %s1313_s16   ;;  %s1086_s15 = sphi %s1130_s15, %s1312_s15  }
   0x4   : > { %p27_p0 = scmp.ge.s32.totalorder %s26_s20, 5  ;;  %p50_p2 = scmp.eq.s32.totalorder %s1102_s19, 0 }
   0x5   : > { %s42_s22 = sadd.s32 1, %s1090_s16  ;;  %p912_p5 = scmp.ge.s32.totalorder %s1102_s19, 5 }
   0x6   : > { %s1317_s20 = smov (%p27_p0, %s26_s20), 0  ;;  %p51_p3 = por %p50_p2, %p49_p1 }
   0x7   : > { %s38_s21 = ssub.s32 %s1098_s18, %s1317_s20  ;;  %195 = sbr.rel (%p912_p5) target bundleno = 28 (0x1c), region = 24 }
   0x8   : > { %p40_p4 = scmp.eq.s32.totalorder %s38_s21, 0 }
   0xa   : > { %s1165_s23 = scalar_select %p40_p4, %s1090_s16, %s42_s22  }
   0xe   : > { %198 = sbr.rel (!%p51_p3) target bundleno = 28 (0x1c), region = 28  ;;  %s200_s24 = sand.u32 (%p51_p3), 1, %s1090_s16  }
   0xf   : > { %s914_s25 = sshll.u32 (%p51_p3), %s1098_s18, 2  ;;  %s913_s26 = sshll.u32 (%p51_p3), %s200_s24, 6 }
  0x10   : > { %s1173_s29 = scalar_lea.vmem (%p51_p3), %s1307_s0, %s914_s25  ;;  %s202_s30 = scalar_lea.vmem (%p51_p3), [#allocation3], %s913_s26 }
  0x11   : > { %v223_v0 = vld [vmem:[%s1173_s29] sm:$0xf] (%p51_p3)  ;;  %v225_v1 = vld [vmem:[%s1173_s29 + $0x14] sm:$0xf] (%p51_p3)  ;;  %v227_v2 = vld [vmem:[%s1173_s29 + $0x28] sm:$0xf] (%p51_p3) }
  0x12   : > { %224 = vst [vmem:[%s202_s30] sm:$0xf] (%p51_p3), %v223_v0  ;;  %226 = vst [vmem:[%s202_s30 + $0x4] sm:$0xf] (%p51_p3), %v225_v1  ;;  %v229_v3 = vld [vmem:[%s1173_s29 + $0x3c] sm:$0xf] (%p51_p3) }
  0x13   : > { %v231_v4 = vld [vmem:[%s1173_s29 + $0x50] sm:$0xf] (%p51_p3)  ;;  %228 = vst [vmem:[%s202_s30 + $0x8] sm:$0xf] (%p51_p3), %v227_v2  ;;  %230 = vst [vmem:[%s202_s30 + $0xc] sm:$0xf] (%p51_p3), %v229_v3 }
  0x14   : > { %232 = vst [vmem:[%s202_s30 + $0x10] sm:$0xf] (%p51_p3), %v231_v4  ;;  %v233_v5 = vld [vmem:[%s1173_s29 + $0x64] sm:$0xf] (%p51_p3)  ;;  %v235_v6 = vld [vmem:[%s1173_s29 + $0x78] sm:$0xf] (%p51_p3) }
  0x15   : > { %v237_v7 = vld [vmem:[%s1173_s29 + $0x8c] sm:$0xf]  ;;  %234 = vst [vmem:[%s202_s30 + $0x14] sm:$0xf] %v233_v5  ;;  %236 = vst [vmem:[%s202_s30 + $0x18] sm:$0xf] %v235_v6 }
  0x16   : > { %238 = vst [vmem:[%s202_s30 + $0x1c] sm:$0xf] %v237_v7  ;;  %v239_v8 = vld [vmem:[%s1173_s29 + $0xa0] sm:$0xf]  ;;  %v241_v9 = vld [vmem:[%s1173_s29 + $0xb4] sm:$0xf] }
  0x17   : > { %v243_v10 = vld [vmem:[%s1173_s29 + $0xc8] sm:$0xf]  ;;  %240 = vst [vmem:[%s202_s30 + $0x20] sm:$0xf] %v239_v8  ;;  %242 = vst [vmem:[%s202_s30 + $0x24] sm:$0xf] %v241_v9 }
  0x18   : > { %244 = vst [vmem:[%s202_s30 + $0x28] sm:$0xf] %v243_v10  ;;  %v245_v11 = vld [vmem:[%s1173_s29 + $0xdc] sm:$0xf]  ;;  %v247_v12 = vld [vmem:[%s1173_s29 + $0xf0] sm:$0xf] }
  0x19   : > { %v249_v13 = vld [vmem:[%s1173_s29 + $0x104] sm:$0xf]  ;;  %246 = vst [vmem:[%s202_s30 + $0x2c] sm:$0xf] %v245_v11  ;;  %248 = vst [vmem:[%s202_s30 + $0x30] sm:$0xf] %v247_v12 }
  0x1a   : > { %250 = vst [vmem:[%s202_s30 + $0x34] sm:$0xf] %v249_v13  ;;  %v251_v14 = vld [vmem:[%s1173_s29 + $0x118] sm:$0xf]  ;;  %v253_v15 = vld [vmem:[%s1173_s29 + $0x12c] sm:$0xf] }
  0x1b   : > { %252 = vst [vmem:[%s202_s30 + $0x38] sm:$0xf] %v251_v14  ;;  %254 = vst [vmem:[%s202_s30 + $0x3c] sm:$0xf] %v253_v15 }
  0x1c PF: > { %p915_p6 = scmp.ge.s32.totalorder %s1102_s19, 1  ;;  %p320_p7 = scmp.lt.s32.totalorder %s1102_s19, 6 }
  0x1e   : > { %p321_p8 = pnand %p915_p6, %p320_p7 }
  0x1f   : > { %s327_s5 = sand.u32 (!%p321_p8), 1, %s1086_s15   ;;  %s917_s6 = sshll.u32 (!%p321_p8), %s1094_s17, 4 }
  0x20   : > { %324 = sbr.rel (%p321_p8) target bundleno = 323 (0x143), region = 73  ;;  %s916_s7 = sshll.u32 (!%p321_p8), %s327_s5, 6 }
  0x21   : > { %p371_p9 = scmp.lt.s32.totalorder (!%p321_p8), %s917_s6, 79  ;;  %s1200_s12 = scalar_lea.vmem (!%p321_p8), [#allocation3], %s916_s7 }
  0x22   : > { %p919_p10 = scmp.ne.s32.totalorder (!%p321_p8), %s1094_s17, 0 }
  0x27   : > { %s1319_s6 = smov (!%p371_p9, %s917_s6), 79  ;;  %398 = sbr.rel (%p919_p10) target bundleno = 49 (0x31), region = 81 }
  0x28   : > { %s918_s8 = sshll.u32 %s1319_s6, 2  ;;  %v1104_v16 = vmov (!%p919_p10), 0.0  }
  0x29   : > { %s1198_s11 = scalar_lea.vmem %s1308_s1, %s918_s8  ;;  %399 = vst [vmem:[#allocation2] sm:$0xff] (!%p919_p10), %v1104_v16  ;;  %400 = vst [vmem:[#allocation2 + $0x8] sm:$0xff] (!%p919_p10), %v1104_v16 }
  0x2a   : > { %401 = vst [vmem:[#allocation2 + $0x10] sm:$0xff] (!%p919_p10), %v1104_v16  ;;  %402 = vst [vmem:[#allocation2 + $0x18] sm:$0xff] (!%p919_p10), %v1104_v16 }
  0x2b   : > { %403 = vst [vmem:[#allocation2 + $0x20] sm:$0xff] (!%p919_p10), %v1104_v16  ;;  %404 = vst [vmem:[#allocation2 + $0x28] sm:$0xff] (!%p919_p10), %v1104_v16 }
  0x2c   : > { %405 = vst [vmem:[#allocation2 + $0x30] sm:$0xff] (!%p919_p10), %v1104_v16  ;;  %406 = vst [vmem:[#allocation2 + $0x38] sm:$0xff] (!%p919_p10), %v1104_v16 }
  0x2d   : > { %407 = vst [vmem:[#allocation2 + $0x40] sm:$0xff] (!%p919_p10), %v1104_v16  ;;  %408 = vst [vmem:[#allocation2 + $0x48] sm:$0xff] (!%p919_p10), %v1104_v16 }
  0x2e   : > { %409 = vst [vmem:[#allocation2 + $0x50] sm:$0xff] %v1104_v16  ;;  %410 = vst [vmem:[#allocation2 + $0x58] sm:$0xff] %v1104_v16 }
  0x2f   : > { %411 = vst [vmem:[#allocation2 + $0x60] sm:$0xff] %v1104_v16  ;;  %412 = vst [vmem:[#allocation2 + $0x68] sm:$0xff] %v1104_v16 }
  0x30   : > { %413 = vst [vmem:[#allocation2 + $0x70] sm:$0xff] %v1104_v16  ;;  %414 = vst [vmem:[#allocation2 + $0x78] sm:$0xff] %v1104_v16 }
  0x31 PF: > { %v1048_v17 = vld [vmem:[%s1198_s11] sm:$0xff]   ;;  %v1049_v18 = vld [vmem:[%s1198_s11 + $0x8] sm:$0xff]   ;;  %v1050_v19 = vld [vmem:[%s1198_s11 + $0x10] sm:$0xff]   ;;  %p936_p11 = scmp.ne.s32.totalorder %s1094_s17, 4 }
  0x32   : > { %959 = vmatprep.subr.bf16.mxu0 %v1048_v17  ;;  %991 = vmatprep.subr.bf16.mxu1 %v1048_v17  ;;  %v1051_v20 = vld [vmem:[%s1198_s11 + $0x18] sm:$0xff]   ;;  %v1056_v21 = vld [vmem:[%s1200_s12] sm:$0xff]   ;;  %v1053_v24 = vld [vmem:[%s1198_s11 + $0x28] sm:$0xff]  }
  0x33   : > { %960 = vmatpush3.bf16.msra.mxu0 %v1048_v17  ;;  %999 = vmatpush3.bf16.msra.mxu1 %v1048_v17  ;;  %v1057_v22 = vld [vmem:[%s1200_s12 + $0x20] sm:$0xff]   ;;  %v1054_v25 = vld [vmem:[%s1198_s11 + $0x30] sm:$0xff]   ;;  %v1055_v26 = vld [vmem:[%s1198_s11 + $0x38] sm:$0xff]  }
  0x34   : > { %961 = vmatprep.subr.bf16.mxu0 %v1049_v18  ;;  %992 = vmatprep.subr.bf16.mxu1 %v1049_v18  ;;  %v1052_v23 = vld [vmem:[%s1198_s11 + $0x20] sm:$0xff]   ;;  %v1058_v27 = vld [vmem:[%s1200_s12 + $0x8] sm:$0xff]   ;;  %v1060_v29 = vld [vmem:[%s1200_s12 + $0x10] sm:$0xff]  }
  0x35   : > { %975 = vmatprep.mubr.bf16.mxu0 %v1056_v21  ;;  %983 = vmatprep.mubr.bf16.mxu1 %v1057_v22  ;;  %v1059_v28 = vld [vmem:[%s1200_s12 + $0x28] sm:$0xff]   ;;  %v1061_v30 = vld [vmem:[%s1200_s12 + $0x30] sm:$0xff]   ;;  %v1062_v31 = vld [vmem:[%s1200_s12 + $0x18] sm:$0xff]  }
  0x36   : > { %v1063_v32 = vld [vmem:[%s1200_s12 + $0x38] sm:$0xff]   ;;  %v417_v33 = vld [vmem:[#allocation2 + $0x10] sm:$0xff]  ;;  %v415_v35 = vld [vmem:[#allocation2] sm:$0xff] }
  0x37   : > { %962 = vmatpush3.bf16.msra.mxu0 %v1049_v18  ;;  %1000 = vmatpush3.bf16.msra.mxu1 %v1049_v18  ;;  %v425_v34 = vld [vmem:[#allocation2 + $0x50] sm:$0xff]  ;;  %v423_v36 = vld [vmem:[#allocation2 + $0x40] sm:$0xff]  ;;  %v418_v39 = vld [vmem:[#allocation2 + $0x18] sm:$0xff] }
  0x38   : > { %963 = vmatprep.subr.bf16.mxu0 %v1050_v19  ;;  %993 = vmatprep.subr.bf16.mxu1 %v1050_v19  ;;  %v426_v40 = vld [vmem:[#allocation2 + $0x58] sm:$0xff]  ;;  %v416_v45 = vld [vmem:[#allocation2 + $0x8] sm:$0xff]  ;;  %v421_v57 = vld [vmem:[#allocation2 + $0x30] sm:$0xff] }
  0x39   : > { %v424_v46 = vld [vmem:[#allocation2 + $0x48] sm:$0xff]  ;;  %v429_v58 = vld [vmem:[#allocation2 + $0x70] sm:$0xff]  ;;  %v419_v59 = vld [vmem:[#allocation2 + $0x20] sm:$0xff] }
  0x3a   : > { %v427_v60 = vld [vmem:[#allocation2 + $0x60] sm:$0xff]  ;;  %v422_v63 = vld [vmem:[#allocation2 + $0x38] sm:$0xff]  ;;  %v420_v5 = vld [vmem:[#allocation2 + $0x28] sm:$0xff] }
  0x3b   : > { %964 = vmatpush3.bf16.msra.mxu0 %v1050_v19  ;;  %1001 = vmatpush3.bf16.msra.mxu1 %v1050_v19  ;;  %v430_v0 = vld [vmem:[#allocation2 + $0x78] sm:$0xff]  ;;  %v428_v6 = vld [vmem:[#allocation2 + $0x68] sm:$0xff]  ;;  %v937_v18 = vld [vmem:[%s1309_s2] ss:$0 sm:$0xff] (!%p936_p11) }
  0x3c   : > { %965 = vmatprep.subr.bf16.mxu0 %v1051_v20  ;;  %994 = vmatprep.subr.bf16.mxu1 %v1051_v20  ;;  %v1226_v19 = vld [vmem:[%s1310_s3] ss:$0 sm:$0xff] (!%p936_p11) }
  0x3f   : > { %966 = vmatpush3.bf16.msra.mxu0 %v1051_v20  ;;  %1002 = vmatpush3.bf16.msra.mxu1 %v1051_v20 }
  0x40   : > { %967 = vmatprep.subr.bf16.mxu0 %v1052_v23  ;;  %995 = vmatprep.subr.bf16.mxu1 %v1052_v23 }
  0x43   : > { %968 = vmatpush3.bf16.msra.mxu0 %v1052_v23  ;;  %1003 = vmatpush3.bf16.msra.mxu1 %v1052_v23 }
  0x44   : > { %969 = vmatprep.subr.bf16.mxu0 %v1053_v24  ;;  %996 = vmatprep.subr.bf16.mxu1 %v1053_v24 }
  0x47   : > { %970 = vmatpush3.bf16.msra.mxu0 %v1053_v24  ;;  %1004 = vmatpush3.bf16.msra.mxu1 %v1053_v24 }
  0x48   : > { %971 = vmatprep.subr.bf16.mxu0 %v1054_v25  ;;  %997 = vmatprep.subr.bf16.mxu1 %v1054_v25 }
  0x4b   : > { %972 = vmatpush3.bf16.msra.mxu0 %v1054_v25  ;;  %1005 = vmatpush3.bf16.msra.mxu1 %v1054_v25 }
  0x4c   : > { %973 = vmatprep.subr.bf16.mxu0 %v1055_v26  ;;  %998 = vmatprep.subr.bf16.mxu1 %v1055_v26 }
  0x4f   : > { %974 = vmatpush3.bf16.msra.mxu0 %v1055_v26  ;;  %1006 = vmatpush3.bf16.msra.mxu1 %v1055_v26 }
  0x52   : > { %976 = vmatmul.mubr.bf16.vlgmr.msra.gmra.mrb[0].mxu0 %v1058_v27  ;;  %984 = vmatmul.mubr.bf16.vlgmr.msra.gmra.mrb[0].mxu1 %v1059_v28 }
  0x53   : > { %979 = vmatprep.mubr.bf16.mxu0 %v1060_v29  ;;  %987 = vmatprep.mubr.bf16.mxu1 %v1061_v30 }
  0x5a   : > { %980 = vmatmul.mubr.bf16.gmra.mrb[4].mxu0 %v1062_v31  ;;  %988 = vmatmul.mubr.bf16.gmra.mrb[4].mxu1 %v1063_v32 }
 0x125   : > { %v977_v37 = vpop.f32.mrb[0].mxu0  ;;  %v985_v38 = vpop.f32.mrb[0].mxu1 }
 0x126   : > { %v658_v41 = vadd.f32 %v977_v37, %v417_v33  ;;  %v666_v42 = vadd.f32 %v985_v38, %v425_v34  ;;  %v593_v43 = vpop.f32.mrb[1].mxu0  ;;  %v625_v44 = vpop.f32.mrb[1].mxu1 }
 0x127   : > { %v656_v47 = vadd.f32 %v593_v43, %v415_v35  ;;  %v664_v48 = vadd.f32 %v625_v44, %v423_v36  ;;  %v978_v49 = vpop.f32.mrb[2].mxu0  ;;  %v986_v50 = vpop.f32.mrb[2].mxu1 }
 0x128   : > { %674 = vst [vmem:[#allocation2 + $0x10] sm:$0xff] %v658_v41  ;;  %682 = vst [vmem:[#allocation2 + $0x50] sm:$0xff] %v666_v42  ;;  %v659_v51 = vadd.f32 %v978_v49, %v418_v39  ;;  %v667_v52 = vadd.f32 %v986_v50, %v426_v40  ;;  %v596_v53 = vpop.f32.mrb[3].mxu0  ;;  %v628_v54 = vpop.f32.mrb[3].mxu1 }
 0x129   : > { %672 = vst [vmem:[#allocation2] sm:$0xff] %v656_v47  ;;  %680 = vst [vmem:[#allocation2 + $0x40] sm:$0xff] %v664_v48  ;;  %v657_v55 = vadd.f32 %v596_v53, %v416_v45  ;;  %v665_v56 = vadd.f32 %v628_v54, %v424_v46 }
 0x12a   : > { %675 = vst [vmem:[#allocation2 + $0x18] sm:$0xff] %v659_v51  ;;  %683 = vst [vmem:[#allocation2 + $0x58] sm:$0xff] %v667_v52 }
 0x12b   : > { %673 = vst [vmem:[#allocation2 + $0x8] sm:$0xff] %v657_v55  ;;  %681 = vst [vmem:[#allocation2 + $0x48] sm:$0xff] %v665_v56 }
 0x12d   : > { %v981_v61 = vpop.f32.mrb[4].mxu0  ;;  %v989_v62 = vpop.f32.mrb[4].mxu1  ;;  %691 = sbr.rel (%p936_p11) target bundleno = 323 (0x143), region = 85 }
 0x12e   : > { %v662_v1 = vadd.f32 %v981_v61, %v421_v57  ;;  %v670_v2 = vadd.f32 %v989_v62, %v429_v58  ;;  %v609_v3 = vpop.f32.mrb[5].mxu0  ;;  %v641_v4 = vpop.f32.mrb[5].mxu1 }
 0x12f   : > { %v660_v7 = vadd.f32 %v609_v3, %v419_v59  ;;  %v668_v8 = vadd.f32 %v641_v4, %v427_v60  ;;  %v982_v9 = vpop.f32.mrb[6].mxu0  ;;  %v990_v10 = vpop.f32.mrb[6].mxu1  ;;  %v694_v22 = vld [vmem:[#allocation2 + $0x10] sm:$0xff] (!%p936_p11) }
 0x130   : > { %678 = vst [vmem:[#allocation2 + $0x30] sm:$0xff] %v662_v1  ;;  %686 = vst [vmem:[#allocation2 + $0x70] sm:$0xff] %v670_v2  ;;  %v663_v11 = vadd.f32 %v982_v9, %v422_v63  ;;  %v671_v12 = vadd.f32 %v990_v10, %v430_v0  ;;  %v612_v13 = vpop.f32.mrb[7].mxu0  ;;  %v644_v14 = vpop.f32.mrb[7].mxu1  ;;  %v692_v17 = vld [vmem:[#allocation2] sm:$0xff] (!%p936_p11)  ;;  %v717_v25 = vmul.f32 (!%p936_p11), %v937_v18, %v694_v22  ;;  %v702_v45 = vld [vmem:[#allocation2 + $0x50] sm:$0xff] (!%p936_p11) }
 0x131   : > { %676 = vst [vmem:[#allocation2 + $0x20] sm:$0xff] %v660_v7  ;;  %684 = vst [vmem:[#allocation2 + $0x60] sm:$0xff] %v668_v8  ;;  %v661_v15 = vadd.f32 %v612_v13, %v420_v5  ;;  %v669_v16 = vadd.f32 %v644_v14, %v428_v6  ;;  %v715_v20 = vmul.f32 (!%p936_p11), %v937_v18, %v692_v17  ;;  %v695_v23 = vld [vmem:[#allocation2 + $0x18] sm:$0xff] (!%p936_p11)  ;;  %v700_v39 = vld [vmem:[#allocation2 + $0x40] sm:$0xff] (!%p936_p11) }
 0x132   : > { %679 = vst [vmem:[#allocation2 + $0x38] sm:$0xff] %v663_v11  ;;  %687 = vst [vmem:[#allocation2 + $0x78] sm:$0xff] %v671_v12  ;;  %v693_v21 = vld [vmem:[#allocation2 + $0x8] sm:$0xff] (!%p936_p11)  ;;  %v718_v26 = vmul.f32 (!%p936_p11), %v937_v18, %v695_v23  ;;  %v740_v36 = vadd.f32 (!%p936_p11), %v1226_v19, %v717_v25  ;;  %v703_v46 = vld [vmem:[#allocation2 + $0x58] sm:$0xff] (!%p936_p11)  ;;  %v723_v57 = vmul.f32 (!%p936_p11), %v937_v18, %v700_v39 }
 0x133   : > { %677 = vst [vmem:[#allocation2 + $0x28] sm:$0xff] %v661_v15  ;;  %685 = vst [vmem:[#allocation2 + $0x68] sm:$0xff] %v669_v16  ;;  %v716_v24 = vmul.f32 (!%p936_p11), %v937_v18, %v693_v21  ;;  %v738_v30 = vadd.f32 (!%p936_p11), %v1226_v19, %v715_v20  ;;  %v701_v44 = vld [vmem:[#allocation2 + $0x48] sm:$0xff] (!%p936_p11)  ;;  %v725_v61 = vmul.f32 (!%p936_p11), %v937_v18, %v702_v45 }
 0x134   : > { %v741_v37 = vadd.f32 %v1226_v19, %v718_v26  ;;  %v756_v48 = vmax.f32 %v740_v36, 0.0  ;;  %v724_v60 = vmul.f32 %v937_v18, %v701_v44  ;;  %v726_v62 = vmul.f32 %v937_v18, %v703_v46 }
 0x135   : > { %v739_v35 = vadd.f32 %v1226_v19, %v716_v24  ;;  %v754_v40 = vmax.f32 %v738_v30, 0.0  ;;  %v746_v63 = vadd.f32 %v1226_v19, %v723_v57  ;;  %v748_v4 = vadd.f32 %v1226_v19, %v725_v61 }
 0x136   : > { %v757_v49 = vmax.f32 %v741_v37, 0.0  ;;  %772 = vst [vmem:[%s1311_s4 + $0x10] sm:$0xff] %v756_v48  ;;  %v747_v3 = vadd.f32 %v1226_v19, %v724_v60  ;;  %v749_v5 = vadd.f32 %v1226_v19, %v726_v62 }
 0x137   : > { %v698_v29 = vld [vmem:[#allocation2 + $0x30] sm:$0xff]  ;;  %v755_v47 = vmax.f32 %v739_v35, 0.0  ;;  %770 = vst [vmem:[%s1311_s4] sm:$0xff] %v754_v40  ;;  %v762_v7 = vmax.f32 %v746_v63, 0.0  ;;  %v764_v12 = vmax.f32 %v748_v4, 0.0 }
 0x138   : > { %v696_v27 = vld [vmem:[#allocation2 + $0x20] sm:$0xff]  ;;  %v721_v33 = vmul.f32 %v937_v18, %v698_v29  ;;  %v706_v53 = vld [vmem:[#allocation2 + $0x70] sm:$0xff]  ;;  %773 = vst [vmem:[%s1311_s4 + $0x18] sm:$0xff] %v757_v49  ;;  %v763_v11 = vmax.f32 %v747_v3, 0.0  ;;  %v765_v13 = vmax.f32 %v749_v5, 0.0 }
 0x139   : > { %v719_v31 = vmul.f32 %v937_v18, %v696_v27  ;;  %v699_v34 = vld [vmem:[#allocation2 + $0x38] sm:$0xff]  ;;  %v704_v51 = vld [vmem:[#allocation2 + $0x60] sm:$0xff]  ;;  %771 = vst [vmem:[%s1311_s4 + $0x8] sm:$0xff] %v755_v47  ;;  %v729_v2 = vmul.f32 %v937_v18, %v706_v53  ;;  %778 = vst [vmem:[%s1311_s4 + $0x40] sm:$0xff] %v762_v7 }
 0x13a   : > { %v697_v28 = vld [vmem:[#allocation2 + $0x28] sm:$0xff]  ;;  %v722_v38 = vmul.f32 %v937_v18, %v699_v34  ;;  %v744_v43 = vadd.f32 %v1226_v19, %v721_v33  ;;  %v707_v58 = vld [vmem:[#allocation2 + $0x78] sm:$0xff]  ;;  %v727_v0 = vmul.f32 %v937_v18, %v704_v51  ;;  %779 = vst [vmem:[%s1311_s4 + $0x48] sm:$0xff] %v763_v11  ;;  %780 = vst [vmem:[%s1311_s4 + $0x50] sm:$0xff] %v764_v12 }
 0x13b   : > { %v720_v32 = vmul.f32 %v937_v18, %v697_v28  ;;  %v742_v41 = vadd.f32 %v1226_v19, %v719_v31  ;;  %v705_v52 = vld [vmem:[#allocation2 + $0x68] sm:$0xff]  ;;  %v730_v6 = vmul.f32 %v937_v18, %v707_v58  ;;  %v752_v10 = vadd.f32 %v1226_v19, %v729_v2  ;;  %781 = vst [vmem:[%s1311_s4 + $0x58] sm:$0xff] %v765_v13 }
 0x13c   : > { %v745_v50 = vadd.f32 %v1226_v19, %v722_v38  ;;  %v760_v56 = vmax.f32 %v744_v43, 0.0  ;;  %v728_v1 = vmul.f32 %v937_v18, %v705_v52  ;;  %v750_v8 = vadd.f32 %v1226_v19, %v727_v0 }
 0x13d   : > { %v743_v42 = vadd.f32 %v1226_v19, %v720_v32  ;;  %v758_v54 = vmax.f32 %v742_v41, 0.0  ;;  %v753_v14 = vadd.f32 %v1226_v19, %v730_v6  ;;  %v768_v17 = vmax.f32 %v752_v10, 0.0 }
 0x13e   : > { %v761_v59 = vmax.f32 %v745_v50, 0.0  ;;  %776 = vst [vmem:[%s1311_s4 + $0x30] sm:$0xff] %v760_v56  ;;  %v751_v9 = vadd.f32 %v1226_v19, %v728_v1  ;;  %v766_v15 = vmax.f32 %v750_v8, 0.0 }
 0x13f   : > { %v759_v55 = vmax.f32 %v743_v42, 0.0  ;;  %774 = vst [vmem:[%s1311_s4 + $0x20] sm:$0xff] %v758_v54  ;;  %v769_v18 = vmax.f32 %v753_v14, 0.0  ;;  %784 = vst [vmem:[%s1311_s4 + $0x70] sm:$0xff] %v768_v17 }
 0x140   : > { %777 = vst [vmem:[%s1311_s4 + $0x38] sm:$0xff] %v761_v59  ;;  %v767_v16 = vmax.f32 %v751_v9, 0.0  ;;  %782 = vst [vmem:[%s1311_s4 + $0x60] sm:$0xff] %v766_v15 }
 0x141   : > { %775 = vst [vmem:[%s1311_s4 + $0x28] sm:$0xff] %v759_v55  ;;  %785 = vst [vmem:[%s1311_s4 + $0x78] sm:$0xff] %v769_v18 }
 0x142   : > { %783 = vst [vmem:[%s1311_s4 + $0x68] sm:$0xff] %v767_v16 }
 0x143 PF: > { %s14_s19 = sadd.s32 1, %s1102_s19   ;;  %s1312_s15 = smov %s1090_s16 }
 0x144   : > { %p11_p12 = scmp.ge.s32.totalorder %s14_s19, 7   ;;  %s1313_s16 = smov %s1165_s23 }
 0x145   : > { %s1314_s17 = smov %s1098_s18  ;;  %s1315_s18 = smov %s1317_s20 }
 0x146   :  { %13 = sbr.rel (!%p11_p12) target bundleno = 3 (0x3), region = 129 }

// kernel: pretrained_model_forward.25
= control target key start
LH: loop header
LB: loop body
LE: loop exit
PB: predicated region body
PF: predicated region fallthrough
CT: control target
= control target key end

     0   :  { %s1246_s18 = smov 0   ;;  %s1248_s19 = smov 0   ;;  %s1489_s0 = inlined_call_operand.vmem [shape: bf16[128,640], index: 0, kind: input, shape index: {}]   ;;  %s1490_s1 = inlined_call_operand.vmem [shape: bf16[640,128], index: 1, kind: input, shape index: {}]   ;;  %s1491_s2 = inlined_call_operand.vmem [shape: f32[1,128], index: 2, kind: input, shape index: {}]   ;;  %s1492_s3 = inlined_call_operand.vmem [shape: f32[1,128], index: 3, kind: input, shape index: {}]   ;;  %s1493_s4 = inlined_call_operand.vmem [shape: f32[128,128], index: 4, kind: input, shape index: {}]   ;;  %s1494_s5 = inlined_call_operand.vmem [shape: f32[128,128], index: 5, kind: output, shape index: {}]  }
   0x1   :  { %s1250_s20 = smov 0   ;;  %s1252_s21 = smov 0  }
   0x2   :  { %s1254_s22 = smov 0  }
   0x3 LB: > { %s27_s23 = sadd.s32 1, %s1209_s21  ;;  %p50_p1 = scmp.ne.s32.totalorder %s1201_s19, %s1197_s18  ;;  %s1213_s22 = sphi %s1254_s22, %s15_s22   ;;  %s1209_s21 = sphi %s1252_s21, %s1498_s21   ;;  %s1205_s20 = sphi %s1250_s20, %s1497_s20   ;;  %s1201_s19 = sphi %s1248_s19, %s1496_s19   ;;  %s1197_s18 = sphi %s1246_s18, %s1495_s18  }
   0x4   : > { %p28_p0 = scmp.ge.s32.totalorder %s27_s23, 5  ;;  %p51_p2 = scmp.eq.s32.totalorder %s1213_s22, 0 }
   0x5   : > { %s43_s25 = sadd.s32 1, %s1201_s19  ;;  %p1023_p5 = scmp.ge.s32.totalorder %s1213_s22, 5 }
   0x6   : > { %s1500_s23 = smov (%p28_p0, %s27_s23), 0  ;;  %p52_p3 = por %p51_p2, %p50_p1 }
   0x7   : > { %s39_s24 = ssub.s32 %s1209_s21, %s1500_s23  ;;  %236 = sbr.rel (%p1023_p5) target bundleno = 28 (0x1c), region = 28 }
   0x8   : > { %p41_p4 = scmp.eq.s32.totalorder %s39_s24, 0 }
   0xa   : > { %s1281_s26 = scalar_select %p41_p4, %s1201_s19, %s43_s25  }
   0xe   : > { %239 = sbr.rel (!%p52_p3) target bundleno = 28 (0x1c), region = 32  ;;  %s241_s27 = sand.u32 (%p52_p3), 1, %s1201_s19  }
   0xf   : > { %s1025_s28 = sshll.u32 (%p52_p3), %s1209_s21, 2  ;;  %s1024_s29 = sshll.u32 (%p52_p3), %s241_s27, 6 }
  0x10   : > { %s1289_s7 = scalar_lea.vmem (%p52_p3), %s1489_s0, %s1025_s28  ;;  %s243_s8 = scalar_lea.vmem (%p52_p3), [#allocation3], %s1024_s29 }
  0x11   : > { %v264_v0 = vld [vmem:[%s1289_s7] sm:$0xf] (%p52_p3)  ;;  %v266_v1 = vld [vmem:[%s1289_s7 + $0x14] sm:$0xf] (%p52_p3)  ;;  %v268_v2 = vld [vmem:[%s1289_s7 + $0x28] sm:$0xf] (%p52_p3) }
  0x12   : > { %265 = vst [vmem:[%s243_s8] sm:$0xf] (%p52_p3), %v264_v0  ;;  %267 = vst [vmem:[%s243_s8 + $0x4] sm:$0xf] (%p52_p3), %v266_v1  ;;  %v270_v3 = vld [vmem:[%s1289_s7 + $0x3c] sm:$0xf] (%p52_p3) }
  0x13   : > { %v272_v4 = vld [vmem:[%s1289_s7 + $0x50] sm:$0xf] (%p52_p3)  ;;  %269 = vst [vmem:[%s243_s8 + $0x8] sm:$0xf] (%p52_p3), %v268_v2  ;;  %271 = vst [vmem:[%s243_s8 + $0xc] sm:$0xf] (%p52_p3), %v270_v3 }
  0x14   : > { %273 = vst [vmem:[%s243_s8 + $0x10] sm:$0xf] (%p52_p3), %v272_v4  ;;  %v274_v5 = vld [vmem:[%s1289_s7 + $0x64] sm:$0xf] (%p52_p3)  ;;  %v276_v6 = vld [vmem:[%s1289_s7 + $0x78] sm:$0xf] (%p52_p3) }
  0x15   : > { %v278_v7 = vld [vmem:[%s1289_s7 + $0x8c] sm:$0xf]  ;;  %275 = vst [vmem:[%s243_s8 + $0x14] sm:$0xf] %v274_v5  ;;  %277 = vst [vmem:[%s243_s8 + $0x18] sm:$0xf] %v276_v6 }
  0x16   : > { %279 = vst [vmem:[%s243_s8 + $0x1c] sm:$0xf] %v278_v7  ;;  %v280_v8 = vld [vmem:[%s1289_s7 + $0xa0] sm:$0xf]  ;;  %v282_v9 = vld [vmem:[%s1289_s7 + $0xb4] sm:$0xf] }
  0x17   : > { %v284_v10 = vld [vmem:[%s1289_s7 + $0xc8] sm:$0xf]  ;;  %281 = vst [vmem:[%s243_s8 + $0x20] sm:$0xf] %v280_v8  ;;  %283 = vst [vmem:[%s243_s8 + $0x24] sm:$0xf] %v282_v9 }
  0x18   : > { %285 = vst [vmem:[%s243_s8 + $0x28] sm:$0xf] %v284_v10  ;;  %v286_v11 = vld [vmem:[%s1289_s7 + $0xdc] sm:$0xf]  ;;  %v288_v12 = vld [vmem:[%s1289_s7 + $0xf0] sm:$0xf] }
  0x19   : > { %v290_v13 = vld [vmem:[%s1289_s7 + $0x104] sm:$0xf]  ;;  %287 = vst [vmem:[%s243_s8 + $0x2c] sm:$0xf] %v286_v11  ;;  %289 = vst [vmem:[%s243_s8 + $0x30] sm:$0xf] %v288_v12 }
  0x1a   : > { %291 = vst [vmem:[%s243_s8 + $0x34] sm:$0xf] %v290_v13  ;;  %v292_v14 = vld [vmem:[%s1289_s7 + $0x118] sm:$0xf]  ;;  %v294_v15 = vld [vmem:[%s1289_s7 + $0x12c] sm:$0xf] }
  0x1b   : > { %293 = vst [vmem:[%s243_s8 + $0x38] sm:$0xf] %v292_v14  ;;  %295 = vst [vmem:[%s243_s8 + $0x3c] sm:$0xf] %v294_v15 }
  0x1c PF: > { %p1026_p6 = scmp.ge.s32.totalorder %s1213_s22, 1  ;;  %p361_p7 = scmp.lt.s32.totalorder %s1213_s22, 6 }
  0x1e   : > { %p362_p8 = pnand %p1026_p6, %p361_p7 }
  0x1f   : > { %s368_s9 = sand.u32 (!%p362_p8), 1, %s1197_s18   ;;  %s1028_s10 = sshll.u32 (!%p362_p8), %s1205_s20, 4 }
  0x20   : > { %365 = sbr.rel (%p362_p8) target bundleno = 326 (0x146), region = 77  ;;  %s1027_s11 = sshll.u32 (!%p362_p8), %s368_s9, 6 }
  0x21   : > { %p422_p9 = scmp.lt.s32.totalorder (!%p362_p8), %s1028_s10, 79  ;;  %s1316_s16 = scalar_lea.vmem (!%p362_p8), [#allocation3], %s1027_s11 }
  0x22   : > { %p1030_p10 = scmp.ne.s32.totalorder (!%p362_p8), %s1205_s20, 0 }
  0x27   : > { %s1502_s10 = smov (!%p422_p9, %s1028_s10), 79  ;;  %458 = sbr.rel (%p1030_p10) target bundleno = 49 (0x31), region = 85 }
  0x28   : > { %s1029_s12 = sshll.u32 %s1502_s10, 2  ;;  %v1215_v16 = vmov (!%p1030_p10), 0.0  }
  0x29   : > { %s1314_s15 = scalar_lea.vmem %s1490_s1, %s1029_s12  ;;  %459 = vst [vmem:[#allocation2] sm:$0xff] (!%p1030_p10), %v1215_v16  ;;  %460 = vst [vmem:[#allocation2 + $0x8] sm:$0xff] (!%p1030_p10), %v1215_v16 }
  0x2a   : > { %461 = vst [vmem:[#allocation2 + $0x10] sm:$0xff] (!%p1030_p10), %v1215_v16  ;;  %462 = vst [vmem:[#allocation2 + $0x18] sm:$0xff] (!%p1030_p10), %v1215_v16 }
  0x2b   : > { %463 = vst [vmem:[#allocation2 + $0x20] sm:$0xff] (!%p1030_p10), %v1215_v16  ;;  %464 = vst [vmem:[#allocation2 + $0x28] sm:$0xff] (!%p1030_p10), %v1215_v16 }
  0x2c   : > { %465 = vst [vmem:[#allocation2 + $0x30] sm:$0xff] (!%p1030_p10), %v1215_v16  ;;  %466 = vst [vmem:[#allocation2 + $0x38] sm:$0xff] (!%p1030_p10), %v1215_v16 }
  0x2d   : > { %467 = vst [vmem:[#allocation2 + $0x40] sm:$0xff] (!%p1030_p10), %v1215_v16  ;;  %468 = vst [vmem:[#allocation2 + $0x48] sm:$0xff] (!%p1030_p10), %v1215_v16 }
  0x2e   : > { %469 = vst [vmem:[#allocation2 + $0x50] sm:$0xff] %v1215_v16  ;;  %470 = vst [vmem:[#allocation2 + $0x58] sm:$0xff] %v1215_v16 }
  0x2f   : > { %471 = vst [vmem:[#allocation2 + $0x60] sm:$0xff] %v1215_v16  ;;  %472 = vst [vmem:[#allocation2 + $0x68] sm:$0xff] %v1215_v16 }
  0x30   : > { %473 = vst [vmem:[#allocation2 + $0x70] sm:$0xff] %v1215_v16  ;;  %474 = vst [vmem:[#allocation2 + $0x78] sm:$0xff] %v1215_v16 }
  0x31 PF: > { %v1159_v17 = vld [vmem:[%s1314_s15] sm:$0xff]   ;;  %v1160_v18 = vld [vmem:[%s1314_s15 + $0x8] sm:$0xff]   ;;  %v1161_v19 = vld [vmem:[%s1314_s15 + $0x10] sm:$0xff]   ;;  %p1047_p11 = scmp.ne.s32.totalorder %s1205_s20, 4 }
  0x32   : > { %1070 = vmatprep.subr.bf16.mxu0 %v1159_v17  ;;  %1102 = vmatprep.subr.bf16.mxu1 %v1159_v17  ;;  %v1162_v20 = vld [vmem:[%s1314_s15 + $0x18] sm:$0xff]   ;;  %v1167_v21 = vld [vmem:[%s1316_s16] sm:$0xff]   ;;  %v1164_v24 = vld [vmem:[%s1314_s15 + $0x28] sm:$0xff]  }
  0x33   : > { %1071 = vmatpush3.bf16.msra.mxu0 %v1159_v17  ;;  %1110 = vmatpush3.bf16.msra.mxu1 %v1159_v17  ;;  %v1168_v22 = vld [vmem:[%s1316_s16 + $0x20] sm:$0xff]   ;;  %v1165_v25 = vld [vmem:[%s1314_s15 + $0x30] sm:$0xff]   ;;  %v1166_v26 = vld [vmem:[%s1314_s15 + $0x38] sm:$0xff]  }
  0x34   : > { %1072 = vmatprep.subr.bf16.mxu0 %v1160_v18  ;;  %1103 = vmatprep.subr.bf16.mxu1 %v1160_v18  ;;  %v1163_v23 = vld [vmem:[%s1314_s15 + $0x20] sm:$0xff]   ;;  %v1169_v27 = vld [vmem:[%s1316_s16 + $0x8] sm:$0xff]   ;;  %v1171_v29 = vld [vmem:[%s1316_s16 + $0x10] sm:$0xff]  }
  0x35   : > { %1086 = vmatprep.mubr.bf16.mxu0 %v1167_v21  ;;  %1094 = vmatprep.mubr.bf16.mxu1 %v1168_v22  ;;  %v1170_v28 = vld [vmem:[%s1316_s16 + $0x28] sm:$0xff]   ;;  %v1172_v30 = vld [vmem:[%s1316_s16 + $0x30] sm:$0xff]   ;;  %v1173_v31 = vld [vmem:[%s1316_s16 + $0x18] sm:$0xff]  }
  0x36   : > { %v1174_v32 = vld [vmem:[%s1316_s16 + $0x38] sm:$0xff]   ;;  %v477_v33 = vld [vmem:[#allocation2 + $0x10] sm:$0xff]  ;;  %v475_v35 = vld [vmem:[#allocation2] sm:$0xff] }
  0x37   : > { %1073 = vmatpush3.bf16.msra.mxu0 %v1160_v18  ;;  %1111 = vmatpush3.bf16.msra.mxu1 %v1160_v18  ;;  %v485_v34 = vld [vmem:[#allocation2 + $0x50] sm:$0xff]  ;;  %v483_v36 = vld [vmem:[#allocation2 + $0x40] sm:$0xff]  ;;  %v478_v39 = vld [vmem:[#allocation2 + $0x18] sm:$0xff] }
  0x38   : > { %1074 = vmatprep.subr.bf16.mxu0 %v1161_v19  ;;  %1104 = vmatprep.subr.bf16.mxu1 %v1161_v19  ;;  %v486_v40 = vld [vmem:[#allocation2 + $0x58] sm:$0xff]  ;;  %v476_v45 = vld [vmem:[#allocation2 + $0x8] sm:$0xff]  ;;  %v481_v57 = vld [vmem:[#allocation2 + $0x30] sm:$0xff] }
  0x39   : > { %v484_v46 = vld [vmem:[#allocation2 + $0x48] sm:$0xff]  ;;  %v489_v58 = vld [vmem:[#allocation2 + $0x70] sm:$0xff]  ;;  %v479_v59 = vld [vmem:[#allocation2 + $0x20] sm:$0xff] }
  0x3a   : > { %v487_v60 = vld [vmem:[#allocation2 + $0x60] sm:$0xff]  ;;  %v482_v63 = vld [vmem:[#allocation2 + $0x38] sm:$0xff]  ;;  %v480_v5 = vld [vmem:[#allocation2 + $0x28] sm:$0xff] }
  0x3b   : > { %1075 = vmatpush3.bf16.msra.mxu0 %v1161_v19  ;;  %1112 = vmatpush3.bf16.msra.mxu1 %v1161_v19  ;;  %v490_v0 = vld [vmem:[#allocation2 + $0x78] sm:$0xff]  ;;  %v488_v6 = vld [vmem:[#allocation2 + $0x68] sm:$0xff]  ;;  %v1339_v18 = vld [vmem:[%s1491_s2] ss:$0 sm:$0xff] (!%p1047_p11) }
  0x3c   : > { %1076 = vmatprep.subr.bf16.mxu0 %v1162_v20  ;;  %1105 = vmatprep.subr.bf16.mxu1 %v1162_v20  ;;  %v1344_v19 = vld [vmem:[%s1492_s3] ss:$0 sm:$0xff] (!%p1047_p11) }
  0x3d   : > { %v814_v22 = vld [vmem:[%s1493_s4] sm:$0xff] (!%p1047_p11) }
  0x3f   : > { %1077 = vmatpush3.bf16.msra.mxu0 %v1162_v20  ;;  %1113 = vmatpush3.bf16.msra.mxu1 %v1162_v20 }
  0x40   : > { %1078 = vmatprep.subr.bf16.mxu0 %v1163_v23  ;;  %1106 = vmatprep.subr.bf16.mxu1 %v1163_v23 }
  0x43   : > { %1079 = vmatpush3.bf16.msra.mxu0 %v1163_v23  ;;  %1114 = vmatpush3.bf16.msra.mxu1 %v1163_v23 }
  0x44   : > { %1080 = vmatprep.subr.bf16.mxu0 %v1164_v24  ;;  %1107 = vmatprep.subr.bf16.mxu1 %v1164_v24 }
  0x47   : > { %1081 = vmatpush3.bf16.msra.mxu0 %v1164_v24  ;;  %1115 = vmatpush3.bf16.msra.mxu1 %v1164_v24 }
  0x48   : > { %1082 = vmatprep.subr.bf16.mxu0 %v1165_v25  ;;  %1108 = vmatprep.subr.bf16.mxu1 %v1165_v25 }
  0x4b   : > { %1083 = vmatpush3.bf16.msra.mxu0 %v1165_v25  ;;  %1116 = vmatpush3.bf16.msra.mxu1 %v1165_v25 }
  0x4c   : > { %1084 = vmatprep.subr.bf16.mxu0 %v1166_v26  ;;  %1109 = vmatprep.subr.bf16.mxu1 %v1166_v26 }
  0x4f   : > { %1085 = vmatpush3.bf16.msra.mxu0 %v1166_v26  ;;  %1117 = vmatpush3.bf16.msra.mxu1 %v1166_v26 }
  0x52   : > { %1087 = vmatmul.mubr.bf16.vlgmr.msra.gmra.mrb[0].mxu0 %v1169_v27  ;;  %1095 = vmatmul.mubr.bf16.vlgmr.msra.gmra.mrb[0].mxu1 %v1170_v28  ;;  %v815_v27 = vld [vmem:[%s1493_s4 + $0x8] sm:$0xff] (!%p1047_p11) }
  0x53   : > { %1090 = vmatprep.mubr.bf16.mxu0 %v1171_v29  ;;  %1098 = vmatprep.mubr.bf16.mxu1 %v1172_v30  ;;  %v816_v29 = vld [vmem:[%s1493_s4 + $0x10] sm:$0xff] (!%p1047_p11) }
  0x5a   : > { %1091 = vmatmul.mubr.bf16.gmra.mrb[4].mxu0 %v1173_v31  ;;  %1099 = vmatmul.mubr.bf16.gmra.mrb[4].mxu1 %v1174_v32 }
 0x125   : > { %v1088_v37 = vpop.f32.mrb[0].mxu0  ;;  %v1096_v38 = vpop.f32.mrb[0].mxu1 }
 0x126   : > { %v718_v41 = vadd.f32 %v1088_v37, %v477_v33  ;;  %v726_v42 = vadd.f32 %v1096_v38, %v485_v34  ;;  %v653_v43 = vpop.f32.mrb[1].mxu0  ;;  %v685_v44 = vpop.f32.mrb[1].mxu1  ;;  %v817_v33 = vld [vmem:[%s1493_s4 + $0x18] sm:$0xff] (!%p1047_p11) }
 0x127   : > { %v716_v47 = vadd.f32 %v653_v43, %v475_v35  ;;  %v724_v48 = vadd.f32 %v685_v44, %v483_v36  ;;  %v1089_v49 = vpop.f32.mrb[2].mxu0  ;;  %v1097_v50 = vpop.f32.mrb[2].mxu1 }
 0x128   : > { %734 = vst [vmem:[#allocation2 + $0x10] sm:$0xff] %v718_v41  ;;  %742 = vst [vmem:[#allocation2 + $0x50] sm:$0xff] %v726_v42  ;;  %v719_v51 = vadd.f32 %v1089_v49, %v478_v39  ;;  %v727_v52 = vadd.f32 %v1097_v50, %v486_v40  ;;  %v656_v53 = vpop.f32.mrb[3].mxu0  ;;  %v688_v54 = vpop.f32.mrb[3].mxu1  ;;  %v818_v40 = vld [vmem:[%s1493_s4 + $0x20] sm:$0xff] (!%p1047_p11) }
 0x129   : > { %732 = vst [vmem:[#allocation2] sm:$0xff] %v716_v47  ;;  %740 = vst [vmem:[#allocation2 + $0x40] sm:$0xff] %v724_v48  ;;  %v717_v55 = vadd.f32 %v656_v53, %v476_v45  ;;  %v725_v56 = vadd.f32 %v688_v54, %v484_v46  ;;  %v819_v45 = vld [vmem:[%s1493_s4 + $0x28] sm:$0xff] (!%p1047_p11)  ;;  %v820_v53 = vld [vmem:[%s1493_s4 + $0x30] sm:$0xff] (!%p1047_p11) }
 0x12a   : > { %735 = vst [vmem:[#allocation2 + $0x18] sm:$0xff] %v719_v51  ;;  %743 = vst [vmem:[#allocation2 + $0x58] sm:$0xff] %v727_v52  ;;  %v821_v54 = vld [vmem:[%s1493_s4 + $0x38] sm:$0xff] (!%p1047_p11) }
 0x12b   : > { %733 = vst [vmem:[#allocation2 + $0x8] sm:$0xff] %v717_v55  ;;  %741 = vst [vmem:[#allocation2 + $0x48] sm:$0xff] %v725_v56 }
 0x12d   : > { %v1092_v61 = vpop.f32.mrb[4].mxu0  ;;  %v1100_v62 = vpop.f32.mrb[4].mxu1  ;;  %751 = sbr.rel (%p1047_p11) target bundleno = 326 (0x146), region = 89 }
 0x12e   : > { %v722_v1 = vadd.f32 %v1092_v61, %v481_v57  ;;  %v730_v2 = vadd.f32 %v1100_v62, %v489_v58  ;;  %v669_v3 = vpop.f32.mrb[5].mxu0  ;;  %v701_v4 = vpop.f32.mrb[5].mxu1 }
 0x12f   : > { %v720_v7 = vadd.f32 %v669_v3, %v479_v59  ;;  %v728_v8 = vadd.f32 %v701_v4, %v487_v60  ;;  %v1093_v9 = vpop.f32.mrb[6].mxu0  ;;  %v1101_v10 = vpop.f32.mrb[6].mxu1  ;;  %v754_v24 = vld [vmem:[#allocation2 + $0x10] sm:$0xff] (!%p1047_p11) }
 0x130   : > { %738 = vst [vmem:[#allocation2 + $0x30] sm:$0xff] %v722_v1  ;;  %746 = vst [vmem:[#allocation2 + $0x70] sm:$0xff] %v730_v2  ;;  %v723_v11 = vadd.f32 %v1093_v9, %v482_v63  ;;  %v731_v12 = vadd.f32 %v1101_v10, %v490_v0  ;;  %v672_v13 = vpop.f32.mrb[7].mxu0  ;;  %v704_v14 = vpop.f32.mrb[7].mxu1  ;;  %v752_v17 = vld [vmem:[#allocation2] sm:$0xff] (!%p1047_p11)  ;;  %v777_v28 = vmul.f32 (!%p1047_p11), %v1339_v18, %v754_v24  ;;  %v762_v60 = vld [vmem:[#allocation2 + $0x50] sm:$0xff] (!%p1047_p11) }
 0x131   : > { %736 = vst [vmem:[#allocation2 + $0x20] sm:$0xff] %v720_v7  ;;  %744 = vst [vmem:[#allocation2 + $0x60] sm:$0xff] %v728_v8  ;;  %v721_v15 = vadd.f32 %v672_v13, %v480_v5  ;;  %v729_v16 = vadd.f32 %v704_v14, %v488_v6  ;;  %v775_v20 = vmul.f32 (!%p1047_p11), %v1339_v18, %v752_v17  ;;  %v755_v25 = vld [vmem:[#allocation2 + $0x18] sm:$0xff] (!%p1047_p11)  ;;  %v760_v48 = vld [vmem:[#allocation2 + $0x40] sm:$0xff] (!%p1047_p11) }
 0x132   : > { %739 = vst [vmem:[#allocation2 + $0x38] sm:$0xff] %v723_v11  ;;  %747 = vst [vmem:[#allocation2 + $0x78] sm:$0xff] %v731_v12  ;;  %v753_v21 = vld [vmem:[#allocation2 + $0x8] sm:$0xff] (!%p1047_p11)  ;;  %v778_v30 = vmul.f32 (!%p1047_p11), %v1339_v18, %v755_v25  ;;  %v800_v38 = vadd.f32 (!%p1047_p11), %v1344_v19, %v777_v28  ;;  %v763_v61 = vld [vmem:[#allocation2 + $0x58] sm:$0xff] (!%p1047_p11)  ;;  %v783_v1 = vmul.f32 (!%p1047_p11), %v1339_v18, %v760_v48 }
 0x133   : > { %737 = vst [vmem:[#allocation2 + $0x28] sm:$0xff] %v721_v15  ;;  %745 = vst [vmem:[#allocation2 + $0x68] sm:$0xff] %v729_v16  ;;  %v776_v23 = vmul.f32 (!%p1047_p11), %v1339_v18, %v753_v21  ;;  %v798_v26 = vadd.f32 (!%p1047_p11), %v1344_v19, %v775_v20  ;;  %v761_v55 = vld [vmem:[#allocation2 + $0x48] sm:$0xff] (!%p1047_p11)  ;;  %v822_v6 = vld [vmem:[%s1493_s4 + $0x40] sm:$0xff] (!%p1047_p11)  ;;  %v785_v12 = vmul.f32 (!%p1047_p11), %v1339_v18, %v762_v60 }
 0x134   : > { %v801_v39 = vadd.f32 %v1344_v19, %v778_v30  ;;  %v832_v50 = vadd.f32 %v816_v29, %v800_v38  ;;  %v784_v7 = vmul.f32 %v1339_v18, %v761_v55  ;;  %v806_v10 = vadd.f32 %v1344_v19, %v783_v1  ;;  %v823_v11 = vld [vmem:[%s1493_s4 + $0x48] sm:$0xff]  ;;  %v824_v21 = vld [vmem:[%s1493_s4 + $0x50] sm:$0xff] }
 0x135   : > { %v799_v32 = vadd.f32 %v1344_v19, %v776_v23  ;;  %v830_v37 = vadd.f32 %v814_v22, %v798_v26  ;;  %v786_v13 = vmul.f32 %v1339_v18, %v763_v61  ;;  %v825_v22 = vld [vmem:[%s1493_s4 + $0x58] sm:$0xff]  ;;  %v808_v25 = vadd.f32 %v1344_v19, %v785_v12  ;;  %v828_v38 = vld [vmem:[%s1493_s4 + $0x70] sm:$0xff] }
 0x136   : > { %v833_v51 = vadd.f32 %v817_v33, %v801_v39  ;;  %v848_v62 = vmax.f32 %v832_v50, 0.0  ;;  %v807_v20 = vadd.f32 %v1344_v19, %v784_v7  ;;  %v838_v24 = vadd.f32 %v822_v6, %v806_v10  ;;  %v829_v39 = vld [vmem:[%s1493_s4 + $0x78] sm:$0xff] }
 0x137   : > { %v758_v36 = vld [vmem:[#allocation2 + $0x30] sm:$0xff]  ;;  %v831_v43 = vadd.f32 %v815_v27, %v799_v32  ;;  %v846_v49 = vmax.f32 %v830_v37, 0.0  ;;  %v809_v26 = vadd.f32 %v1344_v19, %v786_v13  ;;  %v826_v27 = vld [vmem:[%s1493_s4 + $0x60] sm:$0xff] }
 0x138   : > { %v756_v31 = vld [vmem:[#allocation2 + $0x20] sm:$0xff]  ;;  %v781_v46 = vmul.f32 %v1339_v18, %v758_v36  ;;  %v849_v63 = vmax.f32 %v833_v51, 0.0  ;;  %864 = vst [vmem:[%s1494_s5 + $0x10] sm:$0xff] %v848_v62  ;;  %v766_v14 = vld [vmem:[#allocation2 + $0x70] sm:$0xff]  ;;  %v839_v29 = vadd.f32 %v823_v11, %v807_v20 }
 0x139   : > { %v779_v34 = vmul.f32 %v1339_v18, %v756_v31  ;;  %v759_v42 = vld [vmem:[#allocation2 + $0x38] sm:$0xff]  ;;  %v847_v56 = vmax.f32 %v831_v43, 0.0  ;;  %862 = vst [vmem:[%s1494_s5] sm:$0xff] %v846_v49  ;;  %v764_v2 = vld [vmem:[#allocation2 + $0x60] sm:$0xff]  ;;  %v827_v31 = vld [vmem:[%s1493_s4 + $0x68] sm:$0xff]  ;;  %v789_v32 = vmul.f32 %v1339_v18, %v766_v14  ;;  %v841_v36 = vadd.f32 %v825_v22, %v809_v26 }
 0x13a   : > { %v757_v35 = vld [vmem:[#allocation2 + $0x28] sm:$0xff]  ;;  %v782_v47 = vmul.f32 %v1339_v18, %v759_v42  ;;  %v804_v58 = vadd.f32 %v1344_v19, %v781_v46  ;;  %865 = vst [vmem:[%s1494_s5 + $0x18] sm:$0xff] %v849_v63  ;;  %v767_v15 = vld [vmem:[#allocation2 + $0x78] sm:$0xff]  ;;  %v787_v23 = vmul.f32 %v1339_v18, %v764_v2 }
 0x13b   : > { %v780_v41 = vmul.f32 %v1339_v18, %v757_v35  ;;  %v802_v44 = vadd.f32 %v1344_v19, %v779_v34  ;;  %863 = vst [vmem:[%s1494_s5 + $0x8] sm:$0xff] %v847_v56  ;;  %v765_v8 = vld [vmem:[#allocation2 + $0x68] sm:$0xff]  ;;  %v790_v33 = vmul.f32 %v1339_v18, %v767_v15  ;;  %v854_v34 = vmax.f32 %v838_v24, 0.0 }
 0x13c   : > { %v805_v59 = vadd.f32 %v1344_v19, %v782_v47  ;;  %v836_v4 = vadd.f32 %v820_v53, %v804_v58  ;;  %v788_v28 = vmul.f32 %v1339_v18, %v765_v8  ;;  %v810_v30 = vadd.f32 %v1344_v19, %v787_v23 }
 0x13d   : > { %v803_v52 = vadd.f32 %v1344_v19, %v780_v41  ;;  %v834_v57 = vadd.f32 %v818_v40, %v802_v44  ;;  %v840_v35 = vadd.f32 %v824_v21, %v808_v25  ;;  %v855_v40 = vmax.f32 %v839_v29, 0.0  ;;  %870 = vst [vmem:[%s1494_s5 + $0x40] sm:$0xff] %v854_v34 }
 0x13e   : > { %v837_v5 = vadd.f32 %v821_v54, %v805_v59  ;;  %v852_v16 = vmax.f32 %v836_v4, 0.0  ;;  %v811_v37 = vadd.f32 %v1344_v19, %v788_v28  ;;  %v842_v41 = vadd.f32 %v826_v27, %v810_v30 }
 0x13f   : > { %v835_v0 = vadd.f32 %v819_v45, %v803_v52  ;;  %v850_v3 = vmax.f32 %v834_v57, 0.0  ;;  %v812_v42 = vadd.f32 %v1344_v19, %v789_v32  ;;  %v813_v43 = vadd.f32 %v1344_v19, %v790_v33  ;;  %871 = vst [vmem:[%s1494_s5 + $0x48] sm:$0xff] %v855_v40 }
 0x140   : > { %v853_v17 = vmax.f32 %v837_v5, 0.0  ;;  %868 = vst [vmem:[%s1494_s5 + $0x30] sm:$0xff] %v852_v16  ;;  %v856_v18 = vmax.f32 %v840_v35, 0.0  ;;  %v857_v44 = vmax.f32 %v841_v36, 0.0  ;;  %v843_v45 = vadd.f32 %v827_v31, %v811_v37 }
 0x141   : > { %v851_v9 = vmax.f32 %v835_v0, 0.0  ;;  %866 = vst [vmem:[%s1494_s5 + $0x20] sm:$0xff] %v850_v3  ;;  %v858_v46 = vmax.f32 %v842_v41, 0.0  ;;  %v844_v47 = vadd.f32 %v828_v38, %v812_v42  ;;  %v845_v48 = vadd.f32 %v829_v39, %v813_v43 }
 0x142   : > { %869 = vst [vmem:[%s1494_s5 + $0x38] sm:$0xff] %v853_v17  ;;  %872 = vst [vmem:[%s1494_s5 + $0x50] sm:$0xff] %v856_v18  ;;  %v859_v19 = vmax.f32 %v843_v45, 0.0 }
 0x143   : > { %867 = vst [vmem:[%s1494_s5 + $0x28] sm:$0xff] %v851_v9  ;;  %873 = vst [vmem:[%s1494_s5 + $0x58] sm:$0xff] %v857_v44  ;;  %v860_v49 = vmax.f32 %v844_v47, 0.0  ;;  %v861_v50 = vmax.f32 %v845_v48, 0.0 }
 0x144   : > { %874 = vst [vmem:[%s1494_s5 + $0x60] sm:$0xff] %v858_v46  ;;  %875 = vst [vmem:[%s1494_s5 + $0x68] sm:$0xff] %v859_v19 }
 0x145   : > { %876 = vst [vmem:[%s1494_s5 + $0x70] sm:$0xff] %v860_v49  ;;  %877 = vst [vmem:[%s1494_s5 + $0x78] sm:$0xff] %v861_v50 }
 0x146 PF: > { %s15_s22 = sadd.s32 1, %s1213_s22   ;;  %s1495_s18 = smov %s1201_s19 }
 0x147   : > { %p12_p12 = scmp.ge.s32.totalorder %s15_s22, 7   ;;  %s1496_s19 = smov %s1281_s26 }
 0x148   : > { %s1497_s20 = smov %s1209_s21  ;;  %s1498_s21 = smov %s1500_s23 }
 0x149   :  { %14 = sbr.rel (!%p12_p12) target bundleno = 3 (0x3), region = 136 }

// kernel: pretrained_model_forward.28
= control target key start
LH: loop header
LB: loop body
LE: loop exit
PB: predicated region body
PF: predicated region fallthrough
CT: control target
= control target key end

     0   :  { %s832_s15 = smov 0   ;;  %s834_s16 = smov 0   ;;  %s934_s0 = inlined_call_operand.vmem [shape: bf16[32,640], index: 0, kind: input, shape index: {}]   ;;  %s935_s1 = inlined_call_operand.vmem [shape: bf16[640,128], index: 1, kind: input, shape index: {}]   ;;  %s936_s2 = inlined_call_operand.vmem [shape: f32[1,128], index: 2, kind: input, shape index: {}]   ;;  %s937_s3 = inlined_call_operand.vmem [shape: f32[1,128], index: 3, kind: input, shape index: {}]   ;;  %s938_s4 = inlined_call_operand.vmem [shape: f32[32,128], index: 4, kind: output, shape index: {}]  }
   0x1   :  { %s836_s17 = smov 0   ;;  %s838_s18 = smov 0  }
   0x2   :  { %s840_s19 = smov 0  }
   0x3 LB: > { %s26_s20 = sadd.s32 1, %s800_s18  ;;  %p49_p1 = scmp.ne.s32.totalorder %s792_s16, %s788_s15  ;;  %s804_s19 = sphi %s840_s19, %s14_s19   ;;  %s800_s18 = sphi %s838_s18, %s942_s18   ;;  %s796_s17 = sphi %s836_s17, %s941_s17   ;;  %s792_s16 = sphi %s834_s16, %s940_s16   ;;  %s788_s15 = sphi %s832_s15, %s939_s15  }
   0x4   : > { %p27_p0 = scmp.ge.s32.totalorder %s26_s20, 5  ;;  %p50_p2 = scmp.eq.s32.totalorder %s804_s19, 0 }
   0x5   : > { %s42_s22 = sadd.s32 1, %s792_s16  ;;  %p660_p5 = scmp.ge.s32.totalorder %s804_s19, 5 }
   0x6   : > { %s944_s20 = smov (%p27_p0, %s26_s20), 0  ;;  %p51_p3 = por %p50_p2, %p49_p1 }
   0x7   : > { %s38_s21 = ssub.s32 %s800_s18, %s944_s20  ;;  %195 = sbr.rel (%p660_p5) target bundleno = 21 (0x15), region = 24 }
   0x8   : > { %p40_p4 = scmp.eq.s32.totalorder %s38_s21, 0 }
   0xa   : > { %s867_s23 = scalar_select %p40_p4, %s792_s16, %s42_s22  }
   0xe   : > { %198 = sbr.rel (!%p51_p3) target bundleno = 21 (0x15), region = 28  ;;  %s200_s24 = sand.u32 (%p51_p3), 1, %s792_s16  }
   0xf   : > { %s662_s25 = sshll.u32 (%p51_p3), %s800_s18, 2  ;;  %s661_s26 = sshll.u32 (%p51_p3), %s200_s24, 4 }
  0x10   : > { %s207_s29 = scalar_lea.vmem (%p51_p3), %s934_s0, %s662_s25  ;;  %s202_s30 = scalar_lea.vmem (%p51_p3), [#allocation3], %s661_s26 }
  0x11   : > { %v223_v0 = vld [vmem:[%s207_s29] sm:$0xf] (%p51_p3)  ;;  %v225_v1 = vld [vmem:[%s207_s29 + $0x14] sm:$0xf] (%p51_p3)  ;;  %v227_v2 = vld [vmem:[%s207_s29 + $0x28] sm:$0xf] (%p51_p3) }
  0x12   : > { %224 = vst [vmem:[%s202_s30] sm:$0xf] (%p51_p3), %v223_v0  ;;  %226 = vst [vmem:[%s202_s30 + $0x4] sm:$0xf] (%p51_p3), %v225_v1  ;;  %v229_v3 = vld [vmem:[%s207_s29 + $0x3c] sm:$0xf] (%p51_p3) }
  0x13   : > { %228 = vst [vmem:[%s202_s30 + $0x8] sm:$0xf] (%p51_p3), %v227_v2  ;;  %230 = vst [vmem:[%s202_s30 + $0xc] sm:$0xf] (%p51_p3), %v229_v3 }
  0x15 PF: > { %p663_p6 = scmp.ge.s32.totalorder %s804_s19, 1  ;;  %p272_p7 = scmp.lt.s32.totalorder %s804_s19, 6 }
  0x17   : > { %p273_p8 = pnand %p663_p6, %p272_p7 }
  0x18   : > { %s279_s5 = sand.u32 (!%p273_p8), 1, %s788_s15   ;;  %s665_s6 = sshll.u32 (!%p273_p8), %s796_s17, 4 }
  0x19   : > { %276 = sbr.rel (%p273_p8) target bundleno = 304 (0x130), region = 73  ;;  %s879_s7 = sshll.u32 (!%p273_p8), %s279_s5, 4 }
  0x1a   : > { %p323_p9 = scmp.lt.s32.totalorder (!%p273_p8), %s665_s6, 79  ;;  %s281_s12 = scalar_lea.vmem (!%p273_p8), [#allocation3], %s879_s7 }
  0x1b   : > { %p667_p10 = scmp.ne.s32.totalorder (!%p273_p8), %s796_s17, 0 }
  0x20   : > { %s946_s6 = smov (!%p323_p9, %s665_s6), 79  ;;  %350 = sbr.rel (%p667_p10) target bundleno = 39 (0x27), region = 81 }
  0x21   : > { %s666_s8 = sshll.u32 %s946_s6, 2  ;;  %v806_v4 = vmov (!%p667_p10), 0.0  }
  0x22   : > { %s884_s11 = scalar_lea.vmem %s935_s1, %s666_s8  ;;  %351 = vst [vmem:[#allocation2] sm:$0xff] (!%p667_p10), %v806_v4  ;;  %352 = vst [vmem:[#allocation2 + $0x8] sm:$0xff] (!%p667_p10), %v806_v4 }
  0x23   : > { %353 = vst [vmem:[#allocation2 + $0x10] sm:$0xff] (!%p667_p10), %v806_v4  ;;  %354 = vst [vmem:[#allocation2 + $0x18] sm:$0xff] (!%p667_p10), %v806_v4 }
  0x27 PF: > { %v756_v5 = vld [vmem:[%s884_s11] sm:$0xff]   ;;  %v757_v6 = vld [vmem:[%s884_s11 + $0x8] sm:$0xff]   ;;  %v758_v7 = vld [vmem:[%s884_s11 + $0x10] sm:$0xff]   ;;  %p678_p11 = scmp.ne.s32.totalorder %s796_s17, 4 }
  0x28   : > { %695 = vmatprep.subr.bf16.mxu0 %v756_v5  ;;  %v759_v8 = vld [vmem:[%s884_s11 + $0x18] sm:$0xff]   ;;  %v764_v9 = vld [vmem:[%s281_s12] sm:$0xff]   ;;  %v761_v11 = vld [vmem:[%s884_s11 + $0x28] sm:$0xff]  }
  0x29   : > { %696 = vmatpush3.bf16.msra.mxu0 %v756_v5  ;;  %711 = vmatprep.mubr.bf16.mxu0 %v764_v9  ;;  %v760_v10 = vld [vmem:[%s884_s11 + $0x20] sm:$0xff]   ;;  %v762_v12 = vld [vmem:[%s884_s11 + $0x30] sm:$0xff]   ;;  %v763_v13 = vld [vmem:[%s884_s11 + $0x38] sm:$0xff]  }
  0x2a   : > { %697 = vmatprep.subr.bf16.mxu0 %v757_v6  ;;  %v765_v14 = vld [vmem:[%s281_s12 + $0x8] sm:$0xff]   ;;  %v357_v15 = vld [vmem:[#allocation2 + $0x10] sm:$0xff]  ;;  %v355_v16 = vld [vmem:[#allocation2] sm:$0xff] }
  0x2b   : > { %v358_v18 = vld [vmem:[#allocation2 + $0x18] sm:$0xff]  ;;  %v356_v21 = vld [vmem:[#allocation2 + $0x8] sm:$0xff]  ;;  %v679_v28 = vld [vmem:[%s936_s2] ss:$0 sm:$0xff] (!%p678_p11) }
  0x2c   : > { %v680_v29 = vld [vmem:[%s937_s3] ss:$0 sm:$0xff] (!%p678_p11) }
  0x2d   : > { %698 = vmatpush3.bf16.msra.mxu0 %v757_v6 }
  0x2e   : > { %699 = vmatprep.subr.bf16.mxu0 %v758_v7 }
  0x31   : > { %700 = vmatpush3.bf16.msra.mxu0 %v758_v7 }
  0x32   : > { %701 = vmatprep.subr.bf16.mxu0 %v759_v8 }
  0x35   : > { %702 = vmatpush3.bf16.msra.mxu0 %v759_v8 }
  0x36   : > { %703 = vmatprep.subr.bf16.mxu0 %v760_v10 }
  0x39   : > { %704 = vmatpush3.bf16.msra.mxu0 %v760_v10 }
  0x3a   : > { %705 = vmatprep.subr.bf16.mxu0 %v761_v11 }
  0x3d   : > { %706 = vmatpush3.bf16.msra.mxu0 %v761_v11 }
  0x3e   : > { %707 = vmatprep.subr.bf16.mxu0 %v762_v12 }
  0x41   : > { %708 = vmatpush3.bf16.msra.mxu0 %v762_v12 }
  0x42   : > { %709 = vmatprep.subr.bf16.mxu0 %v763_v13 }
  0x45   : > { %710 = vmatpush3.bf16.msra.mxu0 %v763_v13 }
  0x48   : > { %712 = vmatmul.mubr.bf16.vlgmr.msra.gmra.mrb[0].mxu0 %v765_v14 }
 0x11b   : > { %v713_v17 = vpop.f32.mrb[0].mxu0  ;;  %499 = sbr.rel (%p678_p11) target bundleno = 304 (0x130), region = 85 }
 0x11c   : > { %v490_v19 = vadd.f32 %v713_v17, %v357_v15  ;;  %v473_v20 = vpop.f32.mrb[1].mxu0 }
 0x11d   : > { %v488_v22 = vadd.f32 %v473_v20, %v355_v16  ;;  %v714_v23 = vpop.f32.mrb[2].mxu0 }
 0x11e   : > { %494 = vst [vmem:[#allocation2 + $0x10] sm:$0xff] %v490_v19  ;;  %v491_v24 = vadd.f32 %v714_v23, %v358_v18  ;;  %v476_v25 = vpop.f32.mrb[3].mxu0 }
 0x11f   : > { %492 = vst [vmem:[#allocation2] sm:$0xff] %v488_v22  ;;  %v489_v26 = vadd.f32 %v476_v25, %v356_v21 }
 0x120   : > { %495 = vst [vmem:[#allocation2 + $0x18] sm:$0xff] %v491_v24 }
 0x121   : > { %493 = vst [vmem:[#allocation2 + $0x8] sm:$0xff] %v489_v26 }
 0x125   : > { %v502_v32 = vld [vmem:[#allocation2 + $0x10] sm:$0xff] }
 0x126   : > { %v500_v27 = vld [vmem:[#allocation2] sm:$0xff]  ;;  %v513_v35 = vmul.f32 %v679_v28, %v502_v32 }
 0x127   : > { %v511_v30 = vmul.f32 %v679_v28, %v500_v27  ;;  %v503_v33 = vld [vmem:[#allocation2 + $0x18] sm:$0xff] }
 0x128   : > { %v501_v31 = vld [vmem:[#allocation2 + $0x8] sm:$0xff]  ;;  %v514_v36 = vmul.f32 %v679_v28, %v503_v33  ;;  %v524_v39 = vadd.f32 %v680_v29, %v513_v35 }
 0x129   : > { %v512_v34 = vmul.f32 %v679_v28, %v501_v31  ;;  %v522_v37 = vadd.f32 %v680_v29, %v511_v30 }
 0x12a   : > { %v525_v40 = vadd.f32 %v680_v29, %v514_v36  ;;  %v528_v43 = vmax.f32 %v524_v39, 0.0 }
 0x12b   : > { %v523_v38 = vadd.f32 %v680_v29, %v512_v34  ;;  %v526_v41 = vmax.f32 %v522_v37, 0.0 }
 0x12c   : > { %v529_v44 = vmax.f32 %v525_v40, 0.0  ;;  %532 = vst [vmem:[%s938_s4 + $0x10] sm:$0xff] %v528_v43 }
 0x12d   : > { %v527_v42 = vmax.f32 %v523_v38, 0.0  ;;  %530 = vst [vmem:[%s938_s4] sm:$0xff] %v526_v41 }
 0x12e   : > { %533 = vst [vmem:[%s938_s4 + $0x18] sm:$0xff] %v529_v44 }
 0x12f   : > { %531 = vst [vmem:[%s938_s4 + $0x8] sm:$0xff] %v527_v42 }
 0x130 PF: > { %s14_s19 = sadd.s32 1, %s804_s19   ;;  %s939_s15 = smov %s792_s16 }
 0x131   : > { %p11_p12 = scmp.ge.s32.totalorder %s14_s19, 7   ;;  %s940_s16 = smov %s867_s23 }
 0x132   : > { %s941_s17 = smov %s800_s18  ;;  %s942_s18 = smov %s944_s20 }
 0x133   :  { %13 = sbr.rel (!%p11_p12) target bundleno = 3 (0x3), region = 129 }

// kernel: pretrained_model_forward.29
= control target key start
LH: loop header
LB: loop body
LE: loop exit
PB: predicated region body
PF: predicated region fallthrough
CT: control target
= control target key end

     0   :  { %s329_s1 = inlined_call_operand.vmem [shape: bf16[128,128], index: 1, kind: input, shape index: {}]   ;;  %s330_s0 = inlined_call_operand.vmem [shape: bf16[32,128], index: 0, kind: input, shape index: {}]   ;;  %s331_s2 = inlined_call_operand.vmem [shape: f32[1,128], index: 2, kind: input, shape index: {}]   ;;  %s332_s3 = inlined_call_operand.vmem [shape: f32[1,128], index: 3, kind: input, shape index: {}]   ;;  %s333_s4 = inlined_call_operand.vmem [shape: f32[32,128], index: 4, kind: output, shape index: {}]  }
   0x1   :  { %v246_v0 = vld [vmem:[%s329_s1] sm:$0xff]   ;;  %v247_v1 = vld [vmem:[%s329_s1 + $0x8] sm:$0xff]   ;;  %v248_v2 = vld [vmem:[%s329_s1 + $0x10] sm:$0xff]  }
   0x2   :  { %226 = vmatprep.subr.bf16.mxu0 %v246_v0  ;;  %v249_v3 = vld [vmem:[%s329_s1 + $0x18] sm:$0xff]   ;;  %v254_v4 = vld [vmem:[%s330_s0] sm:$0xff]   ;;  %v251_v6 = vld [vmem:[%s329_s1 + $0x28] sm:$0xff]  }
   0x3   :  { %227 = vmatpush3.bf16.msra.mxu0 %v246_v0  ;;  %242 = vmatprep.mubr.bf16.mxu0 %v254_v4  ;;  %v250_v5 = vld [vmem:[%s329_s1 + $0x20] sm:$0xff]   ;;  %v252_v7 = vld [vmem:[%s329_s1 + $0x30] sm:$0xff]   ;;  %v253_v8 = vld [vmem:[%s329_s1 + $0x38] sm:$0xff]  }
   0x4   :  { %228 = vmatprep.subr.bf16.mxu0 %v247_v1  ;;  %v255_v9 = vld [vmem:[%s330_s0 + $0x8] sm:$0xff]   ;;  %v214_v10 = vld [vmem:[%s331_s2] ss:$0 sm:$0xff] }
   0x5   :  { %v215_v12 = vld [vmem:[%s332_s3] ss:$0 sm:$0xff] }
   0x7   :  { %229 = vmatpush3.bf16.msra.mxu0 %v247_v1 }
   0x8   :  { %230 = vmatprep.subr.bf16.mxu0 %v248_v2 }
   0xb   :  { %231 = vmatpush3.bf16.msra.mxu0 %v248_v2 }
   0xc   :  { %232 = vmatprep.subr.bf16.mxu0 %v249_v3 }
   0xf   :  { %233 = vmatpush3.bf16.msra.mxu0 %v249_v3 }
  0x10   :  { %234 = vmatprep.subr.bf16.mxu0 %v250_v5 }
  0x13   :  { %235 = vmatpush3.bf16.msra.mxu0 %v250_v5 }
  0x14   :  { %236 = vmatprep.subr.bf16.mxu0 %v251_v6 }
  0x17   :  { %237 = vmatpush3.bf16.msra.mxu0 %v251_v6 }
  0x18   :  { %238 = vmatprep.subr.bf16.mxu0 %v252_v7 }
  0x1b   :  { %239 = vmatpush3.bf16.msra.mxu0 %v252_v7 }
  0x1c   :  { %240 = vmatprep.subr.bf16.mxu0 %v253_v8 }
  0x1f   :  { %241 = vmatpush3.bf16.msra.mxu0 %v253_v8 }
  0x22   :  { %243 = vmatmul.mubr.bf16.vlgmr.msra.gmra.mrb[0].mxu0 %v255_v9 }
  0xf5   :  { %v244_v11 = vpop.f32.mrb[0].mxu0 }
  0xf6   :  { %v183_v13 = vmul.f32 %v244_v11, %v214_v10  ;;  %v144_v14 = vpop.f32.mrb[1].mxu0 }
  0xf7   :  { %v181_v15 = vmul.f32 %v214_v10, %v144_v14  ;;  %v245_v16 = vpop.f32.mrb[2].mxu0 }
  0xf8   :  { %v194_v17 = vadd.f32 %v215_v12, %v183_v13  ;;  %v184_v18 = vmul.f32 %v245_v16, %v214_v10  ;;  %v147_v19 = vpop.f32.mrb[3].mxu0 }
  0xf9   :  { %v192_v20 = vadd.f32 %v215_v12, %v181_v15  ;;  %v182_v21 = vmul.f32 %v214_v10, %v147_v19 }
  0xfa   :  { %198 = vst [vmem:[%s333_s4 + $0x10] sm:$0xff] %v194_v17  ;;  %v195_v22 = vadd.f32 %v215_v12, %v184_v18 }
  0xfb   :  { %196 = vst [vmem:[%s333_s4] sm:$0xff] %v192_v20  ;;  %v193_v23 = vadd.f32 %v215_v12, %v182_v21 }
  0xfc   :  { %199 = vst [vmem:[%s333_s4 + $0x18] sm:$0xff] %v195_v22 }
  0xfd   :  { %197 = vst [vmem:[%s333_s4 + $0x8] sm:$0xff] %v193_v23 }

// kernel: pretrained_model_forward.31
= control target key start
LH: loop header
LB: loop body
LE: loop exit
PB: predicated region body
PF: predicated region fallthrough
CT: control target
= control target key end

     0   :  { %s832_s15 = smov 0   ;;  %s834_s16 = smov 0   ;;  %s934_s0 = inlined_call_operand.vmem [shape: bf16[32,1152], index: 0, kind: input, shape index: {}]   ;;  %s935_s1 = inlined_call_operand.vmem [shape: bf16[1152,128], index: 1, kind: input, shape index: {}]   ;;  %s936_s2 = inlined_call_operand.vmem [shape: f32[1,128], index: 2, kind: input, shape index: {}]   ;;  %s937_s3 = inlined_call_operand.vmem [shape: f32[1,128], index: 3, kind: input, shape index: {}]   ;;  %s938_s4 = inlined_call_operand.vmem [shape: f32[32,128], index: 4, kind: output, shape index: {}]  }
   0x1   :  { %s836_s17 = smov 0   ;;  %s838_s18 = smov 0  }
   0x2   :  { %s840_s19 = smov 0  }
   0x3 LB: > { %s26_s20 = sadd.s32 1, %s800_s18  ;;  %p49_p1 = scmp.ne.s32.totalorder %s792_s16, %s788_s15  ;;  %s804_s19 = sphi %s840_s19, %s14_s19   ;;  %s800_s18 = sphi %s838_s18, %s942_s18   ;;  %s796_s17 = sphi %s836_s17, %s941_s17   ;;  %s792_s16 = sphi %s834_s16, %s940_s16   ;;  %s788_s15 = sphi %s832_s15, %s939_s15  }
   0x4   : > { %p27_p0 = scmp.ge.s32.totalorder %s26_s20, 9  ;;  %p50_p2 = scmp.eq.s32.totalorder %s804_s19, 0 }
   0x5   : > { %s42_s22 = sadd.s32 1, %s792_s16  ;;  %p660_p5 = scmp.ge.s32.totalorder %s804_s19, 9 }
   0x6   : > { %s944_s20 = smov (%p27_p0, %s26_s20), 0  ;;  %p51_p3 = por %p50_p2, %p49_p1 }
   0x7   : > { %s38_s21 = ssub.s32 %s800_s18, %s944_s20  ;;  %195 = sbr.rel (%p660_p5) target bundleno = 21 (0x15), region = 24 }
   0x8   : > { %p40_p4 = scmp.eq.s32.totalorder %s38_s21, 0 }
   0xa   : > { %s867_s23 = scalar_select %p40_p4, %s792_s16, %s42_s22  }
   0xe   : > { %198 = sbr.rel (!%p51_p3) target bundleno = 21 (0x15), region = 28  ;;  %s200_s24 = sand.u32 (%p51_p3), 1, %s792_s16  }
   0xf   : > { %s662_s25 = sshll.u32 (%p51_p3), %s800_s18, 2  ;;  %s661_s26 = sshll.u32 (%p51_p3), %s200_s24, 4 }
  0x10   : > { %s207_s29 = scalar_lea.vmem (%p51_p3), %s934_s0, %s662_s25  ;;  %s202_s30 = scalar_lea.vmem (%p51_p3), [#allocation3], %s661_s26 }
  0x11   : > { %v223_v0 = vld [vmem:[%s207_s29] sm:$0xf] (%p51_p3)  ;;  %v225_v1 = vld [vmem:[%s207_s29 + $0x24] sm:$0xf] (%p51_p3)  ;;  %v227_v2 = vld [vmem:[%s207_s29 + $0x48] sm:$0xf] (%p51_p3) }
  0x12   : > { %224 = vst [vmem:[%s202_s30] sm:$0xf] (%p51_p3), %v223_v0  ;;  %226 = vst [vmem:[%s202_s30 + $0x4] sm:$0xf] (%p51_p3), %v225_v1  ;;  %v229_v3 = vld [vmem:[%s207_s29 + $0x6c] sm:$0xf] (%p51_p3) }
  0x13   : > { %228 = vst [vmem:[%s202_s30 + $0x8] sm:$0xf] (%p51_p3), %v227_v2  ;;  %230 = vst [vmem:[%s202_s30 + $0xc] sm:$0xf] (%p51_p3), %v229_v3 }
  0x15 PF: > { %p663_p6 = scmp.ge.s32.totalorder %s804_s19, 1  ;;  %p272_p7 = scmp.lt.s32.totalorder %s804_s19, 10 }
  0x17   : > { %p273_p8 = pnand %p663_p6, %p272_p7 }
  0x18   : > { %s279_s5 = sand.u32 (!%p273_p8), 1, %s788_s15   ;;  %s665_s6 = sshll.u32 (!%p273_p8), %s796_s17, 4 }
  0x19   : > { %276 = sbr.rel (%p273_p8) target bundleno = 304 (0x130), region = 73  ;;  %s879_s7 = sshll.u32 (!%p273_p8), %s279_s5, 4 }
  0x1a   : > { %p323_p9 = scmp.lt.s32.totalorder (!%p273_p8), %s665_s6, 143  ;;  %s281_s12 = scalar_lea.vmem (!%p273_p8), [#allocation3], %s879_s7 }
  0x1b   : > { %p667_p10 = scmp.ne.s32.totalorder (!%p273_p8), %s796_s17, 0 }
  0x20   : > { %s946_s6 = smov (!%p323_p9, %s665_s6), 143  ;;  %350 = sbr.rel (%p667_p10) target bundleno = 39 (0x27), region = 81 }
  0x21   : > { %s666_s8 = sshll.u32 %s946_s6, 2  ;;  %v806_v4 = vmov (!%p667_p10), 0.0  }
  0x22   : > { %s884_s11 = scalar_lea.vmem %s935_s1, %s666_s8  ;;  %351 = vst [vmem:[#allocation2] sm:$0xff] (!%p667_p10), %v806_v4  ;;  %352 = vst [vmem:[#allocation2 + $0x8] sm:$0xff] (!%p667_p10), %v806_v4 }
  0x23   : > { %353 = vst [vmem:[#allocation2 + $0x10] sm:$0xff] (!%p667_p10), %v806_v4  ;;  %354 = vst [vmem:[#allocation2 + $0x18] sm:$0xff] (!%p667_p10), %v806_v4 }
  0x27 PF: > { %v756_v5 = vld [vmem:[%s884_s11] sm:$0xff]   ;;  %v757_v6 = vld [vmem:[%s884_s11 + $0x8] sm:$0xff]   ;;  %v758_v7 = vld [vmem:[%s884_s11 + $0x10] sm:$0xff]   ;;  %p678_p11 = scmp.ne.s32.totalorder %s796_s17, 8 }
  0x28   : > { %695 = vmatprep.subr.bf16.mxu0 %v756_v5  ;;  %v759_v8 = vld [vmem:[%s884_s11 + $0x18] sm:$0xff]   ;;  %v764_v9 = vld [vmem:[%s281_s12] sm:$0xff]   ;;  %v761_v11 = vld [vmem:[%s884_s11 + $0x28] sm:$0xff]  }
  0x29   : > { %696 = vmatpush3.bf16.msra.mxu0 %v756_v5  ;;  %711 = vmatprep.mubr.bf16.mxu0 %v764_v9  ;;  %v760_v10 = vld [vmem:[%s884_s11 + $0x20] sm:$0xff]   ;;  %v762_v12 = vld [vmem:[%s884_s11 + $0x30] sm:$0xff]   ;;  %v763_v13 = vld [vmem:[%s884_s11 + $0x38] sm:$0xff]  }
  0x2a   : > { %697 = vmatprep.subr.bf16.mxu0 %v757_v6  ;;  %v765_v14 = vld [vmem:[%s281_s12 + $0x8] sm:$0xff]   ;;  %v357_v15 = vld [vmem:[#allocation2 + $0x10] sm:$0xff]  ;;  %v355_v16 = vld [vmem:[#allocation2] sm:$0xff] }
  0x2b   : > { %v358_v18 = vld [vmem:[#allocation2 + $0x18] sm:$0xff]  ;;  %v356_v21 = vld [vmem:[#allocation2 + $0x8] sm:$0xff]  ;;  %v679_v28 = vld [vmem:[%s936_s2] ss:$0 sm:$0xff] (!%p678_p11) }
  0x2c   : > { %v680_v29 = vld [vmem:[%s937_s3] ss:$0 sm:$0xff] (!%p678_p11) }
  0x2d   : > { %698 = vmatpush3.bf16.msra.mxu0 %v757_v6 }
  0x2e   : > { %699 = vmatprep.subr.bf16.mxu0 %v758_v7 }
  0x31   : > { %700 = vmatpush3.bf16.msra.mxu0 %v758_v7 }
  0x32   : > { %701 = vmatprep.subr.bf16.mxu0 %v759_v8 }
  0x35   : > { %702 = vmatpush3.bf16.msra.mxu0 %v759_v8 }
  0x36   : > { %703 = vmatprep.subr.bf16.mxu0 %v760_v10 }
  0x39   : > { %704 = vmatpush3.bf16.msra.mxu0 %v760_v10 }
  0x3a   : > { %705 = vmatprep.subr.bf16.mxu0 %v761_v11 }
  0x3d   : > { %706 = vmatpush3.bf16.msra.mxu0 %v761_v11 }
  0x3e   : > { %707 = vmatprep.subr.bf16.mxu0 %v762_v12 }
  0x41   : > { %708 = vmatpush3.bf16.msra.mxu0 %v762_v12 }
  0x42   : > { %709 = vmatprep.subr.bf16.mxu0 %v763_v13 }
  0x45   : > { %710 = vmatpush3.bf16.msra.mxu0 %v763_v13 }
  0x48   : > { %712 = vmatmul.mubr.bf16.vlgmr.msra.gmra.mrb[0].mxu0 %v765_v14 }
 0x11b   : > { %v713_v17 = vpop.f32.mrb[0].mxu0  ;;  %499 = sbr.rel (%p678_p11) target bundleno = 304 (0x130), region = 85 }
 0x11c   : > { %v490_v19 = vadd.f32 %v713_v17, %v357_v15  ;;  %v473_v20 = vpop.f32.mrb[1].mxu0 }
 0x11d   : > { %v488_v22 = vadd.f32 %v473_v20, %v355_v16  ;;  %v714_v23 = vpop.f32.mrb[2].mxu0 }
 0x11e   : > { %494 = vst [vmem:[#allocation2 + $0x10] sm:$0xff] %v490_v19  ;;  %v491_v24 = vadd.f32 %v714_v23, %v358_v18  ;;  %v476_v25 = vpop.f32.mrb[3].mxu0 }
 0x11f   : > { %492 = vst [vmem:[#allocation2] sm:$0xff] %v488_v22  ;;  %v489_v26 = vadd.f32 %v476_v25, %v356_v21 }
 0x120   : > { %495 = vst [vmem:[#allocation2 + $0x18] sm:$0xff] %v491_v24 }
 0x121   : > { %493 = vst [vmem:[#allocation2 + $0x8] sm:$0xff] %v489_v26 }
 0x125   : > { %v502_v32 = vld [vmem:[#allocation2 + $0x10] sm:$0xff] }
 0x126   : > { %v500_v27 = vld [vmem:[#allocation2] sm:$0xff]  ;;  %v513_v35 = vmul.f32 %v679_v28, %v502_v32 }
 0x127   : > { %v511_v30 = vmul.f32 %v679_v28, %v500_v27  ;;  %v503_v33 = vld [vmem:[#allocation2 + $0x18] sm:$0xff] }
 0x128   : > { %v501_v31 = vld [vmem:[#allocation2 + $0x8] sm:$0xff]  ;;  %v514_v36 = vmul.f32 %v679_v28, %v503_v33  ;;  %v524_v39 = vadd.f32 %v680_v29, %v513_v35 }
 0x129   : > { %v512_v34 = vmul.f32 %v679_v28, %v501_v31  ;;  %v522_v37 = vadd.f32 %v680_v29, %v511_v30 }
 0x12a   : > { %v525_v40 = vadd.f32 %v680_v29, %v514_v36  ;;  %v528_v43 = vmax.f32 %v524_v39, 0.0 }
 0x12b   : > { %v523_v38 = vadd.f32 %v680_v29, %v512_v34  ;;  %v526_v41 = vmax.f32 %v522_v37, 0.0 }
 0x12c   : > { %v529_v44 = vmax.f32 %v525_v40, 0.0  ;;  %532 = vst [vmem:[%s938_s4 + $0x10] sm:$0xff] %v528_v43 }
 0x12d   : > { %v527_v42 = vmax.f32 %v523_v38, 0.0  ;;  %530 = vst [vmem:[%s938_s4] sm:$0xff] %v526_v41 }
 0x12e   : > { %533 = vst [vmem:[%s938_s4 + $0x18] sm:$0xff] %v529_v44 }
 0x12f   : > { %531 = vst [vmem:[%s938_s4 + $0x8] sm:$0xff] %v527_v42 }
 0x130 PF: > { %s14_s19 = sadd.s32 1, %s804_s19   ;;  %s939_s15 = smov %s792_s16 }
 0x131   : > { %p11_p12 = scmp.ge.s32.totalorder %s14_s19, 11   ;;  %s940_s16 = smov %s867_s23 }
 0x132   : > { %s941_s17 = smov %s800_s18  ;;  %s942_s18 = smov %s944_s20 }
 0x133   :  { %13 = sbr.rel (!%p11_p12) target bundleno = 3 (0x3), region = 129 }

// kernel: pretrained_model_forward.30
= control target key start
LH: loop header
LB: loop body
LE: loop exit
PB: predicated region body
PF: predicated region fallthrough
CT: control target
= control target key end

     0   :  { %s924_s18 = smov 0   ;;  %s926_s19 = smov 0   ;;  %s1038_s0 = inlined_call_operand.vmem [shape: bf16[32,1152], index: 0, kind: input, shape index: {}]   ;;  %s1039_s1 = inlined_call_operand.vmem [shape: bf16[1152,128], index: 1, kind: input, shape index: {}]   ;;  %s1040_s2 = inlined_call_operand.vmem [shape: f32[1,128], index: 2, kind: input, shape index: {}]   ;;  %s1041_s3 = inlined_call_operand.vmem [shape: f32[1,128], index: 3, kind: input, shape index: {}]   ;;  %s1042_s4 = inlined_call_operand.vmem [shape: f32[32,128], index: 4, kind: input, shape index: {}]   ;;  %s1043_s5 = inlined_call_operand.vmem [shape: f32[32,128], index: 5, kind: output, shape index: {}]  }
   0x1   :  { %s928_s20 = smov 0   ;;  %s930_s21 = smov 0  }
   0x2   :  { %s932_s22 = smov 0  }
   0x3 LB: > { %s27_s23 = sadd.s32 1, %s887_s21  ;;  %p50_p1 = scmp.ne.s32.totalorder %s879_s19, %s875_s18  ;;  %s891_s22 = sphi %s932_s22, %s15_s22   ;;  %s887_s21 = sphi %s930_s21, %s1047_s21   ;;  %s883_s20 = sphi %s928_s20, %s1046_s20   ;;  %s879_s19 = sphi %s926_s19, %s1045_s19   ;;  %s875_s18 = sphi %s924_s18, %s1044_s18  }
   0x4   : > { %p28_p0 = scmp.ge.s32.totalorder %s27_s23, 9  ;;  %p51_p2 = scmp.eq.s32.totalorder %s891_s22, 0 }
   0x5   : > { %s43_s25 = sadd.s32 1, %s879_s19  ;;  %p747_p5 = scmp.ge.s32.totalorder %s891_s22, 9 }
   0x6   : > { %s1049_s23 = smov (%p28_p0, %s27_s23), 0  ;;  %p52_p3 = por %p51_p2, %p50_p1 }
   0x7   : > { %s39_s24 = ssub.s32 %s887_s21, %s1049_s23  ;;  %236 = sbr.rel (%p747_p5) target bundleno = 21 (0x15), region = 28 }
   0x8   : > { %p41_p4 = scmp.eq.s32.totalorder %s39_s24, 0 }
   0xa   : > { %s959_s26 = scalar_select %p41_p4, %s879_s19, %s43_s25  }
   0xe   : > { %239 = sbr.rel (!%p52_p3) target bundleno = 21 (0x15), region = 32  ;;  %s241_s27 = sand.u32 (%p52_p3), 1, %s879_s19  }
   0xf   : > { %s749_s28 = sshll.u32 (%p52_p3), %s887_s21, 2  ;;  %s748_s29 = sshll.u32 (%p52_p3), %s241_s27, 4 }
  0x10   : > { %s248_s7 = scalar_lea.vmem (%p52_p3), %s1038_s0, %s749_s28  ;;  %s243_s8 = scalar_lea.vmem (%p52_p3), [#allocation3], %s748_s29 }
  0x11   : > { %v264_v0 = vld [vmem:[%s248_s7] sm:$0xf] (%p52_p3)  ;;  %v266_v1 = vld [vmem:[%s248_s7 + $0x24] sm:$0xf] (%p52_p3)  ;;  %v268_v2 = vld [vmem:[%s248_s7 + $0x48] sm:$0xf] (%p52_p3) }
  0x12   : > { %265 = vst [vmem:[%s243_s8] sm:$0xf] (%p52_p3), %v264_v0  ;;  %267 = vst [vmem:[%s243_s8 + $0x4] sm:$0xf] (%p52_p3), %v266_v1  ;;  %v270_v3 = vld [vmem:[%s248_s7 + $0x6c] sm:$0xf] (%p52_p3) }
  0x13   : > { %269 = vst [vmem:[%s243_s8 + $0x8] sm:$0xf] (%p52_p3), %v268_v2  ;;  %271 = vst [vmem:[%s243_s8 + $0xc] sm:$0xf] (%p52_p3), %v270_v3 }
  0x15 PF: > { %p750_p6 = scmp.ge.s32.totalorder %s891_s22, 1  ;;  %p313_p7 = scmp.lt.s32.totalorder %s891_s22, 10 }
  0x17   : > { %p314_p8 = pnand %p750_p6, %p313_p7 }
  0x18   : > { %s320_s9 = sand.u32 (!%p314_p8), 1, %s875_s18   ;;  %s752_s10 = sshll.u32 (!%p314_p8), %s883_s20, 4 }
  0x19   : > { %317 = sbr.rel (%p314_p8) target bundleno = 306 (0x132), region = 77  ;;  %s971_s11 = sshll.u32 (!%p314_p8), %s320_s9, 4 }
  0x1a   : > { %p374_p9 = scmp.lt.s32.totalorder (!%p314_p8), %s752_s10, 143  ;;  %s322_s16 = scalar_lea.vmem (!%p314_p8), [#allocation3], %s971_s11 }
  0x1b   : > { %p754_p10 = scmp.ne.s32.totalorder (!%p314_p8), %s883_s20, 0 }
  0x20   : > { %s1051_s10 = smov (!%p374_p9, %s752_s10), 143  ;;  %410 = sbr.rel (%p754_p10) target bundleno = 39 (0x27), region = 85 }
  0x21   : > { %s753_s12 = sshll.u32 %s1051_s10, 2  ;;  %v893_v4 = vmov (!%p754_p10), 0.0  }
  0x22   : > { %s976_s15 = scalar_lea.vmem %s1039_s1, %s753_s12  ;;  %411 = vst [vmem:[#allocation2] sm:$0xff] (!%p754_p10), %v893_v4  ;;  %412 = vst [vmem:[#allocation2 + $0x8] sm:$0xff] (!%p754_p10), %v893_v4 }
  0x23   : > { %413 = vst [vmem:[#allocation2 + $0x10] sm:$0xff] (!%p754_p10), %v893_v4  ;;  %414 = vst [vmem:[#allocation2 + $0x18] sm:$0xff] (!%p754_p10), %v893_v4 }
  0x27 PF: > { %v843_v5 = vld [vmem:[%s976_s15] sm:$0xff]   ;;  %v844_v6 = vld [vmem:[%s976_s15 + $0x8] sm:$0xff]   ;;  %v845_v7 = vld [vmem:[%s976_s15 + $0x10] sm:$0xff]   ;;  %p765_p11 = scmp.ne.s32.totalorder %s883_s20, 8 }
  0x28   : > { %782 = vmatprep.subr.bf16.mxu0 %v843_v5  ;;  %v846_v8 = vld [vmem:[%s976_s15 + $0x18] sm:$0xff]   ;;  %v851_v9 = vld [vmem:[%s322_s16] sm:$0xff]   ;;  %v848_v11 = vld [vmem:[%s976_s15 + $0x28] sm:$0xff]  }
  0x29   : > { %783 = vmatpush3.bf16.msra.mxu0 %v843_v5  ;;  %798 = vmatprep.mubr.bf16.mxu0 %v851_v9  ;;  %v847_v10 = vld [vmem:[%s976_s15 + $0x20] sm:$0xff]   ;;  %v849_v12 = vld [vmem:[%s976_s15 + $0x30] sm:$0xff]   ;;  %v850_v13 = vld [vmem:[%s976_s15 + $0x38] sm:$0xff]  }
  0x2a   : > { %784 = vmatprep.subr.bf16.mxu0 %v844_v6  ;;  %v852_v14 = vld [vmem:[%s322_s16 + $0x8] sm:$0xff]   ;;  %v417_v15 = vld [vmem:[#allocation2 + $0x10] sm:$0xff]  ;;  %v415_v16 = vld [vmem:[#allocation2] sm:$0xff] }
  0x2b   : > { %v418_v18 = vld [vmem:[#allocation2 + $0x18] sm:$0xff]  ;;  %v416_v21 = vld [vmem:[#allocation2 + $0x8] sm:$0xff]  ;;  %v766_v28 = vld [vmem:[%s1040_s2] ss:$0 sm:$0xff] (!%p765_p11) }
  0x2c   : > { %v767_v29 = vld [vmem:[%s1041_s3] ss:$0 sm:$0xff] (!%p765_p11)  ;;  %v587_v37 = vld [vmem:[%s1042_s4 + $0x8] sm:$0xff] (!%p765_p11)  ;;  %v588_v41 = vld [vmem:[%s1042_s4 + $0x10] sm:$0xff] (!%p765_p11) }
  0x2d   : > { %785 = vmatpush3.bf16.msra.mxu0 %v844_v6  ;;  %v586_v32 = vld [vmem:[%s1042_s4] sm:$0xff] (!%p765_p11)  ;;  %v589_v42 = vld [vmem:[%s1042_s4 + $0x18] sm:$0xff] (!%p765_p11) }
  0x2e   : > { %786 = vmatprep.subr.bf16.mxu0 %v845_v7 }
  0x31   : > { %787 = vmatpush3.bf16.msra.mxu0 %v845_v7 }
  0x32   : > { %788 = vmatprep.subr.bf16.mxu0 %v846_v8 }
  0x35   : > { %789 = vmatpush3.bf16.msra.mxu0 %v846_v8 }
  0x36   : > { %790 = vmatprep.subr.bf16.mxu0 %v847_v10 }
  0x39   : > { %791 = vmatpush3.bf16.msra.mxu0 %v847_v10 }
  0x3a   : > { %792 = vmatprep.subr.bf16.mxu0 %v848_v11 }
  0x3d   : > { %793 = vmatpush3.bf16.msra.mxu0 %v848_v11 }
  0x3e   : > { %794 = vmatprep.subr.bf16.mxu0 %v849_v12 }
  0x41   : > { %795 = vmatpush3.bf16.msra.mxu0 %v849_v12 }
  0x42   : > { %796 = vmatprep.subr.bf16.mxu0 %v850_v13 }
  0x45   : > { %797 = vmatpush3.bf16.msra.mxu0 %v850_v13 }
  0x48   : > { %799 = vmatmul.mubr.bf16.vlgmr.msra.gmra.mrb[0].mxu0 %v852_v14 }
 0x11b   : > { %v800_v17 = vpop.f32.mrb[0].mxu0  ;;  %559 = sbr.rel (%p765_p11) target bundleno = 306 (0x132), region = 89 }
 0x11c   : > { %v550_v19 = vadd.f32 %v800_v17, %v417_v15  ;;  %v533_v20 = vpop.f32.mrb[1].mxu0 }
 0x11d   : > { %v548_v22 = vadd.f32 %v533_v20, %v415_v16  ;;  %v801_v23 = vpop.f32.mrb[2].mxu0 }
 0x11e   : > { %554 = vst [vmem:[#allocation2 + $0x10] sm:$0xff] %v550_v19  ;;  %v551_v24 = vadd.f32 %v801_v23, %v418_v18  ;;  %v536_v25 = vpop.f32.mrb[3].mxu0 }
 0x11f   : > { %552 = vst [vmem:[#allocation2] sm:$0xff] %v548_v22  ;;  %v549_v26 = vadd.f32 %v536_v25, %v416_v21 }
 0x120   : > { %555 = vst [vmem:[#allocation2 + $0x18] sm:$0xff] %v551_v24 }
 0x121   : > { %553 = vst [vmem:[#allocation2 + $0x8] sm:$0xff] %v549_v26 }
 0x125   : > { %v562_v34 = vld [vmem:[#allocation2 + $0x10] sm:$0xff] }
 0x126   : > { %v560_v27 = vld [vmem:[#allocation2] sm:$0xff]  ;;  %v573_v38 = vmul.f32 %v766_v28, %v562_v34 }
 0x127   : > { %v571_v30 = vmul.f32 %v766_v28, %v560_v27  ;;  %v563_v35 = vld [vmem:[#allocation2 + $0x18] sm:$0xff] }
 0x128   : > { %v561_v31 = vld [vmem:[#allocation2 + $0x8] sm:$0xff]  ;;  %v574_v39 = vmul.f32 %v766_v28, %v563_v35  ;;  %v584_v44 = vadd.f32 %v767_v29, %v573_v38 }
 0x129   : > { %v572_v33 = vmul.f32 %v766_v28, %v561_v31  ;;  %v582_v36 = vadd.f32 %v767_v29, %v571_v30 }
 0x12a   : > { %v585_v45 = vadd.f32 %v767_v29, %v574_v39  ;;  %v592_v48 = vadd.f32 %v588_v41, %v584_v44 }
 0x12b   : > { %v583_v40 = vadd.f32 %v767_v29, %v572_v33  ;;  %v590_v43 = vadd.f32 %v586_v32, %v582_v36 }
 0x12c   : > { %v593_v49 = vadd.f32 %v589_v42, %v585_v45  ;;  %v596_v51 = vmax.f32 %v592_v48, 0.0 }
 0x12d   : > { %v591_v46 = vadd.f32 %v587_v37, %v583_v40  ;;  %v594_v47 = vmax.f32 %v590_v43, 0.0 }
 0x12e   : > { %v597_v52 = vmax.f32 %v593_v49, 0.0  ;;  %600 = vst [vmem:[%s1043_s5 + $0x10] sm:$0xff] %v596_v51 }
 0x12f   : > { %v595_v50 = vmax.f32 %v591_v46, 0.0  ;;  %598 = vst [vmem:[%s1043_s5] sm:$0xff] %v594_v47 }
 0x130   : > { %601 = vst [vmem:[%s1043_s5 + $0x18] sm:$0xff] %v597_v52 }
 0x131   : > { %599 = vst [vmem:[%s1043_s5 + $0x8] sm:$0xff] %v595_v50 }
 0x132 PF: > { %s15_s22 = sadd.s32 1, %s891_s22   ;;  %s1044_s18 = smov %s879_s19 }
 0x133   : > { %p12_p12 = scmp.ge.s32.totalorder %s15_s22, 11   ;;  %s1045_s19 = smov %s959_s26 }
 0x134   : > { %s1046_s20 = smov %s887_s21  ;;  %s1047_s21 = smov %s1049_s23 }
 0x135   :  { %14 = sbr.rel (!%p12_p12) target bundleno = 3 (0x3), region = 136 }

// kernel: pretrained_model_forward.33
= control target key start
LH: loop header
LB: loop body
LE: loop exit
PB: predicated region body
PF: predicated region fallthrough
CT: control target
= control target key end

     0   :  { %s770_s15 = smov 0   ;;  %s772_s16 = smov 0   ;;  %s843_s0 = inlined_call_operand.vmem [shape: bf16[8,1152], index: 0, kind: input, shape index: {}]   ;;  %s844_s1 = inlined_call_operand.vmem [shape: bf16[1152,256], index: 1, kind: input, shape index: {}]   ;;  %s845_s2 = inlined_call_operand.vmem [shape: f32[1,256], index: 2, kind: input, shape index: {}]   ;;  %s846_s3 = inlined_call_operand.vmem [shape: f32[1,256], index: 3, kind: input, shape index: {}]   ;;  %s847_s4 = inlined_call_operand.vmem [shape: f32[8,256], index: 4, kind: output, shape index: {}]  }
   0x1   :  { %s774_s17 = smov 0  }
   0x2 LB: > { %s26_s18 = sadd.s32 1, %s737_s16  ;;  %p641_p0 = scmp.ge.s32.totalorder %s741_s17, 1  ;;  %s741_s17 = sphi %s774_s17, %s14_s17   ;;  %s737_s16 = sphi %s772_s16, %s849_s16   ;;  %s733_s15 = sphi %s770_s15, %s848_s15  }
   0x3   : > { %p27_p1 = scmp.ge.s32.totalorder %s26_s18, 9  ;;  %p227_p2 = scmp.lt.s32.totalorder %s741_s17, 10 }
   0x5   : > { %s851_s18 = smov (%p27_p1, %s26_s18), 0  ;;  %p228_p3 = pnand %p641_p0, %p227_p2 }
   0x6   : > { %p280_p4 = scmp.lt.s32.totalorder (!%p228_p3), %s733_s15, 8  ;;  %s643_s19 = sshll.u32 (!%p228_p3), %s733_s15, 4 }
   0x7   : > { %231 = sbr.rel (%p228_p3) target bundleno = 285 (0x11d), region = 36  ;;  %p288_p5 = scmp.lt.s32.totalorder (!%p228_p3), %s643_s19, 143 }
   0x8   : > { %p646_p6 = scmp.ne.s32.totalorder (!%p228_p3), %s733_s15, 0 }
   0xe   : > { %s281_s20 = scalar_select %p280_p4, %s733_s15, 8 }
   0xf   : > { %s853_s19 = smov (!%p288_p5, %s643_s19), 143  ;;  %322 = sbr.rel (%p646_p6) target bundleno = 22 (0x16), region = 40 }
  0x10   : > { %s642_s21 = sshll.u32 %s281_s20, 2  ;;  %s668_s25 = sshll.u32 %s853_s19, 3  ;;  %v743_v0 = vmov (!%p646_p6), 0.0  }
  0x11   : > { %s796_s24 = scalar_lea.vmem %s843_s0, %s642_s21  ;;  %s801_s28 = scalar_lea.vmem %s844_s1, %s668_s25  ;;  %323 = vst [vmem:[#allocation2] sm:$0xff] (!%p646_p6), %v743_v0  ;;  %324 = vst [vmem:[#allocation2 + $0x8] sm:$0xff] (!%p646_p6), %v743_v0 }
  0x16 PF: > { %v695_v1 = vld [vmem:[%s801_s28 + $0x4] ss:$8 sps:$4 sm:$0xff]   ;;  %v697_v2 = vld [vmem:[%s801_s28] ss:$8 sps:$4 sm:$0xff]   ;;  %v744_v3 = vmov 0   ;;  %p663_p7 = scmp.ne.s32.totalorder %s733_s15, 8 }
  0x17   : > { %456 = vmatprep.mubr.bf16.mxu0 %v744_v3  ;;  %424 = vmatprep.subr.bf16.mxu0 %v695_v1  ;;  %v698_v4 = vld [vmem:[%s801_s28 + $0x14] ss:$8 sps:$4 sm:$0xff]   ;;  %v700_v5 = vld [vmem:[%s801_s28 + $0x10] ss:$8 sps:$4 sm:$0xff]   ;;  %v701_v6 = vld [vmem:[%s801_s28 + $0x24] ss:$8 sps:$4 sm:$0xff]   ;;  %v477_v27 = vlaneseq (!%p663_p7) }
  0x18   : > { %425 = vmatpush1.bf16.msra.mxu0 %v697_v2  ;;  %v703_v7 = vld [vmem:[%s801_s28 + $0x20] ss:$8 sps:$4 sm:$0xff]   ;;  %v704_v8 = vld [vmem:[%s801_s28 + $0x34] ss:$8 sps:$4 sm:$0xff]   ;;  %v706_v9 = vld [vmem:[%s801_s28 + $0x30] ss:$8 sps:$4 sm:$0xff]  }
  0x19   : > { %426 = vmatprep.subr.bf16.mxu0 %v698_v4  ;;  %v707_v10 = vld [vmem:[%s801_s28 + $0x44] ss:$8 sps:$4 sm:$0xff]   ;;  %v709_v11 = vld [vmem:[%s801_s28 + $0x40] ss:$8 sps:$4 sm:$0xff]   ;;  %v710_v12 = vld [vmem:[%s801_s28 + $0x54] ss:$8 sps:$4 sm:$0xff]  }
  0x1a   : > { %v712_v13 = vld [vmem:[%s801_s28 + $0x50] ss:$8 sps:$4 sm:$0xff]   ;;  %v713_v14 = vld [vmem:[%s801_s28 + $0x64] ss:$8 sps:$4 sm:$0xff]   ;;  %v715_v15 = vld [vmem:[%s801_s28 + $0x60] ss:$8 sps:$4 sm:$0xff]  }
  0x1b   : > { %v716_v16 = vld [vmem:[%s801_s28 + $0x74] ss:$8 sps:$4 sm:$0xff]   ;;  %v718_v17 = vld [vmem:[%s801_s28 + $0x70] ss:$8 sps:$4 sm:$0xff]   ;;  %v327_v18 = vld [vmem:[%s796_s24] sm:$0xf] }
  0x1c   : > { %427 = vmatpush1.bf16.msra.mxu0 %v700_v5  ;;  %v325_v19 = vld [vmem:[#allocation2] sm:$0xff]  ;;  %v326_v20 = vld [vmem:[#allocation2 + $0x8] sm:$0xff]  ;;  %v478_v28 = vshrl.u32 (!%p663_p7), %v477_v27, 7 }
  0x1d   : > { %428 = vmatprep.subr.bf16.mxu0 %v701_v6  ;;  %v475_v29 = vld [vmem:[%s845_s2] sm:$0x3] (!%p663_p7) }
  0x1e   : > { %v489_v30 = vld [vmem:[%s846_s3] sm:$0x3] (!%p663_p7)  ;;  %v479_v31 = vsub.s32 (!%p663_p7), 0, %v478_v28  ;;  %v483_v32 = vsub.s32 (!%p663_p7), 1, %v478_v28 }
  0x20   : > { %429 = vmatpush1.bf16.msra.mxu0 %v703_v7  ;;  %v480_v35 = vrot.slane (!%p663_p7), %v475_v29, %v479_v31  ;;  %v494_v36 = vrot.slane (!%p663_p7), %v489_v30, %v479_v31  ;;  %v484_v37 = vrot.slane (!%p663_p7), %v475_v29, %v483_v32  ;;  %v498_v38 = vrot.slane (!%p663_p7), %v489_v30, %v483_v32 }
  0x21   : > { %430 = vmatprep.subr.bf16.mxu0 %v704_v8 }
  0x24   : > { %431 = vmatpush1.bf16.msra.mxu0 %v706_v9 }
  0x25   : > { %432 = vmatprep.subr.bf16.mxu0 %v707_v10 }
  0x28   : > { %433 = vmatpush1.bf16.msra.mxu0 %v709_v11 }
  0x29   : > { %434 = vmatprep.subr.bf16.mxu0 %v710_v12 }
  0x2c   : > { %435 = vmatpush1.bf16.msra.mxu0 %v712_v13 }
  0x2d   : > { %436 = vmatprep.subr.bf16.mxu0 %v713_v14 }
  0x30   : > { %437 = vmatpush1.bf16.msra.mxu0 %v715_v15 }
  0x31   : > { %438 = vmatprep.subr.bf16.mxu0 %v716_v16 }
  0x34   : > { %439 = vmatpush1.bf16.msra.mxu0 %v718_v17 }
  0x37   : > { %457 = vmatmul.mubr.bf16.vlgmr.msra.gmra.mrb[0].mxu0 %v327_v18 }
 0x108   : > { %472 = sbr.rel (%p663_p7) target bundleno = 285 (0x11d), region = 44 }
 0x10a   : > { %v458_v21 = vpop.f32.mrb[0].mxu0 }
 0x10b   : > { %v465_v22 = vadd.f32 %v458_v21, %v325_v19  ;;  %v460_v23 = vpop.f32.mrb[1].mxu0 }
 0x10c   : > { %v466_v24 = vadd.f32 %v460_v23, %v326_v20  ;;  %v462_v25 = vpop.f32.mrb[2].mxu0 }
 0x10d   : > { %467 = vst [vmem:[#allocation2] sm:$0xff] %v465_v22  ;;  %v463_v26 = vpop.f32.mrb[3].mxu0 }
 0x10e   : > { %468 = vst [vmem:[#allocation2 + $0x8] sm:$0xff] %v466_v24 }
 0x114   : > { %v473_v33 = vld [vmem:[#allocation2] sm:$0xff] }
 0x115   : > { %v474_v34 = vld [vmem:[#allocation2 + $0x8] sm:$0xff]  ;;  %v487_v39 = vmul.f32 %v480_v35, %v473_v33 }
 0x116   : > { %v488_v40 = vmul.f32 %v484_v37, %v474_v34 }
 0x117   : > { %v501_v41 = vadd.f32 %v494_v36, %v487_v39 }
 0x118   : > { %v502_v42 = vadd.f32 %v498_v38, %v488_v40 }
 0x119   : > { %v503_v43 = vmax.f32 %v501_v41, 0.0 }
 0x11a   : > { %v504_v44 = vmax.f32 %v502_v42, 0.0 }
 0x11b   : > { %505 = vst [vmem:[%s847_s4] sm:$0xff] %v503_v43 }
 0x11c   : > { %506 = vst [vmem:[%s847_s4 + $0x8] sm:$0xff] %v504_v44 }
 0x11d PF: > { %s14_s17 = sadd.s32 1, %s741_s17   ;;  %s848_s15 = smov %s737_s16 }
 0x11e   : > { %p11_p8 = scmp.ge.s32.totalorder %s14_s17, 11   ;;  %s849_s16 = smov %s851_s18 }
 0x120   :  { %13 = sbr.rel (!%p11_p8) target bundleno = 2 (0x2), region = 83 }

// kernel: pretrained_model_forward.34
= control target key start
LH: loop header
LB: loop body
LE: loop exit
PB: predicated region body
PF: predicated region fallthrough
CT: control target
= control target key end

     0   :  { %v248_v1 = vmov 0   ;;  %v175_v18 = vlaneseq  ;;  %s337_s1 = inlined_call_operand.vmem [shape: bf16[128,256], index: 1, kind: input, shape index: {}]   ;;  %s338_s0 = inlined_call_operand.vmem [shape: bf16[8,128], index: 0, kind: input, shape index: {}]   ;;  %s339_s2 = inlined_call_operand.vmem [shape: f32[1,256], index: 2, kind: input, shape index: {}]   ;;  %s340_s3 = inlined_call_operand.vmem [shape: f32[1,256], index: 3, kind: input, shape index: {}]   ;;  %s341_s4 = inlined_call_operand.vmem [shape: f32[8,256], index: 4, kind: output, shape index: {}]  }
   0x1   :  { %v224_v0 = vld [vmem:[%s337_s1 + $0x4] ss:$8 sps:$4 sm:$0xff]   ;;  %155 = vmatprep.mubr.bf16.mxu0 %v248_v1  ;;  %v226_v2 = vld [vmem:[%s337_s1] ss:$8 sps:$4 sm:$0xff]   ;;  %v227_v3 = vld [vmem:[%s337_s1 + $0x14] ss:$8 sps:$4 sm:$0xff]  }
   0x2   :  { %123 = vmatprep.subr.bf16.mxu0 %v224_v0  ;;  %v229_v4 = vld [vmem:[%s337_s1 + $0x10] ss:$8 sps:$4 sm:$0xff]   ;;  %v230_v5 = vld [vmem:[%s337_s1 + $0x24] ss:$8 sps:$4 sm:$0xff]   ;;  %v232_v6 = vld [vmem:[%s337_s1 + $0x20] ss:$8 sps:$4 sm:$0xff]  }
   0x3   :  { %124 = vmatpush1.bf16.msra.mxu0 %v226_v2  ;;  %v233_v7 = vld [vmem:[%s337_s1 + $0x34] ss:$8 sps:$4 sm:$0xff]   ;;  %v235_v8 = vld [vmem:[%s337_s1 + $0x30] ss:$8 sps:$4 sm:$0xff]   ;;  %v236_v9 = vld [vmem:[%s337_s1 + $0x44] ss:$8 sps:$4 sm:$0xff]  }
   0x4   :  { %125 = vmatprep.subr.bf16.mxu0 %v227_v3  ;;  %v238_v10 = vld [vmem:[%s337_s1 + $0x40] ss:$8 sps:$4 sm:$0xff]   ;;  %v239_v11 = vld [vmem:[%s337_s1 + $0x54] ss:$8 sps:$4 sm:$0xff]   ;;  %v241_v12 = vld [vmem:[%s337_s1 + $0x50] ss:$8 sps:$4 sm:$0xff]  }
   0x5   :  { %v242_v13 = vld [vmem:[%s337_s1 + $0x64] ss:$8 sps:$4 sm:$0xff]   ;;  %v244_v14 = vld [vmem:[%s337_s1 + $0x60] ss:$8 sps:$4 sm:$0xff]   ;;  %v245_v15 = vld [vmem:[%s337_s1 + $0x74] ss:$8 sps:$4 sm:$0xff]  }
   0x6   :  { %v247_v16 = vld [vmem:[%s337_s1 + $0x70] ss:$8 sps:$4 sm:$0xff]   ;;  %v26_v17 = vld [vmem:[%s338_s0] sm:$0xf]  ;;  %v176_v19 = vshrl.u32 %v175_v18, 7 }
   0x7   :  { %126 = vmatpush1.bf16.msra.mxu0 %v229_v4  ;;  %v173_v21 = vld [vmem:[%s339_s2] sm:$0x3] }
   0x8   :  { %127 = vmatprep.subr.bf16.mxu0 %v230_v5  ;;  %v177_v20 = vsub.s32 0, %v176_v19  ;;  %v181_v22 = vsub.s32 1, %v176_v19  ;;  %v187_v23 = vld [vmem:[%s340_s3] sm:$0x3] }
   0xa   :  { %v178_v24 = vrot.slane %v173_v21, %v177_v20  ;;  %v182_v25 = vrot.slane %v173_v21, %v181_v22  ;;  %v192_v26 = vrot.slane %v187_v23, %v177_v20  ;;  %v196_v28 = vrot.slane %v187_v23, %v181_v22 }
   0xb   :  { %128 = vmatpush1.bf16.msra.mxu0 %v232_v6 }
   0xc   :  { %129 = vmatprep.subr.bf16.mxu0 %v233_v7 }
   0xf   :  { %130 = vmatpush1.bf16.msra.mxu0 %v235_v8 }
  0x10   :  { %131 = vmatprep.subr.bf16.mxu0 %v236_v9 }
  0x13   :  { %132 = vmatpush1.bf16.msra.mxu0 %v238_v10 }
  0x14   :  { %133 = vmatprep.subr.bf16.mxu0 %v239_v11 }
  0x17   :  { %134 = vmatpush1.bf16.msra.mxu0 %v241_v12 }
  0x18   :  { %135 = vmatprep.subr.bf16.mxu0 %v242_v13 }
  0x1b   :  { %136 = vmatpush1.bf16.msra.mxu0 %v244_v14 }
  0x1c   :  { %137 = vmatprep.subr.bf16.mxu0 %v245_v15 }
  0x1f   :  { %138 = vmatpush1.bf16.msra.mxu0 %v247_v16 }
  0x22   :  { %156 = vmatmul.mubr.bf16.vlgmr.msra.gmra.mrb[0].mxu0 %v26_v17 }
  0xf5   :  { %v157_v27 = vpop.f32.mrb[0].mxu0 }
  0xf6   :  { %v185_v29 = vmul.f32 %v178_v24, %v157_v27  ;;  %v159_v30 = vpop.f32.mrb[1].mxu0 }
  0xf7   :  { %v186_v31 = vmul.f32 %v182_v25, %v159_v30  ;;  %v161_v32 = vpop.f32.mrb[2].mxu0 }
  0xf8   :  { %v199_v33 = vadd.f32 %v192_v26, %v185_v29  ;;  %v162_v34 = vpop.f32.mrb[3].mxu0 }
  0xf9   :  { %v200_v35 = vadd.f32 %v196_v28, %v186_v31 }
  0xfa   :  { %201 = vst [vmem:[%s341_s4] sm:$0xff] %v199_v33 }
  0xfb   :  { %202 = vst [vmem:[%s341_s4 + $0x8] sm:$0xff] %v200_v35 }

// kernel: pretrained_model_forward.36
= control target key start
LH: loop header
LB: loop body
LE: loop exit
PB: predicated region body
PF: predicated region fallthrough
CT: control target
= control target key end

     0   :  { %s920_s15 = smov 0   ;;  %s922_s16 = smov 0   ;;  %s1008_s0 = inlined_call_operand.vmem [shape: bf16[8,2304], index: 0, kind: input, shape index: {}]   ;;  %s1009_s1 = inlined_call_operand.vmem [shape: bf16[2304,256], index: 1, kind: input, shape index: {}]   ;;  %s1010_s2 = inlined_call_operand.vmem [shape: f32[1,256], index: 2, kind: input, shape index: {}]   ;;  %s1011_s3 = inlined_call_operand.vmem [shape: f32[1,256], index: 3, kind: input, shape index: {}]   ;;  %s1012_s4 = inlined_call_operand.vmem [shape: f32[8,256], index: 4, kind: output, shape index: {}]  }
   0x1   :  { %s924_s17 = smov 0  }
   0x2 LB: > { %s26_s18 = sadd.s32 1, %s888_s16  ;;  %p748_p0 = scmp.ge.s32.totalorder %s892_s17, 1  ;;  %s892_s17 = sphi %s924_s17, %s14_s17   ;;  %s888_s16 = sphi %s922_s16, %s1014_s16   ;;  %s884_s15 = sphi %s920_s15, %s1013_s15  }
   0x3   : > { %p27_p1 = scmp.ge.s32.totalorder %s26_s18, 9  ;;  %p229_p2 = scmp.lt.s32.totalorder %s892_s17, 10 }
   0x5   : > { %s1016_s18 = smov (%p27_p1, %s26_s18), 0  ;;  %p230_p3 = pnand %p748_p0, %p229_p2 }
   0x6   : > { %s749_s19 = sshll.u32 (!%p230_p3), %s884_s15, 1  ;;  %s751_s20 = sshll.u32 (!%p230_p3), %s884_s15, 5 }
   0x7   : > { %233 = sbr.rel (%p230_p3) target bundleno = 319 (0x13f), region = 36  ;;  %p284_p4 = scmp.lt.s32.totalorder (!%p230_p3), %s749_s19, 17 }
   0x8   : > { %p293_p5 = scmp.lt.s32.totalorder (!%p230_p3), %s751_s20, 287  ;;  %p754_p6 = scmp.ne.s32.totalorder (!%p230_p3), %s884_s15, 0 }
   0xe   : > { %s1018_s19 = smov (!%p284_p4, %s749_s19), 17  ;;  %s1020_s20 = smov (!%p293_p5, %s751_s20), 287 }
   0xf   : > { %s750_s21 = sshll.u32 %s1018_s19, 2  ;;  %s794_s25 = sshll.u32 %s1020_s20, 3  ;;  %v894_v0 = vmov (!%p754_p6), 0.0  }
  0x10   : > { %s945_s24 = scalar_lea.vmem %s1008_s0, %s750_s21  ;;  %s950_s28 = scalar_lea.vmem %s1009_s1, %s794_s25  ;;  %327 = vst [vmem:[#allocation2] sm:$0xff] (!%p754_p6), %v894_v0  ;;  %328 = vst [vmem:[#allocation2 + $0x8] sm:$0xff] (!%p754_p6), %v894_v0 }
  0x11   : > { %326 = sbr.rel (%p754_p6) target bundleno = 24 (0x18), region = 40 }
  0x18 PF: > { %v820_v1 = vld [vmem:[%s950_s28 + $0x4] ss:$8 sps:$4 sm:$0xff]   ;;  %v822_v2 = vld [vmem:[%s950_s28] ss:$8 sps:$4 sm:$0xff]   ;;  %v823_v3 = vld [vmem:[%s950_s28 + $0x14] ss:$8 sps:$4 sm:$0xff]  }
  0x19   : > { %531 = vmatprep.subr.bf16.mxu0 %v820_v1  ;;  %v825_v4 = vld [vmem:[%s950_s28 + $0x10] ss:$8 sps:$4 sm:$0xff]   ;;  %v826_v5 = vld [vmem:[%s950_s28 + $0x24] ss:$8 sps:$4 sm:$0xff]   ;;  %v828_v6 = vld [vmem:[%s950_s28 + $0x20] ss:$8 sps:$4 sm:$0xff]  }
  0x1a   : > { %532 = vmatpush1.bf16.msra.mxu0 %v822_v2  ;;  %v829_v7 = vld [vmem:[%s950_s28 + $0x34] ss:$8 sps:$4 sm:$0xff]   ;;  %v831_v8 = vld [vmem:[%s950_s28 + $0x30] ss:$8 sps:$4 sm:$0xff]   ;;  %v832_v9 = vld [vmem:[%s950_s28 + $0x44] ss:$8 sps:$4 sm:$0xff]  }
  0x1b   : > { %533 = vmatprep.subr.bf16.mxu0 %v823_v3  ;;  %v834_v10 = vld [vmem:[%s950_s28 + $0x40] ss:$8 sps:$4 sm:$0xff]   ;;  %v835_v11 = vld [vmem:[%s950_s28 + $0x54] ss:$8 sps:$4 sm:$0xff]   ;;  %v837_v12 = vld [vmem:[%s950_s28 + $0x50] ss:$8 sps:$4 sm:$0xff]  }
  0x1c   : > { %v838_v13 = vld [vmem:[%s950_s28 + $0x64] ss:$8 sps:$4 sm:$0xff]   ;;  %v840_v16 = vld [vmem:[%s950_s28 + $0x60] ss:$8 sps:$4 sm:$0xff]   ;;  %v841_v17 = vld [vmem:[%s950_s28 + $0x74] ss:$8 sps:$4 sm:$0xff]  }
  0x1d   : > { %v331_v14 = vld [vmem:[%s945_s24] sm:$0xff]  ;;  %v843_v18 = vld [vmem:[%s950_s28 + $0x70] ss:$8 sps:$4 sm:$0xff]   ;;  %v847_v21 = vld [vmem:[%s950_s28 + $0x94] ss:$8 sps:$4 sm:$0xff]   ;;  %p789_p7 = scmp.ne.s32.totalorder %s884_s15, 8 }
  0x1e   : > { %534 = vmatpush1.bf16.msra.mxu0 %v825_v4  ;;  %v756_v15 = vcombine.high %v331_v14, %v331_v14  ;;  %v844_v19 = vld [vmem:[%s950_s28 + $0x84] ss:$8 sps:$4 sm:$0xff]   ;;  %v846_v20 = vld [vmem:[%s950_s28 + $0x80] ss:$8 sps:$4 sm:$0xff]   ;;  %v849_v22 = vld [vmem:[%s950_s28 + $0x90] ss:$8 sps:$4 sm:$0xff]   ;;  %v755_v35 = vcombine.low %v331_v14, %v331_v14  ;;  %v584_v44 = vlaneseq (!%p789_p7) }
  0x1f   : > { %535 = vmatprep.subr.bf16.mxu0 %v826_v5  ;;  %v850_v23 = vld [vmem:[%s950_s28 + $0xa4] ss:$8 sps:$4 sm:$0xff]   ;;  %v852_v24 = vld [vmem:[%s950_s28 + $0xa0] ss:$8 sps:$4 sm:$0xff]   ;;  %v853_v25 = vld [vmem:[%s950_s28 + $0xb4] ss:$8 sps:$4 sm:$0xff]  }
  0x20   : > { %563 = vmatprep.mubr.bf16.mxu0 %v756_v15  ;;  %v855_v26 = vld [vmem:[%s950_s28 + $0xb0] ss:$8 sps:$4 sm:$0xff]   ;;  %v856_v27 = vld [vmem:[%s950_s28 + $0xc4] ss:$8 sps:$4 sm:$0xff]   ;;  %v858_v28 = vld [vmem:[%s950_s28 + $0xc0] ss:$8 sps:$4 sm:$0xff]  }
  0x21   : > { %v859_v29 = vld [vmem:[%s950_s28 + $0xd4] ss:$8 sps:$4 sm:$0xff]   ;;  %v861_v30 = vld [vmem:[%s950_s28 + $0xd0] ss:$8 sps:$4 sm:$0xff]   ;;  %v862_v31 = vld [vmem:[%s950_s28 + $0xe4] ss:$8 sps:$4 sm:$0xff]  }
  0x22   : > { %536 = vmatpush1.bf16.msra.mxu0 %v828_v6  ;;  %v864_v32 = vld [vmem:[%s950_s28 + $0xe0] ss:$8 sps:$4 sm:$0xff]   ;;  %v865_v33 = vld [vmem:[%s950_s28 + $0xf4] ss:$8 sps:$4 sm:$0xff]   ;;  %v867_v34 = vld [vmem:[%s950_s28 + $0xf0] ss:$8 sps:$4 sm:$0xff]  }
  0x23   : > { %537 = vmatprep.subr.bf16.mxu0 %v829_v7  ;;  %v329_v36 = vld [vmem:[#allocation2] sm:$0xff]  ;;  %v330_v37 = vld [vmem:[#allocation2 + $0x8] sm:$0xff]  ;;  %v585_v45 = vshrl.u32 (!%p789_p7), %v584_v44, 7 }
  0x24   : > { %v582_v46 = vld [vmem:[%s1010_s2] sm:$0x3] (!%p789_p7) }
  0x25   : > { %v596_v47 = vld [vmem:[%s1011_s3] sm:$0x3] (!%p789_p7)  ;;  %v586_v48 = vsub.s32 (!%p789_p7), 0, %v585_v45  ;;  %v590_v49 = vsub.s32 (!%p789_p7), 1, %v585_v45 }
  0x26   : > { %538 = vmatpush1.bf16.msra.mxu0 %v831_v8 }
  0x27   : > { %539 = vmatprep.subr.bf16.mxu0 %v832_v9  ;;  %v587_v52 = vrot.slane (!%p789_p7), %v582_v46, %v586_v48  ;;  %v601_v53 = vrot.slane (!%p789_p7), %v596_v47, %v586_v48  ;;  %v591_v54 = vrot.slane (!%p789_p7), %v582_v46, %v590_v49  ;;  %v605_v55 = vrot.slane (!%p789_p7), %v596_v47, %v590_v49 }
  0x2a   : > { %540 = vmatpush1.bf16.msra.mxu0 %v834_v10 }
  0x2b   : > { %541 = vmatprep.subr.bf16.mxu0 %v835_v11 }
  0x2e   : > { %542 = vmatpush1.bf16.msra.mxu0 %v837_v12 }
  0x2f   : > { %543 = vmatprep.subr.bf16.mxu0 %v838_v13 }
  0x32   : > { %544 = vmatpush1.bf16.msra.mxu0 %v840_v16 }
  0x33   : > { %545 = vmatprep.subr.bf16.mxu0 %v841_v17 }
  0x36   : > { %546 = vmatpush1.bf16.msra.mxu0 %v843_v18 }
  0x37   : > { %547 = vmatprep.subr.bf16.mxu0 %v844_v19 }
  0x3a   : > { %548 = vmatpush1.bf16.msra.mxu0 %v846_v20 }
  0x3b   : > { %549 = vmatprep.subr.bf16.mxu0 %v847_v21 }
  0x3e   : > { %550 = vmatpush1.bf16.msra.mxu0 %v849_v22 }
  0x3f   : > { %551 = vmatprep.subr.bf16.mxu0 %v850_v23 }
  0x42   : > { %552 = vmatpush1.bf16.msra.mxu0 %v852_v24 }
  0x43   : > { %553 = vmatprep.subr.bf16.mxu0 %v853_v25 }
  0x46   : > { %554 = vmatpush1.bf16.msra.mxu0 %v855_v26 }
  0x47   : > { %555 = vmatprep.subr.bf16.mxu0 %v856_v27 }
  0x4a   : > { %556 = vmatpush1.bf16.msra.mxu0 %v858_v28 }
  0x4b   : > { %557 = vmatprep.subr.bf16.mxu0 %v859_v29 }
  0x4e   : > { %558 = vmatpush1.bf16.msra.mxu0 %v861_v30 }
  0x4f   : > { %559 = vmatprep.subr.bf16.mxu0 %v862_v31 }
  0x52   : > { %560 = vmatpush1.bf16.msra.mxu0 %v864_v32 }
  0x53   : > { %561 = vmatprep.subr.bf16.mxu0 %v865_v33 }
  0x56   : > { %562 = vmatpush1.bf16.msra.mxu0 %v867_v34 }
  0x59   : > { %564 = vmatmul.mubr.bf16.vlgmr.msra.gmra.mrb[0].mxu0 %v755_v35 }
 0x12a   : > { %579 = sbr.rel (%p789_p7) target bundleno = 319 (0x13f), region = 44 }
 0x12c   : > { %v565_v38 = vpop.f32.mrb[0].mxu0 }
 0x12d   : > { %v572_v39 = vadd.f32 %v565_v38, %v329_v36  ;;  %v567_v40 = vpop.f32.mrb[1].mxu0 }
 0x12e   : > { %v573_v41 = vadd.f32 %v567_v40, %v330_v37  ;;  %v569_v42 = vpop.f32.mrb[2].mxu0 }
 0x12f   : > { %574 = vst [vmem:[#allocation2] sm:$0xff] %v572_v39  ;;  %v570_v43 = vpop.f32.mrb[3].mxu0 }
 0x130   : > { %575 = vst [vmem:[#allocation2 + $0x8] sm:$0xff] %v573_v41 }
 0x136   : > { %v580_v50 = vld [vmem:[#allocation2] sm:$0xff] }
 0x137   : > { %v581_v51 = vld [vmem:[#allocation2 + $0x8] sm:$0xff]  ;;  %v594_v56 = vmul.f32 %v587_v52, %v580_v50 }
 0x138   : > { %v595_v57 = vmul.f32 %v591_v54, %v581_v51 }
 0x139   : > { %v608_v58 = vadd.f32 %v601_v53, %v594_v56 }
 0x13a   : > { %v609_v59 = vadd.f32 %v605_v55, %v595_v57 }
 0x13b   : > { %v610_v60 = vmax.f32 %v608_v58, 0.0 }
 0x13c   : > { %v611_v61 = vmax.f32 %v609_v59, 0.0 }
 0x13d   : > { %612 = vst [vmem:[%s1012_s4] sm:$0xff] %v610_v60 }
 0x13e   : > { %613 = vst [vmem:[%s1012_s4 + $0x8] sm:$0xff] %v611_v61 }
 0x13f PF: > { %s14_s17 = sadd.s32 1, %s892_s17   ;;  %s1013_s15 = smov %s888_s16 }
 0x140   : > { %p11_p8 = scmp.ge.s32.totalorder %s14_s17, 11   ;;  %s1014_s16 = smov %s1016_s18 }
 0x142   :  { %13 = sbr.rel (!%p11_p8) target bundleno = 2 (0x2), region = 83 }

// kernel: pretrained_model_forward.35
= control target key start
LH: loop header
LB: loop body
LE: loop exit
PB: predicated region body
PF: predicated region fallthrough
CT: control target
= control target key end

     0   :  { %s1014_s18 = smov 0   ;;  %s1016_s19 = smov 0   ;;  %s1108_s0 = inlined_call_operand.vmem [shape: bf16[8,2304], index: 0, kind: input, shape index: {}]   ;;  %s1109_s1 = inlined_call_operand.vmem [shape: bf16[2304,256], index: 1, kind: input, shape index: {}]   ;;  %s1110_s2 = inlined_call_operand.vmem [shape: f32[1,256], index: 2, kind: input, shape index: {}]   ;;  %s1111_s3 = inlined_call_operand.vmem [shape: f32[1,256], index: 3, kind: input, shape index: {}]   ;;  %s1112_s4 = inlined_call_operand.vmem [shape: f32[8,256], index: 4, kind: input, shape index: {}]   ;;  %s1113_s5 = inlined_call_operand.vmem [shape: f32[8,256], index: 5, kind: output, shape index: {}]  }
   0x1   :  { %s1018_s20 = smov 0  }
   0x2 LB: > { %s27_s21 = sadd.s32 1, %s977_s19  ;;  %p837_p0 = scmp.ge.s32.totalorder %s981_s20, 1  ;;  %s981_s20 = sphi %s1018_s20, %s15_s20   ;;  %s977_s19 = sphi %s1016_s19, %s1115_s19   ;;  %s973_s18 = sphi %s1014_s18, %s1114_s18  }
   0x3   : > { %p28_p1 = scmp.ge.s32.totalorder %s27_s21, 9  ;;  %p271_p2 = scmp.lt.s32.totalorder %s981_s20, 10 }
   0x5   : > { %s1117_s21 = smov (%p28_p1, %s27_s21), 0  ;;  %p272_p3 = pnand %p837_p0, %p271_p2 }
   0x6   : > { %s838_s22 = sshll.u32 (!%p272_p3), %s973_s18, 1  ;;  %s840_s23 = sshll.u32 (!%p272_p3), %s973_s18, 5 }
   0x7   : > { %275 = sbr.rel (%p272_p3) target bundleno = 321 (0x141), region = 40  ;;  %p337_p4 = scmp.lt.s32.totalorder (!%p272_p3), %s838_s22, 17 }
   0x8   : > { %p346_p5 = scmp.lt.s32.totalorder (!%p272_p3), %s840_s23, 287  ;;  %p843_p6 = scmp.ne.s32.totalorder (!%p272_p3), %s973_s18, 0 }
   0xe   : > { %s1119_s22 = smov (!%p337_p4, %s838_s22), 17  ;;  %s1121_s23 = smov (!%p346_p5, %s840_s23), 287 }
   0xf   : > { %s839_s24 = sshll.u32 %s1119_s22, 2  ;;  %s883_s28 = sshll.u32 %s1121_s23, 3  ;;  %v983_v0 = vmov (!%p843_p6), 0.0  }
  0x10   : > { %s1039_s27 = scalar_lea.vmem %s1108_s0, %s839_s24  ;;  %s1044_s6 = scalar_lea.vmem %s1109_s1, %s883_s28  ;;  %390 = vst [vmem:[#allocation2] sm:$0xff] (!%p843_p6), %v983_v0  ;;  %391 = vst [vmem:[#allocation2 + $0x8] sm:$0xff] (!%p843_p6), %v983_v0 }
  0x11   : > { %389 = sbr.rel (%p843_p6) target bundleno = 24 (0x18), region = 44 }
  0x18 PF: > { %v909_v1 = vld [vmem:[%s1044_s6 + $0x4] ss:$8 sps:$4 sm:$0xff]   ;;  %v911_v2 = vld [vmem:[%s1044_s6] ss:$8 sps:$4 sm:$0xff]   ;;  %v912_v3 = vld [vmem:[%s1044_s6 + $0x14] ss:$8 sps:$4 sm:$0xff]  }
  0x19   : > { %594 = vmatprep.subr.bf16.mxu0 %v909_v1  ;;  %v914_v4 = vld [vmem:[%s1044_s6 + $0x10] ss:$8 sps:$4 sm:$0xff]   ;;  %v915_v5 = vld [vmem:[%s1044_s6 + $0x24] ss:$8 sps:$4 sm:$0xff]   ;;  %v917_v6 = vld [vmem:[%s1044_s6 + $0x20] ss:$8 sps:$4 sm:$0xff]  }
  0x1a   : > { %595 = vmatpush1.bf16.msra.mxu0 %v911_v2  ;;  %v918_v7 = vld [vmem:[%s1044_s6 + $0x34] ss:$8 sps:$4 sm:$0xff]   ;;  %v920_v8 = vld [vmem:[%s1044_s6 + $0x30] ss:$8 sps:$4 sm:$0xff]   ;;  %v921_v9 = vld [vmem:[%s1044_s6 + $0x44] ss:$8 sps:$4 sm:$0xff]  }
  0x1b   : > { %596 = vmatprep.subr.bf16.mxu0 %v912_v3  ;;  %v923_v10 = vld [vmem:[%s1044_s6 + $0x40] ss:$8 sps:$4 sm:$0xff]   ;;  %v924_v11 = vld [vmem:[%s1044_s6 + $0x54] ss:$8 sps:$4 sm:$0xff]   ;;  %v926_v12 = vld [vmem:[%s1044_s6 + $0x50] ss:$8 sps:$4 sm:$0xff]  }
  0x1c   : > { %v927_v13 = vld [vmem:[%s1044_s6 + $0x64] ss:$8 sps:$4 sm:$0xff]   ;;  %v929_v16 = vld [vmem:[%s1044_s6 + $0x60] ss:$8 sps:$4 sm:$0xff]   ;;  %v930_v17 = vld [vmem:[%s1044_s6 + $0x74] ss:$8 sps:$4 sm:$0xff]  }
  0x1d   : > { %v394_v14 = vld [vmem:[%s1039_s27] sm:$0xff]  ;;  %v932_v18 = vld [vmem:[%s1044_s6 + $0x70] ss:$8 sps:$4 sm:$0xff]   ;;  %v936_v21 = vld [vmem:[%s1044_s6 + $0x94] ss:$8 sps:$4 sm:$0xff]   ;;  %p878_p7 = scmp.ne.s32.totalorder %s973_s18, 8 }
  0x1e   : > { %597 = vmatpush1.bf16.msra.mxu0 %v914_v4  ;;  %v845_v15 = vcombine.high %v394_v14, %v394_v14  ;;  %v933_v19 = vld [vmem:[%s1044_s6 + $0x84] ss:$8 sps:$4 sm:$0xff]   ;;  %v935_v20 = vld [vmem:[%s1044_s6 + $0x80] ss:$8 sps:$4 sm:$0xff]   ;;  %v938_v22 = vld [vmem:[%s1044_s6 + $0x90] ss:$8 sps:$4 sm:$0xff]   ;;  %v844_v35 = vcombine.low %v394_v14, %v394_v14  ;;  %v647_v44 = vlaneseq (!%p878_p7) }
  0x1f   : > { %598 = vmatprep.subr.bf16.mxu0 %v915_v5  ;;  %v939_v23 = vld [vmem:[%s1044_s6 + $0xa4] ss:$8 sps:$4 sm:$0xff]   ;;  %v941_v24 = vld [vmem:[%s1044_s6 + $0xa0] ss:$8 sps:$4 sm:$0xff]   ;;  %v942_v25 = vld [vmem:[%s1044_s6 + $0xb4] ss:$8 sps:$4 sm:$0xff]  }
  0x20   : > { %626 = vmatprep.mubr.bf16.mxu0 %v845_v15  ;;  %v944_v26 = vld [vmem:[%s1044_s6 + $0xb0] ss:$8 sps:$4 sm:$0xff]   ;;  %v945_v27 = vld [vmem:[%s1044_s6 + $0xc4] ss:$8 sps:$4 sm:$0xff]   ;;  %v947_v28 = vld [vmem:[%s1044_s6 + $0xc0] ss:$8 sps:$4 sm:$0xff]  }
  0x21   : > { %v948_v29 = vld [vmem:[%s1044_s6 + $0xd4] ss:$8 sps:$4 sm:$0xff]   ;;  %v950_v30 = vld [vmem:[%s1044_s6 + $0xd0] ss:$8 sps:$4 sm:$0xff]   ;;  %v951_v31 = vld [vmem:[%s1044_s6 + $0xe4] ss:$8 sps:$4 sm:$0xff]  }
  0x22   : > { %599 = vmatpush1.bf16.msra.mxu0 %v917_v6  ;;  %v953_v32 = vld [vmem:[%s1044_s6 + $0xe0] ss:$8 sps:$4 sm:$0xff]   ;;  %v954_v33 = vld [vmem:[%s1044_s6 + $0xf4] ss:$8 sps:$4 sm:$0xff]   ;;  %v956_v34 = vld [vmem:[%s1044_s6 + $0xf0] ss:$8 sps:$4 sm:$0xff]  }
  0x23   : > { %600 = vmatprep.subr.bf16.mxu0 %v918_v7  ;;  %v392_v36 = vld [vmem:[#allocation2] sm:$0xff]  ;;  %v393_v37 = vld [vmem:[#allocation2 + $0x8] sm:$0xff]  ;;  %v648_v45 = vshrl.u32 (!%p878_p7), %v647_v44, 7 }
  0x24   : > { %v645_v46 = vld [vmem:[%s1110_s2] sm:$0x3] (!%p878_p7)  ;;  %v674_v59 = vld [vmem:[%s1112_s4 + $0x8] sm:$0xff] (!%p878_p7) }
  0x25   : > { %v659_v47 = vld [vmem:[%s1111_s3] sm:$0x3] (!%p878_p7)  ;;  %v649_v48 = vsub.s32 (!%p878_p7), 0, %v648_v45  ;;  %v653_v49 = vsub.s32 (!%p878_p7), 1, %v648_v45 }
  0x26   : > { %601 = vmatpush1.bf16.msra.mxu0 %v920_v8  ;;  %v673_v58 = vld [vmem:[%s1112_s4] sm:$0xff] (!%p878_p7) }
  0x27   : > { %602 = vmatprep.subr.bf16.mxu0 %v921_v9  ;;  %v650_v52 = vrot.slane (!%p878_p7), %v645_v46, %v649_v48  ;;  %v664_v53 = vrot.slane (!%p878_p7), %v659_v47, %v649_v48  ;;  %v654_v54 = vrot.slane (!%p878_p7), %v645_v46, %v653_v49  ;;  %v668_v55 = vrot.slane (!%p878_p7), %v659_v47, %v653_v49 }
  0x2a   : > { %603 = vmatpush1.bf16.msra.mxu0 %v923_v10 }
  0x2b   : > { %604 = vmatprep.subr.bf16.mxu0 %v924_v11 }
  0x2e   : > { %605 = vmatpush1.bf16.msra.mxu0 %v926_v12 }
  0x2f   : > { %606 = vmatprep.subr.bf16.mxu0 %v927_v13 }
  0x32   : > { %607 = vmatpush1.bf16.msra.mxu0 %v929_v16 }
  0x33   : > { %608 = vmatprep.subr.bf16.mxu0 %v930_v17 }
  0x36   : > { %609 = vmatpush1.bf16.msra.mxu0 %v932_v18 }
  0x37   : > { %610 = vmatprep.subr.bf16.mxu0 %v933_v19 }
  0x3a   : > { %611 = vmatpush1.bf16.msra.mxu0 %v935_v20 }
  0x3b   : > { %612 = vmatprep.subr.bf16.mxu0 %v936_v21 }
  0x3e   : > { %613 = vmatpush1.bf16.msra.mxu0 %v938_v22 }
  0x3f   : > { %614 = vmatprep.subr.bf16.mxu0 %v939_v23 }
  0x42   : > { %615 = vmatpush1.bf16.msra.mxu0 %v941_v24 }
  0x43   : > { %616 = vmatprep.subr.bf16.mxu0 %v942_v25 }
  0x46   : > { %617 = vmatpush1.bf16.msra.mxu0 %v944_v26 }
  0x47   : > { %618 = vmatprep.subr.bf16.mxu0 %v945_v27 }
  0x4a   : > { %619 = vmatpush1.bf16.msra.mxu0 %v947_v28 }
  0x4b   : > { %620 = vmatprep.subr.bf16.mxu0 %v948_v29 }
  0x4e   : > { %621 = vmatpush1.bf16.msra.mxu0 %v950_v30 }
  0x4f   : > { %622 = vmatprep.subr.bf16.mxu0 %v951_v31 }
  0x52   : > { %623 = vmatpush1.bf16.msra.mxu0 %v953_v32 }
  0x53   : > { %624 = vmatprep.subr.bf16.mxu0 %v954_v33 }
  0x56   : > { %625 = vmatpush1.bf16.msra.mxu0 %v956_v34 }
  0x59   : > { %627 = vmatmul.mubr.bf16.vlgmr.msra.gmra.mrb[0].mxu0 %v844_v35 }
 0x12a   : > { %642 = sbr.rel (%p878_p7) target bundleno = 321 (0x141), region = 48 }
 0x12c   : > { %v628_v38 = vpop.f32.mrb[0].mxu0 }
 0x12d   : > { %v635_v39 = vadd.f32 %v628_v38, %v392_v36  ;;  %v630_v40 = vpop.f32.mrb[1].mxu0 }
 0x12e   : > { %v636_v41 = vadd.f32 %v630_v40, %v393_v37  ;;  %v632_v42 = vpop.f32.mrb[2].mxu0 }
 0x12f   : > { %637 = vst [vmem:[#allocation2] sm:$0xff] %v635_v39  ;;  %v633_v43 = vpop.f32.mrb[3].mxu0 }
 0x130   : > { %638 = vst [vmem:[#allocation2 + $0x8] sm:$0xff] %v636_v41 }
 0x136   : > { %v643_v50 = vld [vmem:[#allocation2] sm:$0xff] }
 0x137   : > { %v644_v51 = vld [vmem:[#allocation2 + $0x8] sm:$0xff]  ;;  %v657_v56 = vmul.f32 %v650_v52, %v643_v50 }
 0x138   : > { %v658_v57 = vmul.f32 %v654_v54, %v644_v51 }
 0x139   : > { %v671_v60 = vadd.f32 %v664_v53, %v657_v56 }
 0x13a   : > { %v672_v61 = vadd.f32 %v668_v55, %v658_v57 }
 0x13b   : > { %v675_v62 = vadd.f32 %v673_v58, %v671_v60 }
 0x13c   : > { %v676_v63 = vadd.f32 %v674_v59, %v672_v61 }
 0x13d   : > { %v677_v0 = vmax.f32 %v675_v62, 0.0 }
 0x13e   : > { %v678_v1 = vmax.f32 %v676_v63, 0.0 }
 0x13f   : > { %679 = vst [vmem:[%s1113_s5] sm:$0xff] %v677_v0 }
 0x140   : > { %680 = vst [vmem:[%s1113_s5 + $0x8] sm:$0xff] %v678_v1 }
 0x141 PF: > { %s15_s20 = sadd.s32 1, %s981_s20   ;;  %s1114_s18 = smov %s977_s19 }
 0x142   : > { %p12_p8 = scmp.ge.s32.totalorder %s15_s20, 11   ;;  %s1115_s19 = smov %s1117_s21 }
 0x144   :  { %14 = sbr.rel (!%p12_p8) target bundleno = 2 (0x2), region = 90 }

// kernel: pretrained_model_forward.38
= control target key start
LH: loop header
LB: loop body
LE: loop exit
PB: predicated region body
PF: predicated region fallthrough
CT: control target
= control target key end

     0   :  { %s1136_s15 = smov 0   ;;  %s1138_s16 = smov 0   ;;  %s1360_s0 = inlined_call_operand.vmem [shape: bf16[8,2304], index: 0, kind: input, shape index: {}]   ;;  %s1361_s1 = inlined_call_operand.vmem [shape: bf16[2304,512], index: 1, kind: input, shape index: {}]   ;;  %s1362_s2 = inlined_call_operand.vmem [shape: f32[1,512], index: 2, kind: input, shape index: {}]   ;;  %s1363_s3 = inlined_call_operand.vmem [shape: f32[1,512], index: 3, kind: input, shape index: {}]   ;;  %s1364_s4 = inlined_call_operand.vmem [shape: f32[8,512], index: 4, kind: output, shape index: {}]  }
   0x1   :  { %s1140_s17 = smov 0   ;;  %s1142_s18 = smov 0  }
   0x2   :  { %s1144_s19 = smov 0   ;;  %s1146_s20 = smov 0  }
   0x3   :  { %s1148_s21 = smov 0  }
   0x4 LB: > { %s26_s22 = sadd.s32 1, %s1100_s19  ;;  %s29_s23 = sadd.s32 1, %s1104_s20  ;;  %s1108_s21 = sphi %s1148_s21, %s14_s21   ;;  %s1104_s20 = sphi %s1146_s20, %s1370_s20   ;;  %s1100_s19 = sphi %s1144_s19, %s1369_s19   ;;  %s1096_s18 = sphi %s1142_s18, %s1368_s18   ;;  %s1092_s17 = sphi %s1140_s17, %s1367_s17   ;;  %s1088_s16 = sphi %s1138_s16, %s1366_s16   ;;  %s1084_s15 = sphi %s1136_s15, %s1365_s15  }
   0x5   : > { %p27_p0 = scmp.ge.s32.totalorder %s26_s22, 9  ;;  %p77_p1 = scmp.ne.s32.totalorder %s1088_s16, %s1084_s15 }
   0x6   : > { %p78_p2 = scmp.eq.s32.totalorder %s1108_s21, 0  ;;  %s70_s27 = sadd.s32 1, %s1088_s16 }
   0x7   : > { %s1372_s22 = smov (%p27_p0, %s26_s22), 0  ;;  %s1374_s23 = smov (!%p27_p0, %s29_s23), %s1104_s20 }
   0x8   : > { %p79_p3 = por %p78_p2, %p77_p1  ;;  %p31_p4 = scmp.ge.s32.totalorder %s1374_s23, 2 }
   0x9   : > { %s65_s24 = ssub.s32 %s1100_s19, %s1372_s22  ;;  %p894_p6 = scmp.ge.s32.totalorder %s1108_s21, 18 }
   0xa   : > { %s1376_s23 = smov (%p31_p4, %s1374_s23), 0 }
   0xb   : > { %s66_s25 = ssub.s32 %s1104_s20, %s1376_s23  ;;  %183 = sbr.rel (%p894_p6) target bundleno = 41 (0x29), region = 16 }
   0xc   : > { %s67_s26 = sor.u32 %s66_s25, %s65_s24 }
   0xd   : > { %p68_p5 = scmp.eq.s32.totalorder %s67_s26, 0 }
   0xf   : > { %s1187_s28 = scalar_select %p68_p5, %s1088_s16, %s70_s27  }
  0x12   : > { %199 = sbr.rel (!%p79_p3) target bundleno = 41 (0x29), region = 24  ;;  %s201_s29 = sand.u32 (%p79_p3), 1, %s1088_s16  }
  0x13   : > { %s897_s30 = sshll.u32 (%p79_p3), %s1104_s20, 1  ;;  %s895_s5 = sshll.u32 (%p79_p3), %s201_s29, 8 }
  0x14   : > { %s946_s6 = sshll.u32 (%p79_p3), %s1100_s19, 7  ;;  %s1201_s12 = scalar_lea.vmem (%p79_p3), [#allocation3], %s895_s5 }
  0x15   : > { %s207_s7 = sadd.s32 (%p79_p3), %s946_s6, %s897_s30 }
  0x16   : > { %s899_s8 = sshll.u32 (%p79_p3), %s207_s7, 2 }
  0x17   : > { %s1196_s11 = scalar_lea.vmem (%p79_p3), %s1361_s1, %s899_s8 }
  0x18   : > { %v299_v0 = vld [vmem:[%s1196_s11] sm:$0xff] (%p79_p3)  ;;  %v301_v1 = vld [vmem:[%s1196_s11 + $0x10] sm:$0xff] (%p79_p3) }
  0x19   : > { %v303_v2 = vld [vmem:[%s1196_s11 + $0x20] sm:$0xff]  ;;  %300 = vst [vmem:[%s1201_s12] sm:$0xff] %v299_v0  ;;  %302 = vst [vmem:[%s1201_s12 + $0x8] sm:$0xff] %v301_v1  ;;  %v305_v3 = vld [vmem:[%s1196_s11 + $0x30] sm:$0xff] }
  0x1a   : > { %304 = vst [vmem:[%s1201_s12 + $0x10] sm:$0xff] %v303_v2  ;;  %v307_v4 = vld [vmem:[%s1196_s11 + $0x40] sm:$0xff]  ;;  %v309_v5 = vld [vmem:[%s1196_s11 + $0x50] sm:$0xff]  ;;  %306 = vst [vmem:[%s1201_s12 + $0x18] sm:$0xff] %v305_v3 }
  0x1b   : > { %308 = vst [vmem:[%s1201_s12 + $0x20] sm:$0xff] %v307_v4  ;;  %310 = vst [vmem:[%s1201_s12 + $0x28] sm:$0xff] %v309_v5  ;;  %v311_v6 = vld [vmem:[%s1196_s11 + $0x60] sm:$0xff]  ;;  %v313_v7 = vld [vmem:[%s1196_s11 + $0x70] sm:$0xff] }
  0x1c   : > { %v315_v8 = vld [vmem:[%s1196_s11 + $0x80] sm:$0xff]  ;;  %312 = vst [vmem:[%s1201_s12 + $0x30] sm:$0xff] %v311_v6  ;;  %314 = vst [vmem:[%s1201_s12 + $0x38] sm:$0xff] %v313_v7  ;;  %v317_v9 = vld [vmem:[%s1196_s11 + $0x90] sm:$0xff] }
  0x1d   : > { %316 = vst [vmem:[%s1201_s12 + $0x40] sm:$0xff] %v315_v8  ;;  %v319_v10 = vld [vmem:[%s1196_s11 + $0xa0] sm:$0xff]  ;;  %v321_v11 = vld [vmem:[%s1196_s11 + $0xb0] sm:$0xff]  ;;  %318 = vst [vmem:[%s1201_s12 + $0x48] sm:$0xff] %v317_v9 }
  0x1e   : > { %320 = vst [vmem:[%s1201_s12 + $0x50] sm:$0xff] %v319_v10  ;;  %322 = vst [vmem:[%s1201_s12 + $0x58] sm:$0xff] %v321_v11  ;;  %v323_v12 = vld [vmem:[%s1196_s11 + $0xc0] sm:$0xff]  ;;  %v325_v13 = vld [vmem:[%s1196_s11 + $0xd0] sm:$0xff] }
  0x1f   : > { %v327_v14 = vld [vmem:[%s1196_s11 + $0xe0] sm:$0xff]  ;;  %324 = vst [vmem:[%s1201_s12 + $0x60] sm:$0xff] %v323_v12  ;;  %326 = vst [vmem:[%s1201_s12 + $0x68] sm:$0xff] %v325_v13  ;;  %v329_v15 = vld [vmem:[%s1196_s11 + $0xf0] sm:$0xff] }
  0x20   : > { %328 = vst [vmem:[%s1201_s12 + $0x70] sm:$0xff] %v327_v14  ;;  %v331_v16 = vld [vmem:[%s1196_s11 + $0x100] sm:$0xff]  ;;  %v333_v17 = vld [vmem:[%s1196_s11 + $0x110] sm:$0xff]  ;;  %330 = vst [vmem:[%s1201_s12 + $0x78] sm:$0xff] %v329_v15 }
  0x21   : > { %332 = vst [vmem:[%s1201_s12 + $0x80] sm:$0xff] %v331_v16  ;;  %334 = vst [vmem:[%s1201_s12 + $0x88] sm:$0xff] %v333_v17  ;;  %v335_v18 = vld [vmem:[%s1196_s11 + $0x120] sm:$0xff]  ;;  %v337_v19 = vld [vmem:[%s1196_s11 + $0x130] sm:$0xff] }
  0x22   : > { %v339_v20 = vld [vmem:[%s1196_s11 + $0x140] sm:$0xff]  ;;  %336 = vst [vmem:[%s1201_s12 + $0x90] sm:$0xff] %v335_v18  ;;  %338 = vst [vmem:[%s1201_s12 + $0x98] sm:$0xff] %v337_v19  ;;  %v341_v21 = vld [vmem:[%s1196_s11 + $0x150] sm:$0xff] }
  0x23   : > { %340 = vst [vmem:[%s1201_s12 + $0xa0] sm:$0xff] %v339_v20  ;;  %v343_v22 = vld [vmem:[%s1196_s11 + $0x160] sm:$0xff]  ;;  %v345_v23 = vld [vmem:[%s1196_s11 + $0x170] sm:$0xff]  ;;  %342 = vst [vmem:[%s1201_s12 + $0xa8] sm:$0xff] %v341_v21 }
  0x24   : > { %344 = vst [vmem:[%s1201_s12 + $0xb0] sm:$0xff] %v343_v22  ;;  %346 = vst [vmem:[%s1201_s12 + $0xb8] sm:$0xff] %v345_v23  ;;  %v347_v24 = vld [vmem:[%s1196_s11 + $0x180] sm:$0xff]  ;;  %v349_v25 = vld [vmem:[%s1196_s11 + $0x190] sm:$0xff] }
  0x25   : > { %v351_v26 = vld [vmem:[%s1196_s11 + $0x1a0] sm:$0xff]  ;;  %348 = vst [vmem:[%s1201_s12 + $0xc0] sm:$0xff] %v347_v24  ;;  %350 = vst [vmem:[%s1201_s12 + $0xc8] sm:$0xff] %v349_v25  ;;  %v353_v27 = vld [vmem:[%s1196_s11 + $0x1b0] sm:$0xff] }
  0x26   : > { %352 = vst [vmem:[%s1201_s12 + $0xd0] sm:$0xff] %v351_v26  ;;  %v355_v28 = vld [vmem:[%s1196_s11 + $0x1c0] sm:$0xff]  ;;  %v357_v29 = vld [vmem:[%s1196_s11 + $0x1d0] sm:$0xff]  ;;  %354 = vst [vmem:[%s1201_s12 + $0xd8] sm:$0xff] %v353_v27 }
  0x27   : > { %356 = vst [vmem:[%s1201_s12 + $0xe0] sm:$0xff] %v355_v28  ;;  %358 = vst [vmem:[%s1201_s12 + $0xe8] sm:$0xff] %v357_v29  ;;  %v359_v30 = vld [vmem:[%s1196_s11 + $0x1e0] sm:$0xff]  ;;  %v361_v31 = vld [vmem:[%s1196_s11 + $0x1f0] sm:$0xff] }
  0x28   : > { %360 = vst [vmem:[%s1201_s12 + $0xf0] sm:$0xff] %v359_v30  ;;  %362 = vst [vmem:[%s1201_s12 + $0xf8] sm:$0xff] %v361_v31 }
  0x29 PF: > { %p900_p7 = scmp.ge.s32.totalorder %s1108_s21, 1  ;;  %p383_p8 = scmp.lt.s32.totalorder %s1108_s21, 19 }
  0x2b   : > { %p384_p9 = pnand %p900_p7, %p383_p8 }
  0x2c   : > { %s390_s13 = sand.u32 (!%p384_p9), 1, %s1084_s15   ;;  %s902_s14 = sshll.u32 (!%p384_p9), %s1092_s17, 1 }
  0x2d   : > { %387 = sbr.rel (%p384_p9) target bundleno = 357 (0x165), region = 70  ;;  %s901_s24 = sshll.u32 (!%p384_p9), %s390_s13, 8 }
  0x2e   : > { %p439_p10 = scmp.lt.s32.totalorder (!%p384_p9), %s902_s14, 17  ;;  %s904_s25 = sshll.u32 (!%p384_p9), %s1096_s18, 1 }
  0x2f   : > { %p449_p11 = scmp.lt.s32.totalorder (!%p384_p9), %s904_s25, 3  ;;  %s1290_s13 = scalar_lea.vmem (!%p384_p9), [#allocation3], %s901_s24 }
  0x30   : > { %p908_p12 = scmp.ne.s32.totalorder (!%p384_p9), %s1092_s17, 0 }
  0x34   : > { %s1378_s14 = smov (!%p439_p10, %s902_s14), 17  ;;  %s1380_s25 = smov (!%p449_p11, %s904_s25), 3 }
  0x35   : > { %s903_s26 = sshll.u32 %s1378_s14, 2  ;;  %s451_s15 = scalar_lea.vmem %s1362_s2, %s1380_s25  ;;  %v1110_v32 = vmov (!%p908_p12), 0.0  }
  0x36   : > { %s1272_s30 = scalar_lea.vmem %s1360_s0, %s903_s26  ;;  %s456_s18 = scalar_lea.vmem %s1363_s3, %s1380_s25  ;;  %472 = vst [vmem:[#allocation2] sm:$0xff] (!%p908_p12), %v1110_v32  ;;  %473 = vst [vmem:[#allocation2 + $0x8] sm:$0xff] (!%p908_p12), %v1110_v32 }
  0x37   : > { %s907_s9 = sshll.u32 %s1380_s25, 3  ;;  %471 = sbr.rel (%p908_p12) target bundleno = 62 (0x3e), region = 78 }
  0x38   : > { %s1288_s12 = scalar_lea.vmem %s1364_s4, %s907_s9 }
  0x3e PF: > { %v1004_v33 = vld [vmem:[%s1290_s13 + $0x4] ss:$8 sps:$4 sm:$0xff]   ;;  %v1006_v34 = vld [vmem:[%s1290_s13] ss:$8 sps:$4 sm:$0xff]   ;;  %v1007_v35 = vld [vmem:[%s1290_s13 + $0x14] ss:$8 sps:$4 sm:$0xff]  }
  0x3f   : > { %676 = vmatprep.subr.bf16.mxu0 %v1004_v33  ;;  %v1009_v36 = vld [vmem:[%s1290_s13 + $0x10] ss:$8 sps:$4 sm:$0xff]   ;;  %v1010_v37 = vld [vmem:[%s1290_s13 + $0x24] ss:$8 sps:$4 sm:$0xff]   ;;  %v1012_v38 = vld [vmem:[%s1290_s13 + $0x20] ss:$8 sps:$4 sm:$0xff]  }
  0x40   : > { %677 = vmatpush1.bf16.msra.mxu0 %v1006_v34  ;;  %v1013_v39 = vld [vmem:[%s1290_s13 + $0x34] ss:$8 sps:$4 sm:$0xff]   ;;  %v1015_v40 = vld [vmem:[%s1290_s13 + $0x30] ss:$8 sps:$4 sm:$0xff]   ;;  %v1016_v41 = vld [vmem:[%s1290_s13 + $0x44] ss:$8 sps:$4 sm:$0xff]  }
  0x41   : > { %678 = vmatprep.subr.bf16.mxu0 %v1007_v35  ;;  %v1018_v42 = vld [vmem:[%s1290_s13 + $0x40] ss:$8 sps:$4 sm:$0xff]   ;;  %v1019_v43 = vld [vmem:[%s1290_s13 + $0x54] ss:$8 sps:$4 sm:$0xff]   ;;  %v1021_v44 = vld [vmem:[%s1290_s13 + $0x50] ss:$8 sps:$4 sm:$0xff]  }
  0x42   : > { %v1022_v45 = vld [vmem:[%s1290_s13 + $0x64] ss:$8 sps:$4 sm:$0xff]   ;;  %v476_v46 = vld [vmem:[%s1272_s30] sm:$0xff]  ;;  %v1024_v48 = vld [vmem:[%s1290_s13 + $0x60] ss:$8 sps:$4 sm:$0xff]   ;;  %p943_p13 = scmp.ne.s32.totalorder %s1092_s17, 8 }
  0x43   : > { %v910_v47 = vcombine.high %v476_v46, %v476_v46  ;;  %v1025_v49 = vld [vmem:[%s1290_s13 + $0x74] ss:$8 sps:$4 sm:$0xff]   ;;  %v1027_v50 = vld [vmem:[%s1290_s13 + $0x70] ss:$8 sps:$4 sm:$0xff]   ;;  %v1028_v51 = vld [vmem:[%s1290_s13 + $0x84] ss:$8 sps:$4 sm:$0xff]   ;;  %v909_v3 = vcombine.low %v476_v46, %v476_v46  ;;  %v729_v12 = vlaneseq (!%p943_p13) }
  0x44   : > { %679 = vmatpush1.bf16.msra.mxu0 %v1009_v36  ;;  %v1030_v52 = vld [vmem:[%s1290_s13 + $0x80] ss:$8 sps:$4 sm:$0xff]   ;;  %v1031_v53 = vld [vmem:[%s1290_s13 + $0x94] ss:$8 sps:$4 sm:$0xff]   ;;  %v1033_v54 = vld [vmem:[%s1290_s13 + $0x90] ss:$8 sps:$4 sm:$0xff]  }
  0x45   : > { %680 = vmatprep.subr.bf16.mxu0 %v1010_v37  ;;  %708 = vmatprep.mubr.bf16.mxu0 %v910_v47  ;;  %v1034_v55 = vld [vmem:[%s1290_s13 + $0xa4] ss:$8 sps:$4 sm:$0xff]   ;;  %v1036_v56 = vld [vmem:[%s1290_s13 + $0xa0] ss:$8 sps:$4 sm:$0xff]   ;;  %v1037_v57 = vld [vmem:[%s1290_s13 + $0xb4] ss:$8 sps:$4 sm:$0xff]  }
  0x46   : > { %v1039_v58 = vld [vmem:[%s1290_s13 + $0xb0] ss:$8 sps:$4 sm:$0xff]   ;;  %v1040_v59 = vld [vmem:[%s1290_s13 + $0xc4] ss:$8 sps:$4 sm:$0xff]   ;;  %v1042_v60 = vld [vmem:[%s1290_s13 + $0xc0] ss:$8 sps:$4 sm:$0xff]  }
  0x47   : > { %v1043_v61 = vld [vmem:[%s1290_s13 + $0xd4] ss:$8 sps:$4 sm:$0xff]   ;;  %v1045_v62 = vld [vmem:[%s1290_s13 + $0xd0] ss:$8 sps:$4 sm:$0xff]   ;;  %v1046_v63 = vld [vmem:[%s1290_s13 + $0xe4] ss:$8 sps:$4 sm:$0xff]  }
  0x48   : > { %681 = vmatpush1.bf16.msra.mxu0 %v1012_v38  ;;  %v1048_v0 = vld [vmem:[%s1290_s13 + $0xe0] ss:$8 sps:$4 sm:$0xff]   ;;  %v1049_v1 = vld [vmem:[%s1290_s13 + $0xf4] ss:$8 sps:$4 sm:$0xff]   ;;  %v1051_v2 = vld [vmem:[%s1290_s13 + $0xf0] ss:$8 sps:$4 sm:$0xff]  }
  0x49   : > { %682 = vmatprep.subr.bf16.mxu0 %v1013_v39  ;;  %v474_v4 = vld [vmem:[#allocation2] sm:$0xff]  ;;  %v475_v5 = vld [vmem:[#allocation2 + $0x8] sm:$0xff]  ;;  %v730_v13 = vshrl.u32 (!%p943_p13), %v729_v12, 7 }
  0x4a   : > { %v727_v14 = vld [vmem:[%s451_s15] sm:$0x3] (!%p943_p13) }
  0x4b   : > { %v741_v15 = vld [vmem:[%s456_s18] sm:$0x3] (!%p943_p13)  ;;  %v731_v16 = vsub.s32 (!%p943_p13), 0, %v730_v13  ;;  %v735_v17 = vsub.s32 (!%p943_p13), 1, %v730_v13 }
  0x4c   : > { %683 = vmatpush1.bf16.msra.mxu0 %v1015_v40 }
  0x4d   : > { %684 = vmatprep.subr.bf16.mxu0 %v1016_v41  ;;  %v732_v20 = vrot.slane (!%p943_p13), %v727_v14, %v731_v16  ;;  %v746_v21 = vrot.slane (!%p943_p13), %v741_v15, %v731_v16  ;;  %v736_v22 = vrot.slane (!%p943_p13), %v727_v14, %v735_v17  ;;  %v750_v23 = vrot.slane (!%p943_p13), %v741_v15, %v735_v17 }
  0x50   : > { %685 = vmatpush1.bf16.msra.mxu0 %v1018_v42 }
  0x51   : > { %686 = vmatprep.subr.bf16.mxu0 %v1019_v43 }
  0x54   : > { %687 = vmatpush1.bf16.msra.mxu0 %v1021_v44 }
  0x55   : > { %688 = vmatprep.subr.bf16.mxu0 %v1022_v45 }
  0x58   : > { %689 = vmatpush1.bf16.msra.mxu0 %v1024_v48 }
  0x59   : > { %690 = vmatprep.subr.bf16.mxu0 %v1025_v49 }
  0x5c   : > { %691 = vmatpush1.bf16.msra.mxu0 %v1027_v50 }
  0x5d   : > { %692 = vmatprep.subr.bf16.mxu0 %v1028_v51 }
  0x60   : > { %693 = vmatpush1.bf16.msra.mxu0 %v1030_v52 }
  0x61   : > { %694 = vmatprep.subr.bf16.mxu0 %v1031_v53 }
  0x64   : > { %695 = vmatpush1.bf16.msra.mxu0 %v1033_v54 }
  0x65   : > { %696 = vmatprep.subr.bf16.mxu0 %v1034_v55 }
  0x68   : > { %697 = vmatpush1.bf16.msra.mxu0 %v1036_v56 }
  0x69   : > { %698 = vmatprep.subr.bf16.mxu0 %v1037_v57 }
  0x6c   : > { %699 = vmatpush1.bf16.msra.mxu0 %v1039_v58 }
  0x6d   : > { %700 = vmatprep.subr.bf16.mxu0 %v1040_v59 }
  0x70   : > { %701 = vmatpush1.bf16.msra.mxu0 %v1042_v60 }
  0x71   : > { %702 = vmatprep.subr.bf16.mxu0 %v1043_v61 }
  0x74   : > { %703 = vmatpush1.bf16.msra.mxu0 %v1045_v62 }
  0x75   : > { %704 = vmatprep.subr.bf16.mxu0 %v1046_v63 }
  0x78   : > { %705 = vmatpush1.bf16.msra.mxu0 %v1048_v0 }
  0x79   : > { %706 = vmatprep.subr.bf16.mxu0 %v1049_v1 }
  0x7c   : > { %707 = vmatpush1.bf16.msra.mxu0 %v1051_v2 }
  0x7f   : > { %709 = vmatmul.mubr.bf16.vlgmr.msra.gmra.mrb[0].mxu0 %v909_v3 }
 0x150   : > { %724 = sbr.rel (%p943_p13) target bundleno = 357 (0x165), region = 82 }
 0x152   : > { %v710_v6 = vpop.f32.mrb[0].mxu0 }
 0x153   : > { %v717_v7 = vadd.f32 %v710_v6, %v474_v4  ;;  %v712_v8 = vpop.f32.mrb[1].mxu0 }
 0x154   : > { %v718_v9 = vadd.f32 %v712_v8, %v475_v5  ;;  %v714_v10 = vpop.f32.mrb[2].mxu0 }
 0x155   : > { %719 = vst [vmem:[#allocation2] sm:$0xff] %v717_v7  ;;  %v715_v11 = vpop.f32.mrb[3].mxu0 }
 0x156   : > { %720 = vst [vmem:[#allocation2 + $0x8] sm:$0xff] %v718_v9 }
 0x15c   : > { %v725_v18 = vld [vmem:[#allocation2] sm:$0xff] }
 0x15d   : > { %v726_v19 = vld [vmem:[#allocation2 + $0x8] sm:$0xff]  ;;  %v739_v24 = vmul.f32 %v732_v20, %v725_v18 }
 0x15e   : > { %v740_v25 = vmul.f32 %v736_v22, %v726_v19 }
 0x15f   : > { %v753_v26 = vadd.f32 %v746_v21, %v739_v24 }
 0x160   : > { %v754_v27 = vadd.f32 %v750_v23, %v740_v25 }
 0x161   : > { %v755_v28 = vmax.f32 %v753_v26, 0.0 }
 0x162   : > { %v756_v29 = vmax.f32 %v754_v27, 0.0 }
 0x163   : > { %757 = vst [vmem:[%s1288_s12] sm:$0xff] %v755_v28 }
 0x164   : > { %758 = vst [vmem:[%s1288_s12 + $0x8] sm:$0xff] %v756_v29 }
 0x165 PF: > { %s14_s21 = sadd.s32 1, %s1108_s21   ;;  %s1365_s15 = smov %s1088_s16 }
 0x166   : > { %p11_p0 = scmp.ge.s32.totalorder %s14_s21, 20   ;;  %s1366_s16 = smov %s1187_s28 }
 0x167   : > { %s1367_s17 = smov %s1100_s19  ;;  %s1368_s18 = smov %s1104_s20 }
 0x168   : > { %s1369_s19 = smov %s1372_s22  ;;  %s1370_s20 = smov %s1376_s23 }
 0x169   :  { %13 = sbr.rel (!%p11_p0) target bundleno = 4 (0x4), region = 126 }

// kernel: pretrained_model_forward.39
= control target key start
LH: loop header
LB: loop body
LE: loop exit
PB: predicated region body
PF: predicated region fallthrough
CT: control target
= control target key end

     0   :  { %s1094_s15 = smov 0   ;;  %s1096_s16 = smov 0   ;;  %s1276_s0 = inlined_call_operand.vmem [shape: bf16[8,256], index: 0, kind: input, shape index: {}]   ;;  %s1277_s1 = inlined_call_operand.vmem [shape: bf16[256,512], index: 1, kind: input, shape index: {}]   ;;  %s1278_s2 = inlined_call_operand.vmem [shape: f32[1,512], index: 2, kind: input, shape index: {}]   ;;  %s1279_s3 = inlined_call_operand.vmem [shape: f32[1,512], index: 3, kind: input, shape index: {}]   ;;  %s1280_s4 = inlined_call_operand.vmem [shape: f32[8,512], index: 4, kind: output, shape index: {}]  }
   0x1   :  { %s1098_s17 = smov 0   ;;  %s1100_s18 = smov 0  }
   0x2   :  { %s1102_s19 = smov 0  }
   0x3 LB: > { %s29_s20 = sadd.s32 1, %s1063_s18  ;;  %p77_p1 = scmp.ne.s32.totalorder %s1055_s16, %s1051_s15  ;;  %s1067_s19 = sphi %s1102_s19, %s14_s19   ;;  %s1063_s18 = sphi %s1100_s18, %s1284_s18   ;;  %s1059_s17 = sphi %s1098_s17, %s1283_s17   ;;  %s1055_s16 = sphi %s1096_s16, %s1282_s16   ;;  %s1051_s15 = sphi %s1094_s15, %s1281_s15  }
   0x4   : > { %p31_p0 = scmp.ge.s32.totalorder %s29_s20, 2  ;;  %p78_p2 = scmp.eq.s32.totalorder %s1067_s19, 0 }
   0x5   : > { %s70_s22 = sadd.s32 1, %s1055_s16  ;;  %p892_p5 = scmp.ge.s32.totalorder %s1067_s19, 2 }
   0x6   : > { %s1286_s20 = smov (%p31_p0, %s29_s20), 0  ;;  %p79_p3 = por %p78_p2, %p77_p1 }
   0x7   : > { %s66_s21 = ssub.s32 %s1063_s18, %s1286_s20  ;;  %196 = sbr.rel (%p892_p5) target bundleno = 34 (0x22), region = 20 }
   0x8   : > { %p68_p4 = scmp.eq.s32.totalorder %s66_s21, 0 }
   0xa   : > { %s1129_s23 = scalar_select %p68_p4, %s1055_s16, %s70_s22  }
   0xe   : > { %199 = sbr.rel (!%p79_p3) target bundleno = 34 (0x22), region = 24  ;;  %s201_s24 = sand.u32 (%p79_p3), 1, %s1055_s16  }
   0xf   : > { %s938_s25 = sshll.u32 (%p79_p3), %s1063_s18, 3  ;;  %s893_s26 = sshll.u32 (%p79_p3), %s201_s24, 8 }
  0x10   : > { %s1137_s29 = scalar_lea.vmem (%p79_p3), %s1277_s1, %s938_s25  ;;  %s1142_s30 = scalar_lea.vmem (%p79_p3), [#allocation3], %s893_s26 }
  0x11   : > { %v299_v0 = vld [vmem:[%s1137_s29] sm:$0xff] (%p79_p3)  ;;  %v301_v1 = vld [vmem:[%s1137_s29 + $0x10] sm:$0xff] (%p79_p3) }
  0x12   : > { %v303_v2 = vld [vmem:[%s1137_s29 + $0x20] sm:$0xff] (%p79_p3)  ;;  %300 = vst [vmem:[%s1142_s30] sm:$0xff] (%p79_p3), %v299_v0  ;;  %302 = vst [vmem:[%s1142_s30 + $0x8] sm:$0xff] (%p79_p3), %v301_v1  ;;  %v305_v3 = vld [vmem:[%s1137_s29 + $0x30] sm:$0xff] (%p79_p3) }
  0x13   : > { %304 = vst [vmem:[%s1142_s30 + $0x10] sm:$0xff] (%p79_p3), %v303_v2  ;;  %v307_v4 = vld [vmem:[%s1137_s29 + $0x40] sm:$0xff] (%p79_p3)  ;;  %v309_v5 = vld [vmem:[%s1137_s29 + $0x50] sm:$0xff] (%p79_p3)  ;;  %306 = vst [vmem:[%s1142_s30 + $0x18] sm:$0xff] (%p79_p3), %v305_v3 }
  0x14   : > { %308 = vst [vmem:[%s1142_s30 + $0x20] sm:$0xff] (%p79_p3), %v307_v4  ;;  %310 = vst [vmem:[%s1142_s30 + $0x28] sm:$0xff] (%p79_p3), %v309_v5  ;;  %v311_v6 = vld [vmem:[%s1137_s29 + $0x60] sm:$0xff] (%p79_p3)  ;;  %v313_v7 = vld [vmem:[%s1137_s29 + $0x70] sm:$0xff] (%p79_p3) }
  0x15   : > { %v315_v8 = vld [vmem:[%s1137_s29 + $0x80] sm:$0xff]  ;;  %312 = vst [vmem:[%s1142_s30 + $0x30] sm:$0xff] %v311_v6  ;;  %314 = vst [vmem:[%s1142_s30 + $0x38] sm:$0xff] %v313_v7  ;;  %v317_v9 = vld [vmem:[%s1137_s29 + $0x90] sm:$0xff] }
  0x16   : > { %316 = vst [vmem:[%s1142_s30 + $0x40] sm:$0xff] %v315_v8  ;;  %v319_v10 = vld [vmem:[%s1137_s29 + $0xa0] sm:$0xff]  ;;  %v321_v11 = vld [vmem:[%s1137_s29 + $0xb0] sm:$0xff]  ;;  %318 = vst [vmem:[%s1142_s30 + $0x48] sm:$0xff] %v317_v9 }
  0x17   : > { %320 = vst [vmem:[%s1142_s30 + $0x50] sm:$0xff] %v319_v10  ;;  %322 = vst [vmem:[%s1142_s30 + $0x58] sm:$0xff] %v321_v11  ;;  %v323_v12 = vld [vmem:[%s1137_s29 + $0xc0] sm:$0xff]  ;;  %v325_v13 = vld [vmem:[%s1137_s29 + $0xd0] sm:$0xff] }
  0x18   : > { %v327_v14 = vld [vmem:[%s1137_s29 + $0xe0] sm:$0xff]  ;;  %324 = vst [vmem:[%s1142_s30 + $0x60] sm:$0xff] %v323_v12  ;;  %326 = vst [vmem:[%s1142_s30 + $0x68] sm:$0xff] %v325_v13  ;;  %v329_v15 = vld [vmem:[%s1137_s29 + $0xf0] sm:$0xff] }
  0x19   : > { %328 = vst [vmem:[%s1142_s30 + $0x70] sm:$0xff] %v327_v14  ;;  %v331_v16 = vld [vmem:[%s1137_s29 + $0x100] sm:$0xff]  ;;  %v333_v17 = vld [vmem:[%s1137_s29 + $0x110] sm:$0xff]  ;;  %330 = vst [vmem:[%s1142_s30 + $0x78] sm:$0xff] %v329_v15 }
  0x1a   : > { %332 = vst [vmem:[%s1142_s30 + $0x80] sm:$0xff] %v331_v16  ;;  %334 = vst [vmem:[%s1142_s30 + $0x88] sm:$0xff] %v333_v17  ;;  %v335_v18 = vld [vmem:[%s1137_s29 + $0x120] sm:$0xff]  ;;  %v337_v19 = vld [vmem:[%s1137_s29 + $0x130] sm:$0xff] }
  0x1b   : > { %v339_v20 = vld [vmem:[%s1137_s29 + $0x140] sm:$0xff]  ;;  %336 = vst [vmem:[%s1142_s30 + $0x90] sm:$0xff] %v335_v18  ;;  %338 = vst [vmem:[%s1142_s30 + $0x98] sm:$0xff] %v337_v19  ;;  %v341_v21 = vld [vmem:[%s1137_s29 + $0x150] sm:$0xff] }
  0x1c   : > { %340 = vst [vmem:[%s1142_s30 + $0xa0] sm:$0xff] %v339_v20  ;;  %v343_v22 = vld [vmem:[%s1137_s29 + $0x160] sm:$0xff]  ;;  %v345_v23 = vld [vmem:[%s1137_s29 + $0x170] sm:$0xff]  ;;  %342 = vst [vmem:[%s1142_s30 + $0xa8] sm:$0xff] %v341_v21 }
  0x1d   : > { %344 = vst [vmem:[%s1142_s30 + $0xb0] sm:$0xff] %v343_v22  ;;  %346 = vst [vmem:[%s1142_s30 + $0xb8] sm:$0xff] %v345_v23  ;;  %v347_v24 = vld [vmem:[%s1137_s29 + $0x180] sm:$0xff]  ;;  %v349_v25 = vld [vmem:[%s1137_s29 + $0x190] sm:$0xff] }
  0x1e   : > { %v351_v26 = vld [vmem:[%s1137_s29 + $0x1a0] sm:$0xff]  ;;  %348 = vst [vmem:[%s1142_s30 + $0xc0] sm:$0xff] %v347_v24  ;;  %350 = vst [vmem:[%s1142_s30 + $0xc8] sm:$0xff] %v349_v25  ;;  %v353_v27 = vld [vmem:[%s1137_s29 + $0x1b0] sm:$0xff] }
  0x1f   : > { %352 = vst [vmem:[%s1142_s30 + $0xd0] sm:$0xff] %v351_v26  ;;  %v355_v28 = vld [vmem:[%s1137_s29 + $0x1c0] sm:$0xff]  ;;  %v357_v29 = vld [vmem:[%s1137_s29 + $0x1d0] sm:$0xff]  ;;  %354 = vst [vmem:[%s1142_s30 + $0xd8] sm:$0xff] %v353_v27 }
  0x20   : > { %356 = vst [vmem:[%s1142_s30 + $0xe0] sm:$0xff] %v355_v28  ;;  %358 = vst [vmem:[%s1142_s30 + $0xe8] sm:$0xff] %v357_v29  ;;  %v359_v30 = vld [vmem:[%s1137_s29 + $0x1e0] sm:$0xff]  ;;  %v361_v31 = vld [vmem:[%s1137_s29 + $0x1f0] sm:$0xff] }
  0x21   : > { %360 = vst [vmem:[%s1142_s30 + $0xf0] sm:$0xff] %v359_v30  ;;  %362 = vst [vmem:[%s1142_s30 + $0xf8] sm:$0xff] %v361_v31 }
  0x22 PF: > { %p896_p6 = scmp.ge.s32.totalorder %s1067_s19, 1  ;;  %p383_p7 = scmp.lt.s32.totalorder %s1067_s19, 3 }
  0x24   : > { %p384_p8 = pnand %p896_p6, %p383_p7 }
  0x25   : > { %s390_s5 = sand.u32 (!%p384_p8), 1, %s1051_s15   ;;  %v1211_v32 = vld [vmem:[%s1276_s0] sm:$0xff] (!%p384_p8)  ;;  %s898_s10 = sshll.u32 (!%p384_p8), %s1059_s17, 1  ;;  %v728_v3 = vlaneseq (!%p384_p8) }
  0x26   : > { %387 = sbr.rel (%p384_p8) target bundleno = 323 (0x143), region = 70  ;;  %s897_s8 = sshll.u32 (!%p384_p8), %s390_s5, 8  ;;  %v903_v33 = vcombine.high (!%p384_p8), %v1211_v32, %v1211_v32  ;;  %v902_v2 = vcombine.low (!%p384_p8), %v1211_v32, %v1211_v32 }
  0x27   : > { %s1215_s9 = scalar_lea.vmem (!%p384_p8), [#allocation3], %s897_s8  ;;  %p449_p9 = scmp.lt.s32.totalorder (!%p384_p8), %s898_s10, 3  ;;  %v729_v4 = vshrl.u32 (!%p384_p8), %v728_v3, 7 }
  0x28   : > { %v979_v34 = vld [vmem:[%s1215_s9 + $0x4] ss:$8 sps:$4 sm:$0xff] (!%p384_p8)   ;;  %708 = vmatprep.mubr.bf16.mxu0 (!%p384_p8), %v903_v33  ;;  %v981_v35 = vld [vmem:[%s1215_s9] ss:$8 sps:$4 sm:$0xff] (!%p384_p8)   ;;  %v982_v36 = vld [vmem:[%s1215_s9 + $0x14] ss:$8 sps:$4 sm:$0xff] (!%p384_p8)  }
  0x29   : > { %676 = vmatprep.subr.bf16.mxu0 (!%p384_p8), %v979_v34  ;;  %v984_v37 = vld [vmem:[%s1215_s9 + $0x10] ss:$8 sps:$4 sm:$0xff] (!%p384_p8)   ;;  %v985_v38 = vld [vmem:[%s1215_s9 + $0x24] ss:$8 sps:$4 sm:$0xff] (!%p384_p8)   ;;  %v987_v39 = vld [vmem:[%s1215_s9 + $0x20] ss:$8 sps:$4 sm:$0xff] (!%p384_p8)  }
  0x2a   : > { %677 = vmatpush1.bf16.msra.mxu0 (!%p384_p8), %v981_v35  ;;  %v988_v40 = vld [vmem:[%s1215_s9 + $0x34] ss:$8 sps:$4 sm:$0xff] (!%p384_p8)   ;;  %v990_v41 = vld [vmem:[%s1215_s9 + $0x30] ss:$8 sps:$4 sm:$0xff] (!%p384_p8)   ;;  %v991_v42 = vld [vmem:[%s1215_s9 + $0x44] ss:$8 sps:$4 sm:$0xff] (!%p384_p8)  }
  0x2b   : > { %678 = vmatprep.subr.bf16.mxu0 (!%p384_p8), %v982_v36  ;;  %v993_v43 = vld [vmem:[%s1215_s9 + $0x40] ss:$8 sps:$4 sm:$0xff] (!%p384_p8)   ;;  %v994_v44 = vld [vmem:[%s1215_s9 + $0x54] ss:$8 sps:$4 sm:$0xff] (!%p384_p8)   ;;  %v996_v45 = vld [vmem:[%s1215_s9 + $0x50] ss:$8 sps:$4 sm:$0xff] (!%p384_p8)  }
  0x2c   : > { %v997_v46 = vld [vmem:[%s1215_s9 + $0x64] ss:$8 sps:$4 sm:$0xff] (!%p384_p8)   ;;  %v999_v47 = vld [vmem:[%s1215_s9 + $0x60] ss:$8 sps:$4 sm:$0xff] (!%p384_p8)   ;;  %v1000_v48 = vld [vmem:[%s1215_s9 + $0x74] ss:$8 sps:$4 sm:$0xff] (!%p384_p8)  }
  0x2d   : > { %v1002_v49 = vld [vmem:[%s1215_s9 + $0x70] ss:$8 sps:$4 sm:$0xff]   ;;  %v1003_v50 = vld [vmem:[%s1215_s9 + $0x84] ss:$8 sps:$4 sm:$0xff]   ;;  %v1005_v51 = vld [vmem:[%s1215_s9 + $0x80] ss:$8 sps:$4 sm:$0xff]  }
  0x2e   : > { %679 = vmatpush1.bf16.msra.mxu0 %v984_v37  ;;  %v1006_v52 = vld [vmem:[%s1215_s9 + $0x94] ss:$8 sps:$4 sm:$0xff]   ;;  %v1008_v53 = vld [vmem:[%s1215_s9 + $0x90] ss:$8 sps:$4 sm:$0xff]   ;;  %v1009_v54 = vld [vmem:[%s1215_s9 + $0xa4] ss:$8 sps:$4 sm:$0xff]  }
  0x2f   : > { %680 = vmatprep.subr.bf16.mxu0 %v985_v38  ;;  %v1011_v55 = vld [vmem:[%s1215_s9 + $0xa0] ss:$8 sps:$4 sm:$0xff]   ;;  %v1012_v56 = vld [vmem:[%s1215_s9 + $0xb4] ss:$8 sps:$4 sm:$0xff]   ;;  %v1014_v57 = vld [vmem:[%s1215_s9 + $0xb0] ss:$8 sps:$4 sm:$0xff]  }
  0x30   : > { %v1015_v58 = vld [vmem:[%s1215_s9 + $0xc4] ss:$8 sps:$4 sm:$0xff]   ;;  %v1017_v59 = vld [vmem:[%s1215_s9 + $0xc0] ss:$8 sps:$4 sm:$0xff]   ;;  %v1018_v60 = vld [vmem:[%s1215_s9 + $0xd4] ss:$8 sps:$4 sm:$0xff]  }
  0x31   : > { %v1020_v61 = vld [vmem:[%s1215_s9 + $0xd0] ss:$8 sps:$4 sm:$0xff]   ;;  %v1021_v62 = vld [vmem:[%s1215_s9 + $0xe4] ss:$8 sps:$4 sm:$0xff]   ;;  %v1023_v63 = vld [vmem:[%s1215_s9 + $0xe0] ss:$8 sps:$4 sm:$0xff]  }
  0x32   : > { %681 = vmatpush1.bf16.msra.mxu0 %v987_v39  ;;  %v1024_v0 = vld [vmem:[%s1215_s9 + $0xf4] ss:$8 sps:$4 sm:$0xff]   ;;  %v1026_v1 = vld [vmem:[%s1215_s9 + $0xf0] ss:$8 sps:$4 sm:$0xff]   ;;  %s1288_s10 = smov (!%p449_p9, %s898_s10), 3  ;;  %v730_v5 = vsub.s32 0, %v729_v4 }
  0x33   : > { %682 = vmatprep.subr.bf16.mxu0 %v988_v40  ;;  %s451_s13 = scalar_lea.vmem %s1278_s2, %s1288_s10  ;;  %s456_s21 = scalar_lea.vmem %s1279_s3, %s1288_s10  ;;  %v734_v7 = vsub.s32 1, %v729_v4 }
  0x34   : > { %v726_v6 = vld [vmem:[%s451_s13] sm:$0x3]  ;;  %s901_s22 = sshll.u32 %s1288_s10, 3 }
  0x35   : > { %v740_v8 = vld [vmem:[%s456_s21] sm:$0x3]  ;;  %v731_v9 = vrot.slane %v726_v6, %v730_v5  ;;  %v735_v10 = vrot.slane %v726_v6, %v734_v7  ;;  %s466_s25 = scalar_lea.vmem %s1280_s4, %s901_s22 }
  0x36   : > { %683 = vmatpush1.bf16.msra.mxu0 %v990_v41  ;;  %v745_v11 = vrot.slane %v740_v8, %v730_v5  ;;  %v749_v13 = vrot.slane %v740_v8, %v734_v7 }
  0x37   : > { %684 = vmatprep.subr.bf16.mxu0 %v991_v42 }
  0x3a   : > { %685 = vmatpush1.bf16.msra.mxu0 %v993_v43 }
  0x3b   : > { %686 = vmatprep.subr.bf16.mxu0 %v994_v44 }
  0x3e   : > { %687 = vmatpush1.bf16.msra.mxu0 %v996_v45 }
  0x3f   : > { %688 = vmatprep.subr.bf16.mxu0 %v997_v46 }
  0x42   : > { %689 = vmatpush1.bf16.msra.mxu0 %v999_v47 }
  0x43   : > { %690 = vmatprep.subr.bf16.mxu0 %v1000_v48 }
  0x46   : > { %691 = vmatpush1.bf16.msra.mxu0 %v1002_v49 }
  0x47   : > { %692 = vmatprep.subr.bf16.mxu0 %v1003_v50 }
  0x4a   : > { %693 = vmatpush1.bf16.msra.mxu0 %v1005_v51 }
  0x4b   : > { %694 = vmatprep.subr.bf16.mxu0 %v1006_v52 }
  0x4e   : > { %695 = vmatpush1.bf16.msra.mxu0 %v1008_v53 }
  0x4f   : > { %696 = vmatprep.subr.bf16.mxu0 %v1009_v54 }
  0x52   : > { %697 = vmatpush1.bf16.msra.mxu0 %v1011_v55 }
  0x53   : > { %698 = vmatprep.subr.bf16.mxu0 %v1012_v56 }
  0x56   : > { %699 = vmatpush1.bf16.msra.mxu0 %v1014_v57 }
  0x57   : > { %700 = vmatprep.subr.bf16.mxu0 %v1015_v58 }
  0x5a   : > { %701 = vmatpush1.bf16.msra.mxu0 %v1017_v59 }
  0x5b   : > { %702 = vmatprep.subr.bf16.mxu0 %v1018_v60 }
  0x5e   : > { %703 = vmatpush1.bf16.msra.mxu0 %v1020_v61 }
  0x5f   : > { %704 = vmatprep.subr.bf16.mxu0 %v1021_v62 }
  0x62   : > { %705 = vmatpush1.bf16.msra.mxu0 %v1023_v63 }
  0x63   : > { %706 = vmatprep.subr.bf16.mxu0 %v1024_v0 }
  0x66   : > { %707 = vmatpush1.bf16.msra.mxu0 %v1026_v1 }
  0x69   : > { %709 = vmatmul.mubr.bf16.vlgmr.msra.gmra.mrb[0].mxu0 %v902_v2 }
 0x13c   : > { %v710_v12 = vpop.f32.mrb[0].mxu0 }
 0x13d   : > { %v738_v14 = vmul.f32 %v731_v9, %v710_v12  ;;  %v712_v15 = vpop.f32.mrb[1].mxu0 }
 0x13e   : > { %v739_v16 = vmul.f32 %v735_v10, %v712_v15  ;;  %v714_v17 = vpop.f32.mrb[2].mxu0 }
 0x13f   : > { %v752_v18 = vadd.f32 %v745_v11, %v738_v14  ;;  %v715_v19 = vpop.f32.mrb[3].mxu0 }
 0x140   : > { %v753_v20 = vadd.f32 %v749_v13, %v739_v16 }
 0x141   : > { %754 = vst [vmem:[%s466_s25] sm:$0xff] %v752_v18 }
 0x142   : > { %755 = vst [vmem:[%s466_s25 + $0x8] sm:$0xff] %v753_v20 }
 0x143 PF: > { %s14_s19 = sadd.s32 1, %s1067_s19   ;;  %s1281_s15 = smov %s1055_s16 }
 0x144   : > { %p11_p10 = scmp.ge.s32.totalorder %s14_s19, 4   ;;  %s1282_s16 = smov %s1129_s23 }
 0x145   : > { %s1283_s17 = smov %s1063_s18  ;;  %s1284_s18 = smov %s1286_s20 }
 0x146   :  { %13 = sbr.rel (!%p11_p10) target bundleno = 3 (0x3), region = 126 }

// kernel: pretrained_model_forward.40
= control target key start
LH: loop header
LB: loop body
LE: loop exit
PB: predicated region body
PF: predicated region fallthrough
CT: control target
= control target key end

     0   :  { %s1228_s18 = smov 0   ;;  %s1230_s19 = smov 0   ;;  %s1459_s0 = inlined_call_operand.vmem [shape: bf16[8,4608], index: 0, kind: input, shape index: {}]   ;;  %s1460_s1 = inlined_call_operand.vmem [shape: bf16[4608,512], index: 1, kind: input, shape index: {}]   ;;  %s1461_s2 = inlined_call_operand.vmem [shape: f32[1,512], index: 2, kind: input, shape index: {}]   ;;  %s1462_s3 = inlined_call_operand.vmem [shape: f32[1,512], index: 3, kind: input, shape index: {}]   ;;  %s1463_s4 = inlined_call_operand.vmem [shape: f32[8,512], index: 4, kind: input, shape index: {}]   ;;  %s1464_s5 = inlined_call_operand.vmem [shape: f32[8,512], index: 5, kind: output, shape index: {}]  }
   0x1   :  { %s1232_s20 = smov 0   ;;  %s1234_s21 = smov 0  }
   0x2   :  { %s1236_s22 = smov 0   ;;  %s1238_s23 = smov 0  }
   0x3   :  { %s1240_s24 = smov 0  }
   0x4 LB: > { %s27_s25 = sadd.s32 1, %s1187_s22  ;;  %s30_s26 = sadd.s32 1, %s1191_s23  ;;  %s1195_s24 = sphi %s1240_s24, %s15_s24   ;;  %s1191_s23 = sphi %s1238_s23, %s1470_s23   ;;  %s1187_s22 = sphi %s1236_s22, %s1469_s22   ;;  %s1183_s21 = sphi %s1234_s21, %s1468_s21   ;;  %s1179_s20 = sphi %s1232_s20, %s1467_s20   ;;  %s1175_s19 = sphi %s1230_s19, %s1466_s19   ;;  %s1171_s18 = sphi %s1228_s18, %s1465_s18  }
   0x5   : > { %p28_p0 = scmp.ge.s32.totalorder %s27_s25, 18  ;;  %p78_p1 = scmp.ne.s32.totalorder %s1175_s19, %s1171_s18 }
   0x6   : > { %p79_p2 = scmp.eq.s32.totalorder %s1195_s24, 0  ;;  %s71_s30 = sadd.s32 1, %s1175_s19 }
   0x7   : > { %s1472_s25 = smov (%p28_p0, %s27_s25), 0  ;;  %s1474_s26 = smov (!%p28_p0, %s30_s26), %s1191_s23 }
   0x8   : > { %p80_p3 = por %p79_p2, %p78_p1  ;;  %p32_p4 = scmp.ge.s32.totalorder %s1474_s26, 2 }
   0x9   : > { %s66_s27 = ssub.s32 %s1187_s22, %s1472_s25  ;;  %p979_p6 = scmp.ge.s32.totalorder %s1195_s24, 36 }
   0xa   : > { %s1476_s26 = smov (%p32_p4, %s1474_s26), 0 }
   0xb   : > { %s67_s28 = ssub.s32 %s1191_s23, %s1476_s26  ;;  %212 = sbr.rel (%p979_p6) target bundleno = 41 (0x29), region = 16 }
   0xc   : > { %s68_s29 = sor.u32 %s67_s28, %s66_s27 }
   0xd   : > { %p69_p5 = scmp.eq.s32.totalorder %s68_s29, 0 }
   0xf   : > { %s1279_s6 = scalar_select %p69_p5, %s1175_s19, %s71_s30  }
  0x12   : > { %228 = sbr.rel (!%p80_p3) target bundleno = 41 (0x29), region = 24  ;;  %s230_s7 = sand.u32 (%p80_p3), 1, %s1175_s19  }
  0x13   : > { %s982_s8 = sshll.u32 (%p80_p3), %s1191_s23, 1  ;;  %s980_s9 = sshll.u32 (%p80_p3), %s230_s7, 8 }
  0x14   : > { %s1033_s10 = sshll.u32 (%p80_p3), %s1187_s22, 7  ;;  %s1293_s16 = scalar_lea.vmem (%p80_p3), [#allocation3], %s980_s9 }
  0x15   : > { %s236_s11 = sadd.s32 (%p80_p3), %s1033_s10, %s982_s8 }
  0x16   : > { %s984_s12 = sshll.u32 (%p80_p3), %s236_s11, 2 }
  0x17   : > { %s1288_s15 = scalar_lea.vmem (%p80_p3), %s1460_s1, %s984_s12 }
  0x18   : > { %v328_v0 = vld [vmem:[%s1288_s15] sm:$0xff] (%p80_p3)  ;;  %v330_v1 = vld [vmem:[%s1288_s15 + $0x10] sm:$0xff] (%p80_p3) }
  0x19   : > { %v332_v2 = vld [vmem:[%s1288_s15 + $0x20] sm:$0xff]  ;;  %329 = vst [vmem:[%s1293_s16] sm:$0xff] %v328_v0  ;;  %331 = vst [vmem:[%s1293_s16 + $0x8] sm:$0xff] %v330_v1  ;;  %v334_v3 = vld [vmem:[%s1288_s15 + $0x30] sm:$0xff] }
  0x1a   : > { %333 = vst [vmem:[%s1293_s16 + $0x10] sm:$0xff] %v332_v2  ;;  %v336_v4 = vld [vmem:[%s1288_s15 + $0x40] sm:$0xff]  ;;  %v338_v5 = vld [vmem:[%s1288_s15 + $0x50] sm:$0xff]  ;;  %335 = vst [vmem:[%s1293_s16 + $0x18] sm:$0xff] %v334_v3 }
  0x1b   : > { %337 = vst [vmem:[%s1293_s16 + $0x20] sm:$0xff] %v336_v4  ;;  %339 = vst [vmem:[%s1293_s16 + $0x28] sm:$0xff] %v338_v5  ;;  %v340_v6 = vld [vmem:[%s1288_s15 + $0x60] sm:$0xff]  ;;  %v342_v7 = vld [vmem:[%s1288_s15 + $0x70] sm:$0xff] }
  0x1c   : > { %v344_v8 = vld [vmem:[%s1288_s15 + $0x80] sm:$0xff]  ;;  %341 = vst [vmem:[%s1293_s16 + $0x30] sm:$0xff] %v340_v6  ;;  %343 = vst [vmem:[%s1293_s16 + $0x38] sm:$0xff] %v342_v7  ;;  %v346_v9 = vld [vmem:[%s1288_s15 + $0x90] sm:$0xff] }
  0x1d   : > { %345 = vst [vmem:[%s1293_s16 + $0x40] sm:$0xff] %v344_v8  ;;  %v348_v10 = vld [vmem:[%s1288_s15 + $0xa0] sm:$0xff]  ;;  %v350_v11 = vld [vmem:[%s1288_s15 + $0xb0] sm:$0xff]  ;;  %347 = vst [vmem:[%s1293_s16 + $0x48] sm:$0xff] %v346_v9 }
  0x1e   : > { %349 = vst [vmem:[%s1293_s16 + $0x50] sm:$0xff] %v348_v10  ;;  %351 = vst [vmem:[%s1293_s16 + $0x58] sm:$0xff] %v350_v11  ;;  %v352_v12 = vld [vmem:[%s1288_s15 + $0xc0] sm:$0xff]  ;;  %v354_v13 = vld [vmem:[%s1288_s15 + $0xd0] sm:$0xff] }
  0x1f   : > { %v356_v14 = vld [vmem:[%s1288_s15 + $0xe0] sm:$0xff]  ;;  %353 = vst [vmem:[%s1293_s16 + $0x60] sm:$0xff] %v352_v12  ;;  %355 = vst [vmem:[%s1293_s16 + $0x68] sm:$0xff] %v354_v13  ;;  %v358_v15 = vld [vmem:[%s1288_s15 + $0xf0] sm:$0xff] }
  0x20   : > { %357 = vst [vmem:[%s1293_s16 + $0x70] sm:$0xff] %v356_v14  ;;  %v360_v16 = vld [vmem:[%s1288_s15 + $0x100] sm:$0xff]  ;;  %v362_v17 = vld [vmem:[%s1288_s15 + $0x110] sm:$0xff]  ;;  %359 = vst [vmem:[%s1293_s16 + $0x78] sm:$0xff] %v358_v15 }
  0x21   : > { %361 = vst [vmem:[%s1293_s16 + $0x80] sm:$0xff] %v360_v16  ;;  %363 = vst [vmem:[%s1293_s16 + $0x88] sm:$0xff] %v362_v17  ;;  %v364_v18 = vld [vmem:[%s1288_s15 + $0x120] sm:$0xff]  ;;  %v366_v19 = vld [vmem:[%s1288_s15 + $0x130] sm:$0xff] }
  0x22   : > { %v368_v20 = vld [vmem:[%s1288_s15 + $0x140] sm:$0xff]  ;;  %365 = vst [vmem:[%s1293_s16 + $0x90] sm:$0xff] %v364_v18  ;;  %367 = vst [vmem:[%s1293_s16 + $0x98] sm:$0xff] %v366_v19  ;;  %v370_v21 = vld [vmem:[%s1288_s15 + $0x150] sm:$0xff] }
  0x23   : > { %369 = vst [vmem:[%s1293_s16 + $0xa0] sm:$0xff] %v368_v20  ;;  %v372_v22 = vld [vmem:[%s1288_s15 + $0x160] sm:$0xff]  ;;  %v374_v23 = vld [vmem:[%s1288_s15 + $0x170] sm:$0xff]  ;;  %371 = vst [vmem:[%s1293_s16 + $0xa8] sm:$0xff] %v370_v21 }
  0x24   : > { %373 = vst [vmem:[%s1293_s16 + $0xb0] sm:$0xff] %v372_v22  ;;  %375 = vst [vmem:[%s1293_s16 + $0xb8] sm:$0xff] %v374_v23  ;;  %v376_v24 = vld [vmem:[%s1288_s15 + $0x180] sm:$0xff]  ;;  %v378_v25 = vld [vmem:[%s1288_s15 + $0x190] sm:$0xff] }
  0x25   : > { %v380_v26 = vld [vmem:[%s1288_s15 + $0x1a0] sm:$0xff]  ;;  %377 = vst [vmem:[%s1293_s16 + $0xc0] sm:$0xff] %v376_v24  ;;  %379 = vst [vmem:[%s1293_s16 + $0xc8] sm:$0xff] %v378_v25  ;;  %v382_v27 = vld [vmem:[%s1288_s15 + $0x1b0] sm:$0xff] }
  0x26   : > { %381 = vst [vmem:[%s1293_s16 + $0xd0] sm:$0xff] %v380_v26  ;;  %v384_v28 = vld [vmem:[%s1288_s15 + $0x1c0] sm:$0xff]  ;;  %v386_v29 = vld [vmem:[%s1288_s15 + $0x1d0] sm:$0xff]  ;;  %383 = vst [vmem:[%s1293_s16 + $0xd8] sm:$0xff] %v382_v27 }
  0x27   : > { %385 = vst [vmem:[%s1293_s16 + $0xe0] sm:$0xff] %v384_v28  ;;  %387 = vst [vmem:[%s1293_s16 + $0xe8] sm:$0xff] %v386_v29  ;;  %v388_v30 = vld [vmem:[%s1288_s15 + $0x1e0] sm:$0xff]  ;;  %v390_v31 = vld [vmem:[%s1288_s15 + $0x1f0] sm:$0xff] }
  0x28   : > { %389 = vst [vmem:[%s1293_s16 + $0xf0] sm:$0xff] %v388_v30  ;;  %391 = vst [vmem:[%s1293_s16 + $0xf8] sm:$0xff] %v390_v31 }
  0x29 PF: > { %p985_p7 = scmp.ge.s32.totalorder %s1195_s24, 1  ;;  %p425_p8 = scmp.lt.s32.totalorder %s1195_s24, 37 }
  0x2b   : > { %p426_p9 = pnand %p985_p7, %p425_p8 }
  0x2c   : > { %s432_s17 = sand.u32 (!%p426_p9), 1, %s1171_s18   ;;  %s987_s27 = sshll.u32 (!%p426_p9), %s1179_s20, 1 }
  0x2d   : > { %429 = sbr.rel (%p426_p9) target bundleno = 359 (0x167), region = 74  ;;  %s986_s28 = sshll.u32 (!%p426_p9), %s432_s17, 8 }
  0x2e   : > { %p492_p10 = scmp.lt.s32.totalorder (!%p426_p9), %s987_s27, 35  ;;  %s989_s29 = sshll.u32 (!%p426_p9), %s1183_s21, 1 }
  0x2f   : > { %p502_p11 = scmp.lt.s32.totalorder (!%p426_p9), %s989_s29, 3  ;;  %s1387_s8 = scalar_lea.vmem (!%p426_p9), [#allocation3], %s986_s28 }
  0x30   : > { %p995_p12 = scmp.ne.s32.totalorder (!%p426_p9), %s1179_s20, 0 }
  0x34   : > { %s1478_s27 = smov (!%p492_p10, %s987_s27), 35  ;;  %s1480_s29 = smov (!%p502_p11, %s989_s29), 3 }
  0x35   : > { %s988_s30 = sshll.u32 %s1478_s27, 2  ;;  %s504_s18 = scalar_lea.vmem %s1461_s2, %s1480_s29  ;;  %v1197_v32 = vmov (!%p995_p12), 0.0  }
  0x36   : > { %s1364_s9 = scalar_lea.vmem %s1459_s0, %s988_s30  ;;  %s509_s21 = scalar_lea.vmem %s1462_s3, %s1480_s29  ;;  %535 = vst [vmem:[#allocation2] sm:$0xff] (!%p995_p12), %v1197_v32  ;;  %536 = vst [vmem:[#allocation2 + $0x8] sm:$0xff] (!%p995_p12), %v1197_v32 }
  0x37   : > { %s992_s14 = sshll.u32 %s1480_s29, 3  ;;  %534 = sbr.rel (%p995_p12) target bundleno = 62 (0x3e), region = 82 }
  0x38   : > { %s1380_s17 = scalar_lea.vmem %s1463_s4, %s992_s14  ;;  %s1385_s7 = scalar_lea.vmem %s1464_s5, %s992_s14 }
  0x3e PF: > { %v1091_v33 = vld [vmem:[%s1387_s8 + $0x4] ss:$8 sps:$4 sm:$0xff]   ;;  %v1093_v34 = vld [vmem:[%s1387_s8] ss:$8 sps:$4 sm:$0xff]   ;;  %v1094_v35 = vld [vmem:[%s1387_s8 + $0x14] ss:$8 sps:$4 sm:$0xff]  }
  0x3f   : > { %739 = vmatprep.subr.bf16.mxu0 %v1091_v33  ;;  %v1096_v36 = vld [vmem:[%s1387_s8 + $0x10] ss:$8 sps:$4 sm:$0xff]   ;;  %v1097_v37 = vld [vmem:[%s1387_s8 + $0x24] ss:$8 sps:$4 sm:$0xff]   ;;  %v1099_v38 = vld [vmem:[%s1387_s8 + $0x20] ss:$8 sps:$4 sm:$0xff]  }
  0x40   : > { %740 = vmatpush1.bf16.msra.mxu0 %v1093_v34  ;;  %v1100_v39 = vld [vmem:[%s1387_s8 + $0x34] ss:$8 sps:$4 sm:$0xff]   ;;  %v1102_v40 = vld [vmem:[%s1387_s8 + $0x30] ss:$8 sps:$4 sm:$0xff]   ;;  %v1103_v41 = vld [vmem:[%s1387_s8 + $0x44] ss:$8 sps:$4 sm:$0xff]  }
  0x41   : > { %741 = vmatprep.subr.bf16.mxu0 %v1094_v35  ;;  %v1105_v42 = vld [vmem:[%s1387_s8 + $0x40] ss:$8 sps:$4 sm:$0xff]   ;;  %v1106_v43 = vld [vmem:[%s1387_s8 + $0x54] ss:$8 sps:$4 sm:$0xff]   ;;  %v1108_v44 = vld [vmem:[%s1387_s8 + $0x50] ss:$8 sps:$4 sm:$0xff]  }
  0x42   : > { %v1109_v45 = vld [vmem:[%s1387_s8 + $0x64] ss:$8 sps:$4 sm:$0xff]   ;;  %v539_v46 = vld [vmem:[%s1364_s9] sm:$0xff]  ;;  %v1111_v48 = vld [vmem:[%s1387_s8 + $0x60] ss:$8 sps:$4 sm:$0xff]   ;;  %p1030_p13 = scmp.ne.s32.totalorder %s1179_s20, 17 }
  0x43   : > { %v997_v47 = vcombine.high %v539_v46, %v539_v46  ;;  %v1112_v49 = vld [vmem:[%s1387_s8 + $0x74] ss:$8 sps:$4 sm:$0xff]   ;;  %v1114_v50 = vld [vmem:[%s1387_s8 + $0x70] ss:$8 sps:$4 sm:$0xff]   ;;  %v1115_v51 = vld [vmem:[%s1387_s8 + $0x84] ss:$8 sps:$4 sm:$0xff]   ;;  %v996_v3 = vcombine.low %v539_v46, %v539_v46  ;;  %v792_v12 = vlaneseq (!%p1030_p13) }
  0x44   : > { %742 = vmatpush1.bf16.msra.mxu0 %v1096_v36  ;;  %v1117_v52 = vld [vmem:[%s1387_s8 + $0x80] ss:$8 sps:$4 sm:$0xff]   ;;  %v1118_v53 = vld [vmem:[%s1387_s8 + $0x94] ss:$8 sps:$4 sm:$0xff]   ;;  %v1120_v54 = vld [vmem:[%s1387_s8 + $0x90] ss:$8 sps:$4 sm:$0xff]  }
  0x45   : > { %743 = vmatprep.subr.bf16.mxu0 %v1097_v37  ;;  %771 = vmatprep.mubr.bf16.mxu0 %v997_v47  ;;  %v1121_v55 = vld [vmem:[%s1387_s8 + $0xa4] ss:$8 sps:$4 sm:$0xff]   ;;  %v1123_v56 = vld [vmem:[%s1387_s8 + $0xa0] ss:$8 sps:$4 sm:$0xff]   ;;  %v1124_v57 = vld [vmem:[%s1387_s8 + $0xb4] ss:$8 sps:$4 sm:$0xff]  }
  0x46   : > { %v1126_v58 = vld [vmem:[%s1387_s8 + $0xb0] ss:$8 sps:$4 sm:$0xff]   ;;  %v1127_v59 = vld [vmem:[%s1387_s8 + $0xc4] ss:$8 sps:$4 sm:$0xff]   ;;  %v1129_v60 = vld [vmem:[%s1387_s8 + $0xc0] ss:$8 sps:$4 sm:$0xff]  }
  0x47   : > { %v1130_v61 = vld [vmem:[%s1387_s8 + $0xd4] ss:$8 sps:$4 sm:$0xff]   ;;  %v1132_v62 = vld [vmem:[%s1387_s8 + $0xd0] ss:$8 sps:$4 sm:$0xff]   ;;  %v1133_v63 = vld [vmem:[%s1387_s8 + $0xe4] ss:$8 sps:$4 sm:$0xff]  }
  0x48   : > { %744 = vmatpush1.bf16.msra.mxu0 %v1099_v38  ;;  %v1135_v0 = vld [vmem:[%s1387_s8 + $0xe0] ss:$8 sps:$4 sm:$0xff]   ;;  %v1136_v1 = vld [vmem:[%s1387_s8 + $0xf4] ss:$8 sps:$4 sm:$0xff]   ;;  %v1138_v2 = vld [vmem:[%s1387_s8 + $0xf0] ss:$8 sps:$4 sm:$0xff]  }
  0x49   : > { %745 = vmatprep.subr.bf16.mxu0 %v1100_v39  ;;  %v537_v4 = vld [vmem:[#allocation2] sm:$0xff]  ;;  %v538_v5 = vld [vmem:[#allocation2 + $0x8] sm:$0xff]  ;;  %v793_v13 = vshrl.u32 (!%p1030_p13), %v792_v12, 7 }
  0x4a   : > { %v790_v14 = vld [vmem:[%s504_s18] sm:$0x3] (!%p1030_p13)  ;;  %v819_v27 = vld [vmem:[%s1380_s17 + $0x8] sm:$0xff] (!%p1030_p13) }
  0x4b   : > { %v804_v15 = vld [vmem:[%s509_s21] sm:$0x3] (!%p1030_p13)  ;;  %v794_v16 = vsub.s32 (!%p1030_p13), 0, %v793_v13  ;;  %v798_v17 = vsub.s32 (!%p1030_p13), 1, %v793_v13 }
  0x4c   : > { %746 = vmatpush1.bf16.msra.mxu0 %v1102_v40  ;;  %v818_v26 = vld [vmem:[%s1380_s17] sm:$0xff] (!%p1030_p13) }
  0x4d   : > { %747 = vmatprep.subr.bf16.mxu0 %v1103_v41  ;;  %v795_v20 = vrot.slane (!%p1030_p13), %v790_v14, %v794_v16  ;;  %v809_v21 = vrot.slane (!%p1030_p13), %v804_v15, %v794_v16  ;;  %v799_v22 = vrot.slane (!%p1030_p13), %v790_v14, %v798_v17  ;;  %v813_v23 = vrot.slane (!%p1030_p13), %v804_v15, %v798_v17 }
  0x50   : > { %748 = vmatpush1.bf16.msra.mxu0 %v1105_v42 }
  0x51   : > { %749 = vmatprep.subr.bf16.mxu0 %v1106_v43 }
  0x54   : > { %750 = vmatpush1.bf16.msra.mxu0 %v1108_v44 }
  0x55   : > { %751 = vmatprep.subr.bf16.mxu0 %v1109_v45 }
  0x58   : > { %752 = vmatpush1.bf16.msra.mxu0 %v1111_v48 }
  0x59   : > { %753 = vmatprep.subr.bf16.mxu0 %v1112_v49 }
  0x5c   : > { %754 = vmatpush1.bf16.msra.mxu0 %v1114_v50 }
  0x5d   : > { %755 = vmatprep.subr.bf16.mxu0 %v1115_v51 }
  0x60   : > { %756 = vmatpush1.bf16.msra.mxu0 %v1117_v52 }
  0x61   : > { %757 = vmatprep.subr.bf16.mxu0 %v1118_v53 }
  0x64   : > { %758 = vmatpush1.bf16.msra.mxu0 %v1120_v54 }
  0x65   : > { %759 = vmatprep.subr.bf16.mxu0 %v1121_v55 }
  0x68   : > { %760 = vmatpush1.bf16.msra.mxu0 %v1123_v56 }
  0x69   : > { %761 = vmatprep.subr.bf16.mxu0 %v1124_v57 }
  0x6c   : > { %762 = vmatpush1.bf16.msra.mxu0 %v1126_v58 }
  0x6d   : > { %763 = vmatprep.subr.bf16.mxu0 %v1127_v59 }
  0x70   : > { %764 = vmatpush1.bf16.msra.mxu0 %v1129_v60 }
  0x71   : > { %765 = vmatprep.subr.bf16.mxu0 %v1130_v61 }
  0x74   : > { %766 = vmatpush1.bf16.msra.mxu0 %v1132_v62 }
  0x75   : > { %767 = vmatprep.subr.bf16.mxu0 %v1133_v63 }
  0x78   : > { %768 = vmatpush1.bf16.msra.mxu0 %v1135_v0 }
  0x79   : > { %769 = vmatprep.subr.bf16.mxu0 %v1136_v1 }
  0x7c   : > { %770 = vmatpush1.bf16.msra.mxu0 %v1138_v2 }
  0x7f   : > { %772 = vmatmul.mubr.bf16.vlgmr.msra.gmra.mrb[0].mxu0 %v996_v3 }
 0x150   : > { %787 = sbr.rel (%p1030_p13) target bundleno = 359 (0x167), region = 86 }
 0x152   : > { %v773_v6 = vpop.f32.mrb[0].mxu0 }
 0x153   : > { %v780_v7 = vadd.f32 %v773_v6, %v537_v4  ;;  %v775_v8 = vpop.f32.mrb[1].mxu0 }
 0x154   : > { %v781_v9 = vadd.f32 %v775_v8, %v538_v5  ;;  %v777_v10 = vpop.f32.mrb[2].mxu0 }
 0x155   : > { %782 = vst [vmem:[#allocation2] sm:$0xff] %v780_v7  ;;  %v778_v11 = vpop.f32.mrb[3].mxu0 }
 0x156   : > { %783 = vst [vmem:[#allocation2 + $0x8] sm:$0xff] %v781_v9 }
 0x15c   : > { %v788_v18 = vld [vmem:[#allocation2] sm:$0xff] }
 0x15d   : > { %v789_v19 = vld [vmem:[#allocation2 + $0x8] sm:$0xff]  ;;  %v802_v24 = vmul.f32 %v795_v20, %v788_v18 }
 0x15e   : > { %v803_v25 = vmul.f32 %v799_v22, %v789_v19 }
 0x15f   : > { %v816_v28 = vadd.f32 %v809_v21, %v802_v24 }
 0x160   : > { %v817_v29 = vadd.f32 %v813_v23, %v803_v25 }
 0x161   : > { %v820_v30 = vadd.f32 %v818_v26, %v816_v28 }
 0x162   : > { %v821_v31 = vadd.f32 %v819_v27, %v817_v29 }
 0x163   : > { %v822_v32 = vmax.f32 %v820_v30, 0.0 }
 0x164   : > { %v823_v33 = vmax.f32 %v821_v31, 0.0 }
 0x165   : > { %824 = vst [vmem:[%s1385_s7] sm:$0xff] %v822_v32 }
 0x166   : > { %825 = vst [vmem:[%s1385_s7 + $0x8] sm:$0xff] %v823_v33 }
 0x167 PF: > { %s15_s24 = sadd.s32 1, %s1195_s24   ;;  %s1465_s18 = smov %s1175_s19 }
 0x168   : > { %p12_p0 = scmp.ge.s32.totalorder %s15_s24, 38   ;;  %s1466_s19 = smov %s1279_s6 }
 0x169   : > { %s1467_s20 = smov %s1187_s22  ;;  %s1468_s21 = smov %s1191_s23 }
 0x16a   : > { %s1469_s22 = smov %s1472_s25  ;;  %s1470_s23 = smov %s1476_s26 }
 0x16b   :  { %14 = sbr.rel (!%p12_p0) target bundleno = 4 (0x4), region = 133 }

// kernel: pretrained_model_forward.41
= control target key start
LH: loop header
LB: loop body
LE: loop exit
PB: predicated region body
PF: predicated region fallthrough
CT: control target
= control target key end

     0   :  { %s1136_s15 = smov 0   ;;  %s1138_s16 = smov 0   ;;  %s1360_s0 = inlined_call_operand.vmem [shape: bf16[8,4608], index: 0, kind: input, shape index: {}]   ;;  %s1361_s1 = inlined_call_operand.vmem [shape: bf16[4608,512], index: 1, kind: input, shape index: {}]   ;;  %s1362_s2 = inlined_call_operand.vmem [shape: f32[1,512], index: 2, kind: input, shape index: {}]   ;;  %s1363_s3 = inlined_call_operand.vmem [shape: f32[1,512], index: 3, kind: input, shape index: {}]   ;;  %s1364_s4 = inlined_call_operand.vmem [shape: f32[8,512], index: 4, kind: output, shape index: {}]  }
   0x1   :  { %s1140_s17 = smov 0   ;;  %s1142_s18 = smov 0  }
   0x2   :  { %s1144_s19 = smov 0   ;;  %s1146_s20 = smov 0  }
   0x3   :  { %s1148_s21 = smov 0  }
   0x4 LB: > { %s26_s22 = sadd.s32 1, %s1100_s19  ;;  %s29_s23 = sadd.s32 1, %s1104_s20  ;;  %s1108_s21 = sphi %s1148_s21, %s14_s21   ;;  %s1104_s20 = sphi %s1146_s20, %s1370_s20   ;;  %s1100_s19 = sphi %s1144_s19, %s1369_s19   ;;  %s1096_s18 = sphi %s1142_s18, %s1368_s18   ;;  %s1092_s17 = sphi %s1140_s17, %s1367_s17   ;;  %s1088_s16 = sphi %s1138_s16, %s1366_s16   ;;  %s1084_s15 = sphi %s1136_s15, %s1365_s15  }
   0x5   : > { %p27_p0 = scmp.ge.s32.totalorder %s26_s22, 18  ;;  %p77_p1 = scmp.ne.s32.totalorder %s1088_s16, %s1084_s15 }
   0x6   : > { %p78_p2 = scmp.eq.s32.totalorder %s1108_s21, 0  ;;  %s70_s27 = sadd.s32 1, %s1088_s16 }
   0x7   : > { %s1372_s22 = smov (%p27_p0, %s26_s22), 0  ;;  %s1374_s23 = smov (!%p27_p0, %s29_s23), %s1104_s20 }
   0x8   : > { %p79_p3 = por %p78_p2, %p77_p1  ;;  %p31_p4 = scmp.ge.s32.totalorder %s1374_s23, 2 }
   0x9   : > { %s65_s24 = ssub.s32 %s1100_s19, %s1372_s22  ;;  %p894_p6 = scmp.ge.s32.totalorder %s1108_s21, 36 }
   0xa   : > { %s1376_s23 = smov (%p31_p4, %s1374_s23), 0 }
   0xb   : > { %s66_s25 = ssub.s32 %s1104_s20, %s1376_s23  ;;  %183 = sbr.rel (%p894_p6) target bundleno = 41 (0x29), region = 16 }
   0xc   : > { %s67_s26 = sor.u32 %s66_s25, %s65_s24 }
   0xd   : > { %p68_p5 = scmp.eq.s32.totalorder %s67_s26, 0 }
   0xf   : > { %s1187_s28 = scalar_select %p68_p5, %s1088_s16, %s70_s27  }
  0x12   : > { %199 = sbr.rel (!%p79_p3) target bundleno = 41 (0x29), region = 24  ;;  %s201_s29 = sand.u32 (%p79_p3), 1, %s1088_s16  }
  0x13   : > { %s897_s30 = sshll.u32 (%p79_p3), %s1104_s20, 1  ;;  %s895_s5 = sshll.u32 (%p79_p3), %s201_s29, 8 }
  0x14   : > { %s946_s6 = sshll.u32 (%p79_p3), %s1100_s19, 7  ;;  %s1201_s12 = scalar_lea.vmem (%p79_p3), [#allocation3], %s895_s5 }
  0x15   : > { %s207_s7 = sadd.s32 (%p79_p3), %s946_s6, %s897_s30 }
  0x16   : > { %s899_s8 = sshll.u32 (%p79_p3), %s207_s7, 2 }
  0x17   : > { %s1196_s11 = scalar_lea.vmem (%p79_p3), %s1361_s1, %s899_s8 }
  0x18   : > { %v299_v0 = vld [vmem:[%s1196_s11] sm:$0xff] (%p79_p3)  ;;  %v301_v1 = vld [vmem:[%s1196_s11 + $0x10] sm:$0xff] (%p79_p3) }
  0x19   : > { %v303_v2 = vld [vmem:[%s1196_s11 + $0x20] sm:$0xff]  ;;  %300 = vst [vmem:[%s1201_s12] sm:$0xff] %v299_v0  ;;  %302 = vst [vmem:[%s1201_s12 + $0x8] sm:$0xff] %v301_v1  ;;  %v305_v3 = vld [vmem:[%s1196_s11 + $0x30] sm:$0xff] }
  0x1a   : > { %304 = vst [vmem:[%s1201_s12 + $0x10] sm:$0xff] %v303_v2  ;;  %v307_v4 = vld [vmem:[%s1196_s11 + $0x40] sm:$0xff]  ;;  %v309_v5 = vld [vmem:[%s1196_s11 + $0x50] sm:$0xff]  ;;  %306 = vst [vmem:[%s1201_s12 + $0x18] sm:$0xff] %v305_v3 }
  0x1b   : > { %308 = vst [vmem:[%s1201_s12 + $0x20] sm:$0xff] %v307_v4  ;;  %310 = vst [vmem:[%s1201_s12 + $0x28] sm:$0xff] %v309_v5  ;;  %v311_v6 = vld [vmem:[%s1196_s11 + $0x60] sm:$0xff]  ;;  %v313_v7 = vld [vmem:[%s1196_s11 + $0x70] sm:$0xff] }
  0x1c   : > { %v315_v8 = vld [vmem:[%s1196_s11 + $0x80] sm:$0xff]  ;;  %312 = vst [vmem:[%s1201_s12 + $0x30] sm:$0xff] %v311_v6  ;;  %314 = vst [vmem:[%s1201_s12 + $0x38] sm:$0xff] %v313_v7  ;;  %v317_v9 = vld [vmem:[%s1196_s11 + $0x90] sm:$0xff] }
  0x1d   : > { %316 = vst [vmem:[%s1201_s12 + $0x40] sm:$0xff] %v315_v8  ;;  %v319_v10 = vld [vmem:[%s1196_s11 + $0xa0] sm:$0xff]  ;;  %v321_v11 = vld [vmem:[%s1196_s11 + $0xb0] sm:$0xff]  ;;  %318 = vst [vmem:[%s1201_s12 + $0x48] sm:$0xff] %v317_v9 }
  0x1e   : > { %320 = vst [vmem:[%s1201_s12 + $0x50] sm:$0xff] %v319_v10  ;;  %322 = vst [vmem:[%s1201_s12 + $0x58] sm:$0xff] %v321_v11  ;;  %v323_v12 = vld [vmem:[%s1196_s11 + $0xc0] sm:$0xff]  ;;  %v325_v13 = vld [vmem:[%s1196_s11 + $0xd0] sm:$0xff] }
  0x1f   : > { %v327_v14 = vld [vmem:[%s1196_s11 + $0xe0] sm:$0xff]  ;;  %324 = vst [vmem:[%s1201_s12 + $0x60] sm:$0xff] %v323_v12  ;;  %326 = vst [vmem:[%s1201_s12 + $0x68] sm:$0xff] %v325_v13  ;;  %v329_v15 = vld [vmem:[%s1196_s11 + $0xf0] sm:$0xff] }
  0x20   : > { %328 = vst [vmem:[%s1201_s12 + $0x70] sm:$0xff] %v327_v14  ;;  %v331_v16 = vld [vmem:[%s1196_s11 + $0x100] sm:$0xff]  ;;  %v333_v17 = vld [vmem:[%s1196_s11 + $0x110] sm:$0xff]  ;;  %330 = vst [vmem:[%s1201_s12 + $0x78] sm:$0xff] %v329_v15 }
  0x21   : > { %332 = vst [vmem:[%s1201_s12 + $0x80] sm:$0xff] %v331_v16  ;;  %334 = vst [vmem:[%s1201_s12 + $0x88] sm:$0xff] %v333_v17  ;;  %v335_v18 = vld [vmem:[%s1196_s11 + $0x120] sm:$0xff]  ;;  %v337_v19 = vld [vmem:[%s1196_s11 + $0x130] sm:$0xff] }
  0x22   : > { %v339_v20 = vld [vmem:[%s1196_s11 + $0x140] sm:$0xff]  ;;  %336 = vst [vmem:[%s1201_s12 + $0x90] sm:$0xff] %v335_v18  ;;  %338 = vst [vmem:[%s1201_s12 + $0x98] sm:$0xff] %v337_v19  ;;  %v341_v21 = vld [vmem:[%s1196_s11 + $0x150] sm:$0xff] }
  0x23   : > { %340 = vst [vmem:[%s1201_s12 + $0xa0] sm:$0xff] %v339_v20  ;;  %v343_v22 = vld [vmem:[%s1196_s11 + $0x160] sm:$0xff]  ;;  %v345_v23 = vld [vmem:[%s1196_s11 + $0x170] sm:$0xff]  ;;  %342 = vst [vmem:[%s1201_s12 + $0xa8] sm:$0xff] %v341_v21 }
  0x24   : > { %344 = vst [vmem:[%s1201_s12 + $0xb0] sm:$0xff] %v343_v22  ;;  %346 = vst [vmem:[%s1201_s12 + $0xb8] sm:$0xff] %v345_v23  ;;  %v347_v24 = vld [vmem:[%s1196_s11 + $0x180] sm:$0xff]  ;;  %v349_v25 = vld [vmem:[%s1196_s11 + $0x190] sm:$0xff] }
  0x25   : > { %v351_v26 = vld [vmem:[%s1196_s11 + $0x1a0] sm:$0xff]  ;;  %348 = vst [vmem:[%s1201_s12 + $0xc0] sm:$0xff] %v347_v24  ;;  %350 = vst [vmem:[%s1201_s12 + $0xc8] sm:$0xff] %v349_v25  ;;  %v353_v27 = vld [vmem:[%s1196_s11 + $0x1b0] sm:$0xff] }
  0x26   : > { %352 = vst [vmem:[%s1201_s12 + $0xd0] sm:$0xff] %v351_v26  ;;  %v355_v28 = vld [vmem:[%s1196_s11 + $0x1c0] sm:$0xff]  ;;  %v357_v29 = vld [vmem:[%s1196_s11 + $0x1d0] sm:$0xff]  ;;  %354 = vst [vmem:[%s1201_s12 + $0xd8] sm:$0xff] %v353_v27 }
  0x27   : > { %356 = vst [vmem:[%s1201_s12 + $0xe0] sm:$0xff] %v355_v28  ;;  %358 = vst [vmem:[%s1201_s12 + $0xe8] sm:$0xff] %v357_v29  ;;  %v359_v30 = vld [vmem:[%s1196_s11 + $0x1e0] sm:$0xff]  ;;  %v361_v31 = vld [vmem:[%s1196_s11 + $0x1f0] sm:$0xff] }
  0x28   : > { %360 = vst [vmem:[%s1201_s12 + $0xf0] sm:$0xff] %v359_v30  ;;  %362 = vst [vmem:[%s1201_s12 + $0xf8] sm:$0xff] %v361_v31 }
  0x29 PF: > { %p900_p7 = scmp.ge.s32.totalorder %s1108_s21, 1  ;;  %p383_p8 = scmp.lt.s32.totalorder %s1108_s21, 37 }
  0x2b   : > { %p384_p9 = pnand %p900_p7, %p383_p8 }
  0x2c   : > { %s390_s13 = sand.u32 (!%p384_p9), 1, %s1084_s15   ;;  %s902_s14 = sshll.u32 (!%p384_p9), %s1092_s17, 1 }
  0x2d   : > { %387 = sbr.rel (%p384_p9) target bundleno = 357 (0x165), region = 70  ;;  %s901_s24 = sshll.u32 (!%p384_p9), %s390_s13, 8 }
  0x2e   : > { %p439_p10 = scmp.lt.s32.totalorder (!%p384_p9), %s902_s14, 35  ;;  %s904_s25 = sshll.u32 (!%p384_p9), %s1096_s18, 1 }
  0x2f   : > { %p449_p11 = scmp.lt.s32.totalorder (!%p384_p9), %s904_s25, 3  ;;  %s1290_s13 = scalar_lea.vmem (!%p384_p9), [#allocation3], %s901_s24 }
  0x30   : > { %p908_p12 = scmp.ne.s32.totalorder (!%p384_p9), %s1092_s17, 0 }
  0x34   : > { %s1378_s14 = smov (!%p439_p10, %s902_s14), 35  ;;  %s1380_s25 = smov (!%p449_p11, %s904_s25), 3 }
  0x35   : > { %s903_s26 = sshll.u32 %s1378_s14, 2  ;;  %s451_s15 = scalar_lea.vmem %s1362_s2, %s1380_s25  ;;  %v1110_v32 = vmov (!%p908_p12), 0.0  }
  0x36   : > { %s1272_s30 = scalar_lea.vmem %s1360_s0, %s903_s26  ;;  %s456_s18 = scalar_lea.vmem %s1363_s3, %s1380_s25  ;;  %472 = vst [vmem:[#allocation2] sm:$0xff] (!%p908_p12), %v1110_v32  ;;  %473 = vst [vmem:[#allocation2 + $0x8] sm:$0xff] (!%p908_p12), %v1110_v32 }
  0x37   : > { %s907_s9 = sshll.u32 %s1380_s25, 3  ;;  %471 = sbr.rel (%p908_p12) target bundleno = 62 (0x3e), region = 78 }
  0x38   : > { %s1288_s12 = scalar_lea.vmem %s1364_s4, %s907_s9 }
  0x3e PF: > { %v1004_v33 = vld [vmem:[%s1290_s13 + $0x4] ss:$8 sps:$4 sm:$0xff]   ;;  %v1006_v34 = vld [vmem:[%s1290_s13] ss:$8 sps:$4 sm:$0xff]   ;;  %v1007_v35 = vld [vmem:[%s1290_s13 + $0x14] ss:$8 sps:$4 sm:$0xff]  }
  0x3f   : > { %676 = vmatprep.subr.bf16.mxu0 %v1004_v33  ;;  %v1009_v36 = vld [vmem:[%s1290_s13 + $0x10] ss:$8 sps:$4 sm:$0xff]   ;;  %v1010_v37 = vld [vmem:[%s1290_s13 + $0x24] ss:$8 sps:$4 sm:$0xff]   ;;  %v1012_v38 = vld [vmem:[%s1290_s13 + $0x20] ss:$8 sps:$4 sm:$0xff]  }
  0x40   : > { %677 = vmatpush1.bf16.msra.mxu0 %v1006_v34  ;;  %v1013_v39 = vld [vmem:[%s1290_s13 + $0x34] ss:$8 sps:$4 sm:$0xff]   ;;  %v1015_v40 = vld [vmem:[%s1290_s13 + $0x30] ss:$8 sps:$4 sm:$0xff]   ;;  %v1016_v41 = vld [vmem:[%s1290_s13 + $0x44] ss:$8 sps:$4 sm:$0xff]  }
  0x41   : > { %678 = vmatprep.subr.bf16.mxu0 %v1007_v35  ;;  %v1018_v42 = vld [vmem:[%s1290_s13 + $0x40] ss:$8 sps:$4 sm:$0xff]   ;;  %v1019_v43 = vld [vmem:[%s1290_s13 + $0x54] ss:$8 sps:$4 sm:$0xff]   ;;  %v1021_v44 = vld [vmem:[%s1290_s13 + $0x50] ss:$8 sps:$4 sm:$0xff]  }
  0x42   : > { %v1022_v45 = vld [vmem:[%s1290_s13 + $0x64] ss:$8 sps:$4 sm:$0xff]   ;;  %v476_v46 = vld [vmem:[%s1272_s30] sm:$0xff]  ;;  %v1024_v48 = vld [vmem:[%s1290_s13 + $0x60] ss:$8 sps:$4 sm:$0xff]   ;;  %p943_p13 = scmp.ne.s32.totalorder %s1092_s17, 17 }
  0x43   : > { %v910_v47 = vcombine.high %v476_v46, %v476_v46  ;;  %v1025_v49 = vld [vmem:[%s1290_s13 + $0x74] ss:$8 sps:$4 sm:$0xff]   ;;  %v1027_v50 = vld [vmem:[%s1290_s13 + $0x70] ss:$8 sps:$4 sm:$0xff]   ;;  %v1028_v51 = vld [vmem:[%s1290_s13 + $0x84] ss:$8 sps:$4 sm:$0xff]   ;;  %v909_v3 = vcombine.low %v476_v46, %v476_v46  ;;  %v729_v12 = vlaneseq (!%p943_p13) }
  0x44   : > { %679 = vmatpush1.bf16.msra.mxu0 %v1009_v36  ;;  %v1030_v52 = vld [vmem:[%s1290_s13 + $0x80] ss:$8 sps:$4 sm:$0xff]   ;;  %v1031_v53 = vld [vmem:[%s1290_s13 + $0x94] ss:$8 sps:$4 sm:$0xff]   ;;  %v1033_v54 = vld [vmem:[%s1290_s13 + $0x90] ss:$8 sps:$4 sm:$0xff]  }
  0x45   : > { %680 = vmatprep.subr.bf16.mxu0 %v1010_v37  ;;  %708 = vmatprep.mubr.bf16.mxu0 %v910_v47  ;;  %v1034_v55 = vld [vmem:[%s1290_s13 + $0xa4] ss:$8 sps:$4 sm:$0xff]   ;;  %v1036_v56 = vld [vmem:[%s1290_s13 + $0xa0] ss:$8 sps:$4 sm:$0xff]   ;;  %v1037_v57 = vld [vmem:[%s1290_s13 + $0xb4] ss:$8 sps:$4 sm:$0xff]  }
  0x46   : > { %v1039_v58 = vld [vmem:[%s1290_s13 + $0xb0] ss:$8 sps:$4 sm:$0xff]   ;;  %v1040_v59 = vld [vmem:[%s1290_s13 + $0xc4] ss:$8 sps:$4 sm:$0xff]   ;;  %v1042_v60 = vld [vmem:[%s1290_s13 + $0xc0] ss:$8 sps:$4 sm:$0xff]  }
  0x47   : > { %v1043_v61 = vld [vmem:[%s1290_s13 + $0xd4] ss:$8 sps:$4 sm:$0xff]   ;;  %v1045_v62 = vld [vmem:[%s1290_s13 + $0xd0] ss:$8 sps:$4 sm:$0xff]   ;;  %v1046_v63 = vld [vmem:[%s1290_s13 + $0xe4] ss:$8 sps:$4 sm:$0xff]  }
  0x48   : > { %681 = vmatpush1.bf16.msra.mxu0 %v1012_v38  ;;  %v1048_v0 = vld [vmem:[%s1290_s13 + $0xe0] ss:$8 sps:$4 sm:$0xff]   ;;  %v1049_v1 = vld [vmem:[%s1290_s13 + $0xf4] ss:$8 sps:$4 sm:$0xff]   ;;  %v1051_v2 = vld [vmem:[%s1290_s13 + $0xf0] ss:$8 sps:$4 sm:$0xff]  }
  0x49   : > { %682 = vmatprep.subr.bf16.mxu0 %v1013_v39  ;;  %v474_v4 = vld [vmem:[#allocation2] sm:$0xff]  ;;  %v475_v5 = vld [vmem:[#allocation2 + $0x8] sm:$0xff]  ;;  %v730_v13 = vshrl.u32 (!%p943_p13), %v729_v12, 7 }
  0x4a   : > { %v727_v14 = vld [vmem:[%s451_s15] sm:$0x3] (!%p943_p13) }
  0x4b   : > { %v741_v15 = vld [vmem:[%s456_s18] sm:$0x3] (!%p943_p13)  ;;  %v731_v16 = vsub.s32 (!%p943_p13), 0, %v730_v13  ;;  %v735_v17 = vsub.s32 (!%p943_p13), 1, %v730_v13 }
  0x4c   : > { %683 = vmatpush1.bf16.msra.mxu0 %v1015_v40 }
  0x4d   : > { %684 = vmatprep.subr.bf16.mxu0 %v1016_v41  ;;  %v732_v20 = vrot.slane (!%p943_p13), %v727_v14, %v731_v16  ;;  %v746_v21 = vrot.slane (!%p943_p13), %v741_v15, %v731_v16  ;;  %v736_v22 = vrot.slane (!%p943_p13), %v727_v14, %v735_v17  ;;  %v750_v23 = vrot.slane (!%p943_p13), %v741_v15, %v735_v17 }
  0x50   : > { %685 = vmatpush1.bf16.msra.mxu0 %v1018_v42 }
  0x51   : > { %686 = vmatprep.subr.bf16.mxu0 %v1019_v43 }
  0x54   : > { %687 = vmatpush1.bf16.msra.mxu0 %v1021_v44 }
  0x55   : > { %688 = vmatprep.subr.bf16.mxu0 %v1022_v45 }
  0x58   : > { %689 = vmatpush1.bf16.msra.mxu0 %v1024_v48 }
  0x59   : > { %690 = vmatprep.subr.bf16.mxu0 %v1025_v49 }
  0x5c   : > { %691 = vmatpush1.bf16.msra.mxu0 %v1027_v50 }
  0x5d   : > { %692 = vmatprep.subr.bf16.mxu0 %v1028_v51 }
  0x60   : > { %693 = vmatpush1.bf16.msra.mxu0 %v1030_v52 }
  0x61   : > { %694 = vmatprep.subr.bf16.mxu0 %v1031_v53 }
  0x64   : > { %695 = vmatpush1.bf16.msra.mxu0 %v1033_v54 }
  0x65   : > { %696 = vmatprep.subr.bf16.mxu0 %v1034_v55 }
  0x68   : > { %697 = vmatpush1.bf16.msra.mxu0 %v1036_v56 }
  0x69   : > { %698 = vmatprep.subr.bf16.mxu0 %v1037_v57 }
  0x6c   : > { %699 = vmatpush1.bf16.msra.mxu0 %v1039_v58 }
  0x6d   : > { %700 = vmatprep.subr.bf16.mxu0 %v1040_v59 }
  0x70   : > { %701 = vmatpush1.bf16.msra.mxu0 %v1042_v60 }
  0x71   : > { %702 = vmatprep.subr.bf16.mxu0 %v1043_v61 }
  0x74   : > { %703 = vmatpush1.bf16.msra.mxu0 %v1045_v62 }
  0x75   : > { %704 = vmatprep.subr.bf16.mxu0 %v1046_v63 }
  0x78   : > { %705 = vmatpush1.bf16.msra.mxu0 %v1048_v0 }
  0x79   : > { %706 = vmatprep.subr.bf16.mxu0 %v1049_v1 }
  0x7c   : > { %707 = vmatpush1.bf16.msra.mxu0 %v1051_v2 }
  0x7f   : > { %709 = vmatmul.mubr.bf16.vlgmr.msra.gmra.mrb[0].mxu0 %v909_v3 }
 0x150   : > { %724 = sbr.rel (%p943_p13) target bundleno = 357 (0x165), region = 82 }
 0x152   : > { %v710_v6 = vpop.f32.mrb[0].mxu0 }
 0x153   : > { %v717_v7 = vadd.f32 %v710_v6, %v474_v4  ;;  %v712_v8 = vpop.f32.mrb[1].mxu0 }
 0x154   : > { %v718_v9 = vadd.f32 %v712_v8, %v475_v5  ;;  %v714_v10 = vpop.f32.mrb[2].mxu0 }
 0x155   : > { %719 = vst [vmem:[#allocation2] sm:$0xff] %v717_v7  ;;  %v715_v11 = vpop.f32.mrb[3].mxu0 }
 0x156   : > { %720 = vst [vmem:[#allocation2 + $0x8] sm:$0xff] %v718_v9 }
 0x15c   : > { %v725_v18 = vld [vmem:[#allocation2] sm:$0xff] }
 0x15d   : > { %v726_v19 = vld [vmem:[#allocation2 + $0x8] sm:$0xff]  ;;  %v739_v24 = vmul.f32 %v732_v20, %v725_v18 }
 0x15e   : > { %v740_v25 = vmul.f32 %v736_v22, %v726_v19 }
 0x15f   : > { %v753_v26 = vadd.f32 %v746_v21, %v739_v24 }
 0x160   : > { %v754_v27 = vadd.f32 %v750_v23, %v740_v25 }
 0x161   : > { %v755_v28 = vmax.f32 %v753_v26, 0.0 }
 0x162   : > { %v756_v29 = vmax.f32 %v754_v27, 0.0 }
 0x163   : > { %757 = vst [vmem:[%s1288_s12] sm:$0xff] %v755_v28 }
 0x164   : > { %758 = vst [vmem:[%s1288_s12 + $0x8] sm:$0xff] %v756_v29 }
 0x165 PF: > { %s14_s21 = sadd.s32 1, %s1108_s21   ;;  %s1365_s15 = smov %s1088_s16 }
 0x166   : > { %p11_p0 = scmp.ge.s32.totalorder %s14_s21, 38   ;;  %s1366_s16 = smov %s1187_s28 }
 0x167   : > { %s1367_s17 = smov %s1100_s19  ;;  %s1368_s18 = smov %s1104_s20 }
 0x168   : > { %s1369_s19 = smov %s1372_s22  ;;  %s1370_s20 = smov %s1376_s23 }
 0x169   :  { %13 = sbr.rel (!%p11_p0) target bundleno = 4 (0x4), region = 126 }

// kernel: pretrained_model_forward.43
= control target key start
LH: loop header
LB: loop body
LE: loop exit
PB: predicated region body
PF: predicated region fallthrough
CT: control target
= control target key end

     0   :  { %v39_v21 = vlaneseq  ;;  %vm367_vm0 = vcmask 1041409   ;;  %vm370_vm1 = vcmask 1042434   ;;  %vm373_vm2 = vcmask 1043459   ;;  %s1075_s1 = inlined_call_operand.vmem [shape: bf16[512,128], index: 1, kind: input, shape index: {}]   ;;  %s1076_s0 = inlined_call_operand.vmem [shape: f32[8,1,512], index: 0, kind: input, shape index: {}]   ;;  %s1077_s2 = inlined_call_operand.vmem [shape: f32[1,128], index: 2, kind: input, shape index: {}]   ;;  %s1078_s3 = inlined_call_operand.vmem [shape: f32[8,128], index: 3, kind: output, shape index: {}]  }
   0x1   :  { %v791_v0 = vld [vmem:[%s1075_s1 + $0x40] sm:$0xff]   ;;  %v795_v4 = vld [vmem:[%s1075_s1 + $0x48] sm:$0xff]   ;;  %v799_v8 = vld [vmem:[%s1075_s1 + $0x50] sm:$0xff]   ;;  %vm376_vm3 = vcmask 1044484   ;;  %vm379_vm4 = vcmask 1045509   ;;  %vm382_vm5 = vcmask 1046534  }
   0x2   :  { %v792_v1 = vld [vmem:[%s1075_s1 + $0xc0] sm:$0xff]   ;;  %747 = vmatprep.subr.bf16.mxu0 %v791_v0  ;;  %v796_v5 = vld [vmem:[%s1075_s1 + $0xc8] sm:$0xff]   ;;  %v800_v9 = vld [vmem:[%s1075_s1 + $0xd0] sm:$0xff]   ;;  %v40_v26 = vshrl.u32 %v39_v21, 7  ;;  %vm385_vm6 = vcmask 1047559  }
   0x3   :  { %v793_v2 = vld [vmem:[%s1075_s1] sm:$0xff]   ;;  %769 = vmatprep.subr.bf16.mxu1 %v792_v1  ;;  %v797_v6 = vld [vmem:[%s1075_s1 + $0x8] sm:$0xff]   ;;  %v801_v10 = vld [vmem:[%s1075_s1 + $0x10] sm:$0xff]  }
   0x4   :  { %v794_v3 = vld [vmem:[%s1075_s1 + $0x80] sm:$0xff]   ;;  %748 = vmatpush3.bf16.msra.mxu0 %v793_v2  ;;  %v798_v7 = vld [vmem:[%s1075_s1 + $0x88] sm:$0xff]   ;;  %v802_v11 = vld [vmem:[%s1075_s1 + $0x90] sm:$0xff]   ;;  %v45_v31 = vsub.s32 1, %v40_v26  ;;  %v933_v33 = vsub.s32 3, %v40_v26  ;;  %v938_v35 = vsub.s32 0, %v40_v26 }
   0x5   :  { %770 = vmatpush3.bf16.msra.mxu1 %v794_v3  ;;  %749 = vmatprep.subr.bf16.mxu0 %v795_v4  ;;  %v803_v12 = vld [vmem:[%s1075_s1 + $0x58] sm:$0xff]   ;;  %v807_v16 = vld [vmem:[%s1075_s1 + $0x60] sm:$0xff]   ;;  %v811_v20 = vld [vmem:[%s1075_s1 + $0x68] sm:$0xff]   ;;  %v943_v37 = vsub.s32 2, %v40_v26 }
   0x6   :  { %771 = vmatprep.subr.bf16.mxu1 %v796_v5  ;;  %v804_v13 = vld [vmem:[%s1075_s1 + $0xd8] sm:$0xff]   ;;  %v808_v17 = vld [vmem:[%s1075_s1 + $0xe0] sm:$0xff]   ;;  %v812_v22 = vld [vmem:[%s1075_s1 + $0xe8] sm:$0xff]  }
   0x7   :  { %v805_v14 = vld [vmem:[%s1075_s1 + $0x18] sm:$0xff]   ;;  %v809_v18 = vld [vmem:[%s1075_s1 + $0x20] sm:$0xff]   ;;  %v813_v23 = vld [vmem:[%s1075_s1 + $0x28] sm:$0xff]  }
   0x8   :  { %750 = vmatpush3.bf16.msra.mxu0 %v797_v6  ;;  %v806_v15 = vld [vmem:[%s1075_s1 + $0x98] sm:$0xff]   ;;  %v810_v19 = vld [vmem:[%s1075_s1 + $0xa0] sm:$0xff]   ;;  %v814_v24 = vld [vmem:[%s1075_s1 + $0xa8] sm:$0xff]  }
   0x9   :  { %772 = vmatpush3.bf16.msra.mxu1 %v798_v7  ;;  %751 = vmatprep.subr.bf16.mxu0 %v799_v8  ;;  %v815_v25 = vld [vmem:[%s1075_s1 + $0x70] sm:$0xff]   ;;  %v819_v30 = vld [vmem:[%s1075_s1 + $0x78] sm:$0xff]   ;;  %v948_v38 = vld [vmem:[%s1076_s0] sm:$0xf] }
   0xa   :  { %773 = vmatprep.subr.bf16.mxu1 %v800_v9  ;;  %v816_v27 = vld [vmem:[%s1075_s1 + $0xf0] sm:$0xff]   ;;  %v820_v32 = vld [vmem:[%s1075_s1 + $0xf8] sm:$0xff]   ;;  %v953_v39 = vld [vmem:[%s1076_s0 + $0x4] sm:$0xf]  ;;  %v46_v44 = vrot.slane %v948_v38, %v45_v31  ;;  %v54_v47 = vrot.slane %v948_v38, %v933_v33 }
   0xb   :  { %v817_v28 = vld [vmem:[%s1075_s1 + $0x30] sm:$0xff]   ;;  %v821_v34 = vld [vmem:[%s1075_s1 + $0x38] sm:$0xff]   ;;  %v958_v40 = vld [vmem:[%s1076_s0 + $0x8] sm:$0xf]  ;;  %v62_v45 = vrot.slane %v953_v39, %v45_v31  ;;  %v70_v53 = vrot.slane %v953_v39, %v933_v33 }
   0xc   :  { %752 = vmatpush3.bf16.msra.mxu0 %v801_v10  ;;  %v818_v29 = vld [vmem:[%s1075_s1 + $0xb0] sm:$0xff]   ;;  %v822_v36 = vld [vmem:[%s1075_s1 + $0xb8] sm:$0xff]   ;;  %v963_v41 = vld [vmem:[%s1076_s0 + $0xc] sm:$0xf]  ;;  %v78_v46 = vrot.slane %v958_v40, %v45_v31  ;;  %v200_v56 = vpack.c.bf16 %v46_v44, %v46_v44  ;;  %v86_v9 = vrot.slane %v958_v40, %v933_v33 }
   0xd   :  { %774 = vmatpush3.bf16.msra.mxu1 %v802_v11  ;;  %753 = vmatprep.subr.bf16.mxu0 %v803_v12  ;;  %v968_v42 = vld [vmem:[%s1076_s0 + $0x10] sm:$0xf]  ;;  %v973_v43 = vld [vmem:[%s1076_s0 + $0x14] sm:$0xf]  ;;  %v983_v48 = vld [vmem:[%s1076_s0 + $0x18] sm:$0xf]  ;;  %v94_v50 = vrot.slane %v963_v41, %v45_v31  ;;  %v204_v57 = vpack.c.bf16 %v62_v45, %v62_v45 }
   0xe   :  { %775 = vmatprep.subr.bf16.mxu1 %v804_v13  ;;  %v988_v49 = vld [vmem:[%s1076_s0 + $0x1c] sm:$0xf]  ;;  %v110_v51 = vrot.slane %v968_v42, %v45_v31  ;;  %v126_v52 = vrot.slane %v973_v43, %v45_v31  ;;  %v142_v54 = vrot.slane %v983_v48, %v45_v31  ;;  %v208_v58 = vpack.c.bf16 %v78_v46, %v78_v46 }
   0xf   :  { %v158_v55 = vrot.slane %v988_v49, %v45_v31  ;;  %v212_v59 = vpack.c.bf16 %v94_v50, %v94_v50  ;;  %v335_v0 = vunpack.c.l.b16 %v200_v56  ;;  %v339_v1 = vunpack.c.l.b16 %v204_v57 }
  0x10   :  { %754 = vmatpush3.bf16.msra.mxu0 %v805_v14  ;;  %v216_v60 = vpack.c.bf16 %v110_v51, %v110_v51  ;;  %v220_v61 = vpack.c.bf16 %v126_v52, %v126_v52  ;;  %v224_v62 = vpack.c.bf16 %v142_v54, %v142_v54  ;;  %v343_v2 = vunpack.c.l.b16 %v208_v58 }
  0x11   :  { %776 = vmatpush3.bf16.msra.mxu1 %v806_v15  ;;  %755 = vmatprep.subr.bf16.mxu0 %v807_v16  ;;  %v228_v63 = vpack.c.bf16 %v158_v55, %v158_v55  ;;  %v347_v3 = vunpack.c.l.b16 %v212_v59  ;;  %v387_v8 = vrot.slane %v339_v1, 7  ;;  %v150_v21 = vrot.slane %v983_v48, %v933_v33 }
  0x12   :  { %777 = vmatprep.subr.bf16.mxu1 %v808_v17  ;;  %v351_v4 = vunpack.c.l.b16 %v216_v60  ;;  %v355_v5 = vunpack.c.l.b16 %v220_v61  ;;  %v359_v6 = vunpack.c.l.b16 %v224_v62  ;;  %v389_v10 = vrot.slane %v343_v2, 6 }
  0x13   :  { %v363_v7 = vunpack.c.l.b16 %v228_v63  ;;  %v391_v11 = vrot.slane %v347_v3, 5  ;;  %v388_v14 = vsel %vm367_vm0, %v387_v8, %v335_v0  ;;  %v102_v17 = vrot.slane %v963_v41, %v933_v33 }
  0x14   :  { %756 = vmatpush3.bf16.msra.mxu0 %v809_v18  ;;  %v393_v12 = vrot.slane %v351_v4, 4  ;;  %v395_v13 = vrot.slane %v355_v5, 3  ;;  %v397_v15 = vrot.slane %v359_v6, 2  ;;  %v390_v18 = vsel %vm370_vm1, %v389_v10, %v388_v14 }
  0x15   :  { %778 = vmatpush3.bf16.msra.mxu1 %v810_v19  ;;  %757 = vmatprep.subr.bf16.mxu0 %v811_v20  ;;  %v399_v16 = vrot.slane %v363_v7, 1  ;;  %v118_v19 = vrot.slane %v968_v42, %v933_v33  ;;  %v134_v20 = vrot.slane %v973_v43, %v933_v33  ;;  %v42_v63 = vrot.slane %v948_v38, %v938_v35 }
  0x16   :  { %779 = vmatprep.subr.bf16.mxu1 %v812_v22  ;;  %v392_v22 = vsel %vm373_vm2, %v391_v11, %v390_v18  ;;  %v58_v1 = vrot.slane %v953_v39, %v938_v35  ;;  %v74_v2 = vrot.slane %v958_v40, %v938_v35  ;;  %v90_v3 = vrot.slane %v963_v41, %v938_v35 }
  0x17   :  { %v394_v26 = vsel %vm376_vm3, %v393_v12, %v392_v22  ;;  %v222_v31 = vpack.c.bf16 %v134_v20, %v134_v20  ;;  %v106_v5 = vrot.slane %v968_v42, %v938_v35  ;;  %v122_v6 = vrot.slane %v973_v43, %v938_v35 }
  0x18   :  { %758 = vmatpush3.bf16.msra.mxu0 %v813_v23  ;;  %v166_v23 = vrot.slane %v988_v49, %v933_v33  ;;  %v138_v7 = vrot.slane %v983_v48, %v938_v35  ;;  %v199_v10 = vpack.c.bf16 %v42_v63, %v42_v63  ;;  %v203_v11 = vpack.c.bf16 %v58_v1, %v58_v1 }
  0x19   :  { %780 = vmatpush3.bf16.msra.mxu1 %v814_v24  ;;  %759 = vmatprep.subr.bf16.mxu0 %v815_v25  ;;  %v202_v24 = vpack.c.bf16 %v54_v47, %v54_v47  ;;  %v206_v25 = vpack.c.bf16 %v70_v53, %v70_v53  ;;  %v357_v51 = vunpack.c.l.b16 %v222_v31  ;;  %v211_v14 = vpack.c.bf16 %v90_v3, %v90_v3 }
  0x1a   :  { %781 = vmatprep.subr.bf16.mxu1 %v816_v27  ;;  %v210_v27 = vpack.c.bf16 %v86_v9, %v86_v9  ;;  %v154_v9 = vrot.slane %v988_v49, %v938_v35  ;;  %v223_v18 = vpack.c.bf16 %v138_v7, %v138_v7  ;;  %v338_v22 = vunpack.c.l.b16 %v203_v11 }
  0x1b   :  { %v337_v44 = vunpack.c.l.b16 %v202_v24  ;;  %v341_v45 = vunpack.c.l.b16 %v206_v25  ;;  %v423_v59 = vrot.slane %v357_v51, 3  ;;  %v346_v25 = vunpack.c.l.b16 %v211_v14 }
  0x1c   :  { %760 = vmatpush3.bf16.msra.mxu0 %v817_v28  ;;  %v214_v28 = vpack.c.bf16 %v102_v17, %v102_v17  ;;  %v345_v46 = vunpack.c.l.b16 %v210_v27  ;;  %v219_v17 = vpack.c.bf16 %v122_v6, %v122_v6  ;;  %v358_v27 = vunpack.c.l.b16 %v223_v18 }
  0x1d   :  { %782 = vmatpush3.bf16.msra.mxu1 %v818_v29  ;;  %761 = vmatprep.subr.bf16.mxu0 %v819_v30  ;;  %v218_v29 = vpack.c.bf16 %v118_v19, %v118_v19  ;;  %v396_v30 = vsel %vm379_vm4, %v395_v13, %v394_v26  ;;  %v415_v55 = vrot.slane %v341_v45, 7  ;;  %v207_v13 = vpack.c.bf16 %v74_v2, %v74_v2 }
  0x1e   :  { %783 = vmatprep.subr.bf16.mxu1 %v820_v32  ;;  %v226_v32 = vpack.c.bf16 %v150_v21, %v150_v21  ;;  %v349_v33 = vunpack.c.l.b16 %v214_v28  ;;  %v417_v56 = vrot.slane %v345_v46, 6  ;;  %v227_v19 = vpack.c.bf16 %v154_v9, %v154_v9 }
  0x1f   :  { %v353_v47 = vunpack.c.l.b16 %v218_v29  ;;  %v416_v60 = vsel %vm367_vm0, %v415_v55, %v337_v44  ;;  %v334_v21 = vunpack.c.l.b16 %v199_v10  ;;  %v354_v26 = vunpack.c.l.b16 %v219_v17 }
  0x20   :  { %762 = vmatpush3.bf16.msra.mxu0 %v821_v34  ;;  %v230_v34 = vpack.c.bf16 %v166_v23, %v166_v23  ;;  %v361_v53 = vunpack.c.l.b16 %v226_v32  ;;  %v419_v57 = vrot.slane %v349_v33, 5  ;;  %v418_v0 = vsel %vm370_vm1, %v417_v56, %v416_v60 }
  0x21   :  { %784 = vmatpush3.bf16.msra.mxu1 %v822_v36  ;;  %v398_v36 = vsel %vm382_vm5, %v397_v15, %v396_v30  ;;  %v421_v58 = vrot.slane %v353_v47, 4  ;;  %v215_v15 = vpack.c.bf16 %v106_v5, %v106_v5  ;;  %v342_v23 = vunpack.c.l.b16 %v207_v13 }
  0x22   :  { %v400_v50 = vsel %vm385_vm6, %v399_v16, %v398_v36  ;;  %v365_v54 = vunpack.c.l.b16 %v230_v34  ;;  %v425_v61 = vrot.slane %v361_v53, 2  ;;  %v420_v4 = vsel %vm373_vm2, %v419_v57, %v418_v0 }
  0x23   :  { %v430_v52 = vpack.c.b16 %v400_v50, %v400_v50  ;;  %v422_v8 = vsel %vm376_vm3, %v421_v58, %v420_v4  ;;  %v350_v35 = vunpack.c.l.b16 %v215_v15  ;;  %v362_v28 = vunpack.c.l.b16 %v227_v19 }
  0x24   :  { %v427_v62 = vrot.slane %v365_v54, 1  ;;  %v424_v12 = vsel %vm379_vm4, %v423_v59, %v422_v8  ;;  %v366_v29 = vrot.slane %v338_v22, 7  ;;  %v369_v30 = vrot.slane %v342_v23, 6 }
  0x25   :  { %661 = vmatprep.mubr.bf16.mxu0 %v430_v52  ;;  %v426_v16 = vsel %vm382_vm5, %v425_v61, %v424_v12  ;;  %v372_v31 = vrot.slane %v346_v25, 5  ;;  %v375_v32 = vrot.slane %v350_v35, 4  ;;  %v378_v34 = vrot.slane %v354_v26, 3  ;;  %v714_v25 = vld [vmem:[%s1077_s2] ss:$0 sm:$0xff] }
  0x26   :  { %v428_v20 = vsel %vm385_vm6, %v427_v62, %v426_v16  ;;  %v50_v36 = vrot.slane %v948_v38, %v943_v37  ;;  %v368_v44 = vsel %vm367_vm0, %v366_v29, %v334_v21  ;;  %v381_v45 = vrot.slane %v358_v27, 2 }
  0x27   :  { %v432_v24 = vpack.c.b16 %v428_v20, %v428_v20  ;;  %v384_v46 = vrot.slane %v362_v28, 1  ;;  %v66_v50 = vrot.slane %v953_v39, %v943_v37  ;;  %v371_v33 = vsel %vm370_vm1, %v369_v30, %v368_v44 }
  0x28   :  { %v82_v47 = vrot.slane %v958_v40, %v943_v37  ;;  %v98_v51 = vrot.slane %v963_v41, %v943_v37  ;;  %v114_v52 = vrot.slane %v968_v42, %v943_v37  ;;  %v374_v38 = vsel %vm373_vm2, %v372_v31, %v371_v33 }
  0x29   :  { %701 = vmatprep.mubr.bf16.mxu1 %v432_v24  ;;  %v130_v53 = vrot.slane %v973_v43, %v943_v37  ;;  %v146_v54 = vrot.slane %v983_v48, %v943_v37  ;;  %v162_v39 = vrot.slane %v988_v49, %v943_v37  ;;  %v377_v55 = vsel %vm376_vm3, %v375_v32, %v374_v38 }
  0x2a   :  { %v201_v40 = vpack.c.bf16 %v50_v36, %v50_v36  ;;  %v205_v56 = vpack.c.bf16 %v66_v50, %v66_v50  ;;  %v209_v57 = vpack.c.bf16 %v82_v47, %v82_v47  ;;  %v380_v41 = vsel %vm379_vm4, %v378_v34, %v377_v55 }
  0x2b   :  { %v213_v58 = vpack.c.bf16 %v98_v51, %v98_v51  ;;  %v217_v42 = vpack.c.bf16 %v114_v52, %v114_v52  ;;  %v221_v59 = vpack.c.bf16 %v130_v53, %v130_v53  ;;  %v383_v60 = vsel %vm382_vm5, %v381_v45, %v380_v41 }
  0x2c   :  { %v225_v61 = vpack.c.bf16 %v146_v54, %v146_v54  ;;  %v229_v43 = vpack.c.bf16 %v162_v39, %v162_v39  ;;  %v336_v62 = vunpack.c.l.b16 %v201_v40  ;;  %v386_v48 = vsel %vm385_vm6, %v384_v46, %v383_v60 }
  0x2d   :  { %v340_v63 = vunpack.c.l.b16 %v205_v56  ;;  %v344_v0 = vunpack.c.l.b16 %v209_v57  ;;  %v348_v37 = vunpack.c.l.b16 %v213_v58  ;;  %v429_v49 = vpack.c.b16 %v386_v48, %v386_v48 }
  0x2e   :  { %v352_v1 = vunpack.c.l.b16 %v217_v42  ;;  %v356_v2 = vunpack.c.l.b16 %v221_v59  ;;  %v360_v3 = vunpack.c.l.b16 %v225_v61  ;;  %v364_v4 = vunpack.c.l.b16 %v229_v43 }
  0x2f   :  { %v401_v5 = vrot.slane %v340_v63, 7  ;;  %v403_v6 = vrot.slane %v344_v0, 6  ;;  %v405_v7 = vrot.slane %v348_v37, 5  ;;  %662 = vmatmul.mubr.bf16.vlgmr.msra.gmra.mrb[0].mxu0 %v429_v49 }
  0x30   :  { %v407_v8 = vrot.slane %v352_v1, 4  ;;  %v409_v10 = vrot.slane %v356_v2, 3  ;;  %v411_v12 = vrot.slane %v360_v3, 2  ;;  %v413_v14 = vrot.slane %v364_v4, 1 }
  0x31   :  { %v402_v9 = vsel %vm367_vm0, %v401_v5, %v336_v62 }
  0x32   :  { %v404_v11 = vsel %vm370_vm1, %v403_v6, %v402_v9 }
  0x33   :  { %v406_v13 = vsel %vm373_vm2, %v405_v7, %v404_v11 }
  0x34   :  { %v408_v15 = vsel %vm376_vm3, %v407_v8, %v406_v13 }
  0x35   :  { %v410_v16 = vsel %vm379_vm4, %v409_v10, %v408_v15 }
  0x36   :  { %v412_v17 = vsel %vm382_vm5, %v411_v12, %v410_v16 }
  0x37   :  { %v414_v18 = vsel %vm385_vm6, %v413_v14, %v412_v17 }
  0x38   :  { %v431_v19 = vpack.c.b16 %v414_v18, %v414_v18 }
  0x3a   :  { %702 = vmatmul.mubr.bf16.vlgmr.msra.gmra.mrb[0].mxu1 %v431_v19 }
 0x102   :  { %v763_v20 = vpop.f32.mrb[0].mxu0 }
 0x103   :  { %v764_v21 = vpop.f32.mrb[1].mxu0 }
 0x104   :  { %v765_v22 = vadd.f32 %v764_v21, %v763_v20  ;;  %v766_v23 = vpop.f32.mrb[2].mxu0 }
 0x105   :  { %v767_v24 = vpop.f32.mrb[3].mxu0 }
 0x106   :  { %v664_v26 = vadd.f32 %v765_v22, %v714_v25 }
 0x10d   :  { %v785_v35 = vpop.f32.mrb[0].mxu1 }
 0x10e   :  { %v786_v27 = vpop.f32.mrb[1].mxu1 }
 0x10f   :  { %v787_v28 = vadd.f32 %v786_v27, %v785_v35  ;;  %v788_v29 = vpop.f32.mrb[2].mxu1 }
 0x110   :  { %v789_v30 = vpop.f32.mrb[3].mxu1 }
 0x111   :  { %v704_v31 = vadd.f32 %v787_v28, %v664_v26 }
 0x113   :  { %709 = vst [vmem:[%s1078_s3] sm:$0xff] %v704_v31 }

</bundles_post_ra>
